<compile_context>
chip_gen: v7x
topology: tpu7x:2x2x1
jax: 0.10.0
libtpu: 0.0.40
codegen_flags: <defaults>
</compile_context>

<pallas_src>
from functools import partial

import jax
import jax.numpy as jnp
import numpy as np
from jax.experimental import pallas as pl
from jax.experimental.pallas import tpu as pltpu

_BT_DEFAULT = 8  # waveforms per grid step (batch tile)


def _augment_kernel(shift_ref, vlen_ref, gcm_ref, gca_ref,
                    x_ref, noise_ref, o_ref):
    """One batch tile of BT waveforms per grid step.

    shift_ref : SMEM i32[B]    time shift per sample, already reduced mod chunk
    vlen_ref  : SMEM i32[B]    effective valid length (0 for silence samples)
    gcm_ref   : VMEM f32[BT,1] gain coefficient multiplied by the signal RMS
                               (0 for silence samples)
    gca_ref   : VMEM f32[BT,1] gain coefficient added directly
                               (10^(rms_db/20)/noise_rms for silence, else 0)
    x_ref     : VMEM f32[BT, chunk]   staged waveforms (native layout)
    noise_ref : VMEM f32[1, chunk]    background noise (same block every step
                                      -> DMA'd once, stays VMEM-resident)
    o_ref     : VMEM f32[BT, chunk]
    """
    step = pl.program_id(0)
    bt, chunk = x_ref.shape
    c_idx = jax.lax.broadcasted_iota(jnp.int32, (1, chunk), 1)

    # ---- Phase 1: per-sample mask (PadTrim fill) + flat-time roll (Shift,
    # rollover=True).  These are the only per-sample-different data movements;
    # rolled rows are staged directly into the output block.
    def _row(i, carry):
        b = step * bt + i
        row = x_ref[pl.ds(i, 1), :]                          # (1, chunk)
        row = jnp.where(c_idx < vlen_ref[b], row, 0.0)       # PadTrim fill
        row = pltpu.roll(row, shift_ref[b], axis=1)          # Shift (rollover)
        o_ref[pl.ds(i, 1), :] = row
        return carry

    jax.lax.fori_loop(0, bt, _row, 0, unroll=True)

    # ---- Phase 2: AddBackgroundNoise, fully vectorized over the (BT, chunk)
    # block at full sublane density.
    y = o_ref[...]
    ms = jnp.mean(y * y, axis=1, keepdims=True)              # (BT, 1)
    gain = jnp.sqrt(ms) * gcm_ref[...] + gca_ref[...]        # (BT, 1)
    o_ref[...] = o_ref[...] + gain * noise_ref[...]


@partial(jax.jit, static_argnames=("batch_tile",))
def waveform_augmentations(x, noise, valid_len, shift, its_silence,
                           snr_db, absolute_rms_db, batch_tile=_BT_DEFAULT):
    """Batched WaveformAugmentations.forward.

    x          : f32[B, chunk] waveforms staged into chunk-size slots
                 (real samples in [:valid_len[b]]; the rest is ignored).
    noise      : f32[chunk]    background-noise waveform (shared by the batch).
    valid_len  : i32[B]        real lengths (PadTrim fill applied in-kernel).
    shift      : i32[B]        per-sample Shift draw in samples (may be < 0).
    its_silence: bool[B]       "only noise" flag (uniform(0,1) < only_noise_p).
    snr_db / absolute_rms_db: f32[B] AddBackgroundNoise draws.

    Returns (f32[B, chunk], its_silence).
    """
    x = x.astype(jnp.float32)
    noise2 = jnp.asarray(noise, jnp.float32).reshape(1, -1)   # (1, chunk), tiny
    B, chunk = x.shape
    assert chunk % 128 == 0, "chunk_size must be a multiple of 128"
    bt = min(batch_tile, B)
    assert B % bt == 0, "batch must be a multiple of the batch tile"

    # Hoisted host-side math (pure per-draw scalar work):
    #   noise RMS is a property of the fixed noise clip; 10^(dB/20) of the
    #   host-drawn dBs is pure scalar math; silence is folded into
    #   (vlen_eff = 0, gc_add = absolute gain) so the kernel is branch-free.
    noise_rms = jnp.sqrt(jnp.mean(noise2 * noise2))
    inv_noise_rms = 1.0 / (noise_rms + 1e-12)
    rel_coef = jnp.power(10.0, -snr_db.astype(jnp.float32) / 20.0) * inv_noise_rms
    abs_coef = jnp.power(10.0, absolute_rms_db.astype(jnp.float32) / 20.0) * inv_noise_rms
    gc_mul = jnp.where(its_silence, 0.0, rel_coef).astype(jnp.float32).reshape(B, 1)
    gc_add = jnp.where(its_silence, abs_coef, 0.0).astype(jnp.float32).reshape(B, 1)

    shift_mod = jnp.mod(shift.astype(jnp.int32), chunk).astype(jnp.int32)
    vlen_eff = jnp.where(
        its_silence, 0,
        jnp.minimum(valid_len.astype(jnp.int32), chunk)).astype(jnp.int32)

    smem = pl.BlockSpec(memory_space=pltpu.MemorySpace.SMEM)
    out = pl.pallas_call(
        _augment_kernel,
        out_shape=jax.ShapeDtypeStruct((B, chunk), jnp.float32),
        grid=(B // bt,),
        in_specs=[
            smem,                                            # shift  (scalars)
            smem,                                            # vlen   (scalars)
            pl.BlockSpec((bt, 1), lambda s: (s, 0)),         # gc_mul column
            pl.BlockSpec((bt, 1), lambda s: (s, 0)),         # gc_add column
            pl.BlockSpec((bt, chunk), lambda s: (s, 0)),     # x (native layout)
            pl.BlockSpec((1, chunk), lambda s: (0, 0)),      # noise (resident)
        ],
        out_specs=pl.BlockSpec((bt, chunk), lambda s: (s, 0)),
        compiler_params=pltpu.CompilerParams(
            # "parallel" lets megacore parts shard the batch-tile axis.
            # TODO(synk): on v7x, consider pltpu.CORE_PARALLEL / pl.core_map
            #             for an explicit static split across the 2 TCs.
            dimension_semantics=("parallel",),
            # Explicit (safe on v5e/v6e/v7x); caps growth if batch_tile/chunk
            # are scaled up later.
            vmem_limit_bytes=32 * 1024 * 1024,
        ),
        cost_estimate=pl.CostEstimate(
            flops=6 * B * chunk,
            transcendentals=B,
            bytes_accessed=4 * (2 * B * chunk + chunk),
        ),
    )(shift_mod, vlen_eff, gc_mul, gc_add, x, noise2)

    return out, its_silence


def _reference(x, noise, valid_len, shift, its_silence, snr_db, absolute_rms_db):
    """Pure-numpy reference (per-sample loop), same semantics as the kernel."""
    x = np.asarray(x, np.float64)
    noise = np.asarray(noise, np.float64)
    B, T = x.shape
    t = np.arange(T)
    inv = 1.0 / (np.sqrt(np.mean(noise * noise)) + 1e-12)
    outs = []
    for b in range(B):
        if bool(np.asarray(its_silence)[b]):
            gain = (10.0 ** (float(absolute_rms_db[b]) / 20.0)) * inv
            outs.append(gain * noise)
        else:
            xb = np.where(t < int(valid_len[b]), x[b], 0.0)
            xb = np.roll(xb, int(shift[b]) % T)
            sig_rms = np.sqrt(np.mean(xb * xb))
            gain = sig_rms * (10.0 ** (-float(snr_db[b]) / 20.0)) * inv
            outs.append(xb + gain * noise)
    return np.stack(outs).astype(np.float32)


if __name__ == "__main__":
    B = 16
    chunk_size = 4096        # cfg.chunk_size (multiple of 128 for the layout)
    sampling_rate = 16000    # cfg.sampling_rate (not used by the kernel math)

    key = jax.random.PRNGKey(0)
    kx, kn, ks, ksnr, krms = jax.random.split(key, 5)

    # Per-sample waveforms already staged into chunk-size slots
    # (the module's "1 t" rows, batched).
    x = 0.1 * jax.random.normal(kx, (B, chunk_size), dtype=jnp.float32)

    # Some samples shorter than the chunk -> PadTrim fill inside the kernel.
    valid_len_np = np.full((B,), chunk_size, dtype=np.int32)
    valid_len_np[2], valid_len_np[4] = 3000, 2048
    valid_len_np[7], valid_len_np[11] = 1500, 3577
    valid_len = jnp.asarray(valid_len_np)

    # Deterministic synthetic background noise (stands in for file-loaded noise).
    noise = jax.random.normal(kn, (chunk_size,), dtype=jnp.float32)

    # Deterministic stand-ins for the module's per-sample random draws.
    max_shift = chunk_size // 10
    shift = jax.random.randint(ks, (B,), -max_shift, max_shift + 1,
                               dtype=jnp.int32)
    snr_db = jax.random.uniform(ksnr, (B,), minval=3.0, maxval=30.0)
    absolute_rms_db = jax.random.uniform(krms, (B,), minval=-15.0, maxval=-0.1)
    # random.uniform(0, 1) < only_noise_p stand-in (mixed batch, deterministic).
    sil_np = np.zeros((B,), dtype=bool)
    sil_np[[2, 6, 13]] = True
    its_silence = jnp.asarray(sil_np)

    out, flags = waveform_augmentations(
        x, noise, valid_len, shift, its_silence, snr_db, absolute_rms_db)
    out = jax.block_until_ready(out)
    assert out.shape == (B, chunk_size) and out.dtype == jnp.float32
    assert flags.shape == (B,)

    # Pure-numpy reference check.
    ref = _reference(x, noise, valid_len, shift, its_silence, snr_db,
                     absolute_rms_db)
    np.testing.assert_allclose(np.asarray(out), ref, rtol=1e-4, atol=1e-4)

    # Second call with fresh draws: same shapes -> jit cache hit, and all
    # per-draw parameters are runtime SMEM/VMEM scalars, so no Mosaic
    # recompile per draw.
    out2, _ = waveform_augmentations(
        x, noise, valid_len, -shift, jnp.zeros((B,), dtype=bool),
        snr_db, absolute_rms_db)
    jax.block_until_ready(out2)

    print("KERNEL_OK")
</pallas_src>

<mosaic_0001>
module attributes {stable_mosaic.version = 11 : i64} {
  func.func @_augment_kernel(%arg0: i32, %arg1: memref<16xi32, #tpu.memory_space<smem>>, %arg2: memref<16xi32, #tpu.memory_space<smem>>, %arg3: memref<8x1xf32, #tpu.memory_space<vmem>>, %arg4: memref<8x1xf32, #tpu.memory_space<vmem>>, %arg5: memref<8x4096xf32, #tpu.memory_space<vmem>>, %arg6: memref<1x4096xf32, #tpu.memory_space<vmem>>, %arg7: memref<8x4096xf32, #tpu.memory_space<vmem>>) attributes {dimension_semantics = [#tpu.dimension_semantics<parallel>], iteration_bounds = array<i64: 2>, scalar_prefetch = 0 : i64, scratch_operands = 0 : i64, tpu.core_type = #tpu.core_type<tc>, window_params = [{transform_indices = @transform_0, window_bounds = array<i64: 16>}, {transform_indices = @transform_1, window_bounds = array<i64: 16>}, {transform_indices = @transform_2, window_bounds = array<i64: 8, 1>}, {transform_indices = @transform_3, window_bounds = array<i64: 8, 1>}, {transform_indices = @transform_4, window_bounds = array<i64: 8, 4096>}, {pipeline_mode = #tpu.pipeline_mode<synchronous>, transform_indices = @transform_5, window_bounds = array<i64: 1, 4096>}, {transform_indices = @transform_6, window_bounds = array<i64: 8, 4096>}]} {
    %0 = tpu.iota {dimensions = array<i32: 1>} : vector<1x4096xi32>
    %c0_i32 = arith.constant 0 : i32
    %c8_i32 = arith.constant 8 : i32
    %1 = arith.muli %arg0, %c8_i32 : i32
    %2 = arith.addi %1, %c0_i32 : i32
    %3 = arith.index_cast %c0_i32 : i32 to index
    %c0 = arith.constant 0 : index
    %4 = vector.load %arg5[%3, %c0] : memref<8x4096xf32, #tpu.memory_space<vmem>>, vector<1x4096xf32>
    %5 = arith.index_cast %2 : i32 to index
    %6 = memref.load %arg2[%5] : memref<16xi32, #tpu.memory_space<smem>>
    %7 = vector.broadcast %6 : i32 to vector<1x4096xi32>
    %8 = arith.cmpi slt, %0, %7 : vector<1x4096xi32>
    %cst = arith.constant 0.000000e+00 : f32
    %9 = vector.broadcast %cst : f32 to vector<1x4096xf32>
    %10 = arith.select %8, %4, %9 : vector<1x4096xi1>, vector<1x4096xf32>
    %11 = arith.index_cast %2 : i32 to index
    %12 = memref.load %arg1[%11] : memref<16xi32, #tpu.memory_space<smem>>
    %13 = tpu.dynamic_rotate %10 by %12 dim 1 : vector<1x4096xf32>, i32 -> vector<1x4096xf32>
    %14 = arith.index_cast %c0_i32 : i32 to index
    %c0_0 = arith.constant 0 : index
    %15 = vector.load %arg7[%14, %c0_0] : memref<8x4096xf32, #tpu.memory_space<vmem>>, vector<1x4096xf32>
    tpu.vector_store %arg7[%14, %c0_0], %13 {strides = array<i32>} : memref<8x4096xf32, #tpu.memory_space<vmem>>, vector<1x4096xf32>,
    %c1_i32 = arith.constant 1 : i32
    %c8_i32_1 = arith.constant 8 : i32
    %16 = arith.muli %arg0, %c8_i32_1 : i32
    %17 = arith.addi %16, %c1_i32 : i32
    %18 = arith.index_cast %c1_i32 : i32 to index
    %c0_2 = arith.constant 0 : index
    %19 = vector.load %arg5[%18, %c0_2] : memref<8x4096xf32, #tpu.memory_space<vmem>>, vector<1x4096xf32>
    %20 = arith.index_cast %17 : i32 to index
    %21 = memref.load %arg2[%20] : memref<16xi32, #tpu.memory_space<smem>>
    %22 = vector.broadcast %21 : i32 to vector<1x4096xi32>
    %23 = arith.cmpi slt, %0, %22 : vector<1x4096xi32>
    %cst_3 = arith.constant 0.000000e+00 : f32
    %24 = vector.broadcast %cst_3 : f32 to vector<1x4096xf32>
    %25 = arith.select %23, %19, %24 : vector<1x4096xi1>, vector<1x4096xf32>
    %26 = arith.index_cast %17 : i32 to index
    %27 = memref.load %arg1[%26] : memref<16xi32, #tpu.memory_space<smem>>
    %28 = tpu.dynamic_rotate %25 by %27 dim 1 : vector<1x4096xf32>, i32 -> vector<1x4096xf32>
    %29 = arith.index_cast %c1_i32 : i32 to index
    %c0_4 = arith.constant 0 : index
    %30 = vector.load %arg7[%29, %c0_4] : memref<8x4096xf32, #tpu.memory_space<vmem>>, vector<1x4096xf32>
    tpu.vector_store %arg7[%29, %c0_4], %28 {strides = array<i32>} : memref<8x4096xf32, #tpu.memory_space<vmem>>, vector<1x4096xf32>,
    %c2_i32 = arith.constant 2 : i32
    %c8_i32_5 = arith.constant 8 : i32
    %31 = arith.muli %arg0, %c8_i32_5 : i32
    %32 = arith.addi %31, %c2_i32 : i32
    %33 = arith.index_cast %c2_i32 : i32 to index
    %c0_6 = arith.constant 0 : index
    %34 = vector.load %arg5[%33, %c0_6] : memref<8x4096xf32, #tpu.memory_space<vmem>>, vector<1x4096xf32>
    %35 = arith.index_cast %32 : i32 to index
    %36 = memref.load %arg2[%35] : memref<16xi32, #tpu.memory_space<smem>>
    %37 = vector.broadcast %36 : i32 to vector<1x4096xi32>
    %38 = arith.cmpi slt, %0, %37 : vector<1x4096xi32>
    %cst_7 = arith.constant 0.000000e+00 : f32
    %39 = vector.broadcast %cst_7 : f32 to vector<1x4096xf32>
    %40 = arith.select %38, %34, %39 : vector<1x4096xi1>, vector<1x4096xf32>
    %41 = arith.index_cast %32 : i32 to index
    %42 = memref.load %arg1[%41] : memref<16xi32, #tpu.memory_space<smem>>
    %43 = tpu.dynamic_rotate %40 by %42 dim 1 : vector<1x4096xf32>, i32 -> vector<1x4096xf32>
    %44 = arith.index_cast %c2_i32 : i32 to index
    %c0_8 = arith.constant 0 : index
    %45 = vector.load %arg7[%44, %c0_8] : memref<8x4096xf32, #tpu.memory_space<vmem>>, vector<1x4096xf32>
    tpu.vector_store %arg7[%44, %c0_8], %43 {strides = array<i32>} : memref<8x4096xf32, #tpu.memory_space<vmem>>, vector<1x4096xf32>,
    %c3_i32 = arith.constant 3 : i32
    %c8_i32_9 = arith.constant 8 : i32
    %46 = arith.muli %arg0, %c8_i32_9 : i32
    %47 = arith.addi %46, %c3_i32 : i32
    %48 = arith.index_cast %c3_i32 : i32 to index
    %c0_10 = arith.constant 0 : index
    %49 = vector.load %arg5[%48, %c0_10] : memref<8x4096xf32, #tpu.memory_space<vmem>>, vector<1x4096xf32>
    %50 = arith.index_cast %47 : i32 to index
    %51 = memref.load %arg2[%50] : memref<16xi32, #tpu.memory_space<smem>>
    %52 = vector.broadcast %51 : i32 to vector<1x4096xi32>
    %53 = arith.cmpi slt, %0, %52 : vector<1x4096xi32>
    %cst_11 = arith.constant 0.000000e+00 : f32
    %54 = vector.broadcast %cst_11 : f32 to vector<1x4096xf32>
    %55 = arith.select %53, %49, %54 : vector<1x4096xi1>, vector<1x4096xf32>
    %56 = arith.index_cast %47 : i32 to index
    %57 = memref.load %arg1[%56] : memref<16xi32, #tpu.memory_space<smem>>
    %58 = tpu.dynamic_rotate %55 by %57 dim 1 : vector<1x4096xf32>, i32 -> vector<1x4096xf32>
    %59 = arith.index_cast %c3_i32 : i32 to index
    %c0_12 = arith.constant 0 : index
    %60 = vector.load %arg7[%59, %c0_12] : memref<8x4096xf32, #tpu.memory_space<vmem>>, vector<1x4096xf32>
    tpu.vector_store %arg7[%59, %c0_12], %58 {strides = array<i32>} : memref<8x4096xf32, #tpu.memory_space<vmem>>, vector<1x4096xf32>,
    %c4_i32 = arith.constant 4 : i32
    %c8_i32_13 = arith.constant 8 : i32
    %61 = arith.muli %arg0, %c8_i32_13 : i32
    %62 = arith.addi %61, %c4_i32 : i32
    %63 = arith.index_cast %c4_i32 : i32 to index
    %c0_14 = arith.constant 0 : index
    %64 = vector.load %arg5[%63, %c0_14] : memref<8x4096xf32, #tpu.memory_space<vmem>>, vector<1x4096xf32>
    %65 = arith.index_cast %62 : i32 to index
    %66 = memref.load %arg2[%65] : memref<16xi32, #tpu.memory_space<smem>>
    %67 = vector.broadcast %66 : i32 to vector<1x4096xi32>
    %68 = arith.cmpi slt, %0, %67 : vector<1x4096xi32>
    %cst_15 = arith.constant 0.000000e+00 : f32
    %69 = vector.broadcast %cst_15 : f32 to vector<1x4096xf32>
    %70 = arith.select %68, %64, %69 : vector<1x4096xi1>, vector<1x4096xf32>
    %71 = arith.index_cast %62 : i32 to index
    %72 = memref.load %arg1[%71] : memref<16xi32, #tpu.memory_space<smem>>
    %73 = tpu.dynamic_rotate %70 by %72 dim 1 : vector<1x4096xf32>, i32 -> vector<1x4096xf32>
    %74 = arith.index_cast %c4_i32 : i32 to index
    %c0_16 = arith.constant 0 : index
    %75 = vector.load %arg7[%74, %c0_16] : memref<8x4096xf32, #tpu.memory_space<vmem>>, vector<1x4096xf32>
    tpu.vector_store %arg7[%74, %c0_16], %73 {strides = array<i32>} : memref<8x4096xf32, #tpu.memory_space<vmem>>, vector<1x4096xf32>,
    %c5_i32 = arith.constant 5 : i32
    %c8_i32_17 = arith.constant 8 : i32
    %76 = arith.muli %arg0, %c8_i32_17 : i32
    %77 = arith.addi %76, %c5_i32 : i32
    %78 = arith.index_cast %c5_i32 : i32 to index
    %c0_18 = arith.constant 0 : index
    %79 = vector.load %arg5[%78, %c0_18] : memref<8x4096xf32, #tpu.memory_space<vmem>>, vector<1x4096xf32>
    %80 = arith.index_cast %77 : i32 to index
    %81 = memref.load %arg2[%80] : memref<16xi32, #tpu.memory_space<smem>>
    %82 = vector.broadcast %81 : i32 to vector<1x4096xi32>
    %83 = arith.cmpi slt, %0, %82 : vector<1x4096xi32>
    %cst_19 = arith.constant 0.000000e+00 : f32
    %84 = vector.broadcast %cst_19 : f32 to vector<1x4096xf32>
    %85 = arith.select %83, %79, %84 : vector<1x4096xi1>, vector<1x4096xf32>
    %86 = arith.index_cast %77 : i32 to index
    %87 = memref.load %arg1[%86] : memref<16xi32, #tpu.memory_space<smem>>
    %88 = tpu.dynamic_rotate %85 by %87 dim 1 : vector<1x4096xf32>, i32 -> vector<1x4096xf32>
    %89 = arith.index_cast %c5_i32 : i32 to index
    %c0_20 = arith.constant 0 : index
    %90 = vector.load %arg7[%89, %c0_20] : memref<8x4096xf32, #tpu.memory_space<vmem>>, vector<1x4096xf32>
    tpu.vector_store %arg7[%89, %c0_20], %88 {strides = array<i32>} : memref<8x4096xf32, #tpu.memory_space<vmem>>, vector<1x4096xf32>,
    %c6_i32 = arith.constant 6 : i32
    %c8_i32_21 = arith.constant 8 : i32
    %91 = arith.muli %arg0, %c8_i32_21 : i32
    %92 = arith.addi %91, %c6_i32 : i32
    %93 = arith.index_cast %c6_i32 : i32 to index
    %c0_22 = arith.constant 0 : index
    %94 = vector.load %arg5[%93, %c0_22] : memref<8x4096xf32, #tpu.memory_space<vmem>>, vector<1x4096xf32>
    %95 = arith.index_cast %92 : i32 to index
    %96 = memref.load %arg2[%95] : memref<16xi32, #tpu.memory_space<smem>>
    %97 = vector.broadcast %96 : i32 to vector<1x4096xi32>
    %98 = arith.cmpi slt, %0, %97 : vector<1x4096xi32>
    %cst_23 = arith.constant 0.000000e+00 : f32
    %99 = vector.broadcast %cst_23 : f32 to vector<1x4096xf32>
    %100 = arith.select %98, %94, %99 : vector<1x4096xi1>, vector<1x4096xf32>
    %101 = arith.index_cast %92 : i32 to index
    %102 = memref.load %arg1[%101] : memref<16xi32, #tpu.memory_space<smem>>
    %103 = tpu.dynamic_rotate %100 by %102 dim 1 : vector<1x4096xf32>, i32 -> vector<1x4096xf32>
    %104 = arith.index_cast %c6_i32 : i32 to index
    %c0_24 = arith.constant 0 : index
    %105 = vector.load %arg7[%104, %c0_24] : memref<8x4096xf32, #tpu.memory_space<vmem>>, vector<1x4096xf32>
    tpu.vector_store %arg7[%104, %c0_24], %103 {strides = array<i32>} : memref<8x4096xf32, #tpu.memory_space<vmem>>, vector<1x4096xf32>,
    %c7_i32 = arith.constant 7 : i32
    %c8_i32_25 = arith.constant 8 : i32
    %106 = arith.muli %arg0, %c8_i32_25 : i32
    %107 = arith.addi %106, %c7_i32 : i32
    %108 = arith.index_cast %c7_i32 : i32 to index
    %c0_26 = arith.constant 0 : index
    %109 = vector.load %arg5[%108, %c0_26] : memref<8x4096xf32, #tpu.memory_space<vmem>>, vector<1x4096xf32>
    %110 = arith.index_cast %107 : i32 to index
    %111 = memref.load %arg2[%110] : memref<16xi32, #tpu.memory_space<smem>>
    %112 = vector.broadcast %111 : i32 to vector<1x4096xi32>
    %113 = arith.cmpi slt, %0, %112 : vector<1x4096xi32>
    %cst_27 = arith.constant 0.000000e+00 : f32
    %114 = vector.broadcast %cst_27 : f32 to vector<1x4096xf32>
    %115 = arith.select %113, %109, %114 : vector<1x4096xi1>, vector<1x4096xf32>
    %116 = arith.index_cast %107 : i32 to index
    %117 = memref.load %arg1[%116] : memref<16xi32, #tpu.memory_space<smem>>
    %118 = tpu.dynamic_rotate %115 by %117 dim 1 : vector<1x4096xf32>, i32 -> vector<1x4096xf32>
    %119 = arith.index_cast %c7_i32 : i32 to index
    %c0_28 = arith.constant 0 : index
    %120 = vector.load %arg7[%119, %c0_28] : memref<8x4096xf32, #tpu.memory_space<vmem>>, vector<1x4096xf32>
    tpu.vector_store %arg7[%119, %c0_28], %118 {strides = array<i32>} : memref<8x4096xf32, #tpu.memory_space<vmem>>, vector<1x4096xf32>,
    %c8_i32_29 = arith.constant 8 : i32
    %c0_30 = arith.constant 0 : index
    %c0_31 = arith.constant 0 : index
    %121 = vector.load %arg7[%c0_30, %c0_31] : memref<8x4096xf32, #tpu.memory_space<vmem>>, vector<8x4096xf32>
    %122 = arith.mulf %121, %121 : vector<8x4096xf32>
    %cst_32 = arith.constant dense<0.000000e+00> : vector<8xf32>
    %123 = vector.multi_reduction <add>, %122, %cst_32 [1] : vector<8x4096xf32> to vector<8xf32>
    %124 = vector.shape_cast %123 : vector<8xf32> to vector<8x1xf32>
    %cst_33 = arith.constant 4.096000e+03 : f32
    %125 = vector.broadcast %cst_33 : f32 to vector<8x1xf32>
    %126 = arith.divf %124, %125 : vector<8x1xf32>
    %127 = math.sqrt %126 : vector<8x1xf32>
    %c0_34 = arith.constant 0 : index
    %c0_35 = arith.constant 0 : index
    %128 = vector.load %arg3[%c0_34, %c0_35] : memref<8x1xf32, #tpu.memory_space<vmem>>, vector<8x1xf32>
    %129 = arith.mulf %127, %128 : vector<8x1xf32>
    %c0_36 = arith.constant 0 : index
    %c0_37 = arith.constant 0 : index
    %130 = vector.load %arg4[%c0_36, %c0_37] : memref<8x1xf32, #tpu.memory_space<vmem>>, vector<8x1xf32>
    %131 = arith.addf %129, %130 : vector<8x1xf32>
    %c0_38 = arith.constant 0 : index
    %c0_39 = arith.constant 0 : index
    %132 = vector.load %arg7[%c0_38, %c0_39] : memref<8x4096xf32, #tpu.memory_space<vmem>>, vector<8x4096xf32>
    %c0_40 = arith.constant 0 : index
    %c0_41 = arith.constant 0 : index
    %133 = vector.load %arg6[%c0_40, %c0_41] : memref<1x4096xf32, #tpu.memory_space<vmem>>, vector<1x4096xf32>
    %134 = vector.broadcast %131 : vector<8x1xf32> to vector<8x4096xf32>
    %135 = vector.broadcast %133 : vector<1x4096xf32> to vector<8x4096xf32>
    %136 = arith.mulf %134, %135 : vector<8x4096xf32>
    %137 = arith.addf %132, %136 : vector<8x4096xf32>
    %c0_42 = arith.constant 0 : index
    %c0_43 = arith.constant 0 : index
    %138 = vector.load %arg7[%c0_42, %c0_43] : memref<8x4096xf32, #tpu.memory_space<vmem>>, vector<8x4096xf32>
    tpu.vector_store %arg7[%c0_42, %c0_43], %137 {strides = array<i32>} : memref<8x4096xf32, #tpu.memory_space<vmem>>, vector<8x4096xf32>,
    return
  }
  func.func @transform_0(%arg0: i32) -> i32 {
    %c0_i32 = arith.constant 0 : i32
    %c0_i32_0 = arith.constant 0 : i32
    return %c0_i32 : i32
  }
  func.func @transform_1(%arg0: i32) -> i32 {
    %c0_i32 = arith.constant 0 : i32
    %c0_i32_0 = arith.constant 0 : i32
    return %c0_i32 : i32
  }
  func.func @transform_2(%arg0: i32) -> (i32, i32) {
    %c0_i32 = arith.constant 0 : i32
    %c0_i32_0 = arith.constant 0 : i32
    return %arg0, %c0_i32 : i32, i32
  }
  func.func @transform_3(%arg0: i32) -> (i32, i32) {
    %c0_i32 = arith.constant 0 : i32
    %c0_i32_0 = arith.constant 0 : i32
    return %arg0, %c0_i32 : i32, i32
  }
  func.func @transform_4(%arg0: i32) -> (i32, i32) {
    %c0_i32 = arith.constant 0 : i32
    %c0_i32_0 = arith.constant 0 : i32
    return %arg0, %c0_i32 : i32, i32
  }
  func.func @transform_5(%arg0: i32) -> (i32, i32) {
    %c0_i32 = arith.constant 0 : i32
    %c0_i32_0 = arith.constant 0 : i32
    %c0_i32_1 = arith.constant 0 : i32
    return %c0_i32, %c0_i32_0 : i32, i32
  }
  func.func @transform_6(%arg0: i32) -> (i32, i32) {
    %c0_i32 = arith.constant 0 : i32
    %c0_i32_0 = arith.constant 0 : i32
    return %arg0, %c0_i32 : i32, i32
  }
}

</mosaic_0001>

<bundles_post_ra>
// kernel: waveform_augmentations.1
= control target key start
LH: loop header
LB: loop body
LE: loop exit
PB: predicated region body
PF: predicated region fallthrough
CT: control target
= control target key end

     0   :  { %11 = vsyncpa [#allocation5], 0  ;;  %s15565_s0 = inlined_call_operand.vmem [shape: s32[16], index: 0, kind: input, shape index: {}]   ;;  %s15566_s1 = inlined_call_operand.vmem [shape: s32[16], index: 1, kind: input, shape index: {}]   ;;  %s15567_s2 = inlined_call_operand.vmem [shape: f32[16,1], index: 2, kind: input, shape index: {}]   ;;  %s15568_s3 = inlined_call_operand.vmem [shape: f32[16,1], index: 3, kind: input, shape index: {}]   ;;  %s15569_s4 = inlined_call_operand.hbm [shape: f32[16,4096], index: 4, kind: input, shape index: {}]   ;;  %s15570_s5 = inlined_call_operand.vmem [shape: f32[1,4096], index: 5, kind: input, shape index: {}]   ;;  %s15571_s6 = inlined_call_operand.hbm [shape: f32[16,4096], index: 6, kind: output, shape index: {}]  }
   0x1   :  { %12 = vsyncpa [#allocation7], 0 }
   0x2   :  { %13 = vsyncpa [#allocation3], 0 }
   0x3   :  { %15 = vsyncpa [#allocation3 + $0x1], 0 }
   0x4   :  { %16 = vsyncpa [#allocation4], 0 }
   0x5   :  { %18 = vsyncpa [#allocation4 + $0x1], 0  ;;  %s7411_s21 = smov 0   ;;  %s7413_s22 = smov 0  }
   0x6   :  { %s7415_s23 = smov 0   ;;  %s7417_s24 = smov 0  }
   0x7 LB: > { %s7432_s25 = sadd.s32 4294967295, %s7368_s24   ;;  %s7014_s26 = sadd.s32 4294967294, %s7368_s24   ;;  %s7368_s24 = sphi %s7417_s24, %s16436_s24   ;;  %s7364_s23 = sphi %s7415_s23, %s16435_s23   ;;  %s7360_s22 = sphi %s7413_s22, %s16434_s22   ;;  %s7356_s21 = sphi %s7411_s21, %s16433_s21  }
   0x8   : > { %p138_p0 = scmp.ne.s32.totalorder %s7360_s22, %s7356_s21  ;;  %p15572_p1 = scmp.eq.s32.totalorder %s7432_s25, 0 }
   0x9   : > { %p189_p3 = scmp.eq.s32.totalorder %s7014_s26, 1  ;;  %p7015_p5 = scmp.ge.s32.totalorder %s7368_s24, 1 }
   0xa   : > { %p7441_p4 = por %p15572_p1, %p138_p0  ;;  %p196_p7 = scmp.lt.s32.totalorder %s7368_s24, 3 }
   0xb   : > { %p7446_p6 = por %p189_p3, %p138_p0  ;;  %s209_s7 = sshll.u32 %s15565_s0, 4  ;;  %s210_s7 = int_to_ptr.vmem [resolvable:$true] %s209_s7 }
   0xc   : > { %s15824_s27 = scalar_select %p7441_p4, 1, 0 }
   0xd   : > { %s15825_s28 = scalar_select %p7446_p6, 1, 0 }
   0xe   : > { %p7454_p8 = pnand %p7015_p5, %p196_p7  ;;  %s220_s11 = sshll.u32 %s15566_s1, 4  ;;  %s221_s11 = int_to_ptr.vmem [resolvable:$true] %s220_s11 }
   0xf   : > { %s7471_s13 = sadd.s32 1, %s7368_s24   ;;  %s7234_s15 = scalar_lea.vmem %s210_s7, 16 }
  0x10   : > { %s15826_s8 = scalar_select %p7454_p8, 1, 0 }
  0x11   : > { %p7173_p10 = pneg %p7454_p8  ;;  %s122_s14 = ssub.s32 %s7368_s24, %s7471_s13 }
  0x12   : > { %p7235_p12 = scmp.ne.s32.totalorder %s210_s7, %s7234_s15  ;;  %p7242_p5 = scmp.lt.s32.totalorder %s210_s7, %s210_s7 }
  0x13   : > { %p7466_p11 = pnand %p7173_p10, %p15572_p1  ;;  %p7243_p7 = scmp.lt.s32.totalorder %s7234_s15, %s7234_s15 }
  0x15   : > { %p7236_p13 = pneg %p7466_p11  ;;  %p7244_p9 = por %p7243_p7, %p7242_p5 }
  0x17   : > { %p7237_p0 = pnand %p7236_p13, %p7235_p12 }
  0x19   : > { %p7238_p3 = pneg %p7237_p0 }
  0x1b   : > { %p7245_p2 = pnand %p7244_p9, %p7238_p3 }
  0x1d   : > { %7248 = shalt.err (!%p7245_p2)
}
  0x1e   : > { %s7370_s16 = smov [#allocation2]   ;;  %s7249_s17 = scalar_lea.vmem %s221_s11, 16 }
  0x1f   : > { %7176 = dma.vmem_to_smem (!%p7466_p11), %s210_s7, 16, %s7370_s16, [#allocation5]  }
  0x20   : > { %p7250_p10 = scmp.ne.s32.totalorder %s221_s11, %s7249_s17  ;;  %p7257_p4 = scmp.lt.s32.totalorder %s221_s11, %s221_s11 }
  0x21   : > { %p7258_p8 = scmp.lt.s32.totalorder %s7249_s17, %s7249_s17 }
  0x22   : > { %p7252_p1 = pnand %p7250_p10, %p7236_p13 }
  0x23   : > { %p7259_p12 = por %p7258_p8, %p7257_p4 }
  0x24   : > { %p7253_p6 = pneg %p7252_p1 }
  0x26   : > { %p7260_p0 = pnand %p7259_p12, %p7253_p6 }
  0x28   : > { %7263 = shalt.err (!%p7260_p0)
}
  0x29   : > { %s7371_s18 = smov [#allocation6]   ;;  %p123_p2 = scmp.eq.s32.totalorder %s122_s14, 0 }
  0x2a   : > { %7179 = dma.vmem_to_smem (!%p7466_p11), %s221_s11, 16, %s7371_s18, [#allocation7]  }
  0x2b   : > { %s125_s19 = sadd.s32 1, %s7364_s23  ;;  %p132_p1 = scmp.ne.s32.totalorder %s7364_s23, %s7360_s22 }
  0x2c   : > { %p133_p9 = scmp.eq.s32.totalorder %s7368_s24, 0  ;;  %p15828_p6 = scmp.eq.s32.totalorder %s7432_s25, 1 }
  0x2d   : > { %s7486_s20 = scalar_select %p123_p2, %s7364_s23, %s125_s19  }
  0x2e   : > { %p134_p4 = por %p133_p9, %p132_p1  ;;  %p7490_p8 = por %p15828_p6, %p132_p1 }
  0x2f   : > { %p7190_p13 = scmp.lt.s32.totalorder %s7368_s24, 2  ;;  %s248_s29 = sand.u32 1, %s7364_s23  }
  0x30   : > { %s7019_s30 = sshll.u32 %s248_s29, 8  ;;  %s7159_s7 = sshll.u32 %s7368_s24, 12 }
  0x31   : > { %s7500_s11 = scalar_lea.hbm %s15569_s4, %s7159_s7  ;;  %s252_s12 = scalar_lea.vmem [#allocation8], %s7019_s30 }
  0x32   : > { %s260_s14 = sshll.u32 %s252_s12, 4  ;;  %p7504_p11 = pnand %p7190_p13, %p134_p4  ;;  %s7502_s14 = int_to_ptr.vmem [resolvable:$true] %s260_s14 }
  0x33   : > { %s249_s16 = scalar_lea.sflag [#allocation3], %s248_s29  ;;  %s7264_s17 = scalar_lea.hbm %s7500_s11, 4096 }
  0x34   : > { %p7265_p3 = scmp.ne.s32.totalorder %s7500_s11, %s7264_s17  ;;  %p7266_p5 = pneg %p7504_p11 }
  0x35   : > { %s7269_s30 = scalar_lea.hbm %s15569_s4, 8192  ;;  %p7270_p12 = scmp.lt.u32.totalorder %s7500_s11, %s15569_s4 }
  0x36   : > { %p7267_p7 = pnand %p7266_p5, %p7265_p3  ;;  %p7271_p0 = scmp.lt.u32.totalorder %s7269_s30, %s7264_s17 }
  0x37   : > { %p7273_p1 = scmp.lt.u32.totalorder %s7264_s17, %s7500_s11 }
  0x38   : > { %p7268_p10 = pneg %p7267_p7  ;;  %p7272_p2 = por %p7271_p0, %p7270_p12 }
  0x3a   : > { %p7274_p9 = por %p7273_p1, %p7272_p2 }
  0x3c   : > { %p7275_p4 = pnand %p7274_p9, %p7268_p10 }
  0x3e   : > { %7278 = shalt.err (!%p7275_p4)
}
  0x3f   : > { %s7279_s29 = scalar_lea.vmem %s7502_s14, 4096  ;;  %s7372_s10 = smov [#allocation8]  }
  0x40   : > { %p7280_p6 = scmp.ne.s32.totalorder %s7502_s14, %s7279_s29  ;;  %s7284_s12 = sshll.u32 %s7372_s10, 4  ;;  %s7285_s12 = int_to_ptr.vmem [resolvable:$false] %s7284_s12 }
  0x41   : > { %s7286_s18 = scalar_lea.vmem %s7285_s12, 8192  ;;  %p7287_p7 = scmp.lt.s32.totalorder %s7502_s14, %s7285_s12 }
  0x42   : > { %p7282_p13 = pnand %p7280_p6, %p7266_p5  ;;  %p7288_p12 = scmp.lt.s32.totalorder %s7286_s18, %s7279_s29 }
  0x44   : > { %p7283_p3 = pneg %p7282_p13  ;;  %p7289_p0 = por %p7288_p12, %p7287_p7 }
  0x46   : > { %p7290_p2 = pnand %p7289_p0, %p7283_p3 }
  0x48   : > { %7293 = shalt.err (!%p7290_p2)
}
  0x49   : > { %7183 = dma.hbm_to_vmem [thread:$0]  (!%p7504_p11), %s7500_s11, 4096, %s7502_s14, %s249_s16  }
  0x4a   : > { %p15831_p10 = scmp.ne.s32.totalorder %s15826_s8, 0 }
  0x4c   : > { %269 = sbr.rel (%p15831_p10) target bundleno = 1289 (0x509), region = 44 }
  0x53   : > { %p15832_p5 = scmp.eq.s32.totalorder %s7432_s25, 0 }
  0x55   : > { %7339 = dma.done.wait (%p15832_p5), [#allocation5], 16   ;;  %p15833_p1 = pmov %p15832_p5 }
  0x57   : > { %7341 = vsyncadd (%p15833_p1), [#allocation5], 4294967280  ;;  %p15834_p9 = pmov %p15833_p1 }
  0x58   : > { %p15835_p4 = pmov %p15833_p1 }
  0x59   : > { %7343 = dma.done.wait (%p15834_p9), [#allocation7], 16  }
  0x5a   : > { %7345 = vsyncadd (%p15835_p4), [#allocation7], 4294967280  ;;  %s7544_s15 = sand.u32 1, %s7360_s22   ;;  %p15836_p11 = scmp.ne.s32.totalorder %s15824_s27, 0 }
  0x5b   : > { %s7025_s8 = sshll.u32 %s7544_s15, 8  ;;  %s280_s11 = scalar_lea.sflag [#allocation3], %s7544_s15 }
  0x5c   : > { %s7550_s14 = scalar_lea.vmem [#allocation8], %s7025_s8 }
  0x5d   : > { %7347 = dma.done.wait (%p15836_p11), %s280_s11, 4096  }
  0x5e   : > { %7349 = vsyncadd (%p15836_p11), %s280_s11, 4294963200 }
  0x5f   : > { %288 = sfence }
  0x60   : > { %v329_v0 = vlaneseq  ;;  %s7557_s16 = sshll.u32 %s7432_s25, 3  ;;  %v363_v1 = vld [vmem:[%s7550_s14] ss:$8 sm:$0xf]  ;;  %p321_p6 = scmp.lt.s32.totalorder %s7432_s25, 1 }
  0x61   : > { %v364_v2 = vld [vmem:[%s7550_s14] ss:$8 sm:$0xf0]  ;;  %s378_s17 = sld [smem:[#allocation6 + %s7557_s16]]  ;;  %s1128_s7 = sadd.s32 1, %s7557_s16 }
  0x62   : > { %s7563_s19 = sld [smem:[#allocation2 + %s7557_s16]]  ;;  %v7565_v3 = vand.u32 127, %v329_v0  ;;  %v365_v4 = vor.u32 %v364_v2, %v363_v1  ;;  %v7567_v5 = vshrl.u32 %v329_v0, 7  ;;  %v7030_v27 = vld [vmem:[%s7550_s14 + $0x40] ss:$8 sm:$0xf] }
  0x63   : > { %v7031_v30 = vld [vmem:[%s7550_s14 + $0x40] ss:$8 sm:$0xf0]  ;;  %s7808_s9 = sld [smem:[#allocation2 + %s1128_s7]] }
  0x64   : > { %15837 = vst [vmem:[#allocation14_spill] sm:$0xff] %v7565_v3  ;;  %v7570_v6 = vsub.s32 0, %v7567_v5  ;;  %v7573_v7 = vadd.s32 256, %v7565_v3  ;;  %v7576_v8 = vsub.s32 2, %v7567_v5  ;;  %v7579_v9 = vadd.s32 384, %v7565_v3  ;;  %s1145_s29 = sld [smem:[#allocation6 + %s1128_s7]] }
  0x65   : > { %v7582_v10 = vsub.s32 3, %v7567_v5  ;;  %v7585_v11 = vadd.s32 128, %v7565_v3  ;;  %v7588_v12 = vsub.s32 1, %v7567_v5  ;;  %v7593_v15 = vadd.s32 640, %v7565_v3 }
  0x66   : > { %15838 = vst [vmem:[#allocation15_spill] sm:$0xff] %v7570_v6  ;;  %15839 = vst [vmem:[#allocation16_spill] sm:$0xff] %v7573_v7  ;;  %v419_v13 = vrot.slane %v365_v4, %v7570_v6  ;;  %v427_v14 = vrot.slane %v365_v4, %v7576_v8  ;;  %v7596_v16 = vsub.s32 5, %v7567_v5  ;;  %v7604_v20 = vadd.s32 512, %v7565_v3 }
  0x67   : > { %15840 = vst [vmem:[#allocation17_spill] sm:$0xff] %v7576_v8  ;;  %15841 = vst [vmem:[#allocation18_spill] sm:$0xff] %v7579_v9  ;;  %v7598_v17 = vstv %s378_s17  ;;  %v431_v18 = vrot.slane %v365_v4, %v7582_v10  ;;  %v423_v19 = vrot.slane %v365_v4, %v7588_v12  ;;  %v7624_v26 = vsub.s32 4, %v7567_v5  ;;  %v7032_v57 = vld [vmem:[%s7550_s14 + $0x80] ss:$8 sm:$0xf] }
  0x68   : > { %15842 = vst [vmem:[#allocation19_spill] sm:$0xff] %v7582_v10  ;;  %15843 = vst [vmem:[#allocation20_spill] sm:$0xff] %v7585_v11  ;;  %s609_s27 = sand.u32 4095, %s7563_s19   ;;  %vm380_vm0 = vcmp.lt.s32.totalorder %v7565_v3, %v7598_v17  ;;  %vm382_vm1 = vcmp.lt.s32.totalorder %v7573_v7, %v7598_v17  ;;  %vm383_vm2 = vcmp.lt.s32.totalorder %v7579_v9, %v7598_v17  ;;  %v7630_v28 = vadd.s32 896, %v7565_v3 }
  0x69   : > { %15844 = vst [vmem:[#allocation21_spill] sm:$0xff] %v7588_v12  ;;  %15845 = vst [vmem:[#allocation22_spill] sm:$0xff] %v7593_v15  ;;  %s7610_s30 = sand.u32 127, %s609_s27   ;;  %vm381_vm3 = vcmp.lt.s32.totalorder %v7585_v11, %v7598_v17  ;;  %v576_v21 = vsel %vm380_vm0, %v419_v13, 0.0  ;;  %v578_v22 = vsel %vm382_vm1, %v427_v14, 0.0  ;;  %v439_v23 = vrot.slane %v365_v4, %v7596_v16  ;;  %s7834_s10 = sshrl.u32 %s609_s27, 7 }
  0x6a   : > { %15846 = vst [vmem:[#allocation23_spill] sm:$0xff] %v7596_v16  ;;  %15847 = vst [vmem:[#allocation24_spill] sm:$0xff] %v7604_v20  ;;  %612 = vrot.lane.b32.xlu0 %v576_v21, %s7610_s30  ;;  %616 = vrot.lane.b32.xlu1 %v578_v22, %s7610_s30  ;;  %v579_v24 = vsel %vm383_vm2, %v431_v18, 0.0  ;;  %v577_v25 = vsel %vm381_vm3, %v423_v19, 0.0  ;;  %vm385_vm4 = vcmp.lt.s32.totalorder %v7593_v15, %v7598_v17  ;;  %v7633_v29 = vsub.s32 7, %v7567_v5  ;;  %s1376_s12 = sand.u32 4095, %s7808_s9  }
  0x6b   : > { %15848 = vst [vmem:[#allocation25_spill] sm:$0xff] %v7624_v26  ;;  %vm384_vm5 = vcmp.lt.s32.totalorder %v7604_v20, %v7598_v17  ;;  %15849 = vst [vmem:[#allocation26_spill] sm:$0xff] %v7630_v28  ;;  %v435_v31 = vrot.slane %v365_v4, %v7624_v26  ;;  %v7638_v32 = vadd.s32 768, %v7565_v3  ;;  %v7641_v33 = vsub.s32 6, %v7567_v5  ;;  %s7847_s18 = sshrl.u32 %s1376_s12, 7  ;;  %s710_s11 = sand.u32 1, %s7834_s10 }
  0x6c   : > { %15850 = vst [vmem:[#allocation27_spill] sm:$0xff] %v7633_v29  ;;  %v581_v34 = vsel %vm385_vm4, %v439_v23, 0.0  ;;  %v447_v36 = vrot.slane %v365_v4, %v7633_v29  ;;  %v369_v38 = vor.u32 %v7031_v30, %v7030_v27  ;;  %vm387_vm6 = vcmp.lt.s32.totalorder %v7630_v28, %v7598_v17  ;;  %v7033_v60 = vld [vmem:[%s7550_s14 + $0x80] ss:$8 sm:$0xf0]  ;;  %s745_s17 = sand.u32 2, %s7834_s10 }
  0x6d   : > { %15851 = vst [vmem:[#allocation28_spill] sm:$0xff] %v7638_v32  ;;  %15852 = vst [vmem:[#allocation29_spill] sm:$0xff] %v7641_v33  ;;  %v580_v35 = vsel %vm384_vm5, %v435_v31, 0.0  ;;  %v443_v37 = vrot.slane %v365_v4, %v7641_v33  ;;  %vm386_vm7 = vcmp.lt.s32.totalorder %v7638_v32, %v7598_v17  ;;  %v7652_v39 = vadd.s32 1152, %v7565_v3  ;;  %s780_s19 = sand.u32 4, %s7834_s10  ;;  %s815_s27 = sand.u32 8, %s7834_s10 }
  0x6e   : > { %618 = vrot.lane.b32.xlu1 %v579_v24, %s7610_s30  ;;  %614 = vrot.lane.b32.xlu0 %v577_v25, %s7610_s30  ;;  %v7655_v40 = vadd.s32 1024, %v7565_v3  ;;  %v583_v41 = vsel %vm387_vm6, %v447_v36, 0.0  ;;  %v455_v43 = vrot.slane %v369_v38, %v7588_v12  ;;  %v451_v44 = vrot.slane %v369_v38, %v7570_v6  ;;  %s850_s7 = sand.u32 16, %s7834_s10  ;;  %s1477_s9 = sand.u32 1, %s7847_s18 }
  0x6f   : > { %15853 = vst [vmem:[#allocation30_spill] sm:$0xff] %v7652_v39  ;;  %v582_v42 = vsel %vm386_vm7, %v443_v37, 0.0  ;;  %vm389_vm8 = vcmp.lt.s32.totalorder %v7652_v39, %v7598_v17  ;;  %v7666_v45 = vadd.s32 1408, %v7565_v3  ;;  %v7669_v46 = vadd.s32 1280, %v7565_v3  ;;  %s1547_s10 = sand.u32 4, %s7847_s18 }
  0x70   : > { %15854 = vst [vmem:[#allocation31_spill] sm:$0xff] %v7655_v40  ;;  %vm388_vm9 = vcmp.lt.s32.totalorder %v7655_v40, %v7598_v17  ;;  %v463_v47 = vrot.slane %v369_v38, %v7582_v10  ;;  %v585_v48 = vsel %vm389_vm8, %v455_v43, 0.0  ;;  %v459_v50 = vrot.slane %v369_v38, %v7576_v8  ;;  %v7035_v43 = vld [vmem:[%s7550_s14 + $0xc0] ss:$8 sm:$0xf0] }
  0x71   : > { %15855 = vst [vmem:[#allocation32_spill] sm:$0xff] %v7666_v45  ;;  %15856 = vst [vmem:[#allocation33_spill] sm:$0xff] %v7669_v46  ;;  %v584_v49 = vsel %vm388_vm9, %v451_v44, 0.0  ;;  %v7676_v51 = vadd.s32 1664, %v7565_v3  ;;  %vm391_vm10 = vcmp.lt.s32.totalorder %v7666_v45, %v7598_v17  ;;  %vm390_vm11 = vcmp.lt.s32.totalorder %v7669_v46, %v7598_v17 }
  0x72   : > { %622 = vrot.lane.b32.xlu1 %v581_v34, %s7610_s30  ;;  %620 = vrot.lane.b32.xlu0 %v580_v35, %s7610_s30  ;;  %v7683_v52 = vadd.s32 1536, %v7565_v3  ;;  %v471_v53 = vrot.slane %v369_v38, %v7596_v16  ;;  %v587_v54 = vsel %vm391_vm10, %v463_v47, 0.0  ;;  %v586_v55 = vsel %vm390_vm11, %v459_v50, 0.0 }
  0x73   : > { %15857 = vst [vmem:[#allocation34_spill] sm:$0xff] %v7676_v51  ;;  %vm393_vm12 = vcmp.lt.s32.totalorder %v7676_v51, %v7598_v17  ;;  %v467_v56 = vrot.slane %v369_v38, %v7624_v26  ;;  %v7695_v58 = vadd.s32 1920, %v7565_v3  ;;  %v7698_v59 = vadd.s32 1792, %v7565_v3 }
  0x74   : > { %15858 = vst [vmem:[#allocation35_spill] sm:$0xff] %v7683_v52  ;;  %vm392_vm13 = vcmp.lt.s32.totalorder %v7683_v52, %v7598_v17  ;;  %v589_v61 = vsel %vm393_vm12, %v471_v53, 0.0  ;;  %v479_v63 = vrot.slane %v369_v38, %v7633_v29  ;;  %v475_v0 = vrot.slane %v369_v38, %v7641_v33  ;;  %v7034_v38 = vld [vmem:[%s7550_s14 + $0xc0] ss:$8 sm:$0xf] }
  0x75   : > { %15859 = vst [vmem:[#allocation36_spill] sm:$0xff] %v7695_v58  ;;  %15860 = vst [vmem:[#allocation37_spill] sm:$0xff] %v7698_v59  ;;  %v588_v62 = vsel %vm392_vm13, %v467_v56, 0.0  ;;  %v373_v1 = vor.u32 %v7033_v60, %v7032_v57  ;;  %vm395_vm14 = vcmp.lt.s32.totalorder %v7695_v58, %v7598_v17  ;;  %vm394_vm15 = vcmp.lt.s32.totalorder %v7698_v59, %v7598_v17 }
  0x76   : > { %626 = vrot.lane.b32.xlu1 %v583_v41, %s7610_s30  ;;  %624 = vrot.lane.b32.xlu0 %v582_v42, %s7610_s30  ;;  %v7710_v2 = vadd.s32 2176, %v7565_v3  ;;  %v7713_v4 = vadd.s32 2048, %v7565_v3  ;;  %v591_v13 = vsel %vm395_vm14, %v479_v63, 0.0  ;;  %v590_v14 = vsel %vm394_vm15, %v475_v0, 0.0 }
  0x77   : > { %v487_v18 = vrot.slane %v373_v1, %v7588_v12  ;;  %v483_v19 = vrot.slane %v373_v1, %v7570_v6  ;;  %v7724_v21 = vadd.s32 2432, %v7565_v3  ;;  %v7727_v22 = vadd.s32 2304, %v7565_v3 }
  0x78   : > { %15861 = vst [vmem:[#allocation38_spill] sm:$0xff] %v7710_v2  ;;  %15862 = vst [vmem:[#allocation39_spill] sm:$0xff] %v7713_v4  ;;  %vm397_vm0 = vcmp.lt.s32.totalorder %v7710_v2, %v7598_v17  ;;  %vm396_vm1 = vcmp.lt.s32.totalorder %v7713_v4, %v7598_v17  ;;  %v495_v23 = vrot.slane %v373_v1, %v7582_v10  ;;  %v7734_v30 = vadd.s32 2688, %v7565_v3 }
  0x79   : > { %15863 = vst [vmem:[#allocation40_spill] sm:$0xff] %v7724_v21  ;;  %15864 = vst [vmem:[#allocation41_spill] sm:$0xff] %v7727_v22  ;;  %v593_v24 = vsel %vm397_vm0, %v487_v18, 0.0  ;;  %v592_v25 = vsel %vm396_vm1, %v483_v19, 0.0  ;;  %v491_v27 = vrot.slane %v373_v1, %v7576_v8  ;;  %vm399_vm2 = vcmp.lt.s32.totalorder %v7724_v21, %v7598_v17 }
  0x7a   : > { %630 = vrot.lane.b32.xlu1 %v585_v48, %s7610_s30  ;;  %628 = vrot.lane.b32.xlu0 %v584_v49, %s7610_s30  ;;  %15865 = vst [vmem:[#allocation42_spill] sm:$0xff] %v7734_v30  ;;  %vm398_vm3 = vcmp.lt.s32.totalorder %v7727_v22, %v7598_v17  ;;  %v7741_v31 = vadd.s32 2560, %v7565_v3  ;;  %v503_v34 = vrot.slane %v373_v1, %v7596_v16  ;;  %v595_v35 = vsel %vm399_vm2, %v495_v23, 0.0 }
  0x7b   : > { %v594_v36 = vsel %vm398_vm3, %v491_v27, 0.0  ;;  %vm401_vm4 = vcmp.lt.s32.totalorder %v7734_v30, %v7598_v17  ;;  %v499_v37 = vrot.slane %v373_v1, %v7624_v26  ;;  %v7753_v41 = vadd.s32 2944, %v7565_v3  ;;  %v7042_v27 = vld [vmem:[%s7550_s14 + $0x1] ss:$8 sm:$0xf] }
  0x7c   : > { %15866 = vst [vmem:[#allocation43_spill] sm:$0xff] %v7741_v31  ;;  %vm400_vm5 = vcmp.lt.s32.totalorder %v7741_v31, %v7598_v17  ;;  %v7756_v42 = vadd.s32 2816, %v7565_v3  ;;  %v597_v44 = vsel %vm401_vm4, %v503_v34, 0.0  ;;  %v511_v48 = vrot.slane %v373_v1, %v7633_v29 }
  0x7d   : > { %15867 = vst [vmem:[#allocation44_spill] sm:$0xff] %v7753_v41  ;;  %v596_v47 = vsel %vm400_vm5, %v499_v37, 0.0  ;;  %v507_v49 = vrot.slane %v373_v1, %v7641_v33  ;;  %v7763_v50 = vor.u32 %v7035_v43, %v7034_v38  ;;  %vm403_vm6 = vcmp.lt.s32.totalorder %v7753_v41, %v7598_v17 }
  0x7e   : > { %634 = vrot.lane.b32.xlu1 %v587_v54, %s7610_s30  ;;  %632 = vrot.lane.b32.xlu0 %v586_v55, %s7610_s30  ;;  %15868 = vst [vmem:[#allocation45_spill] sm:$0xff] %v7756_v42  ;;  %vm402_vm7 = vcmp.lt.s32.totalorder %v7756_v42, %v7598_v17  ;;  %v7770_v53 = vadd.s32 3200, %v7565_v3  ;;  %v7773_v54 = vadd.s32 3072, %v7565_v3  ;;  %v599_v55 = vsel %vm403_vm6, %v511_v48, 0.0 }
  0x7f   : > { %v598_v56 = vsel %vm402_vm7, %v507_v49, 0.0  ;;  %v519_v57 = vrot.slane %v7763_v50, %v7588_v12  ;;  %v515_v60 = vrot.slane %v7763_v50, %v7570_v6  ;;  %v527_v1 = vrot.slane %v7763_v50, %v7582_v10 }
  0x80   : > { %15869 = vst [vmem:[#allocation46_spill] sm:$0xff] %v7770_v53  ;;  %15870 = vst [vmem:[#allocation47_spill] sm:$0xff] %v7773_v54  ;;  %vm405_vm8 = vcmp.lt.s32.totalorder %v7770_v53, %v7598_v17  ;;  %vm404_vm9 = vcmp.lt.s32.totalorder %v7773_v54, %v7598_v17  ;;  %v7806_v18 = vadd.s32 3584, %v7565_v3  ;;  %v7822_v34 = vadd.s32 3968, %v7565_v3 }
  0x81   : > { %v601_v63 = vsel %vm405_vm8, %v519_v57, 0.0  ;;  %v600_v0 = vsel %vm404_vm9, %v515_v60, 0.0  ;;  %v7373_v37 = vmov 1966171168   ;;  %v543_v43 = vrot.slane %v7763_v50, %v7633_v29 }
  0x82   : > { %638 = vrot.lane.b32.xlu1 %v589_v61, %s7610_s30  ;;  %636 = vrot.lane.b32.xlu0 %v588_v62, %s7610_s30  ;;  %v7786_v61 = vadd.s32 3456, %v7565_v3  ;;  %v7789_v62 = vadd.s32 3328, %v7565_v3  ;;  %15874 = vst [vmem:[#allocation51_spill] sm:$0xff] %v7806_v18  ;;  %vm408_vm13 = vcmp.lt.s32.totalorder %v7806_v18, %v7598_v17  ;;  %15875 = vst [vmem:[#allocation52_spill] sm:$0xff] %v7822_v34  ;;  %v922_v38 = vunpack.c.l.s4 %v7373_v37 }
  0x83   : > { %v539_v48 = vrot.slane %v7763_v50, %v7641_v33  ;;  %vm411_vm14 = vcmp.lt.s32.totalorder %v7822_v34, %v7598_v17  ;;  %v7891_v37 = vstv %s850_s7 }
  0x84   : > { %15871 = vst [vmem:[#allocation48_spill] sm:$0xff] %v7786_v61  ;;  %15872 = vst [vmem:[#allocation49_spill] sm:$0xff] %v7789_v62  ;;  %vm407_vm10 = vcmp.lt.s32.totalorder %v7786_v61, %v7598_v17  ;;  %vm406_vm11 = vcmp.lt.s32.totalorder %v7789_v62, %v7598_v17 }
  0x85   : > { %v603_v19 = vsel %vm407_vm10, %v527_v1, 0.0  ;;  %v7045_v1 = vld [vmem:[%s7550_s14 + $0x41] ss:$8 sm:$0xf0]  ;;  %15882 = vst [vmem:[#allocation59_spill] sm:$0xff] %v7891_v37 }
  0x86   : > { %642 = vrot.lane.b32.xlu1 %v591_v13, %s7610_s30  ;;  %640 = vrot.lane.b32.xlu0 %v590_v14, %s7610_s30  ;;  %v523_v13 = vrot.slane %v7763_v50, %v7576_v8  ;;  %v7803_v14 = vadd.s32 3712, %v7565_v3 }
  0x88   : > { %15873 = vst [vmem:[#allocation50_spill] sm:$0xff] %v7803_v14  ;;  %v602_v23 = vsel %vm406_vm11, %v523_v13, 0.0  ;;  %vm409_vm12 = vcmp.lt.s32.totalorder %v7803_v14, %v7598_v17  ;;  %v7869_v13 = vstv %s745_s17  ;;  %s1582_s17 = sand.u32 8, %s7847_s18 }
  0x89   : > { %15878 = vst [vmem:[#allocation55_spill] sm:$0xff] %v7869_v13 }
  0x8a   : > { %646 = vrot.lane.b32.xlu1 %v593_v24, %s7610_s30  ;;  %644 = vrot.lane.b32.xlu0 %v592_v25, %s7610_s30  ;;  %v535_v24 = vrot.slane %v7763_v50, %v7596_v16  ;;  %v531_v25 = vrot.slane %v7763_v50, %v7624_v26  ;;  %v923_v50 = vunpack.c.0.s8 %v922_v38 }
  0x8e   : > { %650 = vrot.lane.b32.xlu1 %v595_v35, %s7610_s30  ;;  %648 = vrot.lane.b32.xlu0 %v594_v36, %s7610_s30  ;;  %v7825_v35 = vadd.s32 3840, %v7565_v3  ;;  %v7043_v36 = vld [vmem:[%s7550_s14 + $0x1] ss:$8 sm:$0xf0] }
  0x8f   : > { %v7838_v49 = vor.u32 %v7043_v36, %v7042_v27  ;;  %v7889_v36 = vstv %s815_s27 }
  0x90   : > { %15876 = vst [vmem:[#allocation53_spill] sm:$0xff] %v7825_v35  ;;  %vm410_vm15 = vcmp.lt.s32.totalorder %v7825_v35, %v7598_v17  ;;  %15881 = vst [vmem:[#allocation58_spill] sm:$0xff] %v7889_v36 }
  0x91   : > { %v606_v17 = vsel %vm410_vm15, %v539_v48, 0.0  ;;  %v1190_v57 = vrot.slane %v7838_v49, %v7588_v12  ;;  %v1186_v60 = vrot.slane %v7838_v49, %v7570_v6  ;;  %v1206_v48 = vrot.slane %v7838_v49, %v7596_v16 }
  0x92   : > { %654 = vrot.lane.b32.xlu1 %v597_v44, %s7610_s30  ;;  %652 = vrot.lane.b32.xlu0 %v596_v47, %s7610_s30  ;;  %v605_v44 = vsel %vm409_vm12, %v535_v24, 0.0  ;;  %v604_v47 = vsel %vm408_vm13, %v531_v25, 0.0  ;;  %v1198_v24 = vrot.slane %v7838_v49, %v7582_v10 }
  0x96   : > { %658 = vrot.lane.b32.xlu1 %v599_v55, %s7610_s30  ;;  %656 = vrot.lane.b32.xlu0 %v598_v56, %s7610_s30  ;;  %v7845_v55 = vstv %s1145_s29  ;;  %v607_v56 = vsel %vm411_vm14, %v543_v43, 0.0  ;;  %s1512_s29 = sand.u32 2, %s7847_s18  ;;  %v7897_v43 = vstv %s1477_s9 }
  0x97   : > { %vm1148_vm0 = vcmp.lt.s32.totalorder %v7585_v11, %v7845_v55  ;;  %vm1147_vm1 = vcmp.lt.s32.totalorder %v7565_v3, %v7845_v55  ;;  %vm1150_vm2 = vcmp.lt.s32.totalorder %v7579_v9, %v7845_v55  ;;  %vm1149_vm3 = vcmp.lt.s32.totalorder %v7573_v7, %v7845_v55  ;;  %15883 = vst [vmem:[#allocation60_spill] sm:$0xff] %v7897_v43 }
  0x98   : > { %v1344_v25 = vsel %vm1148_vm0, %v1190_v57, 0.0  ;;  %v1343_v27 = vsel %vm1147_vm1, %v1186_v60, 0.0  ;;  %vm1152_vm4 = vcmp.lt.s32.totalorder %v7593_v15, %v7845_v55  ;;  %vm1151_vm5 = vcmp.lt.s32.totalorder %v7604_v20, %v7845_v55 }
  0x99   : > { %v1214_v60 = vrot.slane %v7838_v49, %v7633_v29  ;;  %vm1154_vm6 = vcmp.lt.s32.totalorder %v7630_v28, %v7845_v55  ;;  %vm1153_vm7 = vcmp.lt.s32.totalorder %v7638_v32, %v7845_v55  ;;  %vm1156_vm8 = vcmp.lt.s32.totalorder %v7652_v39, %v7845_v55 }
  0x9a   : > { %662 = vrot.lane.b32.xlu1 %v601_v63, %s7610_s30  ;;  %660 = vrot.lane.b32.xlu0 %v600_v0, %s7610_s30  ;;  %v7865_v63 = vstv %s710_s11  ;;  %v7044_v0 = vld [vmem:[%s7550_s14 + $0x41] ss:$8 sm:$0xf]  ;;  %s7882_s11 = sand.u32 127, %s1376_s12   ;;  %s1617_s12 = sand.u32 16, %s7847_s18  ;;  %vm1155_vm9 = vcmp.lt.s32.totalorder %v7655_v40, %v7845_v55  ;;  %vm1158_vm10 = vcmp.lt.s32.totalorder %v7666_v45, %v7845_v55  ;;  %vm1157_vm11 = vcmp.lt.s32.totalorder %v7669_v46, %v7845_v55 }
  0x9b   : > { %15877 = vst [vmem:[#allocation54_spill] sm:$0xff] %v7865_v63  ;;  %v7895_v38 = vor.u32 %v7045_v1, %v7044_v0  ;;  %v1210_v0 = vrot.slane %v7838_v49, %v7641_v33  ;;  %v7920_v1 = vstv %s1617_s12  ;;  %s1896_s18 = sadd.s32 2, %s7557_s16  ;;  %vm1160_vm12 = vcmp.lt.s32.totalorder %v7676_v51, %v7845_v55 }
  0x9c   : > { %15887 = vst [vmem:[#allocation64_spill] sm:$0xff] %v7920_v1  ;;  %vm1159_vm13 = vcmp.lt.s32.totalorder %v7683_v52, %v7845_v55  ;;  %vm1162_vm14 = vcmp.lt.s32.totalorder %v7695_v58, %v7845_v55  ;;  %vm1161_vm15 = vcmp.lt.s32.totalorder %v7698_v59, %v7845_v55  ;;  %vm1164_vm0 = vcmp.lt.s32.totalorder %v7710_v2, %v7845_v55  ;;  %s7999_s27 = sld [smem:[#allocation6 + %s1896_s18]] }
  0x9d   : > { %v1230_v1 = vrot.slane %v7895_v38, %v7582_v10  ;;  %vm1163_vm1 = vcmp.lt.s32.totalorder %v7713_v4, %v7845_v55 }
  0x9e   : > { %666 = vrot.lane.b32.xlu1 %v603_v19, %s7610_s30  ;;  %664 = vrot.lane.b32.xlu0 %v602_v23, %s7610_s30  ;;  %v7871_v19 = vstv %s780_s19  ;;  %v7874_v23 = vsub.s32 %v923_v50, %v7567_v5  ;;  %v1194_v5 = vrot.slane %v7838_v49, %v7576_v8  ;;  %v7906_v50 = vstv %s1582_s17  ;;  %s7968_s19 = sld [smem:[#allocation2 + %s1896_s18]]  ;;  %s2664_s18 = sadd.s32 3, %s7557_s16 }
  0x9f   : > { %15879 = vst [vmem:[#allocation56_spill] sm:$0xff] %v7871_v19  ;;  %15886 = vst [vmem:[#allocation63_spill] sm:$0xff] %v7906_v50  ;;  %v7954_v37 = vsel %vm1158_vm10, %v1230_v1, 0.0  ;;  %v1242_v1 = vrot.slane %v7895_v38, %v7641_v33  ;;  %vm1174_vm10 = vcmp.lt.s32.totalorder %v7786_v61, %v7845_v55 }
  0xa0   : > { %15880 = vst [vmem:[#allocation57_spill] sm:$0xff] %v7874_v23  ;;  %v1345_v57 = vsel %vm1149_vm3, %v1194_v5, 0.0  ;;  %v1348_v5 = vsel %vm1152_vm4, %v1206_v48, 0.0  ;;  %v1226_v48 = vrot.slane %v7895_v38, %v7576_v8  ;;  %vm1165_vm3 = vcmp.lt.s32.totalorder %v7727_v22, %v7845_v55 }
  0xa1   : > { %vm1168_vm4 = vcmp.lt.s32.totalorder %v7734_v30, %v7845_v55 }
  0xa2   : > { %670 = vrot.lane.b32.xlu1 %v605_v44, %s7610_s30  ;;  %668 = vrot.lane.b32.xlu0 %v604_v47, %s7610_s30  ;;  %v7899_v44 = vstv %s1512_s29  ;;  %v7901_v47 = vstv %s1547_s10 }
  0xa3   : > { %15884 = vst [vmem:[#allocation61_spill] sm:$0xff] %v7899_v44  ;;  %15885 = vst [vmem:[#allocation62_spill] sm:$0xff] %v7901_v47  ;;  %v1350_v47 = vsel %vm1154_vm6, %v1214_v60, 0.0  ;;  %v1349_v44 = vsel %vm1153_vm7, %v1210_v0, 0.0  ;;  %v1234_v60 = vrot.slane %v7895_v38, %v7624_v26  ;;  %v1353_v0 = vsel %vm1157_vm11, %v1226_v48, 0.0 }
  0xa4   : > { %vm1170_vm6 = vcmp.lt.s32.totalorder %v7753_v41, %v7845_v55  ;;  %vm1169_vm7 = vcmp.lt.s32.totalorder %v7756_v42, %v7845_v55  ;;  %s2144_s7 = sand.u32 4095, %s7968_s19   ;;  %vm1173_vm11 = vcmp.lt.s32.totalorder %v7789_v62, %v7845_v55  ;;  %s3432_s19 = sadd.s32 4, %s7557_s16 }
  0xa5   : > { %v1355_v36 = vsel %vm1159_vm13, %v1234_v60, 0.0  ;;  %s8079_s9 = sshrl.u32 %s2144_s7, 7  ;;  %vm1175_vm13 = vcmp.lt.s32.totalorder %v7806_v18, %v7845_v55 }
  0xa6   : > { %674 = vrot.lane.b32.xlu1 %v607_v56, %s7610_s30  ;;  %672 = vrot.lane.b32.xlu0 %v606_v17, %s7610_s30  ;;  %v1346_v56 = vsel %vm1150_vm2, %v1198_v24, 0.0  ;;  %v1202_v17 = vrot.slane %v7838_v49, %v7624_v26  ;;  %v1222_v24 = vrot.slane %v7895_v38, %v7588_v12  ;;  %v1218_v49 = vrot.slane %v7895_v38, %v7570_v6  ;;  %s2245_s29 = sand.u32 1, %s8079_s9  ;;  %s2280_s10 = sand.u32 2, %s8079_s9 }
  0xa7   : > { %vm1166_vm2 = vcmp.lt.s32.totalorder %v7724_v21, %v7845_v55  ;;  %s2315_s17 = sand.u32 4, %s8079_s9  ;;  %s2350_s12 = sand.u32 8, %s8079_s9 }
  0xa8   : > { %v1347_v50 = vsel %vm1151_vm5, %v1202_v17, 0.0  ;;  %v1238_v17 = vrot.slane %v7895_v38, %v7596_v16  ;;  %v1351_v23 = vsel %vm1155_vm9, %v1218_v49, 0.0  ;;  %vm1167_vm5 = vcmp.lt.s32.totalorder %v7741_v31, %v7845_v55 }
  0xa9   : > { %vm1171_vm9 = vcmp.lt.s32.totalorder %v7773_v54, %v7845_v55 }
  0xaa   : > { %1381 = vrot.lane.b32.xlu1 %v1344_v25, %s7882_s11  ;;  %1379 = vrot.lane.b32.xlu0 %v1343_v27, %s7882_s11  ;;  %v7046_v25 = vld [vmem:[%s7550_s14 + $0x81] ss:$8 sm:$0xf] }
  0xab   : > { %v7047_v27 = vld [vmem:[%s7550_s14 + $0x81] ss:$8 sm:$0xf0] }
  0xac   : > { %v7946_v43 = vor.u32 %v7047_v27, %v7046_v25  ;;  %v7048_v27 = vld [vmem:[%s7550_s14 + $0xc1] ss:$8 sm:$0xf] }
  0xae   : > { %1385 = vrot.lane.b32.xlu1 %v1346_v56, %s7882_s11  ;;  %1383 = vrot.lane.b32.xlu0 %v1345_v57, %s7882_s11  ;;  %v1352_v56 = vsel %vm1156_vm8, %v1222_v24, 0.0  ;;  %v1246_v24 = vrot.slane %v7895_v38, %v7633_v29  ;;  %v1250_v25 = vrot.slane %v7946_v43, %v7570_v6  ;;  %v1262_v49 = vrot.slane %v7946_v43, %v7582_v10 }
  0xaf   : > { %v1258_v38 = vrot.slane %v7946_v43, %v7576_v8  ;;  %v1270_v48 = vrot.slane %v7946_v43, %v7596_v16  ;;  %v7991_v57 = vsel %vm1160_vm12, %v1238_v17, 0.0  ;;  %v1266_v19 = vrot.slane %v7946_v43, %v7624_v26 }
  0xb0   : > { %v8009_v17 = vsel %vm1162_vm14, %v1246_v24, 0.0  ;;  %v8028_v60 = vsel %vm1163_vm1, %v1250_v25, 0.0  ;;  %v8032_v24 = vsel %vm1166_vm2, %v1262_v49, 0.0  ;;  %vm1172_vm8 = vcmp.lt.s32.totalorder %v7770_v53, %v7845_v55  ;;  %v7058_v25 = vld [vmem:[%s7550_s14 + $0x2] ss:$8 sm:$0xf] }
  0xb1   : > { %v7059_v49 = vld [vmem:[%s7550_s14 + $0x2] ss:$8 sm:$0xf0]  ;;  %vm1176_vm12 = vcmp.lt.s32.totalorder %v7803_v14, %v7845_v55  ;;  %vm1178_vm14 = vcmp.lt.s32.totalorder %v7822_v34, %v7845_v55 }
  0xb2   : > { %1389 = vrot.lane.b32.xlu1 %v1348_v5, %s7882_s11  ;;  %1387 = vrot.lane.b32.xlu0 %v1347_v50, %s7882_s11  ;;  %v1254_v50 = vrot.slane %v7946_v43, %v7588_v12  ;;  %v7049_v5 = vld [vmem:[%s7550_s14 + $0xc1] ss:$8 sm:$0xf0] }
  0xb3   : > { %v8013_v13 = vor.u32 %v7049_v5, %v7048_v27  ;;  %v8034_v27 = vsel %vm1165_vm3, %v1258_v38, 0.0  ;;  %v8036_v5 = vsel %vm1168_vm4, %v1270_v48, 0.0  ;;  %v8052_v38 = vsel %vm1167_vm5, %v1266_v19, 0.0 }
  0xb4   : > { %15888 = vst [vmem:[#allocation65_spill] sm:$0xff] %v8036_v5  ;;  %15889 = vst [vmem:[#allocation66_spill] sm:$0xff] %v8052_v38  ;;  %v8075_v38 = vor.u32 %v7059_v49, %v7058_v25  ;;  %v8094_v25 = vstv %s7999_s27  ;;  %s8297_s27 = sld [smem:[#allocation6 + %s2664_s18]] }
  0xb5   : > { %v1286_v48 = vrot.slane %v8013_v13, %v7588_v12  ;;  %v1282_v63 = vrot.slane %v8013_v13, %v7570_v6  ;;  %v1290_v19 = vrot.slane %v8013_v13, %v7576_v8  ;;  %vm1915_vm1 = vcmp.lt.s32.totalorder %v7565_v3, %v8094_v25 }
  0xb6   : > { %1393 = vrot.lane.b32.xlu1 %v1350_v47, %s7882_s11  ;;  %1391 = vrot.lane.b32.xlu0 %v1349_v44, %s7882_s11  ;;  %v8018_v44 = vsel %vm1161_vm15, %v1242_v1, 0.0  ;;  %v8023_v47 = vsel %vm1164_vm0, %v1254_v50, 0.0  ;;  %v1278_v1 = vrot.slane %v7946_v43, %v7633_v29  ;;  %v1274_v50 = vrot.slane %v7946_v43, %v7641_v33 }
  0xb7   : > { %v1294_v43 = vrot.slane %v8013_v13, %v7582_v10  ;;  %vm1177_vm15 = vcmp.lt.s32.totalorder %v7825_v35, %v7845_v55  ;;  %vm1916_vm0 = vcmp.lt.s32.totalorder %v7585_v11, %v8094_v25  ;;  %vm1918_vm2 = vcmp.lt.s32.totalorder %v7579_v9, %v8094_v25 }
  0xb8   : > { %v8084_v5 = vsel %vm1170_vm6, %v1278_v1, 0.0  ;;  %v8089_v62 = vsel %vm1169_vm7, %v1274_v50, 0.0  ;;  %v8102_v1 = vsel %vm1172_vm8, %v1286_v48, 0.0  ;;  %v8107_v50 = vsel %vm1171_vm9, %v1282_v63, 0.0 }
  0xb9   : > { %v8112_v49 = vsel %vm1174_vm10, %v1294_v43, 0.0  ;;  %v1306_v48 = vrot.slane %v8013_v13, %v7641_v33  ;;  %v1958_v43 = vrot.slane %v8075_v38, %v7588_v12  ;;  %vm1917_vm3 = vcmp.lt.s32.totalorder %v7573_v7, %v8094_v25 }
  0xba   : > { %1397 = vrot.lane.b32.xlu1 %v1352_v56, %s7882_s11  ;;  %1395 = vrot.lane.b32.xlu0 %v1351_v23, %s7882_s11  ;;  %v1302_v23 = vrot.slane %v8013_v13, %v7596_v16  ;;  %v1298_v56 = vrot.slane %v8013_v13, %v7624_v26  ;;  %15890 = vst [vmem:[#allocation67_spill] sm:$0xff] %v8112_v49  ;;  %v8160_v49 = vstv %s2245_s29  ;;  %v8178_v7 = vstv %s2350_s12  ;;  %s9269_s29 = sld [smem:[#allocation2 + %s2664_s18]] }
  0xbb   : > { %15895 = vst [vmem:[#allocation72_spill] sm:$0xff] %v8160_v49  ;;  %vm1920_vm4 = vcmp.lt.s32.totalorder %v7593_v15, %v8094_v25  ;;  %15898 = vst [vmem:[#allocation75_spill] sm:$0xff] %v8178_v7  ;;  %vm1919_vm5 = vcmp.lt.s32.totalorder %v7604_v20, %v8094_v25  ;;  %vm1922_vm6 = vcmp.lt.s32.totalorder %v7630_v28, %v8094_v25 }
  0xbc   : > { %v8118_v18 = vsel %vm1176_vm12, %v1302_v23, 0.0  ;;  %v8126_v63 = vsel %vm1175_vm13, %v1298_v56, 0.0  ;;  %v1966_v23 = vrot.slane %v8075_v38, %v7582_v10  ;;  %v7060_v56 = vld [vmem:[%s7550_s14 + $0x42] ss:$8 sm:$0xf]  ;;  %vm1921_vm7 = vcmp.lt.s32.totalorder %v7638_v32, %v8094_v25 }
  0xbd   : > { %15892 = vst [vmem:[#allocation69_spill] sm:$0xff] %v8118_v18  ;;  %15893 = vst [vmem:[#allocation70_spill] sm:$0xff] %v8126_v63  ;;  %v7061_v63 = vld [vmem:[%s7550_s14 + $0x42] ss:$8 sm:$0xf0]  ;;  %vm1924_vm8 = vcmp.lt.s32.totalorder %v7652_v39, %v8094_v25  ;;  %vm1923_vm9 = vcmp.lt.s32.totalorder %v7655_v40, %v8094_v25  ;;  %vm1926_vm10 = vcmp.lt.s32.totalorder %v7666_v45, %v8094_v25 }
  0xbe   : > { %1401 = vrot.lane.b32.xlu1 %v7954_v37, %s7882_s11  ;;  %1399 = vrot.lane.b32.xlu0 %v1353_v0, %s7882_s11  ;;  %v1310_v37 = vrot.slane %v8013_v13, %v7633_v29  ;;  %v8116_v0 = vsel %vm1173_vm11, %v1290_v19, 0.0  ;;  %v1954_v19 = vrot.slane %v8075_v38, %v7570_v6  ;;  %v1962_v13 = vrot.slane %v8075_v38, %v7576_v8 }
  0xbf   : > { %15891 = vst [vmem:[#allocation68_spill] sm:$0xff] %v8116_v0  ;;  %v1974_v0 = vrot.slane %v8075_v38, %v7596_v16  ;;  %v1904_v49 = vor.u32 %v7061_v63, %v7060_v56  ;;  %v1970_v63 = vrot.slane %v8075_v38, %v7624_v26  ;;  %vm1925_vm11 = vcmp.lt.s32.totalorder %v7669_v46, %v8094_v25 }
  0xc0   : > { %v8152_v18 = vsel %vm1178_vm14, %v1310_v37, 0.0  ;;  %v8171_v37 = vsel %vm1177_vm15, %v1306_v48, 0.0  ;;  %v8187_v15 = vsel %vm1917_vm3, %v1962_v13, 0.0  ;;  %v1982_v48 = vrot.slane %v8075_v38, %v7633_v29 }
  0xc1   : > { %15894 = vst [vmem:[#allocation71_spill] sm:$0xff] %v8152_v18  ;;  %v8176_v18 = vsel %vm1916_vm0, %v1958_v43, 0.0  ;;  %v8195_v55 = vsel %vm1920_vm4, %v1974_v0, 0.0  ;;  %v1986_v0 = vrot.slane %v1904_v49, %v7570_v6  ;;  %v1998_v43 = vrot.slane %v1904_v49, %v7582_v10 }
  0xc2   : > { %1405 = vrot.lane.b32.xlu1 %v7991_v57, %s7882_s11  ;;  %1403 = vrot.lane.b32.xlu0 %v1355_v36, %s7882_s11  ;;  %v8162_v57 = vstv %s2280_s10  ;;  %v8164_v36 = vstv %s2315_s17  ;;  %15899 = vst [vmem:[#allocation76_spill] sm:$0xff] %v8195_v55  ;;  %v2006_v13 = vrot.slane %v1904_v49, %v7596_v16  ;;  %v2002_v56 = vrot.slane %v1904_v49, %v7624_v26  ;;  %s2912_s10 = sand.u32 4095, %s9269_s29  }
  0xc3   : > { %15896 = vst [vmem:[#allocation73_spill] sm:$0xff] %v8162_v57  ;;  %15897 = vst [vmem:[#allocation74_spill] sm:$0xff] %v8164_v36  ;;  %v8183_v36 = vsel %vm1915_vm1, %v1954_v19, 0.0  ;;  %v8185_v57 = vsel %vm1918_vm2, %v1966_v23, 0.0  ;;  %v8230_v7 = vsel %vm1919_vm5, %v1970_v63, 0.0  ;;  %vm1928_vm12 = vcmp.lt.s32.totalorder %v7676_v51, %v8094_v25  ;;  %s9418_s17 = sand.u32 127, %s2912_s10  }
  0xc4   : > { %v7062_v19 = vld [vmem:[%s7550_s14 + $0x82] ss:$8 sm:$0xf]  ;;  %15900 = vst [vmem:[#allocation77_spill] sm:$0xff] %v8230_v7  ;;  %vm1927_vm13 = vcmp.lt.s32.totalorder %v7683_v52, %v8094_v25  ;;  %v2014_v55 = vrot.slane %v1904_v49, %v7633_v29  ;;  %vm1930_vm14 = vcmp.lt.s32.totalorder %v7695_v58, %v8094_v25  ;;  %vm1929_vm15 = vcmp.lt.s32.totalorder %v7698_v59, %v8094_v25 }
  0xc5   : > { %v7063_v23 = vld [vmem:[%s7550_s14 + $0x82] ss:$8 sm:$0xf0]  ;;  %vm1932_vm0 = vcmp.lt.s32.totalorder %v7710_v2, %v8094_v25  ;;  %vm1931_vm1 = vcmp.lt.s32.totalorder %v7713_v4, %v8094_v25  ;;  %vm1934_vm2 = vcmp.lt.s32.totalorder %v7724_v21, %v8094_v25  ;;  %vm1933_vm3 = vcmp.lt.s32.totalorder %v7727_v22, %v8094_v25 }
  0xc6   : > { %1409 = vrot.lane.b32.xlu1 %v8009_v17, %s7882_s11  ;;  %1407 = vrot.lane.b32.xlu0 %v8018_v44, %s7882_s11  ;;  %v1978_v17 = vrot.slane %v8075_v38, %v7641_v33  ;;  %v1990_v44 = vrot.slane %v1904_v49, %v7588_v12  ;;  %v1994_v38 = vrot.slane %v1904_v49, %v7576_v8 }
  0xc7   : > { %v1908_v63 = vor.u32 %v7063_v23, %v7062_v19  ;;  %v8273_v23 = vsel %vm1927_vm13, %v2002_v56, 0.0  ;;  %vm1936_vm4 = vcmp.lt.s32.totalorder %v7734_v30, %v8094_v25  ;;  %vm1935_vm5 = vcmp.lt.s32.totalorder %v7741_v31, %v8094_v25 }
  0xc8   : > { %v8252_v7 = vsel %vm1924_vm8, %v1990_v44, 0.0  ;;  %v8269_v19 = vsel %vm1925_vm11, %v1994_v38, 0.0  ;;  %v8271_v44 = vsel %vm1928_vm12, %v2006_v13, 0.0  ;;  %15907 = vst [vmem:[#allocation84_spill] sm:$0xff] %v8273_v23  ;;  %vm1940_vm8 = vcmp.lt.s32.totalorder %v7770_v53, %v8094_v25  ;;  %v15930_v53 = vld [vmem:[#allocation55_spill] sm:$0xff] }
  0xc9   : > { %15902 = vst [vmem:[#allocation79_spill] sm:$0xff] %v8252_v7  ;;  %15905 = vst [vmem:[#allocation82_spill] sm:$0xff] %v8269_v19  ;;  %v7065_v38 = vld [vmem:[%s7550_s14 + $0xc2] ss:$8 sm:$0xf0]  ;;  %v2038_v56 = vrot.slane %v1908_v63, %v7596_v16  ;;  %v2046_v23 = vrot.slane %v1908_v63, %v7633_v29 }
  0xca   : > { %1413 = vrot.lane.b32.xlu1 %v8023_v47, %s7882_s11  ;;  %1411 = vrot.lane.b32.xlu0 %v8028_v60, %s7882_s11  ;;  %v8240_v47 = vsel %vm1922_vm6, %v1982_v48, 0.0  ;;  %v8245_v60 = vsel %vm1921_vm7, %v1978_v17, 0.0  ;;  %v8257_v48 = vsel %vm1923_vm9, %v1986_v0, 0.0  ;;  %v8262_v17 = vsel %vm1926_vm10, %v1998_v43, 0.0  ;;  %15906 = vst [vmem:[#allocation83_spill] sm:$0xff] %v8271_v44  ;;  %v15910_v19 = vld [vmem:[#allocation65_spill] sm:$0xff] }
  0xcb   : > { %15901 = vst [vmem:[#allocation78_spill] sm:$0xff] %v8245_v60  ;;  %15903 = vst [vmem:[#allocation80_spill] sm:$0xff] %v8257_v48  ;;  %v2010_v60 = vrot.slane %v1904_v49, %v7641_v33  ;;  %v8281_v49 = vsel %vm1930_vm14, %v2014_v55, 0.0  ;;  %v7064_v0 = vld [vmem:[%s7550_s14 + $0xc2] ss:$8 sm:$0xf]  ;;  %v2022_v43 = vrot.slane %v1908_v63, %v7588_v12  ;;  %v2026_v55 = vrot.slane %v1908_v63, %v7576_v8 }
  0xcc   : > { %15904 = vst [vmem:[#allocation81_spill] sm:$0xff] %v8262_v17  ;;  %15908 = vst [vmem:[#allocation85_spill] sm:$0xff] %v8281_v49  ;;  %v2034_v49 = vrot.slane %v1908_v63, %v7624_v26  ;;  %v2042_v44 = vrot.slane %v1908_v63, %v7641_v33  ;;  %vm1938_vm6 = vcmp.lt.s32.totalorder %v7753_v41, %v8094_v25  ;;  %v7074_v17 = vld [vmem:[%s7550_s14 + $0x3] ss:$8 sm:$0xf] }
  0xcd   : > { %v8299_v13 = vsel %vm1929_vm15, %v2010_v60, 0.0  ;;  %v15911_v60 = vld [vmem:[#allocation66_spill] sm:$0xff]  ;;  %vm1937_vm7 = vcmp.lt.s32.totalorder %v7756_v42, %v8094_v25  ;;  %vm1939_vm9 = vcmp.lt.s32.totalorder %v7773_v54, %v8094_v25  ;;  %vm1942_vm10 = vcmp.lt.s32.totalorder %v7786_v61, %v8094_v25 }
  0xce   : > { %1417 = vrot.lane.b32.xlu1 %v8032_v24, %s7882_s11  ;;  %1415 = vrot.lane.b32.xlu0 %v8034_v27, %s7882_s11  ;;  %v2018_v24 = vrot.slane %v1908_v63, %v7570_v6  ;;  %v2030_v27 = vrot.slane %v1908_v63, %v7582_v10  ;;  %15909 = vst [vmem:[#allocation86_spill] sm:$0xff] %v8299_v13  ;;  %v7075_v48 = vld [vmem:[%s7550_s14 + $0x3] ss:$8 sm:$0xf0]  ;;  %v8324_v63 = vsel %vm1932_vm0, %v2022_v43, 0.0  ;;  %v8343_v43 = vsel %vm1935_vm5, %v2034_v49, 0.0 }
  0xcf   : > { %v1912_v13 = vor.u32 %v7065_v38, %v7064_v0  ;;  %15912 = vst [vmem:[#allocation65_spill] sm:$0xff] %v8324_v63  ;;  %v8339_v0 = vsel %vm1933_vm3, %v2026_v55, 0.0  ;;  %v8341_v38 = vsel %vm1936_vm4, %v2038_v56, 0.0  ;;  %15917 = vst [vmem:[#allocation90_spill] sm:$0xff] %v8343_v43  ;;  %v8355_v55 = vor.u32 %v7075_v48, %v7074_v17  ;;  %v15923_v17 = vld [vmem:[#allocation54_spill] sm:$0xff] }
  0xd0   : > { %15915 = vst [vmem:[#allocation88_spill] sm:$0xff] %v8339_v0  ;;  %15916 = vst [vmem:[#allocation89_spill] sm:$0xff] %v8341_v38  ;;  %v15920_v49 = vstv %s7610_s30  ;;  %vm712_vm12 = vcmp.ne.s32.totalorder %v15923_v17, 0  ;;  %vm1944_vm14 = vcmp.lt.s32.totalorder %v7803_v14, %v8094_v25  ;;  %vm1946_vm0 = vcmp.lt.s32.totalorder %v7822_v34, %v8094_v25  ;;  %v7077_v63 = vld [vmem:[%s7550_s14 + $0x43] ss:$8 sm:$0xf0] }
  0xd1   : > { %vm8364_vm11 = vcmp.lt.s32.totalorder %v7565_v3, %v15920_v49  ;;  %v2062_v48 = vrot.slane %v1912_v13, %v7582_v10  ;;  %v8379_v49 = vstv %s8297_s27  ;;  %v2066_v43 = vrot.slane %v1912_v13, %v7624_v26  ;;  %s8586_s30 = sand.u32 127, %s2144_s7   ;;  %s8846_s7 = sld [smem:[#allocation6 + %s3432_s19]] }
  0xd2   : > { %1421 = vrot.lane.b32.xlu1 %v15910_v19, %s7882_s11  ;;  %1419 = vrot.lane.b32.xlu0 %v15911_v60, %s7882_s11  ;;  %v8329_v19 = vsel %vm1931_vm1, %v2018_v24, 0.0  ;;  %v8334_v60 = vsel %vm1934_vm2, %v2030_v27, 0.0  ;;  %v8349_v24 = vsel %vm1938_vm6, %v2046_v23, 0.0  ;;  %v8351_v27 = vsel %vm1937_vm7, %v2042_v44, 0.0  ;;  %s2385_s27 = sand.u32 16, %s8079_s9  ;;  %s11043_s9 = sshrl.u32 %s2912_s10, 7 }
  0xd3   : > { %15913 = vst [vmem:[#allocation66_spill] sm:$0xff] %v8329_v19  ;;  %15914 = vst [vmem:[#allocation87_spill] sm:$0xff] %v8334_v60  ;;  %v2054_v23 = vrot.slane %v1912_v13, %v7588_v12  ;;  %v2050_v44 = vrot.slane %v1912_v13, %v7570_v6  ;;  %v2078_v38 = vrot.slane %v1912_v13, %v7633_v29  ;;  %v7076_v19 = vld [vmem:[%s7550_s14 + $0x43] ss:$8 sm:$0xf]  ;;  %vm747_vm5 = vcmp.ne.s32.totalorder %v15930_v53, 0 }
  0xd4   : > { %15918 = vst [vmem:[#allocation91_spill] sm:$0xff] %v8349_v24  ;;  %15919 = vst [vmem:[#allocation92_spill] sm:$0xff] %v8351_v27  ;;  %v2070_v24 = vrot.slane %v1912_v13, %v7596_v16  ;;  %v15925_v27 = vld [vmem:[#allocation51_spill] sm:$0xff]  ;;  %vm1945_vm1 = vcmp.lt.s32.totalorder %v7825_v35, %v8094_v25  ;;  %v2074_v0 = vrot.slane %v1912_v13, %v7641_v33 }
  0xd5   : > { %vm1943_vm15 = vcmp.lt.s32.totalorder %v15925_v27, %v8094_v25  ;;  %v2726_v60 = vrot.slane %v8355_v55, %v7588_v12  ;;  %v8402_v7 = vsel %vm1940_vm8, %v2054_v23, 0.0  ;;  %vm2684_vm2 = vcmp.lt.s32.totalorder %v7585_v11, %v8379_v49 }
  0xd6   : > { %1425 = vrot.lane.b32.xlu1 %v8084_v5, %s7882_s11  ;;  %1423 = vrot.lane.b32.xlu0 %v8089_v62, %s7882_s11  ;;  %v15924_v62 = vld [vmem:[#allocation49_spill] sm:$0xff]  ;;  %v2058_v5 = vrot.slane %v1912_v13, %v7576_v8  ;;  %15926 = vst [vmem:[#allocation54_spill] sm:$0xff] %v8402_v7  ;;  %v2722_v13 = vrot.slane %v8355_v55, %v7570_v6 }
  0xd7   : > { %vm1941_vm13 = vcmp.lt.s32.totalorder %v15924_v62, %v8094_v25  ;;  %v2734_v42 = vrot.slane %v8355_v55, %v7582_v10  ;;  %vm2683_vm3 = vcmp.lt.s32.totalorder %v7565_v3, %v8379_v49  ;;  %vm2686_vm4 = vcmp.lt.s32.totalorder %v7579_v9, %v8379_v49 }
  0xd8   : > { %v8447_v9 = vsel %vm1946_vm0, %v2078_v38, 0.0  ;;  %v2730_v25 = vrot.slane %v8355_v55, %v7576_v8  ;;  %vm2687_vm8 = vcmp.lt.s32.totalorder %v7604_v20, %v8379_v49  ;;  %vm2694_vm0 = vcmp.lt.s32.totalorder %v7666_v45, %v8379_v49 }
  0xd9   : > { %15934 = vst [vmem:[#allocation98_spill] sm:$0xff] %v8447_v9  ;;  %v8467_v38 = vsel %vm2686_vm4, %v2734_v42, 0.0  ;;  %v2750_v42 = vrot.slane %v8355_v55, %v7633_v29  ;;  %vm2698_vm4 = vcmp.lt.s32.totalorder %v7695_v58, %v8379_v49 }
  0xda   : > { %1429 = vrot.lane.b32.xlu1 %v8102_v1, %s7882_s11  ;;  %1427 = vrot.lane.b32.xlu0 %v8107_v50, %s7882_s11  ;;  %v8413_v1 = vsel %vm1939_vm9, %v2050_v44, 0.0  ;;  %v8418_v50 = vsel %vm1942_vm10, %v2062_v48, 0.0  ;;  %v8430_v44 = vsel %vm1941_vm13, %v2058_v5, 0.0  ;;  %v8435_v48 = vsel %vm1944_vm14, %v2070_v24, 0.0 }
  0xdb   : > { %15927 = vst [vmem:[#allocation93_spill] sm:$0xff] %v8413_v1  ;;  %15928 = vst [vmem:[#allocation94_spill] sm:$0xff] %v8418_v50  ;;  %v8440_v50 = vsel %vm1943_vm15, %v2066_v43, 0.0  ;;  %v8442_v1 = vor.u32 %v7077_v63, %v7076_v19  ;;  %v8452_v5 = vsel %vm1945_vm1, %v2074_v0, 0.0  ;;  %v8457_v24 = vsel %vm2684_vm2, %v2726_v60, 0.0  ;;  %v15937_v43 = vld [vmem:[#allocation16_spill] sm:$0xff] }
  0xdc   : > { %v8424_v23 = vpop.permute.xlu0 %612  ;;  %v617_v7 = vpop.permute.xlu1 %616  ;;  %15931 = vst [vmem:[#allocation55_spill] sm:$0xff] %v8430_v44  ;;  %15932 = vst [vmem:[#allocation96_spill] sm:$0xff] %v8435_v48  ;;  %vm2685_vm6 = vcmp.lt.s32.totalorder %v15937_v43, %v8379_v49  ;;  %v15938_v63 = vld [vmem:[#allocation67_spill] sm:$0xff]  ;;  %v15939_v19 = vld [vmem:[#allocation68_spill] sm:$0xff]  ;;  %v2742_v60 = vrot.slane %v8355_v55, %v7596_v16  ;;  %vm2690_vm9 = vcmp.lt.s32.totalorder %v7630_v28, %v8379_v49 }
  0xdd   : > { %15929 = vst [vmem:[#allocation95_spill] sm:$0xff] %v8424_v23  ;;  %15933 = vst [vmem:[#allocation97_spill] sm:$0xff] %v8440_v50  ;;  %v8465_v50 = vsel %vm2683_vm3, %v2722_v13, 0.0  ;;  %v15942_v0 = vld [vmem:[#allocation22_spill] sm:$0xff]  ;;  %v2738_v13 = vrot.slane %v8355_v55, %v7624_v26  ;;  %vm2689_vm10 = vcmp.lt.s32.totalorder %v7638_v32, %v8379_v49  ;;  %vm2692_vm13 = vcmp.lt.s32.totalorder %v7652_v39, %v8379_v49  ;;  %v15946_v44 = vld [vmem:[#allocation69_spill] sm:$0xff] }
  0xde   : > { %15935 = vst [vmem:[#allocation99_spill] sm:$0xff] %v8452_v5  ;;  %15936 = vst [vmem:[#allocation100_spill] sm:$0xff] %v8457_v24  ;;  %1433 = vrot.lane.b32.xlu1 %v15938_v63, %s7882_s11  ;;  %1431 = vrot.lane.b32.xlu0 %v15939_v19, %s7882_s11  ;;  %vm2688_vm7 = vcmp.lt.s32.totalorder %v15942_v0, %v8379_v49  ;;  %v2754_v39 = vrot.slane %v8442_v1, %v7570_v6 }
  0xdf   : > { %15940 = vst [vmem:[#allocation67_spill] sm:$0xff] %v8465_v50  ;;  %15941 = vst [vmem:[#allocation68_spill] sm:$0xff] %v8467_v38  ;;  %v2746_v38 = vrot.slane %v8355_v55, %v7641_v33  ;;  %v2758_v50 = vrot.slane %v8442_v1, %v7588_v12  ;;  %vm2691_vm14 = vcmp.lt.s32.totalorder %v7655_v40, %v8379_v49 }
  0xe0   : > { %v619_v63 = vpop.permute.xlu1 %618  ;;  %v615_v19 = vpop.permute.xlu0 %614  ;;  %vm2693_vm1 = vcmp.lt.s32.totalorder %v7669_v46, %v8379_v49  ;;  %vm2696_vm2 = vcmp.lt.s32.totalorder %v7676_v51, %v8379_v49  ;;  %vm2695_vm3 = vcmp.lt.s32.totalorder %v7683_v52, %v8379_v49 }
  0xe1   : > { %v706_v24 = vsel %vm8364_vm11, %v617_v7, %v619_v63  ;;  %v707_v5 = vsel %vm8364_vm11, %v615_v19, %v617_v7  ;;  %v8496_v9 = vsel %vm8364_vm11, %v8424_v23, %v615_v19  ;;  %v15947_v7 = vld [vmem:[#allocation70_spill] sm:$0xff]  ;;  %v8516_v19 = vsel %vm2685_vm6, %v2730_v25, 0.0  ;;  %v15955_v23 = vld [vmem:[#allocation71_spill] sm:$0xff] }
  0xe2   : > { %15943 = vst [vmem:[#allocation101_spill] sm:$0xff] %v8496_v9  ;;  %v8503_v55 = vsel %vm712_vm12, %v8496_v9, %v707_v5  ;;  %v8507_v48 = vsel %vm712_vm12, %v707_v5, %v706_v24  ;;  %1437 = vrot.lane.b32.xlu1 %v15946_v44, %s7882_s11  ;;  %1435 = vrot.lane.b32.xlu0 %v15947_v7, %s7882_s11  ;;  %15948 = vst [vmem:[#allocation69_spill] sm:$0xff] %v8516_v19  ;;  %v8523_v9 = vsel %vm2688_vm7, %v2742_v60, 0.0  ;;  %v15954_v19 = vld [vmem:[#allocation56_spill] sm:$0xff] }
  0xe3   : > { %15944 = vst [vmem:[#allocation102_spill] sm:$0xff] %v8503_v55  ;;  %15945 = vst [vmem:[#allocation103_spill] sm:$0xff] %v8507_v48  ;;  %v8528_v44 = vsel %vm2687_vm8, %v2738_v13, 0.0  ;;  %v8533_v5 = vsel %vm2690_vm9, %v2750_v42, 0.0  ;;  %v8540_v60 = vsel %vm2689_vm10, %v2746_v38, 0.0  ;;  %v2766_v13 = vrot.slane %v8442_v1, %v7582_v10 }
  0xe4   : > { %15949 = vst [vmem:[#allocation70_spill] sm:$0xff] %v8523_v9  ;;  %15950 = vst [vmem:[#allocation104_spill] sm:$0xff] %v8528_v44  ;;  %v623_v25 = vpop.permute.xlu1 %622  ;;  %v621_v7 = vpop.permute.xlu0 %620  ;;  %v8542_v9 = vsel %vm2692_vm13, %v2758_v50, 0.0  ;;  %v2762_v42 = vrot.slane %v8442_v1, %v7576_v8  ;;  %vm782_vm15 = vcmp.ne.s32.totalorder %v15954_v19, 0  ;;  %vm2697_vm6 = vcmp.lt.s32.totalorder %v7698_v59, %v8379_v49 }
  0xe5   : > { %15951 = vst [vmem:[#allocation105_spill] sm:$0xff] %v8533_v5  ;;  %15952 = vst [vmem:[#allocation106_spill] sm:$0xff] %v8540_v60  ;;  %v704_v5 = vsel %vm8364_vm11, %v621_v7, %v623_v25  ;;  %v705_v44 = vsel %vm8364_vm11, %v619_v63, %v621_v7  ;;  %v7078_v50 = vld [vmem:[%s7550_s14 + $0x83] ss:$8 sm:$0xf]  ;;  %v8570_v63 = vsel %vm2691_vm14, %v2754_v39, 0.0  ;;  %v2774_v7 = vrot.slane %v8442_v1, %v7596_v16 }
  0xe6   : > { %15953 = vst [vmem:[#allocation107_spill] sm:$0xff] %v8542_v9  ;;  %v7079_v38 = vld [vmem:[%s7550_s14 + $0x83] ss:$8 sm:$0xf0]  ;;  %v717_v9 = vsel %vm712_vm12, %v706_v24, %v705_v44  ;;  %v718_v60 = vsel %vm712_vm12, %v705_v44, %v704_v5  ;;  %1441 = vrot.lane.b32.xlu1 %v15955_v23, %s7882_s11  ;;  %1439 = vrot.lane.b32.xlu0 %v8171_v37, %s7882_s11  ;;  %15956 = vst [vmem:[#allocation56_spill] sm:$0xff] %v8570_v63  ;;  %v8595_v44 = vsel %vm2694_vm0, %v2766_v13, 0.0 }
  0xe7   : > { %v8577_v32 = vsel %vm747_vm5, %v8503_v55, %v717_v9  ;;  %v8582_v24 = vsel %vm747_vm5, %v8507_v48, %v718_v60  ;;  %v2770_v39 = vrot.slane %v8442_v1, %v7624_v26  ;;  %15957 = vst [vmem:[#allocation71_spill] sm:$0xff] %v8595_v44  ;;  %v8600_v40 = vsel %vm2693_vm1, %v2762_v42, 0.0  ;;  %v15991_v44 = vld [vmem:[#allocation86_spill] sm:$0xff] }
  0xe8   : > { %v627_v37 = vpop.permute.xlu1 %626  ;;  %v625_v23 = vpop.permute.xlu0 %624  ;;  %15958 = vst [vmem:[#allocation108_spill] sm:$0xff] %v8600_v40  ;;  %v8604_v63 = vor.u32 %v7079_v38, %v7078_v50  ;;  %v2782_v13 = vrot.slane %v8442_v1, %v7633_v29  ;;  %v2778_v50 = vrot.slane %v8442_v1, %v7641_v33  ;;  %vm2700_vm7 = vcmp.lt.s32.totalorder %v7710_v2, %v8379_v49  ;;  %v7080_v2 = vld [vmem:[%s7550_s14 + $0xc3] ss:$8 sm:$0xf] }
  0xe9   : > { %v702_v55 = vsel %vm8364_vm11, %v625_v23, %v627_v37  ;;  %v703_v48 = vsel %vm8364_vm11, %v623_v25, %v625_v23  ;;  %v8625_v25 = vsel %vm2696_vm2, %v2774_v7, 0.0  ;;  %vm2699_vm8 = vcmp.lt.s32.totalorder %v7713_v4, %v8379_v49  ;;  %v15965_v4 = vld [vmem:[#allocation76_spill] sm:$0xff] }
  0xea   : > { %v719_v42 = vsel %vm712_vm12, %v704_v5, %v703_v48  ;;  %v720_v52 = vsel %vm712_vm12, %v703_v48, %v702_v55  ;;  %2149 = vrot.lane.b32.xlu1 %v8176_v18, %s8586_s30  ;;  %2147 = vrot.lane.b32.xlu0 %v8183_v36, %s8586_s30  ;;  %15959 = vst [vmem:[#allocation109_spill] sm:$0xff] %v8625_v25  ;;  %v8637_v18 = vsel %vm2695_vm3, %v2770_v39, 0.0  ;;  %v8656_v39 = vsel %vm2698_vm4, %v2782_v13, 0.0 }
  0xeb   : > { %v8631_v38 = vsel %vm747_vm5, %v717_v9, %v719_v42  ;;  %v8635_v48 = vsel %vm747_vm5, %v718_v60, %v720_v52  ;;  %15960 = vst [vmem:[#allocation110_spill] sm:$0xff] %v8637_v18  ;;  %v2790_v9 = vrot.slane %v8604_v63, %v7588_v12  ;;  %v2786_v1 = vrot.slane %v8604_v63, %v7570_v6 }
  0xec   : > { %v631_v36 = vpop.permute.xlu1 %630  ;;  %v629_v5 = vpop.permute.xlu0 %628  ;;  %15961 = vst [vmem:[#allocation111_spill] sm:$0xff] %v8656_v39  ;;  %vm2702_vm9 = vcmp.lt.s32.totalorder %v7724_v21, %v8379_v49  ;;  %v8668_v51 = vsel %vm2697_vm6, %v2778_v50, 0.0  ;;  %vm2701_vm10 = vcmp.lt.s32.totalorder %v7727_v22, %v8379_v49  ;;  %vm2704_vm13 = vcmp.lt.s32.totalorder %v7734_v30, %v8379_v49 }
  0xed   : > { %v700_v60 = vsel %vm8364_vm11, %v629_v5, %v631_v36  ;;  %v701_v7 = vsel %vm8364_vm11, %v627_v37, %v629_v5  ;;  %15962 = vst [vmem:[#allocation112_spill] sm:$0xff] %v8668_v51  ;;  %v2798_v37 = vrot.slane %v8604_v63, %v7582_v10  ;;  %v8693_v5 = vsel %vm2700_vm7, %v2790_v9, 0.0  ;;  %v7081_v9 = vld [vmem:[%s7550_s14 + $0xc3] ss:$8 sm:$0xf0] }
  0xee   : > { %v721_v23 = vsel %vm712_vm12, %v702_v55, %v701_v7  ;;  %v722_v59 = vsel %vm712_vm12, %v701_v7, %v700_v60  ;;  %2153 = vrot.lane.b32.xlu1 %v8185_v57, %s8586_s30  ;;  %2151 = vrot.lane.b32.xlu0 %v8187_v15, %s8586_s30  ;;  %v2794_v15 = vrot.slane %v8604_v63, %v7576_v8  ;;  %v8698_v7 = vsel %vm2699_vm8, %v2786_v1, 0.0 }
  0xef   : > { %v756_v13 = vsel %vm747_vm5, %v719_v42, %v721_v23  ;;  %v757_v55 = vsel %vm747_vm5, %v720_v52, %v722_v59  ;;  %15963 = vst [vmem:[#allocation113_spill] sm:$0xff] %v8693_v5  ;;  %15964 = vst [vmem:[#allocation114_spill] sm:$0xff] %v8698_v7  ;;  %v2806_v45 = vrot.slane %v8604_v63, %v7596_v16  ;;  %v15966_v7 = vld [vmem:[#allocation77_spill] sm:$0xff] }
  0xf0   : > { %v8683_v57 = vsel %vm782_vm15, %v8577_v32, %v756_v13  ;;  %v8688_v42 = vsel %vm782_vm15, %v8582_v24, %v757_v55  ;;  %v635_v50 = vpop.permute.xlu1 %634  ;;  %v633_v52 = vpop.permute.xlu0 %632  ;;  %vm2703_vm14 = vcmp.lt.s32.totalorder %v7741_v31, %v8379_v49  ;;  %vm2706_vm0 = vcmp.lt.s32.totalorder %v7753_v41, %v8379_v49  ;;  %v15970_v41 = vld [vmem:[#allocation78_spill] sm:$0xff] }
  0xf1   : > { %v698_v58 = vsel %vm8364_vm11, %v633_v52, %v635_v50  ;;  %v699_v46 = vsel %vm8364_vm11, %v631_v36, %v633_v52  ;;  %v8721_v36 = vsel %vm2702_vm9, %v2798_v37, 0.0  ;;  %v2802_v52 = vrot.slane %v8604_v63, %v7624_v26 }
  0xf2   : > { %v723_v5 = vsel %vm712_vm12, %v700_v60, %v699_v46  ;;  %v724_v1 = vsel %vm712_vm12, %v699_v46, %v698_v58  ;;  %2157 = vrot.lane.b32.xlu1 %v15965_v4, %s8586_s30  ;;  %2155 = vrot.lane.b32.xlu0 %v15966_v7, %s8586_s30  ;;  %15967 = vst [vmem:[#allocation76_spill] sm:$0xff] %v8721_v36  ;;  %v8754_v39 = vsel %vm2701_vm10, %v2794_v15, 0.0  ;;  %v8759_v18 = vsel %vm2704_vm13, %v2806_v45, 0.0 }
  0xf3   : > { %v758_v51 = vsel %vm747_vm5, %v721_v23, %v723_v5  ;;  %v759_v60 = vsel %vm747_vm5, %v722_v59, %v724_v1  ;;  %v2814_v46 = vrot.slane %v8604_v63, %v7633_v29  ;;  %v8745_v59 = vor.u32 %v7081_v9, %v7080_v2  ;;  %15968 = vst [vmem:[#allocation77_spill] sm:$0xff] %v8754_v39  ;;  %v15986_v39 = vld [vmem:[#allocation84_spill] sm:$0xff] }
  0xf4   : > { %v8736_v4 = vsel %vm782_vm15, %v8631_v38, %v758_v51  ;;  %v8741_v23 = vsel %vm782_vm15, %v8635_v48, %v759_v60  ;;  %v639_v37 = vpop.permute.xlu1 %638  ;;  %v637_v7 = vpop.permute.xlu0 %636  ;;  %15969 = vst [vmem:[#allocation115_spill] sm:$0xff] %v8759_v18  ;;  %v8773_v15 = vsel %vm2703_vm14, %v2802_v52, 0.0  ;;  %v2810_v45 = vrot.slane %v8604_v63, %v7641_v33 }
  0xf5   : > { %v696_v21 = vsel %vm8364_vm11, %v637_v7, %v639_v37  ;;  %v697_v36 = vsel %vm8364_vm11, %v635_v50, %v637_v7  ;;  %v15971_v50 = vld [vmem:[#allocation58_spill] sm:$0xff]  ;;  %15972 = vst [vmem:[#allocation78_spill] sm:$0xff] %v8773_v15  ;;  %vm2707_vm4 = vcmp.lt.s32.totalorder %v7773_v54, %v8379_v49  ;;  %v15977_v15 = vld [vmem:[#allocation80_spill] sm:$0xff]  ;;  %vm2710_vm6 = vcmp.lt.s32.totalorder %v7786_v61, %v8379_v49 }
  0xf6   : > { %v725_v2 = vsel %vm712_vm12, %v698_v58, %v697_v36  ;;  %v726_v9 = vsel %vm712_vm12, %v697_v36, %v696_v21  ;;  %2161 = vrot.lane.b32.xlu1 %v8240_v47, %s8586_s30  ;;  %2159 = vrot.lane.b32.xlu0 %v15970_v41, %s8586_s30  ;;  %vm817_vm1 = vcmp.ne.s32.totalorder %v15971_v50, 0  ;;  %v8781_v47 = vsel %vm2706_vm0, %v2814_v46, 0.0  ;;  %v15974_v41 = vld [vmem:[#allocation45_spill] sm:$0xff] }
  0xf7   : > { %v760_v58 = vsel %vm747_vm5, %v723_v5, %v725_v2  ;;  %v761_v36 = vsel %vm747_vm5, %v724_v1, %v726_v9  ;;  %15973 = vst [vmem:[#allocation58_spill] sm:$0xff] %v8781_v47  ;;  %vm2705_vm2 = vcmp.lt.s32.totalorder %v15974_v41, %v8379_v49  ;;  %v2822_v1 = vrot.slane %v8745_v59, %v7588_v12  ;;  %v15976_v47 = vld [vmem:[#allocation79_spill] sm:$0xff] }
  0xf8   : > { %v8787_v52 = vsel %vm782_vm15, %v756_v13, %v760_v58  ;;  %v8791_v63 = vsel %vm782_vm15, %v757_v55, %v761_v36  ;;  %v643_v7 = vpop.permute.xlu1 %642  ;;  %v641_v5 = vpop.permute.xlu0 %640  ;;  %v2818_v46 = vrot.slane %v8745_v59, %v7570_v6  ;;  %v15975_v13 = vld [vmem:[#allocation46_spill] sm:$0xff]  ;;  %vm2709_vm7 = vcmp.lt.s32.totalorder %v15924_v62, %v8379_v49 }
  0xf9   : > { %v694_v31 = vsel %vm8364_vm11, %v641_v5, %v643_v7  ;;  %v695_v30 = vsel %vm8364_vm11, %v639_v37, %v641_v5  ;;  %vm2708_vm3 = vcmp.lt.s32.totalorder %v15975_v13, %v8379_v49  ;;  %v8817_v37 = vsel %vm2705_vm2, %v2810_v45, 0.0  ;;  %v7091_v13 = vld [vmem:[%s7550_s14 + $0x4] ss:$8 sm:$0xf0] }
  0xfa   : > { %v727_v55 = vsel %vm712_vm12, %v696_v21, %v695_v30  ;;  %v728_v22 = vsel %vm712_vm12, %v695_v30, %v694_v31  ;;  %2165 = vrot.lane.b32.xlu1 %v15976_v47, %s8586_s30  ;;  %2163 = vrot.lane.b32.xlu0 %v15977_v15, %s8586_s30  ;;  %15978 = vst [vmem:[#allocation79_spill] sm:$0xff] %v8817_v37  ;;  %v8855_v41 = vsel %vm2707_vm4, %v2818_v46, 0.0  ;;  %v15982_v37 = vld [vmem:[#allocation82_spill] sm:$0xff] }
  0xfb   : > { %v2830_v5 = vrot.slane %v8745_v59, %v7582_v10  ;;  %v762_v21 = vsel %vm747_vm5, %v725_v2, %v727_v55  ;;  %v763_v18 = vsel %vm747_vm5, %v726_v9, %v728_v22  ;;  %v2826_v30 = vrot.slane %v8745_v59, %v7576_v8  ;;  %15980 = vst [vmem:[#allocation116_spill] sm:$0xff] %v8855_v41  ;;  %v15985_v41 = vld [vmem:[#allocation83_spill] sm:$0xff] }
  0xfc   : > { %v8831_v15 = vsel %vm782_vm15, %v758_v51, %v762_v21  ;;  %v8835_v45 = vsel %vm782_vm15, %v759_v60, %v763_v18  ;;  %v647_v2 = vpop.permute.xlu1 %646  ;;  %v645_v47 = vpop.permute.xlu0 %644  ;;  %v8840_v9 = vsel %vm2708_vm3, %v2822_v1, 0.0  ;;  %v2838_v46 = vrot.slane %v8745_v59, %v7596_v16 }
  0xfd   : > { %15979 = vst [vmem:[#allocation80_spill] sm:$0xff] %v8840_v9  ;;  %v692_v51 = vsel %vm8364_vm11, %v645_v47, %v647_v2  ;;  %v693_v60 = vsel %vm8364_vm11, %v643_v7, %v645_v47  ;;  %v15981_v9 = vld [vmem:[#allocation81_spill] sm:$0xff]  ;;  %v8869_v7 = vsel %vm2710_vm6, %v2830_v5, 0.0  ;;  %vm2712_vm8 = vcmp.lt.s32.totalorder %v7803_v14, %v8379_v49 }
  0xfe   : > { %v729_v1 = vsel %vm712_vm12, %v694_v31, %v693_v60  ;;  %v730_v62 = vsel %vm712_vm12, %v693_v60, %v692_v51  ;;  %2169 = vrot.lane.b32.xlu1 %v15981_v9, %s8586_s30  ;;  %2167 = vrot.lane.b32.xlu0 %v15982_v37, %s8586_s30  ;;  %15983 = vst [vmem:[#allocation81_spill] sm:$0xff] %v8869_v7  ;;  %v8877_v60 = vsel %vm2709_vm7, %v2826_v30, 0.0  ;;  %v7090_v30 = vld [vmem:[%s7550_s14 + $0x4] ss:$8 sm:$0xf]  ;;  %v8922_v25 = vsel %vm2712_vm8, %v2838_v46, 0.0 }
  0xff   : > { %v764_v31 = vsel %vm747_vm5, %v727_v55, %v729_v1  ;;  %v765_v47 = vsel %vm747_vm5, %v728_v22, %v730_v62  ;;  %15984 = vst [vmem:[#allocation82_spill] sm:$0xff] %v8877_v60  ;;  %vm2711_vm9 = vcmp.lt.s32.totalorder %v15925_v27, %v8379_v49  ;;  %v2834_v22 = vrot.slane %v8745_v59, %v7624_v26  ;;  %v15995_v27 = vld [vmem:[#allocation66_spill] sm:$0xff] }
 0x100   : > { %v8883_v37 = vsel %vm782_vm15, %v760_v58, %v764_v31  ;;  %v8887_v5 = vsel %vm782_vm15, %v761_v36, %v765_v47  ;;  %v651_v9 = vpop.permute.xlu1 %650  ;;  %v649_v55 = vpop.permute.xlu0 %648  ;;  %15987 = vst [vmem:[#allocation83_spill] sm:$0xff] %v8922_v25  ;;  %v2846_v40 = vrot.slane %v8745_v59, %v7633_v29  ;;  %vm2714_vm10 = vcmp.lt.s32.totalorder %v7822_v34, %v8379_v49  ;;  %v15990_v25 = vld [vmem:[#allocation85_spill] sm:$0xff] }
 0x101   : > { %v8899_v58 = vsel %vm817_vm1, %v8683_v57, %v8883_v37  ;;  %v8905_v36 = vsel %vm817_vm1, %v8688_v42, %v8887_v5  ;;  %v690_v61 = vsel %vm8364_vm11, %v649_v55, %v651_v9  ;;  %v691_v54 = vsel %vm8364_vm11, %v647_v2, %v649_v55  ;;  %v15994_v34 = vld [vmem:[#allocation65_spill] sm:$0xff] }
 0x102   : > { %v731_v60 = vsel %vm712_vm12, %v692_v51, %v691_v54  ;;  %v732_v7 = vsel %vm712_vm12, %v691_v54, %v690_v61  ;;  %2173 = vrot.lane.b32.xlu1 %v15985_v41, %s8586_s30  ;;  %2171 = vrot.lane.b32.xlu0 %v15986_v39, %s8586_s30  ;;  %v8932_v54 = vor.u32 %v7091_v13, %v7090_v30 }
 0x103   : > { %v766_v2 = vsel %vm747_vm5, %v729_v1, %v731_v60  ;;  %v767_v51 = vsel %vm747_vm5, %v730_v62, %v732_v7  ;;  %vm2713_vm13 = vcmp.lt.s32.totalorder %v7825_v35, %v8379_v49  ;;  %v8945_v62 = vstv %s8846_s7  ;;  %s3048_s7 = sand.u32 2, %s11043_s9 }
 0x104   : > { %v8936_v39 = vsel %vm782_vm15, %v762_v21, %v766_v2  ;;  %v8940_v41 = vsel %vm782_vm15, %v763_v18, %v767_v51  ;;  %v655_v46 = vpop.permute.xlu1 %654  ;;  %v653_v1 = vpop.permute.xlu0 %652  ;;  %vm3452_vm14 = vcmp.lt.s32.totalorder %v7585_v11, %v8945_v62  ;;  %vm3451_vm0 = vcmp.lt.s32.totalorder %v7565_v3, %v8945_v62  ;;  %v16005_v3 = vld [vmem:[#allocation90_spill] sm:$0xff] }
 0x105   : > { %v8951_v13 = vsel %vm817_vm1, %v8736_v4, %v8936_v39  ;;  %v8957_v21 = vsel %vm817_vm1, %v8741_v23, %v8940_v41  ;;  %v688_v18 = vsel %vm8364_vm11, %v653_v1, %v655_v46  ;;  %v689_v55 = vsel %vm8364_vm11, %v651_v9, %v653_v1 }
 0x106   : > { %15988 = vst [vmem:[#allocation84_spill] sm:$0xff] %v8951_v13  ;;  %15989 = vst [vmem:[#allocation117_spill] sm:$0xff] %v8957_v21  ;;  %v733_v30 = vsel %vm712_vm12, %v690_v61, %v689_v55  ;;  %v734_v14 = vsel %vm712_vm12, %v689_v55, %v688_v18  ;;  %2177 = vrot.lane.b32.xlu1 %v15990_v25, %s8586_s30  ;;  %2175 = vrot.lane.b32.xlu0 %v15991_v44, %s8586_s30  ;;  %v8974_v21 = vsel %vm2711_vm9, %v2834_v22, 0.0 }
 0x107   : > { %15992 = vst [vmem:[#allocation85_spill] sm:$0xff] %v8974_v21  ;;  %v2842_v13 = vrot.slane %v8745_v59, %v7641_v33  ;;  %v768_v9 = vsel %vm747_vm5, %v731_v60, %v733_v30  ;;  %v769_v61 = vsel %vm747_vm5, %v732_v7, %v734_v14  ;;  %v8985_v44 = vsel %vm2714_vm10, %v2846_v40, 0.0 }
 0x108   : > { %15993 = vst [vmem:[#allocation86_spill] sm:$0xff] %v8985_v44  ;;  %v3494_v25 = vrot.slane %v8932_v54, %v7588_v12  ;;  %v8991_v22 = vsel %vm782_vm15, %v764_v31, %v768_v9  ;;  %v8995_v59 = vsel %vm782_vm15, %v765_v47, %v769_v61  ;;  %v659_v60 = vpop.permute.xlu1 %658  ;;  %v657_v1 = vpop.permute.xlu0 %656  ;;  %v3490_v21 = vrot.slane %v8932_v54, %v7570_v6 }
 0x109   : > { %v9005_v40 = vsel %vm817_vm1, %v8787_v52, %v8991_v22  ;;  %v9011_v7 = vsel %vm817_vm1, %v8791_v63, %v8995_v59  ;;  %v686_v31 = vsel %vm8364_vm11, %v657_v1, %v659_v60  ;;  %v687_v47 = vsel %vm8364_vm11, %v655_v46, %v657_v1 }
 0x10a   : > { %v735_v55 = vsel %vm712_vm12, %v688_v18, %v687_v47  ;;  %v736_v11 = vsel %vm712_vm12, %v687_v47, %v686_v31  ;;  %2181 = vrot.lane.b32.xlu1 %v15994_v34, %s8586_s30  ;;  %2179 = vrot.lane.b32.xlu0 %v15995_v27, %s8586_s30  ;;  %v9028_v44 = vsel %vm2713_vm13, %v2842_v13, 0.0  ;;  %v9036_v1 = vsel %vm3452_vm14, %v3494_v25, 0.0  ;;  %v15998_v47 = vld [vmem:[#allocation18_spill] sm:$0xff] }
 0x10b   : > { %15996 = vst [vmem:[#allocation65_spill] sm:$0xff] %v9028_v44  ;;  %v770_v46 = vsel %vm747_vm5, %v733_v30, %v735_v55  ;;  %v771_v18 = vsel %vm747_vm5, %v734_v14, %v736_v11  ;;  %15997 = vst [vmem:[#allocation66_spill] sm:$0xff] %v9036_v1  ;;  %v3502_v34 = vrot.slane %v8932_v54, %v7582_v10  ;;  %v16000_v1 = vld [vmem:[#allocation87_spill] sm:$0xff]  ;;  %v16001_v44 = vld [vmem:[#allocation88_spill] sm:$0xff]  ;;  %v9079_v10 = vsel %vm3451_vm0, %v3490_v21, 0.0 }
 0x10c   : > { %v9042_v27 = vsel %vm782_vm15, %v766_v2, %v770_v46  ;;  %v9046_v49 = vsel %vm782_vm15, %v767_v51, %v771_v18  ;;  %v663_v13 = vpop.permute.xlu1 %662  ;;  %v661_v30 = vpop.permute.xlu0 %660  ;;  %vm3454_vm2 = vcmp.lt.s32.totalorder %v15998_v47, %v8945_v62  ;;  %vm3453_vm3 = vcmp.lt.s32.totalorder %v15937_v43, %v8945_v62  ;;  %16002 = vst [vmem:[#allocation87_spill] sm:$0xff] %v9079_v10  ;;  %v7093_v10 = vld [vmem:[%s7550_s14 + $0x44] ss:$8 sm:$0xf0] }
 0x10d   : > { %v9056_v14 = vsel %vm817_vm1, %v8831_v15, %v9042_v27  ;;  %v9062_v2 = vsel %vm817_vm1, %v8835_v45, %v9046_v49  ;;  %v684_v51 = vsel %vm8364_vm11, %v661_v30, %v663_v13  ;;  %v685_v25 = vsel %vm8364_vm11, %v659_v60, %v661_v30  ;;  %v16010_v43 = vld [vmem:[#allocation92_spill] sm:$0xff] }
 0x10e   : > { %15999 = vst [vmem:[#allocation118_spill] sm:$0xff] %v9062_v2  ;;  %v737_v47 = vsel %vm712_vm12, %v686_v31, %v685_v25  ;;  %v738_v35 = vsel %vm712_vm12, %v685_v25, %v684_v51  ;;  %2185 = vrot.lane.b32.xlu1 %v16000_v1, %s8586_s30  ;;  %2183 = vrot.lane.b32.xlu0 %v16001_v44, %s8586_s30  ;;  %v9087_v30 = vsel %vm3454_vm2, %v3502_v34, 0.0 }
 0x10f   : > { %v3498_v2 = vrot.slane %v8932_v54, %v7576_v8  ;;  %v772_v60 = vsel %vm747_vm5, %v735_v55, %v737_v47  ;;  %v773_v31 = vsel %vm747_vm5, %v736_v11, %v738_v35  ;;  %16003 = vst [vmem:[#allocation88_spill] sm:$0xff] %v9087_v30  ;;  %v3510_v44 = vrot.slane %v8932_v54, %v7596_v16  ;;  %v7092_v30 = vld [vmem:[%s7550_s14 + $0x44] ss:$8 sm:$0xf] }
 0x110   : > { %v9093_v21 = vsel %vm782_vm15, %v768_v9, %v772_v60  ;;  %v9097_v1 = vsel %vm782_vm15, %v769_v61, %v773_v31  ;;  %v667_v25 = vpop.permute.xlu1 %666  ;;  %v665_v55 = vpop.permute.xlu0 %664  ;;  %vm3456_vm4 = vcmp.lt.s32.totalorder %v15942_v0, %v8945_v62  ;;  %vm3455_vm6 = vcmp.lt.s32.totalorder %v7604_v20, %v8945_v62  ;;  %v16004_v8 = vld [vmem:[#allocation89_spill] sm:$0xff]  ;;  %v16014_v20 = vld [vmem:[#allocation95_spill] sm:$0xff] }
 0x111   : > { %v9107_v11 = vsel %vm817_vm1, %v8883_v37, %v9093_v21  ;;  %v9113_v9 = vsel %vm817_vm1, %v8887_v5, %v9097_v1  ;;  %v682_v61 = vsel %vm8364_vm11, %v665_v55, %v667_v25  ;;  %v683_v34 = vsel %vm8364_vm11, %v663_v13, %v665_v55 }
 0x112   : > { %v739_v16 = vsel %vm712_vm12, %v684_v51, %v683_v34  ;;  %v740_v37 = vsel %vm712_vm12, %v683_v34, %v682_v61  ;;  %2189 = vrot.lane.b32.xlu1 %v16004_v8, %s8586_s30  ;;  %2187 = vrot.lane.b32.xlu0 %v16005_v3, %s8586_s30  ;;  %v9132_v5 = vsel %vm3453_vm3, %v3498_v2, 0.0  ;;  %v3506_v13 = vrot.slane %v8932_v54, %v7624_v26 }
 0x113   : > { %16006 = vst [vmem:[#allocation89_spill] sm:$0xff] %v9132_v5  ;;  %v9138_v55 = vsel %vm747_vm5, %v737_v47, %v739_v16  ;;  %v9142_v51 = vsel %vm747_vm5, %v738_v35, %v740_v37  ;;  %v9147_v3 = vsel %vm3456_vm4, %v3510_v44, 0.0  ;;  %v3518_v8 = vrot.slane %v8932_v54, %v7633_v29 }
 0x114   : > { %16007 = vst [vmem:[#allocation90_spill] sm:$0xff] %v9147_v3  ;;  %v9154_v2 = vsel %vm782_vm15, %v770_v46, %v9138_v55  ;;  %v9159_v47 = vsel %vm782_vm15, %v771_v18, %v9142_v51  ;;  %v671_v35 = vpop.permute.xlu1 %670  ;;  %v669_v34 = vpop.permute.xlu0 %668  ;;  %vm3458_vm7 = vcmp.lt.s32.totalorder %v7630_v28, %v8945_v62  ;;  %v9163_v44 = vor.u32 %v7093_v10, %v7092_v30  ;;  %v16018_v3 = vld [vmem:[#allocation93_spill] sm:$0xff] }
 0x115   : > { %v9169_v0 = vsel %vm817_vm1, %v8936_v39, %v9154_v2  ;;  %v9175_v46 = vsel %vm817_vm1, %v8940_v41, %v9159_v47  ;;  %v680_v18 = vsel %vm8364_vm11, %v669_v34, %v671_v35  ;;  %v681_v28 = vsel %vm8364_vm11, %v667_v25, %v669_v34  ;;  %v16009_v39 = vld [vmem:[#allocation91_spill] sm:$0xff] }
 0x116   : > { %16008 = vst [vmem:[#allocation119_spill] sm:$0xff] %v9163_v44  ;;  %v741_v10 = vsel %vm712_vm12, %v682_v61, %v681_v28  ;;  %v742_v30 = vsel %vm712_vm12, %v681_v28, %v680_v18  ;;  %2193 = vrot.lane.b32.xlu1 %v16009_v39, %s8586_s30  ;;  %2191 = vrot.lane.b32.xlu0 %v16010_v43, %s8586_s30  ;;  %v9192_v41 = vsel %vm3455_vm6, %v3506_v13, 0.0  ;;  %v9200_v34 = vsel %vm3458_vm7, %v3518_v8, 0.0  ;;  %v16013_v28 = vld [vmem:[#allocation28_spill] sm:$0xff] }
 0x117   : > { %16011 = vst [vmem:[#allocation91_spill] sm:$0xff] %v9192_v41  ;;  %v3514_v29 = vrot.slane %v8932_v54, %v7641_v33  ;;  %v776_v25 = vsel %vm747_vm5, %v739_v16, %v741_v10  ;;  %v777_v61 = vsel %vm747_vm5, %v740_v37, %v742_v30  ;;  %16012 = vst [vmem:[#allocation92_spill] sm:$0xff] %v9200_v34  ;;  %v16015_v33 = vld [vmem:[#allocation59_spill] sm:$0xff]  ;;  %v16016_v37 = vld [vmem:[#allocation101_spill] sm:$0xff] }
 0x118   : > { %vm3457_vm8 = vcmp.lt.s32.totalorder %v16013_v28, %v8945_v62  ;;  %v811_v43 = vsel %vm782_vm15, %v772_v60, %v776_v25  ;;  %v812_v13 = vsel %vm782_vm15, %v773_v31, %v777_v61  ;;  %v675_v54 = vpop.permute.xlu1 %674  ;;  %v673_v39 = vpop.permute.xlu0 %672  ;;  %vm852_vm9 = vcmp.ne.s32.totalorder %v16015_v33, 0  ;;  %v16017_v41 = vld [vmem:[#allocation54_spill] sm:$0xff]  ;;  %v16030_v28 = vld [vmem:[#allocation99_spill] sm:$0xff] }
 0x119   : > { %v9215_v8 = vsel %vm817_vm1, %v8991_v22, %v811_v43  ;;  %v9220_v60 = vsel %vm817_vm1, %v8995_v59, %v812_v13  ;;  %v709_v31 = vsel %vm8364_vm11, %v675_v54, %v16014_v20  ;;  %v678_v16 = vsel %vm8364_vm11, %v673_v39, %v675_v54  ;;  %v16020_v54 = vld [vmem:[#allocation103_spill] sm:$0xff] }
 0x11a   : > { %v714_v34 = vsel %vm712_vm12, %v709_v31, %v16016_v37  ;;  %v679_v22 = vsel %vm8364_vm11, %v671_v35, %v673_v39  ;;  %v713_v59 = vsel %vm712_vm12, %v678_v16, %v709_v31  ;;  %2197 = vrot.lane.b32.xlu1 %v16017_v41, %s8586_s30  ;;  %2195 = vrot.lane.b32.xlu0 %v16018_v3, %s8586_s30  ;;  %v9242_v20 = vsel %vm3457_vm8, %v3514_v29, 0.0  ;;  %v16021_v39 = vld [vmem:[#allocation102_spill] sm:$0xff] }
 0x11b   : > { %16019 = vst [vmem:[#allocation95_spill] sm:$0xff] %v9242_v20  ;;  %v751_v37 = vsel %vm747_vm5, %v714_v34, %v16020_v54  ;;  %v743_v56 = vsel %vm712_vm12, %v680_v18, %v679_v22  ;;  %v744_v35 = vsel %vm712_vm12, %v679_v22, %v678_v16  ;;  %v750_v41 = vsel %vm747_vm5, %v713_v59, %v16021_v39 }
 0x11c   : > { %v790_v29 = vsel %vm782_vm15, %v751_v37, %v8635_v48  ;;  %v748_v3 = vsel %vm747_vm5, %v743_v56, %v713_v59  ;;  %v749_v31 = vsel %vm747_vm5, %v744_v35, %v714_v34  ;;  %v778_v18 = vsel %vm747_vm5, %v741_v10, %v743_v56  ;;  %v9263_v17 = vpop.permute.xlu1 %1381  ;;  %v9265_v16 = vpop.permute.xlu0 %1379  ;;  %v16023_v56 = vld [vmem:[#allocation55_spill] sm:$0xff] }
 0x11d   : > { %v9274_v48 = vsel %vm817_vm1, %v790_v29, %v8835_v45  ;;  %v779_v22 = vsel %vm747_vm5, %v742_v30, %v744_v35  ;;  %v783_v34 = vsel %vm782_vm15, %v776_v25, %v748_v3  ;;  %v784_v10 = vsel %vm782_vm15, %v777_v61, %v749_v31  ;;  %v16022_v30 = vld [vmem:[#allocation94_spill] sm:$0xff] }
 0x11e   : > { %v785_v59 = vsel %vm782_vm15, %v778_v18, %v750_v41  ;;  %v786_v54 = vsel %vm782_vm15, %v779_v22, %v751_v37  ;;  %v787_v45 = vsel %vm782_vm15, %v748_v3, %v8577_v32  ;;  %v788_v53 = vsel %vm782_vm15, %v749_v31, %v8582_v24  ;;  %2201 = vrot.lane.b32.xlu1 %v16022_v30, %s8586_s30  ;;  %v16025_v3 = vld [vmem:[#allocation97_spill] sm:$0xff] }
 0x11f   : > { %v789_v25 = vsel %vm782_vm15, %v750_v41, %v8631_v38  ;;  %v813_v61 = vsel %vm782_vm15, %v9138_v55, %v778_v18  ;;  %v814_v37 = vsel %vm782_vm15, %v9142_v51, %v779_v22  ;;  %v818_v32 = vsel %vm817_vm1, %v9093_v21, %v783_v34  ;;  %2199 = vrot.lane.b32.xlu0 %v16023_v56, %s8586_s30 }
 0x120   : > { %v819_v24 = vsel %vm817_vm1, %v9097_v1, %v784_v10  ;;  %v820_v38 = vsel %vm817_vm1, %v9154_v2, %v785_v59  ;;  %v821_v19 = vsel %vm817_vm1, %v9159_v47, %v786_v54  ;;  %v822_v55 = vsel %vm817_vm1, %v811_v43, %v787_v45  ;;  %v9319_v21 = vpop.permute.xlu1 %1385  ;;  %v9321_v51 = vpop.permute.xlu0 %1383 }
 0x121   : > { %v823_v35 = vsel %vm817_vm1, %v812_v13, %v788_v53  ;;  %v824_v1 = vsel %vm817_vm1, %v813_v61, %v789_v25  ;;  %v825_v2 = vsel %vm817_vm1, %v814_v37, %v790_v29  ;;  %v826_v47 = vsel %vm817_vm1, %v783_v34, %v8683_v57  ;;  %v16024_v29 = vld [vmem:[#allocation96_spill] sm:$0xff] }
 0x122   : > { %v827_v43 = vsel %vm817_vm1, %v784_v10, %v8688_v42  ;;  %v828_v39 = vsel %vm817_vm1, %v785_v59, %v8736_v4  ;;  %v829_v13 = vsel %vm817_vm1, %v786_v54, %v8741_v23  ;;  %v830_v41 = vsel %vm817_vm1, %v787_v45, %v8787_v52  ;;  %2205 = vrot.lane.b32.xlu1 %v16024_v29, %s8586_s30  ;;  %v16028_v59 = vld [vmem:[#allocation118_spill] sm:$0xff] }
 0x123   : > { %v831_v57 = vsel %vm817_vm1, %v788_v53, %v8791_v63  ;;  %v832_v42 = vsel %vm817_vm1, %v789_v25, %v8831_v15  ;;  %v848_v4 = vsel %vm817_vm1, %v9042_v27, %v813_v61  ;;  %v849_v23 = vsel %vm817_vm1, %v9046_v49, %v814_v37  ;;  %2203 = vrot.lane.b32.xlu0 %v16025_v3, %s8586_s30  ;;  %v16026_v15 = vld [vmem:[#allocation84_spill] sm:$0xff]  ;;  %v16027_v27 = vld [vmem:[#allocation117_spill] sm:$0xff]  ;;  %v16029_v61 = vld [vmem:[#allocation98_spill] sm:$0xff] }
 0x124   : > { %v853_v52 = vsel %vm852_vm9, %v8899_v58, %v818_v32  ;;  %v854_v63 = vsel %vm852_vm9, %v8905_v36, %v819_v24  ;;  %v855_v31 = vsel %vm852_vm9, %v16026_v15, %v820_v38  ;;  %v856_v50 = vsel %vm852_vm9, %v16027_v27, %v821_v19  ;;  %v9372_v49 = vpop.permute.xlu1 %1389  ;;  %v9374_v18 = vpop.permute.xlu0 %1387 }
 0x125   : > { %v857_v22 = vsel %vm852_vm9, %v9005_v40, %v822_v55  ;;  %v858_v34 = vsel %vm852_vm9, %v9011_v7, %v823_v35  ;;  %v859_v10 = vsel %vm852_vm9, %v9056_v14, %v824_v1  ;;  %v860_v54 = vsel %vm852_vm9, %v16028_v59, %v825_v2 }
 0x126   : > { %v861_v45 = vsel %vm852_vm9, %v9107_v11, %v826_v47  ;;  %v862_v53 = vsel %vm852_vm9, %v9113_v9, %v827_v43  ;;  %v863_v30 = vsel %vm852_vm9, %v9169_v0, %v828_v39  ;;  %v864_v25 = vsel %vm852_vm9, %v9175_v46, %v829_v13  ;;  %2209 = vrot.lane.b32.xlu1 %v16029_v61, %s8586_s30 }
 0x127   : > { %v865_v37 = vsel %vm852_vm9, %v9215_v8, %v830_v41  ;;  %v866_v56 = vsel %vm852_vm9, %v9220_v60, %v831_v57  ;;  %v867_v29 = vsel %vm852_vm9, %v848_v4, %v832_v42  ;;  %v868_v3 = vsel %vm852_vm9, %v849_v23, %v9274_v48  ;;  %2207 = vrot.lane.b32.xlu0 %v16030_v28, %s8586_s30 }
 0x128   : > { %v869_v61 = vsel %vm852_vm9, %v818_v32, %v8899_v58  ;;  %v870_v20 = vsel %vm852_vm9, %v819_v24, %v8905_v36  ;;  %v871_v5 = vsel %vm852_vm9, %v820_v38, %v16026_v15  ;;  %v872_v28 = vsel %vm852_vm9, %v821_v19, %v16027_v27  ;;  %v9432_v26 = vpop.permute.xlu1 %1393  ;;  %v9434_v6 = vpop.permute.xlu0 %1391  ;;  %v16031_v19 = vld [vmem:[#allocation100_spill] sm:$0xff] }
 0x129   : > { %v873_v58 = vsel %vm852_vm9, %v822_v55, %v9005_v40  ;;  %v874_v36 = vsel %vm852_vm9, %v823_v35, %v9011_v7  ;;  %v875_v32 = vsel %vm852_vm9, %v824_v1, %v9056_v14  ;;  %v876_v24 = vsel %vm852_vm9, %v825_v2, %v16028_v59  ;;  %v16033_v35 = vld [vmem:[#allocation14_spill] sm:$0xff] }
 0x12a   : > { %v9451_v38 = vsel %vm852_vm9, %v826_v47, %v9107_v11  ;;  %v9456_v40 = vsel %vm852_vm9, %v827_v43, %v9113_v9  ;;  %v9461_v7 = vsel %vm852_vm9, %v828_v39, %v9169_v0  ;;  %v9466_v14 = vsel %vm852_vm9, %v829_v13, %v9175_v46  ;;  %2917 = vrot.lane.b32.xlu1 %v16031_v19, %s9418_s17 }
 0x12b   : > { %v9473_v11 = vsel %vm852_vm9, %v830_v41, %v9215_v8  ;;  %v9478_v9 = vsel %vm852_vm9, %v831_v57, %v9220_v60  ;;  %v9482_v0 = vsel %vm852_vm9, %v832_v42, %v848_v4  ;;  %v9487_v46 = vsel %vm852_vm9, %v9274_v48, %v849_v23  ;;  %v16036_v8 = vld [vmem:[#allocation67_spill] sm:$0xff]  ;;  %v16037_v42 = vld [vmem:[#allocation57_spill] sm:$0xff] }
 0x12c   : > { %v16032_v55 = vstv %s7882_s11  ;;  %2915 = vrot.lane.b32.xlu0 %v16036_v8, %s9418_s17  ;;  %v917_v60 = vcombine.low %v853_v52, %v854_v63  ;;  %v918_v2 = vcombine.low %v855_v31, %v856_v50  ;;  %v919_v47 = vcombine.low %v857_v22, %v858_v34  ;;  %v9498_v39 = vpop.permute.xlu1 %1397  ;;  %v9500_v13 = vpop.permute.xlu0 %1395  ;;  %v16038_v63 = vld [vmem:[#allocation60_spill] sm:$0xff]  ;;  %s9550_s11 = scalar_lea.vmem [#allocation9], %s7025_s8  ;;  %s10053_s8 = sld [smem:[#allocation2 + %s3432_s19]] }
 0x12d   : > { %vm9492_vm11 = vcmp.lt.s32.totalorder %v16033_v35, %v16032_v55  ;;  %v920_v43 = vcombine.low %v859_v10, %v860_v54  ;;  %v966_v33 = vcombine.low %v861_v45, %v862_v53  ;;  %v967_v48 = vcombine.low %v863_v30, %v864_v25  ;;  %v16039_v31 = vld [vmem:[#allocation68_spill] sm:$0xff]  ;;  %v16040_v10 = vld [vmem:[#allocation69_spill] sm:$0xff]  ;;  %s4200_s19 = sadd.s32 5, %s7557_s16 }
 0x12e   : > { %v968_v41 = vcombine.low %v865_v37, %v866_v56  ;;  %v969_v57 = vcombine.low %v867_v29, %v868_v3  ;;  %v927_v4 = vrot.slane %v917_v60, %v16037_v42  ;;  %v934_v23 = vrot.slane %v918_v2, %v16037_v42  ;;  %2921 = vrot.lane.b32.xlu1 %v16039_v31, %s9418_s17  ;;  %v16041_v30 = vld [vmem:[#allocation61_spill] sm:$0xff]  ;;  %v16046_v31 = vld [vmem:[#allocation106_spill] sm:$0xff]  ;;  %s11092_s29 = sld [smem:[#allocation6 + %s4200_s19]] }
 0x12f   : > { %v941_v15 = vrot.slane %v919_v47, %v16037_v42  ;;  %v948_v52 = vrot.slane %v920_v43, %v16037_v42  ;;  %vm1479_vm12 = vcmp.ne.s32.totalorder %v16038_v63, 0  ;;  %v976_v27 = vrot.slane %v966_v33, %v16037_v42  ;;  %v16044_v33 = vld [vmem:[#allocation62_spill] sm:$0xff]  ;;  %s11125_s10 = sld [smem:[#allocation2 + %s4200_s19]] }
 0x130   : > { %v983_v50 = vrot.slane %v967_v48, %v16037_v42  ;;  %v990_v22 = vrot.slane %v968_v41, %v16037_v42  ;;  %v997_v34 = vrot.slane %v969_v57, %v16037_v42  ;;  %2919 = vrot.lane.b32.xlu0 %v16040_v10, %s9418_s17  ;;  %v949_v59 = vcombine.low %v927_v4, %v934_v23  ;;  %v9516_v25 = vpop.permute.xlu1 %1401  ;;  %v9518_v37 = vpop.permute.xlu0 %1399 }
 0x131   : > { %v950_v54 = vcombine.low %v941_v15, %v948_v52  ;;  %v1015_v45 = vcombine.low %v869_v61, %v870_v20  ;;  %v1016_v53 = vcombine.low %v871_v5, %v872_v28  ;;  %vm1514_vm5 = vcmp.ne.s32.totalorder %v16041_v30, 0  ;;  %v16042_v5 = vld [vmem:[#allocation70_spill] sm:$0xff] }
 0x132   : > { %v998_v56 = vcombine.low %v976_v27, %v983_v50  ;;  %v999_v29 = vcombine.low %v990_v22, %v997_v34  ;;  %v1017_v3 = vcombine.low %v873_v58, %v874_v36  ;;  %v1018_v19 = vcombine.low %v875_v32, %v876_v24  ;;  %2925 = vrot.lane.b32.xlu1 %v16042_v5, %s9418_s17  ;;  %v16043_v58 = vld [vmem:[#allocation104_spill] sm:$0xff]  ;;  %s3680_s12 = sand.u32 4095, %s10053_s8   ;;  %s4968_s8 = sadd.s32 6, %s7557_s16 }
 0x133   : > { %v957_v55 = vrot.slane %v949_v59, %v16037_v42  ;;  %v964_v8 = vrot.slane %v950_v54, %v16037_v42  ;;  %v1025_v60 = vrot.slane %v1015_v45, %v16037_v42  ;;  %v1032_v20 = vrot.slane %v1016_v53, %v16037_v42  ;;  %s10200_s18 = sand.u32 127, %s3680_s12  }
 0x134   : > { %v1006_v61 = vrot.slane %v998_v56, %v16037_v42  ;;  %v1013_v28 = vrot.slane %v999_v29, %v16037_v42  ;;  %v1039_v2 = vrot.slane %v1017_v3, %v16037_v42  ;;  %v1046_v47 = vrot.slane %v1018_v19, %v16037_v42  ;;  %2923 = vrot.lane.b32.xlu0 %v16043_v58, %s9418_s17  ;;  %v9537_v48 = vpop.permute.xlu1 %1405  ;;  %v9539_v41 = vpop.permute.xlu0 %1403  ;;  %v16047_v29 = vld [vmem:[#allocation107_spill] sm:$0xff] }
 0x135   : > { %v965_v36 = vcombine.low %v957_v55, %v964_v8  ;;  %v1047_v32 = vcombine.low %v1025_v60, %v1032_v20  ;;  %v1064_v24 = vcombine.low %v9451_v38, %v9456_v40  ;;  %v1065_v43 = vcombine.low %v9461_v7, %v9466_v14  ;;  %v16048_v60 = vld [vmem:[#allocation56_spill] sm:$0xff] }
 0x136   : > { %vm1549_vm15 = vcmp.ne.s32.totalorder %v16044_v33, 0  ;;  %v1014_v57 = vcombine.low %v1006_v61, %v1013_v28  ;;  %v1048_v4 = vcombine.low %v1039_v2, %v1046_v47  ;;  %v1066_v23 = vcombine.low %v9473_v11, %v9478_v9  ;;  %v16045_v11 = vld [vmem:[#allocation105_spill] sm:$0xff] }
 0x137   : > { %v1067_v15 = vcombine.low %v9482_v0, %v9487_v46  ;;  %v1055_v38 = vrot.slane %v1047_v32, %v16037_v42  ;;  %v1074_v40 = vrot.slane %v1064_v24, %v16037_v42  ;;  %v1081_v7 = vrot.slane %v1065_v43, %v16037_v42  ;;  %1117 = vst [vmem:[%s9550_s11] ss:$8 sm:$0xf] %v965_v36  ;;  %v16049_v43 = vld [vmem:[#allocation63_spill] sm:$0xff] }
 0x138   : > { %1118 = vst [vmem:[%s9550_s11] ss:$8 sm:$0xf0] %v965_v36  ;;  %v9558_v14 = vsel %vm9492_vm11, %v9265_v16, %v9263_v17  ;;  %2929 = vrot.lane.b32.xlu1 %v16045_v11, %s9418_s17  ;;  %v1062_v9 = vrot.slane %v1048_v4, %v16037_v42  ;;  %v1088_v0 = vrot.slane %v1066_v23, %v16037_v42  ;;  %7036 = vst [vmem:[%s9550_s11 + $0x40] ss:$8 sm:$0xf] %v1014_v57  ;;  %v9585_v10 = vpop.permute.xlu1 %1409  ;;  %v1408_v59 = vpop.permute.xlu0 %1407 }
 0x139   : > { %v1095_v46 = vrot.slane %v1067_v15, %v16037_v42  ;;  %7037 = vst [vmem:[%s9550_s11 + $0x40] ss:$8 sm:$0xf0] %v1014_v57  ;;  %v1473_v52 = vsel %vm9492_vm11, %v9321_v51, %v9319_v21  ;;  %2927 = vrot.lane.b32.xlu0 %v16046_v31, %s9418_s17  ;;  %v1096_v27 = vcombine.low %v1074_v40, %v1081_v7  ;;  %vm1584_vm1 = vcmp.ne.s32.totalorder %v16049_v43, 0  ;;  %v16050_v57 = vld [vmem:[#allocation71_spill] sm:$0xff] }
 0x13a   : > { %v1474_v50 = vsel %vm9492_vm11, %v9263_v17, %v9321_v51  ;;  %v1471_v22 = vsel %vm9492_vm11, %v9374_v18, %v9372_v49  ;;  %v1472_v34 = vsel %vm9492_vm11, %v9319_v21, %v9374_v18  ;;  %v1063_v54 = vcombine.low %v1055_v38, %v1062_v9 }
 0x13b   : > { %v1097_v45 = vcombine.low %v1088_v0, %v1095_v46  ;;  %v9590_v17 = vsel %vm1479_vm12, %v9558_v14, %v1474_v50  ;;  %v9594_v51 = vsel %vm1479_vm12, %v1474_v50, %v1473_v52  ;;  %v1104_v53 = vrot.slane %v1096_v27, %v16037_v42  ;;  %v16052_v46 = vld [vmem:[#allocation30_spill] sm:$0xff] }
 0x13c   : > { %v1484_v21 = vsel %vm1479_vm12, %v1473_v52, %v1472_v34  ;;  %v1485_v18 = vsel %vm1479_vm12, %v1472_v34, %v1471_v22  ;;  %v1469_v56 = vsel %vm9492_vm11, %v9434_v6, %v9432_v26  ;;  %2933 = vrot.lane.b32.xlu1 %v16047_v29, %s9418_s17  ;;  %7038 = vst [vmem:[%s9550_s11 + $0x80] ss:$8 sm:$0xf] %v1063_v54  ;;  %7039 = vst [vmem:[%s9550_s11 + $0x80] ss:$8 sm:$0xf0] %v1063_v54  ;;  %v1412_v28 = vpop.permute.xlu0 %1411 }
 0x13d   : > { %v1111_v3 = vrot.slane %v1097_v45, %v16037_v42  ;;  %v9613_v19 = vsel %vm1514_vm5, %v9590_v17, %v1484_v21  ;;  %v9618_v55 = vsel %vm1514_vm5, %v9594_v51, %v1485_v18  ;;  %v1470_v8 = vsel %vm9492_vm11, %v9372_v49, %v9434_v6  ;;  %2931 = vrot.lane.b32.xlu0 %v16048_v60, %s9418_s17  ;;  %v1414_v49 = vpop.permute.xlu1 %1413 }
 0x13e   : > { %v1486_v20 = vsel %vm1479_vm12, %v1471_v22, %v1470_v8  ;;  %v1487_v5 = vsel %vm1479_vm12, %v1470_v8, %v1469_v56  ;;  %v1467_v61 = vsel %vm9492_vm11, %v9500_v13, %v9498_v39  ;;  %v1468_v6 = vsel %vm9492_vm11, %v9432_v26, %v9500_v13 }
 0x13f   : > { %v1112_v2 = vcombine.low %v1104_v53, %v1111_v3  ;;  %v9640_v47 = vsel %vm1514_vm5, %v1484_v21, %v1486_v20  ;;  %v9644_v58 = vsel %vm1514_vm5, %v1485_v18, %v1487_v5  ;;  %v1488_v36 = vsel %vm1479_vm12, %v1469_v56, %v1468_v6  ;;  %v16053_v53 = vld [vmem:[#allocation109_spill] sm:$0xff]  ;;  %v16054_v56 = vld [vmem:[#allocation110_spill] sm:$0xff] }
 0x140   : > { %v1489_v32 = vsel %vm1479_vm12, %v1468_v6, %v1467_v61  ;;  %v1523_v26 = vsel %vm1514_vm5, %v1486_v20, %v1488_v36  ;;  %v1465_v13 = vsel %vm9492_vm11, %v9518_v37, %v9516_v25  ;;  %v1466_v24 = vsel %vm9492_vm11, %v9498_v39, %v9518_v37  ;;  %2937 = vrot.lane.b32.xlu1 %v16050_v57, %s9418_s17  ;;  %v16051_v37 = vld [vmem:[#allocation108_spill] sm:$0xff]  ;;  %v1416_v0 = vpop.permute.xlu0 %1415 }
 0x141   : > { %7040 = vst [vmem:[%s9550_s11 + $0xc0] ss:$8 sm:$0xf] %v1112_v2  ;;  %7041 = vst [vmem:[%s9550_s11 + $0xc0] ss:$8 sm:$0xf0] %v1112_v2  ;;  %v1524_v4 = vsel %vm1514_vm5, %v1487_v5, %v1489_v32  ;;  %v9670_v23 = vsel %vm1549_vm15, %v9613_v19, %v1523_v26  ;;  %v1490_v15 = vsel %vm1479_vm12, %v1467_v61, %v1466_v24  ;;  %2935 = vrot.lane.b32.xlu0 %v16051_v37, %s9418_s17  ;;  %v1418_v9 = vpop.permute.xlu1 %1417 }
 0x142   : > { %v1491_v39 = vsel %vm1479_vm12, %v1466_v24, %v1465_v13  ;;  %v9681_v38 = vsel %vm1549_vm15, %v9618_v55, %v1524_v4  ;;  %v1525_v40 = vsel %vm1514_vm5, %v1488_v36, %v1490_v15  ;;  %v1463_v11 = vsel %vm9492_vm11, %v9539_v41, %v9537_v48 }
 0x143   : > { %v1526_v7 = vsel %vm1514_vm5, %v1489_v32, %v1491_v39  ;;  %vm3460_vm10 = vcmp.lt.s32.totalorder %v16052_v46, %v8945_v62  ;;  %v9696_v52 = vsel %vm1549_vm15, %v9640_v47, %v1525_v40  ;;  %v1464_v27 = vsel %vm9492_vm11, %v9516_v25, %v9539_v41 }
 0x144   : > { %v9701_v31 = vsel %vm1549_vm15, %v9644_v58, %v1526_v7  ;;  %v1461_v50 = vsel %vm9492_vm11, %v1408_v59, %v9585_v10  ;;  %v1492_v22 = vsel %vm1479_vm12, %v1465_v13, %v1464_v27  ;;  %v1493_v34 = vsel %vm1479_vm12, %v1464_v27, %v1463_v11  ;;  %2941 = vrot.lane.b32.xlu1 %v16053_v53, %s9418_s17  ;;  %v1420_v60 = vpop.permute.xlu0 %1419  ;;  %v16055_v13 = vld [vmem:[#allocation111_spill] sm:$0xff] }
 0x145   : > { %v1462_v54 = vsel %vm9492_vm11, %v9537_v48, %v1408_v59  ;;  %v1459_v45 = vsel %vm9492_vm11, %v1412_v28, %v1414_v49  ;;  %v1527_v25 = vsel %vm1514_vm5, %v1490_v15, %v1492_v22  ;;  %v1528_v41 = vsel %vm1514_vm5, %v1491_v39, %v1493_v34  ;;  %2939 = vrot.lane.b32.xlu0 %v16054_v56, %s9418_s17  ;;  %v1422_v8 = vpop.permute.xlu1 %1421  ;;  %v16059_v56 = vld [vmem:[#allocation114_spill] sm:$0xff] }
 0x146   : > { %v1494_v21 = vsel %vm1479_vm12, %v1463_v11, %v1462_v54  ;;  %v1495_v18 = vsel %vm1479_vm12, %v1462_v54, %v1461_v50  ;;  %v9733_v48 = vsel %vm1549_vm15, %v1523_v26, %v1527_v25  ;;  %v9737_v59 = vsel %vm1549_vm15, %v1524_v4, %v1528_v41  ;;  %v16056_v4 = vld [vmem:[#allocation112_spill] sm:$0xff] }
 0x147   : > { %v1529_v29 = vsel %vm1514_vm5, %v1492_v22, %v1494_v21  ;;  %v1530_v3 = vsel %vm1514_vm5, %v1493_v34, %v1495_v18  ;;  %v1460_v61 = vsel %vm9492_vm11, %v9585_v10, %v1412_v28  ;;  %v1457_v6 = vsel %vm9492_vm11, %v1416_v0, %v1418_v9  ;;  %v16057_v22 = vld [vmem:[#allocation31_spill] sm:$0xff] }
 0x148   : > { %v9745_v20 = vsel %vm1549_vm15, %v1525_v40, %v1529_v29  ;;  %v9749_v5 = vsel %vm1549_vm15, %v1526_v7, %v1530_v3  ;;  %v1496_v2 = vsel %vm1479_vm12, %v1461_v50, %v1460_v61  ;;  %v1497_v36 = vsel %vm1479_vm12, %v1460_v61, %v1459_v45  ;;  %2945 = vrot.lane.b32.xlu1 %v16055_v13, %s9418_s17  ;;  %v1424_v7 = vpop.permute.xlu0 %1423 }
 0x149   : > { %v1458_v32 = vsel %vm9492_vm11, %v1414_v49, %v1416_v0  ;;  %v1455_v26 = vsel %vm9492_vm11, %v1420_v60, %v1422_v8  ;;  %v1531_v10 = vsel %vm1514_vm5, %v1494_v21, %v1496_v2  ;;  %v1532_v28 = vsel %vm1514_vm5, %v1495_v18, %v1497_v36  ;;  %2943 = vrot.lane.b32.xlu0 %v16056_v4, %s9418_s17  ;;  %v1426_v40 = vpop.permute.xlu1 %1425  ;;  %v16062_v4 = vld [vmem:[#allocation76_spill] sm:$0xff] }
 0x14a   : > { %v1498_v24 = vsel %vm1479_vm12, %v1459_v45, %v1458_v32  ;;  %v1499_v57 = vsel %vm1479_vm12, %v1458_v32, %v1457_v6  ;;  %v1566_v49 = vsel %vm1549_vm15, %v1527_v25, %v1531_v10  ;;  %v1567_v15 = vsel %vm1549_vm15, %v1528_v41, %v1532_v28  ;;  %v16058_v25 = vld [vmem:[#allocation113_spill] sm:$0xff] }
 0x14b   : > { %v1533_v39 = vsel %vm1514_vm5, %v1496_v2, %v1498_v24  ;;  %v1534_v37 = vsel %vm1514_vm5, %v1497_v36, %v1499_v57  ;;  %v9787_v11 = vsel %vm1584_vm1, %v9670_v23, %v1566_v49  ;;  %v9792_v0 = vsel %vm1584_vm1, %v9681_v38, %v1567_v15 }
 0x14c   : > { %v1568_v27 = vsel %vm1549_vm15, %v1529_v29, %v1533_v39  ;;  %v1569_v50 = vsel %vm1549_vm15, %v1530_v3, %v1534_v37  ;;  %vm3459_vm13 = vcmp.lt.s32.totalorder %v16057_v22, %v8945_v62  ;;  %v1456_v45 = vsel %vm9492_vm11, %v1418_v9, %v1420_v60  ;;  %2949 = vrot.lane.b32.xlu1 %v16058_v25, %s9418_s17  ;;  %v1428_v2 = vpop.permute.xlu0 %1427  ;;  %v16063_v25 = vld [vmem:[#allocation77_spill] sm:$0xff] }
 0x14d   : > { %v9803_v34 = vsel %vm1584_vm1, %v9696_v52, %v1568_v27  ;;  %v9808_v54 = vsel %vm1584_vm1, %v9701_v31, %v1569_v50  ;;  %v1453_v53 = vsel %vm9492_vm11, %v1424_v7, %v1426_v40  ;;  %v1500_v41 = vsel %vm1479_vm12, %v1457_v6, %v1456_v45  ;;  %2947 = vrot.lane.b32.xlu0 %v16059_v56, %s9418_s17  ;;  %v1430_v6 = vpop.permute.xlu1 %1429 }
 0x14e   : > { %v1501_v21 = vsel %vm1479_vm12, %v1456_v45, %v1455_v26  ;;  %v1454_v18 = vsel %vm9492_vm11, %v1422_v8, %v1424_v7  ;;  %v16060_v29 = vrot.slane %v9163_v44, %v7588_v12  ;;  %v1535_v3 = vsel %vm1514_vm5, %v1498_v24, %v1500_v41 }
 0x14f   : > { %v1536_v60 = vsel %vm1514_vm5, %v1499_v57, %v1501_v21  ;;  %v1502_v8 = vsel %vm1479_vm12, %v1455_v26, %v1454_v18  ;;  %v1503_v61 = vsel %vm1479_vm12, %v1454_v18, %v1453_v53  ;;  %v1570_v36 = vsel %vm1549_vm15, %v1531_v10, %v1535_v3 }
 0x150   : > { %v9830_v9 = vsel %vm3460_vm10, %v16060_v29, 0.0  ;;  %v1571_v32 = vsel %vm1549_vm15, %v1532_v28, %v1536_v60  ;;  %v1537_v13 = vsel %vm1514_vm5, %v1500_v41, %v1502_v8  ;;  %v1538_v24 = vsel %vm1514_vm5, %v1501_v21, %v1503_v61  ;;  %2953 = vrot.lane.b32.xlu1 %v16062_v4, %s9418_s17  ;;  %v1432_v56 = vpop.permute.xlu0 %1431  ;;  %v16064_v29 = vld [vmem:[#allocation32_spill] sm:$0xff]  ;;  %v16065_v4 = vld [vmem:[#allocation19_spill] sm:$0xff] }
 0x151   : > { %16061 = vst [vmem:[#allocation59_spill] sm:$0xff] %v9830_v9  ;;  %v9851_v26 = vsel %vm1584_vm1, %v9733_v48, %v1570_v36  ;;  %v9856_v57 = vsel %vm1584_vm1, %v9737_v59, %v1571_v32  ;;  %v9860_v10 = vsel %vm1549_vm15, %v1533_v39, %v1537_v13  ;;  %v9864_v28 = vsel %vm1549_vm15, %v1534_v37, %v1538_v24  ;;  %v1434_v18 = vpop.permute.xlu1 %1433  ;;  %v16068_v9 = vld [vmem:[#allocation15_spill] sm:$0xff] }
 0x152   : > { %v9872_v7 = vsel %vm1584_vm1, %v9745_v20, %v9860_v10  ;;  %v9878_v45 = vsel %vm1584_vm1, %v9749_v5, %v9864_v28  ;;  %v1451_v39 = vsel %vm9492_vm11, %v1428_v2, %v1430_v6  ;;  %v1452_v37 = vsel %vm9492_vm11, %v1426_v40, %v1428_v2  ;;  %2951 = vrot.lane.b32.xlu0 %v16063_v25, %s9418_s17 }
 0x153   : > { %v1504_v41 = vsel %vm1479_vm12, %v1453_v53, %v1452_v37  ;;  %v1505_v21 = vsel %vm1479_vm12, %v1452_v37, %v1451_v39  ;;  %vm3462_vm14 = vcmp.lt.s32.totalorder %v16064_v29, %v8945_v62  ;;  %v3534_v46 = vrot.slane %v9163_v44, %v16065_v4  ;;  %v16066_v4 = vld [vmem:[#allocation115_spill] sm:$0xff] }
 0x154   : > { %v1539_v40 = vsel %vm1514_vm5, %v1502_v8, %v1504_v41  ;;  %v1540_v2 = vsel %vm1514_vm5, %v1503_v61, %v1505_v21  ;;  %v1449_v53 = vsel %vm9492_vm11, %v1432_v56, %v1434_v18  ;;  %v1450_v37 = vsel %vm9492_vm11, %v1430_v6, %v1432_v56  ;;  %2957 = vrot.lane.b32.xlu1 %v16066_v4, %s9418_s17  ;;  %v16067_v56 = vld [vmem:[#allocation78_spill] sm:$0xff] }
 0x155   : > { %v9904_v25 = vsel %vm1549_vm15, %v1535_v3, %v1539_v40  ;;  %v9908_v12 = vsel %vm1549_vm15, %v1536_v60, %v1540_v2  ;;  %v1506_v8 = vsel %vm1479_vm12, %v1451_v39, %v1450_v37  ;;  %v1507_v61 = vsel %vm1479_vm12, %v1450_v37, %v1449_v53  ;;  %v1436_v37 = vpop.permute.xlu0 %1435 }
 0x156   : > { %v9919_v6 = vsel %vm1584_vm1, %v1566_v49, %v9904_v25  ;;  %v9924_v3 = vsel %vm1584_vm1, %v1567_v15, %v9908_v12  ;;  %v1541_v60 = vsel %vm1514_vm5, %v1504_v41, %v1506_v8  ;;  %v1542_v39 = vsel %vm1514_vm5, %v1505_v21, %v1507_v61  ;;  %2955 = vrot.lane.b32.xlu0 %v16067_v56, %s9418_s17  ;;  %v1438_v15 = vpop.permute.xlu1 %1437  ;;  %v16071_v21 = vld [vmem:[#allocation33_spill] sm:$0xff] }
 0x157   : > { %v9934_v4 = vsel %vm1549_vm15, %v1537_v13, %v1541_v60  ;;  %v9938_v49 = vsel %vm1549_vm15, %v1538_v24, %v1542_v39  ;;  %v16069_v42 = vrot.slane %v9163_v44, %v16068_v9  ;;  %vm3461_vm0 = vcmp.lt.s32.totalorder %v16071_v21, %v8945_v62  ;;  %v16082_v21 = vld [vmem:[#allocation80_spill] sm:$0xff] }
 0x158   : > { %v9953_v13 = vsel %vm1584_vm1, %v1568_v27, %v9934_v4  ;;  %v9958_v24 = vsel %vm1584_vm1, %v1569_v50, %v9938_v49  ;;  %v1447_v56 = vsel %vm9492_vm11, %v1436_v37, %v1438_v15  ;;  %v9973_v27 = vsel %vm3462_vm14, %v3534_v46, 0.0  ;;  %v16076_v50 = vld [vmem:[#allocation17_spill] sm:$0xff] }
 0x159   : > { %v9946_v41 = vsel %vm3459_vm13, %v16069_v42, 0.0  ;;  %16072 = vst [vmem:[#allocation54_spill] sm:$0xff] %v9953_v13  ;;  %16073 = vst [vmem:[#allocation93_spill] sm:$0xff] %v9958_v24  ;;  %v1448_v42 = vsel %vm9492_vm11, %v1434_v18, %v1436_v37  ;;  %v3530_v35 = vrot.slane %v9163_v44, %v16076_v50  ;;  %v16078_v37 = vld [vmem:[#allocation34_spill] sm:$0xff]  ;;  %v16081_v13 = vld [vmem:[#allocation64_spill] sm:$0xff] }
 0x15a   : > { %16070 = vst [vmem:[#allocation101_spill] sm:$0xff] %v9946_v41  ;;  %v1508_v22 = vsel %vm1479_vm12, %v1449_v53, %v1448_v42  ;;  %v1509_v9 = vsel %vm1479_vm12, %v1448_v42, %v1447_v56  ;;  %v16074_v41 = vld [vmem:[#allocation58_spill] sm:$0xff]  ;;  %16075 = vst [vmem:[#allocation103_spill] sm:$0xff] %v9973_v27  ;;  %v16077_v53 = vld [vmem:[#allocation79_spill] sm:$0xff]  ;;  %vm3464_vm2 = vcmp.lt.s32.totalorder %v16078_v37, %v8945_v62  ;;  %v1442_v50 = vpop.permute.xlu1 %1441  ;;  %vm1619_vm3 = vcmp.ne.s32.totalorder %v16081_v13, 0 }
 0x15b   : > { %2961 = vrot.lane.b32.xlu1 %v16074_v41, %s9418_s17  ;;  %v1543_v24 = vsel %vm1514_vm5, %v1506_v8, %v1508_v22  ;;  %v1544_v18 = vsel %vm1514_vm5, %v1507_v61, %v1509_v9  ;;  %2959 = vrot.lane.b32.xlu0 %v16077_v53, %s9418_s17  ;;  %v16079_v41 = vld [vmem:[#allocation23_spill] sm:$0xff]  ;;  %v1440_v8 = vpop.permute.xlu0 %1439  ;;  %v9994_v61 = vsel %vm3461_vm0, %v3530_v35, 0.0 }
 0x15c   : > { %v3542_v42 = vrot.slane %v9163_v44, %v16079_v41  ;;  %v1578_v46 = vsel %vm1549_vm15, %v1539_v40, %v1543_v24  ;;  %v1579_v29 = vsel %vm1549_vm15, %v1540_v2, %v1544_v18  ;;  %v1476_v2 = vsel %vm9492_vm11, %v1442_v50, %v9265_v16 }
 0x15d   : > { %v10000_v41 = vsel %vm1584_vm1, %v1570_v36, %v1578_v46  ;;  %v10004_v40 = vsel %vm1584_vm1, %v1571_v32, %v1579_v29  ;;  %v1445_v35 = vsel %vm9492_vm11, %v1440_v8, %v1442_v50  ;;  %v1481_v27 = vsel %vm1479_vm12, %v1476_v2, %v9558_v14 }
 0x15e   : > { %v1446_v36 = vsel %vm9492_vm11, %v1438_v15, %v1440_v8  ;;  %v1480_v32 = vsel %vm1479_vm12, %v1445_v35, %v1476_v2  ;;  %v10024_v16 = vsel %vm3464_vm2, %v3542_v42, 0.0  ;;  %v1518_v50 = vsel %vm1514_vm5, %v1481_v27, %v9594_v51  ;;  %v10047_v8 = vpop.permute.xlu1 %2149 }
 0x15f   : > { %2965 = vrot.lane.b32.xlu1 %v16082_v21, %s9418_s17  ;;  %v1510_v14 = vsel %vm1479_vm12, %v1447_v56, %v1446_v36  ;;  %v1511_v1 = vsel %vm1479_vm12, %v1446_v36, %v1445_v35  ;;  %v1517_v15 = vsel %vm1514_vm5, %v1480_v32, %v9590_v17  ;;  %v16083_v21 = vld [vmem:[#allocation116_spill] sm:$0xff]  ;;  %v1557_v42 = vsel %vm1549_vm15, %v1518_v50, %v9644_v58  ;;  %v10049_v17 = vpop.permute.xlu0 %2147 }
 0x160   : > { %2963 = vrot.lane.b32.xlu0 %v16083_v21, %s9418_s17  ;;  %v1515_v51 = vsel %vm1514_vm5, %v1510_v14, %v1480_v32  ;;  %v1516_v56 = vsel %vm1514_vm5, %v1511_v1, %v1481_v27  ;;  %v1545_v63 = vsel %vm1514_vm5, %v1508_v22, %v1510_v14  ;;  %v10058_v58 = vsel %vm1584_vm1, %v1557_v42, %v9749_v5  ;;  %v16086_v21 = vld [vmem:[#allocation83_spill] sm:$0xff] }
 0x161   : > { %v1546_v2 = vsel %vm1514_vm5, %v1509_v9, %v1511_v1  ;;  %v1550_v27 = vsel %vm1549_vm15, %v1543_v24, %v1515_v51  ;;  %v1551_v22 = vsel %vm1549_vm15, %v1544_v18, %v1516_v56  ;;  %v1552_v35 = vsel %vm1549_vm15, %v1545_v63, %v1517_v15  ;;  %v16084_v9 = vld [vmem:[#allocation81_spill] sm:$0xff] }
 0x162   : > { %v1553_v36 = vsel %vm1549_vm15, %v1546_v2, %v1518_v50  ;;  %v1554_v5 = vsel %vm1549_vm15, %v1515_v51, %v9613_v19  ;;  %v1555_v30 = vsel %vm1549_vm15, %v1516_v56, %v9618_v55  ;;  %v1556_v24 = vsel %vm1549_vm15, %v1517_v15, %v9640_v47  ;;  %v16085_v50 = vld [vmem:[#allocation82_spill] sm:$0xff] }
 0x163   : > { %2969 = vrot.lane.b32.xlu1 %v16084_v9, %s9418_s17  ;;  %v1580_v18 = vsel %vm1549_vm15, %v1541_v60, %v1545_v63  ;;  %v1581_v32 = vsel %vm1549_vm15, %v1542_v39, %v1546_v2  ;;  %v1585_v19 = vsel %vm1584_vm1, %v9904_v25, %v1550_v27  ;;  %v1586_v55 = vsel %vm1584_vm1, %v9908_v12, %v1551_v22  ;;  %v10101_v25 = vpop.permute.xlu1 %2153  ;;  %v10103_v39 = vpop.permute.xlu0 %2151  ;;  %v16090_v9 = vld [vmem:[#allocation86_spill] sm:$0xff] }
 0x164   : > { %2967 = vrot.lane.b32.xlu0 %v16085_v50, %s9418_s17  ;;  %v1587_v47 = vsel %vm1584_vm1, %v9934_v4, %v1552_v35  ;;  %v1588_v33 = vsel %vm1584_vm1, %v9938_v49, %v1553_v36  ;;  %v1589_v60 = vsel %vm1584_vm1, %v1578_v46, %v1554_v5  ;;  %v1590_v14 = vsel %vm1584_vm1, %v1579_v29, %v1555_v30 }
 0x165   : > { %v1591_v12 = vsel %vm1584_vm1, %v1580_v18, %v1556_v24  ;;  %v1592_v4 = vsel %vm1584_vm1, %v1581_v32, %v1557_v42  ;;  %v1593_v49 = vsel %vm1584_vm1, %v1550_v27, %v9670_v23  ;;  %v1594_v46 = vsel %vm1584_vm1, %v1551_v22, %v9681_v38  ;;  %v16087_v42 = vld [vmem:[#allocation85_spill] sm:$0xff] }
 0x166   : > { %v1595_v1 = vsel %vm1584_vm1, %v1552_v35, %v9696_v52  ;;  %v1596_v29 = vsel %vm1584_vm1, %v1553_v36, %v9701_v31  ;;  %v1597_v15 = vsel %vm1584_vm1, %v1554_v5, %v9733_v48  ;;  %v1598_v23 = vsel %vm1584_vm1, %v1555_v30, %v9737_v59  ;;  %v16088_v35 = vld [vmem:[#allocation54_spill] sm:$0xff]  ;;  %v16089_v5 = vld [vmem:[#allocation93_spill] sm:$0xff] }
 0x167   : > { %2973 = vrot.lane.b32.xlu1 %v16086_v21, %s9418_s17  ;;  %v1599_v38 = vsel %vm1584_vm1, %v1556_v24, %v9745_v20  ;;  %v1615_v52 = vsel %vm1584_vm1, %v9860_v10, %v1580_v18  ;;  %v1616_v31 = vsel %vm1584_vm1, %v9864_v28, %v1581_v32  ;;  %v1620_v48 = vsel %vm1619_vm3, %v9787_v11, %v1585_v19  ;;  %v10154_v10 = vpop.permute.xlu1 %2157  ;;  %v10156_v28 = vpop.permute.xlu0 %2155  ;;  %v16091_v21 = vld [vmem:[#allocation65_spill] sm:$0xff] }
 0x168   : > { %2971 = vrot.lane.b32.xlu0 %v16087_v42, %s9418_s17  ;;  %v1621_v59 = vsel %vm1619_vm3, %v9792_v0, %v1586_v55  ;;  %v1622_v20 = vsel %vm1619_vm3, %v9803_v34, %v1587_v47  ;;  %v1623_v43 = vsel %vm1619_vm3, %v9808_v54, %v1588_v33  ;;  %v1624_v51 = vsel %vm1619_vm3, %v9851_v26, %v1589_v60 }
 0x169   : > { %v1625_v56 = vsel %vm1619_vm3, %v9856_v57, %v1590_v14  ;;  %v1626_v63 = vsel %vm1619_vm3, %v9872_v7, %v1591_v12  ;;  %v1627_v2 = vsel %vm1619_vm3, %v9878_v45, %v1592_v4  ;;  %v1628_v27 = vsel %vm1619_vm3, %v9919_v6, %v1593_v49 }
 0x16a   : > { %v1629_v22 = vsel %vm1619_vm3, %v9924_v3, %v1594_v46  ;;  %v1630_v36 = vsel %vm1619_vm3, %v16088_v35, %v1595_v1  ;;  %v1631_v30 = vsel %vm1619_vm3, %v16089_v5, %v1596_v29  ;;  %v1632_v24 = vsel %vm1619_vm3, %v10000_v41, %v1597_v15 }
 0x16b   : > { %2977 = vrot.lane.b32.xlu1 %v16090_v9, %s9418_s17  ;;  %v1633_v18 = vsel %vm1619_vm3, %v10004_v40, %v1598_v23  ;;  %v1634_v32 = vsel %vm1619_vm3, %v1615_v52, %v1599_v38  ;;  %v1635_v50 = vsel %vm1619_vm3, %v1616_v31, %v10058_v58  ;;  %v1636_v42 = vsel %vm1619_vm3, %v1585_v19, %v9787_v11  ;;  %v10214_v53 = vpop.permute.xlu1 %2161  ;;  %v10216_v44 = vpop.permute.xlu0 %2159 }
 0x16c   : > { %2975 = vrot.lane.b32.xlu0 %v16091_v21, %s9418_s17  ;;  %v1637_v9 = vsel %vm1619_vm3, %v1586_v55, %v9792_v0  ;;  %v1638_v37 = vsel %vm1619_vm3, %v1587_v47, %v9803_v34  ;;  %v1639_v21 = vsel %vm1619_vm3, %v1588_v33, %v9808_v54  ;;  %v1640_v11 = vsel %vm1619_vm3, %v1589_v60, %v9851_v26  ;;  %v16094_v60 = vld [vmem:[#allocation14_spill] sm:$0xff] }
 0x16d   : > { %v1641_v0 = vsel %vm1619_vm3, %v1590_v14, %v9856_v57  ;;  %v1642_v34 = vsel %vm1619_vm3, %v1591_v12, %v9872_v7  ;;  %v1643_v54 = vsel %vm1619_vm3, %v1592_v4, %v9878_v45  ;;  %v10233_v19 = vsel %vm1619_vm3, %v1593_v49, %v9919_v6  ;;  %v16092_v45 = vld [vmem:[#allocation66_spill] sm:$0xff] }
 0x16e   : > { %v10238_v26 = vsel %vm1619_vm3, %v1594_v46, %v9924_v3  ;;  %v10243_v57 = vsel %vm1619_vm3, %v1595_v1, %v16088_v35  ;;  %v10248_v7 = vsel %vm1619_vm3, %v1596_v29, %v16089_v5  ;;  %v10255_v6 = vsel %vm1619_vm3, %v1597_v15, %v10000_v41  ;;  %v16097_v41 = vld [vmem:[#allocation87_spill] sm:$0xff]  ;;  %v16102_v5 = vld [vmem:[#allocation73_spill] sm:$0xff] }
 0x16f   : > { %3685 = vrot.lane.b32.xlu1 %v16092_v45, %s10200_s18  ;;  %v10260_v3 = vsel %vm1619_vm3, %v1598_v23, %v10004_v40  ;;  %v10264_v55 = vsel %vm1619_vm3, %v1599_v38, %v1615_v52  ;;  %v10269_v47 = vsel %vm1619_vm3, %v10058_v58, %v1616_v31  ;;  %v16093_v33 = vstv %s8586_s30  ;;  %v10280_v46 = vpop.permute.xlu1 %2165  ;;  %v10282_v1 = vpop.permute.xlu0 %2163  ;;  %v16098_v23 = vld [vmem:[#allocation57_spill] sm:$0xff]  ;;  %s3013_s30 = sand.u32 1, %s11043_s9 }
 0x170   : > { %vm10274_vm4 = vcmp.lt.s32.totalorder %v16094_v60, %v16093_v33  ;;  %3683 = vrot.lane.b32.xlu0 %v16097_v41, %s10200_s18  ;;  %v1684_v40 = vcombine.low %v1620_v48, %v1621_v59  ;;  %v1685_v12 = vcombine.low %v1622_v20, %v1623_v43  ;;  %v1686_v4 = vcombine.low %v1624_v51, %v1625_v56  ;;  %v16099_v59 = vld [vmem:[#allocation72_spill] sm:$0xff] }
 0x171   : > { %v1687_v49 = vcombine.low %v1626_v63, %v1627_v2  ;;  %v1733_v13 = vcombine.low %v1628_v27, %v1629_v22  ;;  %v1734_v58 = vcombine.low %v1630_v36, %v1631_v30  ;;  %v1735_v29 = vcombine.low %v1632_v24, %v1633_v18  ;;  %v16100_v20 = vld [vmem:[#allocation88_spill] sm:$0xff]  ;;  %v16101_v2 = vld [vmem:[#allocation89_spill] sm:$0xff] }
 0x172   : > { %v1736_v15 = vcombine.low %v1634_v32, %v1635_v50  ;;  %v1694_v38 = vrot.slane %v1684_v40, %v16098_v23  ;;  %v1701_v52 = vrot.slane %v1685_v12, %v16098_v23  ;;  %v1708_v31 = vrot.slane %v1686_v4, %v16098_v23 }
 0x173   : > { %v1715_v48 = vrot.slane %v1687_v49, %v16098_v23  ;;  %vm2247_vm6 = vcmp.ne.s32.totalorder %v16099_v59, 0  ;;  %3689 = vrot.lane.b32.xlu1 %v16100_v20, %s10200_s18  ;;  %v1743_v43 = vrot.slane %v1733_v13, %v16098_v23  ;;  %v1750_v51 = vrot.slane %v1734_v58, %v16098_v23  ;;  %v10298_v30 = vpop.permute.xlu1 %2169  ;;  %v10300_v24 = vpop.permute.xlu0 %2167  ;;  %v16105_v13 = vld [vmem:[#allocation74_spill] sm:$0xff]  ;;  %v16107_v20 = vld [vmem:[#allocation95_spill] sm:$0xff] }
 0x174   : > { %v1757_v56 = vrot.slane %v1735_v29, %v16098_v23  ;;  %v1764_v63 = vrot.slane %v1736_v15, %v16098_v23  ;;  %3687 = vrot.lane.b32.xlu0 %v16101_v2, %s10200_s18  ;;  %v1716_v27 = vcombine.low %v1694_v38, %v1701_v52  ;;  %v1782_v35 = vcombine.low %v1636_v42, %v1637_v9 }
 0x175   : > { %v1717_v22 = vcombine.low %v1708_v31, %v1715_v48  ;;  %v1783_v36 = vcombine.low %v1638_v37, %v1639_v21  ;;  %vm2282_vm7 = vcmp.ne.s32.totalorder %v16102_v5, 0  ;;  %v1765_v18 = vcombine.low %v1743_v43, %v1750_v51  ;;  %v16103_v37 = vld [vmem:[#allocation90_spill] sm:$0xff]  ;;  %v16106_v48 = vld [vmem:[#allocation92_spill] sm:$0xff] }
 0x176   : > { %v1766_v32 = vcombine.low %v1757_v56, %v1764_v63  ;;  %v1784_v50 = vcombine.low %v1640_v11, %v1641_v0  ;;  %v1785_v45 = vcombine.low %v1642_v34, %v1643_v54  ;;  %v1724_v33 = vrot.slane %v1716_v27, %v16098_v23  ;;  %v16104_v11 = vld [vmem:[#allocation91_spill] sm:$0xff] }
 0x177   : > { %v1731_v41 = vrot.slane %v1717_v22, %v16098_v23  ;;  %v1792_v40 = vrot.slane %v1782_v35, %v16098_v23  ;;  %v1799_v42 = vrot.slane %v1783_v36, %v16098_v23  ;;  %3693 = vrot.lane.b32.xlu1 %v16103_v37, %s10200_s18  ;;  %v1773_v9 = vrot.slane %v1765_v18, %v16098_v23  ;;  %v10319_v58 = vpop.permute.xlu1 %2173  ;;  %v10321_v29 = vpop.permute.xlu0 %2171 }
 0x178   : > { %v1780_v21 = vrot.slane %v1766_v32, %v16098_v23  ;;  %v1806_v12 = vrot.slane %v1784_v50, %v16098_v23  ;;  %v1813_v4 = vrot.slane %v1785_v45, %v16098_v23  ;;  %3691 = vrot.lane.b32.xlu0 %v16104_v11, %s10200_s18  ;;  %v1831_v54 = vcombine.low %v10233_v19, %v10238_v26  ;;  %v16108_v32 = vld [vmem:[#allocation59_spill] sm:$0xff] }
 0x179   : > { %v1732_v0 = vcombine.low %v1724_v33, %v1731_v41  ;;  %v1814_v34 = vcombine.low %v1792_v40, %v1799_v42  ;;  %v1832_v49 = vcombine.low %v10243_v57, %v10248_v7  ;;  %vm2317_vm8 = vcmp.ne.s32.totalorder %v16105_v13, 0  ;;  %v16109_v40 = vld [vmem:[#allocation101_spill] sm:$0xff]  ;;  %v16110_v42 = vld [vmem:[#allocation35_spill] sm:$0xff] }
 0x17a   : > { %v1781_v15 = vcombine.low %v1773_v9, %v1780_v21  ;;  %v1815_v38 = vcombine.low %v1806_v12, %v1813_v4  ;;  %v1833_v52 = vcombine.low %v10255_v6, %v10260_v3  ;;  %v1834_v19 = vcombine.low %v10264_v55, %v10269_v47 }
 0x17b   : > { %v1822_v26 = vrot.slane %v1814_v34, %v16098_v23  ;;  %v1841_v57 = vrot.slane %v1831_v54, %v16098_v23  ;;  %v1848_v7 = vrot.slane %v1832_v49, %v16098_v23  ;;  %7050 = vst [vmem:[%s9550_s11 + $0x1] ss:$8 sm:$0xf] %v1732_v0  ;;  %7051 = vst [vmem:[%s9550_s11 + $0x1] ss:$8 sm:$0xf0] %v1732_v0  ;;  %3697 = vrot.lane.b32.xlu1 %v16106_v48, %s10200_s18  ;;  %v10363_v2 = vpop.permute.xlu1 %2177  ;;  %v2176_v27 = vpop.permute.xlu0 %2175 }
 0x17c   : > { %v10336_v31 = vsel %vm10274_vm4, %v10049_v17, %v10047_v8  ;;  %v1829_v6 = vrot.slane %v1815_v38, %v16098_v23  ;;  %v1855_v3 = vrot.slane %v1833_v52, %v16098_v23  ;;  %v1862_v55 = vrot.slane %v1834_v19, %v16098_v23  ;;  %7052 = vst [vmem:[%s9550_s11 + $0x41] ss:$8 sm:$0xf] %v1781_v15  ;;  %v16112_v38 = vld [vmem:[#allocation103_spill] sm:$0xff] }
 0x17d   : > { %7053 = vst [vmem:[%s9550_s11 + $0x41] ss:$8 sm:$0xf0] %v1781_v15  ;;  %v2241_v47 = vsel %vm10274_vm4, %v10103_v39, %v10101_v25  ;;  %3695 = vrot.lane.b32.xlu0 %v16107_v20, %s10200_s18  ;;  %v1863_v43 = vcombine.low %v1841_v57, %v1848_v7  ;;  %v2242_v51 = vsel %vm10274_vm4, %v10047_v8, %v10103_v39  ;;  %v16111_v15 = vld [vmem:[#allocation75_spill] sm:$0xff] }
 0x17e   : > { %v2239_v56 = vsel %vm10274_vm4, %v10156_v28, %v10154_v10  ;;  %v2240_v63 = vsel %vm10274_vm4, %v10101_v25, %v10156_v28  ;;  %v1830_v22 = vcombine.low %v1822_v26, %v1829_v6  ;;  %v1864_v35 = vcombine.low %v1855_v3, %v1862_v55 }
 0x17f   : > { %v10368_v8 = vsel %vm2247_vm6, %v10336_v31, %v2242_v51  ;;  %v10372_v39 = vsel %vm2247_vm6, %v2242_v51, %v2241_v47  ;;  %v1871_v36 = vrot.slane %v1863_v43, %v16098_v23  ;;  %v2252_v25 = vsel %vm2247_vm6, %v2241_v47, %v2240_v63  ;;  %3701 = vrot.lane.b32.xlu1 %v16108_v32, %s10200_s18  ;;  %v2180_v12 = vpop.permute.xlu0 %2179 }
 0x180   : > { %v2253_v28 = vsel %vm2247_vm6, %v2240_v63, %v2239_v56  ;;  %v2237_v18 = vsel %vm10274_vm4, %v10216_v44, %v10214_v53  ;;  %v1878_v50 = vrot.slane %v1864_v35, %v16098_v23  ;;  %7054 = vst [vmem:[%s9550_s11 + $0x81] ss:$8 sm:$0xf] %v1830_v22  ;;  %7055 = vst [vmem:[%s9550_s11 + $0x81] ss:$8 sm:$0xf0] %v1830_v22 }
 0x181   : > { %v10391_v45 = vsel %vm2282_vm7, %v10368_v8, %v2252_v25  ;;  %v10396_v33 = vsel %vm2282_vm7, %v10372_v39, %v2253_v28  ;;  %v2238_v41 = vsel %vm10274_vm4, %v10154_v10, %v10216_v44  ;;  %3699 = vrot.lane.b32.xlu0 %v16109_v40, %s10200_s18  ;;  %vm3463_vm9 = vcmp.lt.s32.totalorder %v16110_v42, %v8945_v62  ;;  %v2182_v10 = vpop.permute.xlu1 %2181 }
 0x182   : > { %v2254_v37 = vsel %vm2247_vm6, %v2239_v56, %v2238_v41  ;;  %v2255_v9 = vsel %vm2247_vm6, %v2238_v41, %v2237_v18  ;;  %v2235_v21 = vsel %vm10274_vm4, %v10282_v1, %v10280_v46  ;;  %v2236_v44 = vsel %vm10274_vm4, %v10214_v53, %v10282_v1 }
 0x183   : > { %v1879_v4 = vcombine.low %v1871_v36, %v1878_v50  ;;  %v10420_v11 = vsel %vm2282_vm7, %v2252_v25, %v2254_v37  ;;  %v10424_v0 = vsel %vm2282_vm7, %v2253_v28, %v2255_v9  ;;  %v2256_v34 = vsel %vm2247_vm6, %v2237_v18, %v2236_v44  ;;  %3705 = vrot.lane.b32.xlu1 %v16112_v38, %s10200_s18  ;;  %v2184_v3 = vpop.permute.xlu0 %2183 }
 0x184   : > { %v2257_v54 = vsel %vm2247_vm6, %v2236_v44, %v2235_v21  ;;  %v2291_v53 = vsel %vm2282_vm7, %v2254_v37, %v2256_v34  ;;  %v2233_v1 = vsel %vm10274_vm4, %v10300_v24, %v10298_v30  ;;  %v2234_v49 = vsel %vm10274_vm4, %v10280_v46, %v10300_v24  ;;  %v16114_v44 = vld [vmem:[#allocation25_spill] sm:$0xff] }
 0x185   : > { %vm2352_vm11 = vcmp.ne.s32.totalorder %v16111_v15, 0  ;;  %7056 = vst [vmem:[%s9550_s11 + $0xc1] ss:$8 sm:$0xf] %v1879_v4  ;;  %v2292_v52 = vsel %vm2282_vm7, %v2255_v9, %v2257_v54  ;;  %v10450_v19 = vsel %vm2317_vm8, %v10391_v45, %v2291_v53  ;;  %v2258_v26 = vsel %vm2247_vm6, %v2235_v21, %v2234_v49  ;;  %3703 = vrot.lane.b32.xlu0 %v9994_v61, %s10200_s18  ;;  %v2186_v6 = vpop.permute.xlu1 %2185  ;;  %v16113_v21 = vld [vmem:[#allocation119_spill] sm:$0xff] }
 0x186   : > { %7057 = vst [vmem:[%s9550_s11 + $0xc1] ss:$8 sm:$0xf0] %v1879_v4  ;;  %v2259_v46 = vsel %vm2247_vm6, %v2234_v49, %v2233_v1  ;;  %v10461_v24 = vsel %vm2317_vm8, %v10396_v33, %v2292_v52  ;;  %v2293_v57 = vsel %vm2282_vm7, %v2256_v34, %v2258_v26  ;;  %v2231_v48 = vsel %vm10274_vm4, %v10321_v29, %v10319_v58 }
 0x187   : > { %v2294_v7 = vsel %vm2282_vm7, %v2257_v54, %v2259_v46  ;;  %v10474_v61 = vsel %vm2317_vm8, %v10420_v11, %v2293_v57  ;;  %v2232_v47 = vsel %vm10274_vm4, %v10298_v30, %v10321_v29  ;;  %v2229_v20 = vsel %vm10274_vm4, %v2176_v27, %v10363_v2  ;;  %3709 = vrot.lane.b32.xlu1 %v10024_v16, %s10200_s18  ;;  %v2188_v28 = vpop.permute.xlu0 %2187 }
 0x188   : > { %v10479_v55 = vsel %vm2317_vm8, %v10424_v0, %v2294_v7  ;;  %v2260_v43 = vsel %vm2247_vm6, %v2233_v1, %v2232_v47  ;;  %v2261_v51 = vsel %vm2247_vm6, %v2232_v47, %v2231_v48  ;;  %v2230_v56 = vsel %vm10274_vm4, %v10319_v58, %v2176_v27 }
 0x189   : > { %v2227_v63 = vsel %vm10274_vm4, %v2180_v12, %v2182_v10  ;;  %v2295_v30 = vsel %vm2282_vm7, %v2258_v26, %v2260_v43  ;;  %v2296_v29 = vsel %vm2282_vm7, %v2259_v46, %v2261_v51  ;;  %v2262_v22 = vsel %vm2247_vm6, %v2231_v48, %v2230_v56  ;;  %v2190_v25 = vpop.permute.xlu1 %2189 }
 0x18a   : > { %v2263_v35 = vsel %vm2247_vm6, %v2230_v56, %v2229_v20  ;;  %v10509_v58 = vsel %vm2317_vm8, %v2291_v53, %v2295_v30  ;;  %v10513_v27 = vsel %vm2317_vm8, %v2292_v52, %v2296_v29  ;;  %v2297_v16 = vsel %vm2282_vm7, %v2260_v43, %v2262_v22 }
 0x18b   : > { %v2298_v36 = vsel %vm2282_vm7, %v2261_v51, %v2263_v35  ;;  %v10521_v18 = vsel %vm2317_vm8, %v2293_v57, %v2297_v16  ;;  %v2228_v50 = vsel %vm10274_vm4, %v10363_v2, %v2180_v12  ;;  %v2225_v41 = vsel %vm10274_vm4, %v2184_v3, %v2186_v6  ;;  %v2192_v26 = vpop.permute.xlu0 %2191 }
 0x18c   : > { %v10525_v32 = vsel %vm2317_vm8, %v2294_v7, %v2298_v36  ;;  %v2264_v40 = vsel %vm2247_vm6, %v2229_v20, %v2228_v50  ;;  %v2265_v37 = vsel %vm2247_vm6, %v2228_v50, %v2227_v63  ;;  %v2226_v9 = vsel %vm10274_vm4, %v2182_v10, %v2184_v3  ;;  %v7095_v50 = vld [vmem:[%s7550_s14 + $0x84] ss:$8 sm:$0xf0] }
 0x18d   : > { %v16115_v4 = vrot.slane %v16113_v21, %v16114_v44  ;;  %v2299_v2 = vsel %vm2282_vm7, %v2262_v22, %v2264_v40  ;;  %v2300_v12 = vsel %vm2282_vm7, %v2263_v35, %v2265_v37  ;;  %v2266_v54 = vsel %vm2247_vm6, %v2227_v63, %v2226_v9  ;;  %v2194_v52 = vpop.permute.xlu1 %2193  ;;  %v16116_v63 = vld [vmem:[#allocation36_spill] sm:$0xff] }
 0x18e   : > { %v2267_v53 = vsel %vm2247_vm6, %v2226_v9, %v2225_v41  ;;  %v10555_v10 = vsel %vm2317_vm8, %v2295_v30, %v2299_v2  ;;  %v10559_v1 = vsel %vm2317_vm8, %v2296_v29, %v2300_v12  ;;  %v2301_v49 = vsel %vm2282_vm7, %v2264_v40, %v2266_v54  ;;  %v16117_v30 = vld [vmem:[#allocation27_spill] sm:$0xff] }
 0x18f   : > { %v3659_v34 = vsel %vm3463_vm9, %v16115_v4, 0.0  ;;  %v2302_v38 = vsel %vm2282_vm7, %v2265_v37, %v2267_v53  ;;  %v10569_v46 = vsel %vm2352_vm11, %v10450_v19, %v10555_v10  ;;  %v10575_v57 = vsel %vm2352_vm11, %v10461_v24, %v10559_v1  ;;  %v2196_v40 = vpop.permute.xlu0 %2195 }
 0x190   : > { %3707 = vrot.lane.b32.xlu0 %v3659_v34, %s10200_s18  ;;  %v10579_v7 = vsel %vm2317_vm8, %v2297_v16, %v2301_v49  ;;  %v10583_v48 = vsel %vm2317_vm8, %v2298_v36, %v2302_v38  ;;  %v2223_v20 = vsel %vm10274_vm4, %v2188_v28, %v2190_v25  ;;  %v2224_v43 = vsel %vm10274_vm4, %v2186_v6, %v2188_v28  ;;  %v16118_v6 = vld [vmem:[#allocation37_spill] sm:$0xff] }
 0x191   : > { %v10589_v3 = vsel %vm2352_vm11, %v10474_v61, %v10579_v7  ;;  %v10595_v47 = vsel %vm2352_vm11, %v10479_v55, %v10583_v48  ;;  %v2268_v51 = vsel %vm2247_vm6, %v2225_v41, %v2224_v43  ;;  %v2269_v56 = vsel %vm2247_vm6, %v2224_v43, %v2223_v20  ;;  %v16119_v16 = vld [vmem:[#allocation29_spill] sm:$0xff]  ;;  %v2198_v41 = vpop.permute.xlu1 %2197 }
 0x192   : > { %vm3466_vm12 = vcmp.lt.s32.totalorder %v16116_v63, %v8945_v62  ;;  %v3550_v29 = vrot.slane %v16113_v21, %v16117_v30  ;;  %v2303_v22 = vsel %vm2282_vm7, %v2266_v54, %v2268_v51  ;;  %v2304_v35 = vsel %vm2282_vm7, %v2267_v53, %v2269_v56  ;;  %v7094_v28 = vld [vmem:[%s7550_s14 + $0x84] ss:$8 sm:$0xf] }
 0x193   : > { %vm3465_vm5 = vcmp.lt.s32.totalorder %v16118_v6, %v8945_v62  ;;  %v3546_v36 = vrot.slane %v16113_v21, %v16119_v16  ;;  %v10621_v37 = vsel %vm2317_vm8, %v2299_v2, %v2303_v22  ;;  %v10625_v9 = vsel %vm2317_vm8, %v2300_v12, %v2304_v35  ;;  %v16121_v6 = vld [vmem:[#allocation38_spill] sm:$0xff] }
 0x194   : > { %v3662_v4 = vsel %vm3466_vm12, %v3550_v29, 0.0  ;;  %v2221_v34 = vsel %vm10274_vm4, %v2192_v26, %v2194_v52  ;;  %v10633_v21 = vsel %vm2352_vm11, %v10509_v58, %v10621_v37  ;;  %v10639_v2 = vsel %vm2352_vm11, %v10513_v27, %v10625_v9 }
 0x195   : > { %16120 = vst [vmem:[#allocation102_spill] sm:$0xff] %v10639_v2  ;;  %3713 = vrot.lane.b32.xlu1 %v3662_v4, %s10200_s18  ;;  %v3661_v54 = vsel %vm3465_vm5, %v3546_v36, 0.0  ;;  %v2222_v12 = vsel %vm10274_vm4, %v2190_v25, %v2192_v26  ;;  %v10649_v29 = vor.u32 %v7095_v50, %v7094_v28  ;;  %vm3468_vm15 = vcmp.lt.s32.totalorder %v16121_v6, %v8945_v62  ;;  %v16122_v25 = vld [vmem:[#allocation39_spill] sm:$0xff]  ;;  %v16127_v6 = vld [vmem:[#allocation40_spill] sm:$0xff] }
 0x196   : > { %3711 = vrot.lane.b32.xlu0 %v3661_v54, %s10200_s18  ;;  %v2270_v53 = vsel %vm2247_vm6, %v2223_v20, %v2222_v12  ;;  %v2271_v43 = vsel %vm2247_vm6, %v2222_v12, %v2221_v34  ;;  %vm3467_vm1 = vcmp.lt.s32.totalorder %v16122_v25, %v8945_v62  ;;  %v2219_v26 = vsel %vm10274_vm4, %v2196_v40, %v2198_v41  ;;  %v2202_v20 = vpop.permute.xlu1 %2201  ;;  %v16124_v4 = vld [vmem:[#allocation15_spill] sm:$0xff]  ;;  %v2200_v12 = vpop.permute.xlu0 %2199 }
 0x197   : > { %v2305_v63 = vsel %vm2282_vm7, %v2268_v51, %v2270_v53  ;;  %v2306_v36 = vsel %vm2282_vm7, %v2269_v56, %v2271_v43  ;;  %v16123_v51 = vld [vmem:[#allocation21_spill] sm:$0xff]  ;;  %v3554_v54 = vrot.slane %v10649_v29, %v16124_v4  ;;  %vm3470_vm10 = vcmp.lt.s32.totalorder %v16127_v6, %v8945_v62 }
 0x198   : > { %v10663_v28 = vsel %vm2317_vm8, %v2301_v49, %v2305_v63  ;;  %v10667_v50 = vsel %vm2317_vm8, %v2302_v38, %v2306_v36  ;;  %v3558_v56 = vrot.slane %v10649_v29, %v16123_v51  ;;  %v2220_v38 = vsel %vm10274_vm4, %v2194_v52, %v2196_v40  ;;  %v16128_v52 = vld [vmem:[#allocation19_spill] sm:$0xff] }
 0x199   : > { %v10677_v25 = vsel %vm2352_vm11, %v10521_v18, %v10663_v28  ;;  %v10683_v49 = vsel %vm2352_vm11, %v10525_v32, %v10667_v50  ;;  %v3663_v60 = vsel %vm3467_vm1, %v3554_v54, 0.0  ;;  %v2272_v4 = vsel %vm2247_vm6, %v2221_v34, %v2220_v38 }
 0x19a   : > { %16125 = vst [vmem:[#allocation94_spill] sm:$0xff] %v10677_v25  ;;  %16126 = vst [vmem:[#allocation55_spill] sm:$0xff] %v10683_v49  ;;  %v3664_v42 = vsel %vm3468_vm15, %v3558_v56, 0.0  ;;  %v2273_v51 = vsel %vm2247_vm6, %v2220_v38, %v2219_v26  ;;  %3715 = vrot.lane.b32.xlu0 %v3663_v60, %s10200_s18  ;;  %v2307_v23 = vsel %vm2282_vm7, %v2270_v53, %v2272_v4  ;;  %v2206_v25 = vpop.permute.xlu1 %2205  ;;  %v16130_v53 = vld [vmem:[#allocation17_spill] sm:$0xff]  ;;  %v2204_v56 = vpop.permute.xlu0 %2203  ;;  %v10737_v2 = vstv %s2385_s27  ;;  %s3118_s27 = sand.u32 8, %s11043_s9 }
 0x19b   : > { %3717 = vrot.lane.b32.xlu1 %v3664_v42, %s10200_s18  ;;  %v2308_v49 = vsel %vm2282_vm7, %v2271_v43, %v2273_v51  ;;  %v3566_v40 = vrot.slane %v10649_v29, %v16128_v52  ;;  %v10704_v34 = vsel %vm2317_vm8, %v2303_v22, %v2307_v23  ;;  %v16129_v42 = vld [vmem:[#allocation41_spill] sm:$0xff]  ;;  %v3562_v43 = vrot.slane %v10649_v29, %v16130_v53  ;;  %v16133_v52 = vld [vmem:[#allocation23_spill] sm:$0xff] }
 0x19c   : > { %v10708_v60 = vsel %vm2317_vm8, %v2304_v35, %v2308_v49  ;;  %vm3469_vm13 = vcmp.lt.s32.totalorder %v16129_v42, %v8945_v62  ;;  %v10718_v54 = vsel %vm2352_vm11, %v10555_v10, %v10704_v34  ;;  %v2217_v38 = vsel %vm10274_vm4, %v2200_v12, %v2202_v20  ;;  %v16132_v10 = vld [vmem:[#allocation42_spill] sm:$0xff] }
 0x19d   : > { %16131 = vst [vmem:[#allocation96_spill] sm:$0xff] %v10718_v54  ;;  %v10724_v22 = vsel %vm2352_vm11, %v10559_v1, %v10708_v60  ;;  %v3666_v35 = vsel %vm3470_vm10, %v3566_v40, 0.0  ;;  %v3665_v42 = vsel %vm3469_vm13, %v3562_v43, 0.0  ;;  %v2218_v53 = vsel %vm10274_vm4, %v2198_v41, %v2200_v12  ;;  %v16134_v43 = vld [vmem:[#allocation43_spill] sm:$0xff] }
 0x19e   : > { %vm3472_vm14 = vcmp.lt.s32.totalorder %v16132_v10, %v8945_v62  ;;  %v3574_v54 = vrot.slane %v10649_v29, %v16133_v52  ;;  %3719 = vrot.lane.b32.xlu0 %v3665_v42, %s10200_s18  ;;  %v2274_v1 = vsel %vm2247_vm6, %v2219_v26, %v2218_v53  ;;  %v2275_v40 = vsel %vm2247_vm6, %v2218_v53, %v2217_v38  ;;  %v2210_v41 = vpop.permute.xlu1 %2209  ;;  %v2208_v26 = vpop.permute.xlu0 %2207 }
 0x19f   : > { %3721 = vrot.lane.b32.xlu1 %v3666_v35, %s10200_s18  ;;  %vm3471_vm0 = vcmp.lt.s32.totalorder %v16134_v43, %v8945_v62  ;;  %v2309_v12 = vsel %vm2282_vm7, %v2272_v4, %v2274_v1  ;;  %v2310_v10 = vsel %vm2282_vm7, %v2273_v51, %v2275_v40  ;;  %v3570_v42 = vrot.slane %v10649_v29, %v16114_v44 }
 0x1a0   : > { %v3668_v35 = vsel %vm3472_vm14, %v3574_v54, 0.0  ;;  %v2344_v53 = vsel %vm2317_vm8, %v2305_v63, %v2309_v12  ;;  %v2345_v6 = vsel %vm2317_vm8, %v2306_v36, %v2310_v10  ;;  %v2215_v43 = vsel %vm10274_vm4, %v2204_v56, %v2206_v25 }
 0x1a1   : > { %v2216_v4 = vsel %vm10274_vm4, %v2202_v20, %v2204_v56  ;;  %v10764_v51 = vsel %vm2352_vm11, %v10579_v7, %v2344_v53  ;;  %v10769_v54 = vsel %vm2352_vm11, %v10583_v48, %v2345_v6  ;;  %v3667_v63 = vsel %vm3471_vm0, %v3570_v42, 0.0  ;;  %v16135_v7 = vld [vmem:[#allocation44_spill] sm:$0xff]  ;;  %v16136_v42 = vld [vmem:[#allocation45_spill] sm:$0xff] }
 0x1a2   : > { %v2276_v36 = vsel %vm2247_vm6, %v2217_v38, %v2216_v4  ;;  %3723 = vrot.lane.b32.xlu0 %v3667_v63, %s10200_s18  ;;  %v2277_v44 = vsel %vm2247_vm6, %v2216_v4, %v2215_v43  ;;  %vm3474_vm2 = vcmp.lt.s32.totalorder %v16135_v7, %v8945_v62  ;;  %v10781_v56 = vpop.permute.xlu1 %2917  ;;  %vm3473_vm3 = vcmp.lt.s32.totalorder %v16136_v42, %v8945_v62  ;;  %v10791_v4 = vpop.permute.xlu0 %2915 }
 0x1a3   : > { %3725 = vrot.lane.b32.xlu1 %v3668_v35, %s10200_s18  ;;  %v2311_v20 = vsel %vm2282_vm7, %v2274_v1, %v2276_v36  ;;  %v2312_v48 = vsel %vm2282_vm7, %v2275_v40, %v2277_v44  ;;  %v3582_v35 = vrot.slane %v10649_v29, %v16117_v30  ;;  %v2244_v40 = vsel %vm10274_vm4, %v2210_v41, %v10049_v17 }
 0x1a4   : > { %v2346_v38 = vsel %vm2317_vm8, %v2307_v23, %v2311_v20  ;;  %v2347_v1 = vsel %vm2317_vm8, %v2308_v49, %v2312_v48  ;;  %v3578_v23 = vrot.slane %v10649_v29, %v16119_v16  ;;  %vm2387_vm9 = vcmp.ne.s32.totalorder %v10737_v2, 0 }
 0x1a5   : > { %v10798_v63 = vsel %vm2352_vm11, %v10621_v37, %v2346_v38  ;;  %v10809_v42 = vsel %vm2352_vm11, %v10625_v9, %v2347_v1  ;;  %v3670_v49 = vsel %vm3474_vm2, %v3582_v35, 0.0  ;;  %v2249_v37 = vsel %vm2247_vm6, %v2244_v40, %v10336_v31 }
 0x1a6   : > { %v2213_v7 = vsel %vm10274_vm4, %v2208_v26, %v2210_v41  ;;  %v3669_v29 = vsel %vm3473_vm3, %v3578_v23, 0.0  ;;  %v2286_v17 = vsel %vm2282_vm7, %v2249_v37, %v10372_v39  ;;  %v2214_v16 = vsel %vm10274_vm4, %v2206_v25, %v2208_v26  ;;  %v10824_v35 = vpop.permute.xlu1 %2921  ;;  %v10837_v39 = vpop.permute.xlu0 %2919 }
 0x1a7   : > { %3729 = vrot.lane.b32.xlu1 %v3670_v49, %s10200_s18  ;;  %v2248_v9 = vsel %vm2247_vm6, %v2213_v7, %v2244_v40  ;;  %3727 = vrot.lane.b32.xlu0 %v3669_v29, %s10200_s18  ;;  %v2325_v31 = vsel %vm2317_vm8, %v2286_v17, %v10424_v0  ;;  %v2278_v41 = vsel %vm2247_vm6, %v2215_v43, %v2214_v16 }
 0x1a8   : > { %v2279_v23 = vsel %vm2247_vm6, %v2214_v16, %v2213_v7  ;;  %v2285_v14 = vsel %vm2282_vm7, %v2248_v9, %v10368_v8  ;;  %v10842_v25 = vsel %vm2352_vm11, %v2325_v31, %v10525_v32  ;;  %v2283_v0 = vsel %vm2282_vm7, %v2278_v41, %v2248_v9 }
 0x1a9   : > { %v2284_v43 = vsel %vm2282_vm7, %v2279_v23, %v2249_v37  ;;  %v2313_v59 = vsel %vm2282_vm7, %v2276_v36, %v2278_v41  ;;  %v2314_v16 = vsel %vm2282_vm7, %v2277_v44, %v2279_v23  ;;  %v2318_v8 = vsel %vm2317_vm8, %v2311_v20, %v2283_v0  ;;  %v16141_v23 = vld [vmem:[#allocation55_spill] sm:$0xff] }
 0x1aa   : > { %v2319_v26 = vsel %vm2317_vm8, %v2312_v48, %v2284_v43  ;;  %v2320_v32 = vsel %vm2317_vm8, %v2313_v59, %v2285_v14  ;;  %v2321_v7 = vsel %vm2317_vm8, %v2314_v16, %v2286_v17  ;;  %v2322_v40 = vsel %vm2317_vm8, %v2283_v0, %v10391_v45  ;;  %v10869_v36 = vpop.permute.xlu1 %2925  ;;  %v10881_v49 = vpop.permute.xlu0 %2923  ;;  %v16142_v0 = vld [vmem:[#allocation96_spill] sm:$0xff] }
 0x1ab   : > { %v2323_v5 = vsel %vm2317_vm8, %v2284_v43, %v10396_v33  ;;  %v2324_v44 = vsel %vm2317_vm8, %v2285_v14, %v10420_v11  ;;  %v2348_v20 = vsel %vm2317_vm8, %v2309_v12, %v2313_v59  ;;  %v2349_v48 = vsel %vm2317_vm8, %v2310_v10, %v2314_v16 }
 0x1ac   : > { %v2353_v45 = vsel %vm2352_vm11, %v10704_v34, %v2318_v8  ;;  %v2354_v33 = vsel %vm2352_vm11, %v10708_v60, %v2319_v26  ;;  %v2355_v11 = vsel %vm2352_vm11, %v2344_v53, %v2320_v32  ;;  %v2356_v37 = vsel %vm2352_vm11, %v2345_v6, %v2321_v7 }
 0x1ad   : > { %v2357_v13 = vsel %vm2352_vm11, %v2346_v38, %v2322_v40  ;;  %v2358_v10 = vsel %vm2352_vm11, %v2347_v1, %v2323_v5  ;;  %v2359_v34 = vsel %vm2352_vm11, %v2348_v20, %v2324_v44  ;;  %v2360_v60 = vsel %vm2352_vm11, %v2349_v48, %v2325_v31  ;;  %v16140_v31 = vld [vmem:[#allocation94_spill] sm:$0xff] }
 0x1ae   : > { %v2361_v12 = vsel %vm2352_vm11, %v2318_v8, %v10450_v19  ;;  %v2362_v6 = vsel %vm2352_vm11, %v2319_v26, %v10461_v24  ;;  %v2363_v53 = vsel %vm2352_vm11, %v2320_v32, %v10474_v61  ;;  %v2364_v38 = vsel %vm2352_vm11, %v2321_v7, %v10479_v55  ;;  %v10913_v29 = vpop.permute.xlu1 %2929  ;;  %v10927_v17 = vpop.permute.xlu0 %2927 }
 0x1af   : > { %v2365_v1 = vsel %vm2352_vm11, %v2322_v40, %v10509_v58  ;;  %v2366_v19 = vsel %vm2352_vm11, %v2323_v5, %v10513_v27  ;;  %16137 = vst [vmem:[#allocation97_spill] sm:$0xff] %v10913_v29  ;;  %v2367_v24 = vsel %vm2352_vm11, %v2324_v44, %v10521_v18  ;;  %v2383_v61 = vsel %vm2352_vm11, %v10663_v28, %v2348_v20 }
 0x1b0   : > { %v2384_v55 = vsel %vm2352_vm11, %v10667_v50, %v2349_v48  ;;  %v2388_v58 = vsel %vm2387_vm9, %v10569_v46, %v2353_v45  ;;  %16138 = vst [vmem:[#allocation84_spill] sm:$0xff] %v10927_v17  ;;  %v2389_v27 = vsel %vm2387_vm9, %v10575_v57, %v2354_v33  ;;  %v2390_v18 = vsel %vm2387_vm9, %v10589_v3, %v2355_v11  ;;  %v16139_v50 = vld [vmem:[#allocation102_spill] sm:$0xff] }
 0x1b1   : > { %v2391_v28 = vsel %vm2387_vm9, %v10595_v47, %v2356_v37  ;;  %v2392_v15 = vsel %vm2387_vm9, %v10633_v21, %v2357_v13  ;;  %v2393_v9 = vsel %vm2387_vm9, %v16139_v50, %v2358_v10  ;;  %v2394_v41 = vsel %vm2387_vm9, %v16140_v31, %v2359_v34 }
 0x1b2   : > { %v2395_v14 = vsel %vm2387_vm9, %v16141_v23, %v2360_v60  ;;  %v2396_v43 = vsel %vm2387_vm9, %v16142_v0, %v2361_v12  ;;  %v2397_v59 = vsel %vm2387_vm9, %v10724_v22, %v2362_v6  ;;  %v2398_v16 = vsel %vm2387_vm9, %v10764_v51, %v2363_v53  ;;  %v10965_v32 = vpop.permute.xlu1 %2933  ;;  %v10978_v20 = vpop.permute.xlu0 %2931 }
 0x1b3   : > { %v2399_v8 = vsel %vm2387_vm9, %v10769_v54, %v2364_v38  ;;  %v2400_v26 = vsel %vm2387_vm9, %v10798_v63, %v2365_v1  ;;  %16143 = vst [vmem:[#allocation117_spill] sm:$0xff] %v10965_v32  ;;  %v2401_v7 = vsel %vm2387_vm9, %v10809_v42, %v2366_v19  ;;  %v2402_v40 = vsel %vm2387_vm9, %v2383_v61, %v2367_v24 }
 0x1b4   : > { %v2403_v5 = vsel %vm2387_vm9, %v2384_v55, %v10842_v25  ;;  %v2404_v44 = vsel %vm2387_vm9, %v2353_v45, %v10569_v46  ;;  %v2405_v48 = vsel %vm2387_vm9, %v2354_v33, %v10575_v57  ;;  %v2406_v32 = vsel %vm2387_vm9, %v2355_v11, %v10589_v3 }
 0x1b5   : > { %v2407_v17 = vsel %vm2387_vm9, %v2356_v37, %v10595_v47  ;;  %v2408_v29 = vsel %vm2387_vm9, %v2357_v13, %v10633_v21  ;;  %v2409_v46 = vsel %vm2387_vm9, %v2358_v10, %v16139_v50  ;;  %v2410_v57 = vsel %vm2387_vm9, %v2359_v34, %v16140_v31 }
 0x1b6   : > { %v2411_v3 = vsel %vm2387_vm9, %v2360_v60, %v16141_v23  ;;  %v2412_v47 = vsel %vm2387_vm9, %v2361_v12, %v16142_v0  ;;  %v2413_v21 = vsel %vm2387_vm9, %v2362_v6, %v10724_v22  ;;  %v2414_v45 = vsel %vm2387_vm9, %v2363_v53, %v10764_v51  ;;  %v11016_v37 = vpop.permute.xlu1 %2937  ;;  %v11026_v34 = vpop.permute.xlu0 %2935  ;;  %v16144_v6 = vld [vmem:[#allocation57_spill] sm:$0xff] }
 0x1b7   : > { %v2415_v33 = vsel %vm2387_vm9, %v2364_v38, %v10769_v54  ;;  %v2416_v11 = vsel %vm2387_vm9, %v2365_v1, %v10798_v63  ;;  %v2417_v13 = vsel %vm2387_vm9, %v2366_v19, %v10809_v42  ;;  %v2418_v22 = vsel %vm2387_vm9, %v2367_v24, %v2383_v61 }
 0x1b8   : > { %v2419_v51 = vsel %vm2387_vm9, %v10842_v25, %v2384_v55  ;;  %v2452_v10 = vcombine.low %v2388_v58, %v2389_v27  ;;  %v2453_v54 = vcombine.low %v2390_v18, %v2391_v28  ;;  %v2454_v60 = vcombine.low %v2392_v15, %v2393_v9 }
 0x1b9   : > { %v2455_v12 = vcombine.low %v2394_v41, %v2395_v14  ;;  %v2501_v63 = vcombine.low %v2396_v43, %v2397_v59  ;;  %v2502_v38 = vcombine.low %v2398_v16, %v2399_v8  ;;  %v2503_v1 = vcombine.low %v2400_v26, %v2401_v7 }
 0x1ba   : > { %v2462_v53 = vrot.slane %v2452_v10, %v16144_v6  ;;  %v2504_v50 = vcombine.low %v2402_v40, %v2403_v5  ;;  %v2469_v42 = vrot.slane %v2453_v54, %v16144_v6  ;;  %v2476_v19 = vrot.slane %v2454_v60, %v16144_v6  ;;  %v11033_v25 = vpop.permute.xlu1 %2941  ;;  %v11038_v18 = vpop.permute.xlu0 %2939  ;;  %v7096_v40 = vld [vmem:[%s7550_s14 + $0xc4] ss:$8 sm:$0xf] }
 0x1bb   : > { %v2483_v24 = vrot.slane %v2455_v12, %v16144_v6  ;;  %v2511_v2 = vrot.slane %v2501_v63, %v16144_v6  ;;  %v2518_v61 = vrot.slane %v2502_v38, %v16144_v6  ;;  %v2525_v55 = vrot.slane %v2503_v1, %v16144_v6  ;;  %v7097_v5 = vld [vmem:[%s7550_s14 + $0xc4] ss:$8 sm:$0xf0] }
 0x1bc   : > { %v2532_v58 = vrot.slane %v2504_v50, %v16144_v6  ;;  %v2550_v27 = vcombine.low %v2404_v44, %v2405_v48  ;;  %v2484_v28 = vcombine.low %v2462_v53, %v2469_v42  ;;  %v2551_v9 = vcombine.low %v2406_v32, %v2407_v17  ;;  %v16147_v50 = vld [vmem:[#allocation21_spill] sm:$0xff] }
 0x1bd   : > { %v2485_v15 = vcombine.low %v2476_v19, %v2483_v24  ;;  %v2552_v31 = vcombine.low %v2408_v29, %v2409_v46  ;;  %v2533_v41 = vcombine.low %v2511_v2, %v2518_v61  ;;  %v2553_v14 = vcombine.low %v2410_v57, %v2411_v3  ;;  %v16148_v19 = vld [vmem:[#allocation15_spill] sm:$0xff] }
 0x1be   : > { %v2534_v23 = vcombine.low %v2525_v55, %v2532_v58  ;;  %v2560_v0 = vrot.slane %v2550_v27, %v16144_v6  ;;  %v2492_v43 = vrot.slane %v2484_v28, %v16144_v6  ;;  %v2567_v16 = vrot.slane %v2551_v9, %v16144_v6  ;;  %v11049_v8 = vpop.permute.xlu1 %2945  ;;  %v11056_v44 = vpop.permute.xlu0 %2943  ;;  %v16149_v58 = vld [vmem:[#allocation48_spill] sm:$0xff]  ;;  %v16150_v9 = vld [vmem:[#allocation19_spill] sm:$0xff] }
 0x1bf   : > { %v2499_v59 = vrot.slane %v2485_v15, %v16144_v6  ;;  %v2574_v17 = vrot.slane %v2552_v31, %v16144_v6  ;;  %v2541_v29 = vrot.slane %v2533_v41, %v16144_v6  ;;  %v2581_v32 = vrot.slane %v2553_v14, %v16144_v6  ;;  %v16152_v14 = vld [vmem:[#allocation17_spill] sm:$0xff] }
 0x1c0   : > { %v2548_v26 = vrot.slane %v2534_v23, %v16144_v6  ;;  %v2599_v7 = vcombine.low %v2412_v47, %v2413_v21  ;;  %v2582_v46 = vcombine.low %v2560_v0, %v2567_v16  ;;  %v2600_v57 = vcombine.low %v2414_v45, %v2415_v33  ;;  %v16151_v23 = vld [vmem:[#allocation49_spill] sm:$0xff] }
 0x1c1   : > { %v2500_v48 = vcombine.low %v2492_v43, %v2499_v59  ;;  %v2601_v3 = vcombine.low %v2416_v11, %v2417_v13  ;;  %v2583_v54 = vcombine.low %v2574_v17, %v2581_v32  ;;  %v2602_v60 = vcombine.low %v2418_v22, %v2419_v51  ;;  %v16145_v13 = vld [vmem:[#allocation46_spill] sm:$0xff]  ;;  %v16146_v22 = vld [vmem:[#allocation47_spill] sm:$0xff] }
 0x1c2   : > { %v2549_v10 = vcombine.low %v2541_v29, %v2548_v26  ;;  %v2609_v12 = vrot.slane %v2599_v7, %v16144_v6  ;;  %v2590_v47 = vrot.slane %v2582_v46, %v16144_v6  ;;  %v2616_v21 = vrot.slane %v2600_v57, %v16144_v6  ;;  %v11068_v45 = vpop.permute.xlu1 %2949  ;;  %v11078_v51 = vpop.permute.xlu0 %2947  ;;  %v16153_v17 = vld [vmem:[#allocation14_spill] sm:$0xff]  ;;  %v16157_v46 = vld [vmem:[#allocation51_spill] sm:$0xff]  ;;  %v16158_v57 = vld [vmem:[#allocation25_spill] sm:$0xff] }
 0x1c3   : > { %v2623_v63 = vrot.slane %v2601_v3, %v16144_v6  ;;  %7066 = vst [vmem:[%s9550_s11 + $0x2] ss:$8 sm:$0xf] %v2500_v48  ;;  %7067 = vst [vmem:[%s9550_s11 + $0x2] ss:$8 sm:$0xf0] %v2500_v48  ;;  %v11065_v53 = vor.u32 %v7097_v5, %v7096_v40  ;;  %v2597_v33 = vrot.slane %v2583_v54, %v16144_v6  ;;  %v11080_v38 = vstv %s3013_s30 }
 0x1c4   : > { %v2630_v11 = vrot.slane %v2602_v60, %v16144_v6  ;;  %7068 = vst [vmem:[%s9550_s11 + $0x42] ss:$8 sm:$0xf] %v2549_v10  ;;  %7069 = vst [vmem:[%s9550_s11 + $0x42] ss:$8 sm:$0xf0] %v2549_v10  ;;  %vm3476_vm4 = vcmp.lt.s32.totalorder %v16145_v13, %v8945_v62  ;;  %vm3475_vm6 = vcmp.lt.s32.totalorder %v16146_v22, %v8945_v62  ;;  %v2979_v55 = vstv %s9418_s17 }
 0x1c5   : > { %v2631_v1 = vcombine.low %v2609_v12, %v2616_v21  ;;  %v3590_v42 = vrot.slane %v11065_v53, %v16147_v50  ;;  %v3586_v24 = vrot.slane %v11065_v53, %v16148_v19  ;;  %v2598_v2 = vcombine.low %v2590_v47, %v2597_v33  ;;  %v16156_v40 = vld [vmem:[#allocation50_spill] sm:$0xff]  ;;  %s3083_s17 = sand.u32 4, %s11043_s9  ;;  %s3153_s30 = sand.u32 16, %s11043_s9 }
 0x1c6   : > { %v2632_v61 = vcombine.low %v2623_v63, %v2630_v11  ;;  %vm3478_vm7 = vcmp.lt.s32.totalorder %v16149_v58, %v8945_v62  ;;  %v3598_v31 = vrot.slane %v11065_v53, %v16150_v9  ;;  %vm3477_vm8 = vcmp.lt.s32.totalorder %v16151_v23, %v8945_v62  ;;  %v11106_v43 = vpop.permute.xlu1 %2953  ;;  %v11108_v59 = vpop.permute.xlu0 %2951  ;;  %v7106_v10 = vld [vmem:[%s7550_s14 + $0x5] ss:$8 sm:$0xf]  ;;  %s4448_s9 = sand.u32 4095, %s11125_s10  }
 0x1c7   : > { %v2639_v27 = vrot.slane %v2631_v1, %v16144_v6  ;;  %v3672_v28 = vsel %vm3476_vm4, %v3590_v42, 0.0  ;;  %v3671_v15 = vsel %vm3475_vm6, %v3586_v24, 0.0  ;;  %7070 = vst [vmem:[%s9550_s11 + $0x82] ss:$8 sm:$0xf] %v2598_v2  ;;  %v3594_v0 = vrot.slane %v11065_v53, %v16152_v14  ;;  %v16159_v11 = vld [vmem:[#allocation52_spill] sm:$0xff] }
 0x1c8   : > { %v2646_v41 = vrot.slane %v2632_v61, %v16144_v6  ;;  %7071 = vst [vmem:[%s9550_s11 + $0x82] ss:$8 sm:$0xf0] %v2598_v2  ;;  %3733 = vrot.lane.b32.xlu1 %v3672_v28, %s10200_s18  ;;  %3731 = vrot.lane.b32.xlu0 %v3671_v15, %s10200_s18  ;;  %v11110_v16 = vstv %s3048_s7  ;;  %vm11113_vm11 = vcmp.lt.s32.totalorder %v16153_v17, %v2979_v55  ;;  %v3674_v26 = vsel %vm3478_vm7, %v3598_v31, 0.0  ;;  %v16161_v61 = vld [vmem:[#allocation29_spill] sm:$0xff]  ;;  %s11261_s19 = sand.u32 127, %s4448_s9  }
 0x1c9   : > { %v3673_v7 = vsel %vm3477_vm8, %v3594_v0, 0.0  ;;  %vm3015_vm12 = vcmp.ne.s32.totalorder %v11080_v38, 0  ;;  %vm3480_vm5 = vcmp.lt.s32.totalorder %v16156_v40, %v8945_v62  ;;  %v3010_v5 = vsel %vm11113_vm11, %v10781_v56, %v10837_v39  ;;  %v7107_v47 = vld [vmem:[%s7550_s14 + $0x5] ss:$8 sm:$0xf0]  ;;  %s12000_s7 = sshrl.u32 %s3680_s12, 7 }
 0x1ca   : > { %v2647_v32 = vcombine.low %v2639_v27, %v2646_v41  ;;  %v3606_v48 = vrot.slane %v11065_v53, %v16133_v52  ;;  %vm3479_vm15 = vcmp.lt.s32.totalorder %v16157_v46, %v8945_v62  ;;  %v3602_v3 = vrot.slane %v11065_v53, %v16158_v57  ;;  %v11180_v1 = vpop.permute.xlu1 %2957  ;;  %v11182_v42 = vpop.permute.xlu0 %2955  ;;  %v16162_v31 = vld [vmem:[#allocation97_spill] sm:$0xff]  ;;  %v16163_v41 = vld [vmem:[#allocation84_spill] sm:$0xff]  ;;  %v16173_v22 = vld [vmem:[#allocation26_spill] sm:$0xff]  ;;  %s3781_s12 = sand.u32 1, %s12000_s7 }
 0x1cb   : > { %v11144_v54 = vsel %vm11113_vm11, %v10791_v4, %v10781_v56  ;;  %vm3050_vm1 = vcmp.ne.s32.totalorder %v11110_v16, 0  ;;  %v3007_v60 = vsel %vm11113_vm11, %v10881_v49, %v10869_v36  ;;  %v3008_v12 = vsel %vm11113_vm11, %v10824_v35, %v10881_v49 }
 0x1cc   : > { %7072 = vst [vmem:[%s9550_s11 + $0xc2] ss:$8 sm:$0xf] %v2647_v32  ;;  %7073 = vst [vmem:[%s9550_s11 + $0xc2] ss:$8 sm:$0xf0] %v2647_v32  ;;  %3737 = vrot.lane.b32.xlu1 %v3674_v26, %s10200_s18  ;;  %3735 = vrot.lane.b32.xlu0 %v3673_v7, %s10200_s18  ;;  %v3009_v56 = vsel %vm11113_vm11, %v10837_v39, %v10824_v35  ;;  %v3614_v33 = vrot.slane %v11065_v53, %v16117_v30 }
 0x1cd   : > { %v3676_v21 = vsel %vm3480_vm5, %v3606_v48, 0.0  ;;  %v3675_v63 = vsel %vm3479_vm15, %v3602_v3, 0.0  ;;  %v11171_v49 = vsel %vm3015_vm12, %v11144_v54, %v3010_v5  ;;  %vm3482_vm10 = vcmp.lt.s32.totalorder %v16159_v11, %v8945_v62  ;;  %v16160_v35 = vld [vmem:[#allocation53_spill] sm:$0xff]  ;;  %v16164_v7 = vld [vmem:[#allocation20_spill] sm:$0xff] }
 0x1ce   : > { %vm3481_vm13 = vcmp.lt.s32.totalorder %v16160_v35, %v8945_v62  ;;  %v11178_v39 = vstv %s11092_s29  ;;  %v3020_v24 = vsel %vm3015_vm12, %v3009_v56, %v3008_v12  ;;  %v3021_v2 = vsel %vm3015_vm12, %v3008_v12, %v3007_v60  ;;  %s3816_s29 = sand.u32 2, %s12000_s7 }
 0x1cf   : > { %v3610_v55 = vrot.slane %v11065_v53, %v16161_v61  ;;  %v11192_v27 = vor.u32 %v7107_v47, %v7106_v10  ;;  %v11194_v28 = vstv %s3083_s17  ;;  %v11198_v15 = vsel %vm3015_vm12, %v3010_v5, %v3009_v56  ;;  %s12081_s17 = sld [smem:[#allocation2 + %s4968_s8]] }
 0x1d0   : > { %3741 = vrot.lane.b32.xlu1 %v3676_v21, %s10200_s18  ;;  %3739 = vrot.lane.b32.xlu0 %v3675_v63, %s10200_s18  ;;  %v3005_v0 = vsel %vm11113_vm11, %v16163_v41, %v16162_v31  ;;  %v3006_v53 = vsel %vm11113_vm11, %v10869_v36, %v16163_v41  ;;  %v3678_v26 = vsel %vm3482_vm10, %v3614_v33, 0.0  ;;  %vm4220_vm14 = vcmp.lt.s32.totalorder %v16164_v7, %v11178_v39  ;;  %v16165_v21 = vld [vmem:[#allocation117_spill] sm:$0xff]  ;;  %v16166_v33 = vld [vmem:[#allocation18_spill] sm:$0xff]  ;;  %v11257_v41 = vpop.permute.xlu0 %2959  ;;  %v16167_v7 = vld [vmem:[#allocation16_spill] sm:$0xff] }
 0x1d1   : > { %v3677_v32 = vsel %vm3481_vm13, %v3610_v55, 0.0  ;;  %v4262_v5 = vrot.slane %v11192_v27, %v16147_v50  ;;  %v11220_v48 = vstv %s3118_s27  ;;  %v11222_v3 = vstv %s3153_s30  ;;  %v11255_v55 = vpop.permute.xlu1 %2961  ;;  %s3851_s27 = sand.u32 4, %s12000_s7  ;;  %s3886_s30 = sand.u32 8, %s12000_s7 }
 0x1d2   : > { %v11227_v36 = vsel %vm3050_vm1, %v11171_v49, %v3020_v24  ;;  %v11232_v62 = vsel %vm3050_vm1, %v11198_v15, %v3021_v2  ;;  %v3022_v10 = vsel %vm3015_vm12, %v3007_v60, %v3006_v53  ;;  %v3023_v12 = vsel %vm3015_vm12, %v3006_v53, %v3005_v0 }
 0x1d3   : > { %vm4219_vm0 = vcmp.lt.s32.totalorder %v16153_v17, %v11178_v39  ;;  %v4258_v47 = vrot.slane %v11192_v27, %v16148_v19  ;;  %v4416_v56 = vsel %vm4220_vm14, %v4262_v5, 0.0  ;;  %v3003_v63 = vsel %vm11113_vm11, %v10978_v20, %v16165_v21  ;;  %v7108_v17 = vld [vmem:[%s7550_s14 + $0x45] ss:$8 sm:$0xf] }
 0x1d4   : > { %3745 = vrot.lane.b32.xlu1 %v3678_v26, %s10200_s18  ;;  %3743 = vrot.lane.b32.xlu0 %v3677_v32, %s10200_s18  ;;  %v3004_v60 = vsel %vm11113_vm11, %v16162_v31, %v10978_v20  ;;  %vm4222_vm2 = vcmp.lt.s32.totalorder %v16166_v33, %v11178_v39  ;;  %v4270_v20 = vrot.slane %v11192_v27, %v16150_v9  ;;  %vm3085_vm9 = vcmp.ne.s32.totalorder %v11194_v28, 0  ;;  %v11324_v33 = vpop.permute.xlu0 %2963 }
 0x1d5   : > { %v4415_v53 = vsel %vm4219_vm0, %v4258_v47, 0.0  ;;  %v3024_v26 = vsel %vm3015_vm12, %v3005_v0, %v3004_v60  ;;  %v3025_v32 = vsel %vm3015_vm12, %v3004_v60, %v3003_v63  ;;  %v11271_v31 = vsel %vm3050_vm1, %v3020_v24, %v3022_v10 }
 0x1d6   : > { %v11275_v5 = vsel %vm3050_vm1, %v3021_v2, %v3023_v12  ;;  %vm4221_vm3 = vcmp.lt.s32.totalorder %v16167_v7, %v11178_v39  ;;  %v4266_v0 = vrot.slane %v11192_v27, %v16152_v14  ;;  %v3059_v47 = vsel %vm3050_vm1, %v3022_v10, %v3024_v26 }
 0x1d7   : > { %v3060_v60 = vsel %vm3050_vm1, %v3023_v12, %v3025_v32  ;;  %v3001_v24 = vsel %vm11113_vm11, %v11026_v34, %v11016_v37  ;;  %v4418_v2 = vsel %vm4222_vm2, %v4270_v20, 0.0  ;;  %v3002_v10 = vsel %vm11113_vm11, %v16165_v21, %v11026_v34 }
 0x1d8   : > { %4453 = vrot.lane.b32.xlu1 %v4416_v56, %s11261_s19  ;;  %4451 = vrot.lane.b32.xlu0 %v4415_v53, %s11261_s19  ;;  %v4417_v7 = vsel %vm4221_vm3, %v4266_v0, 0.0  ;;  %v4278_v12 = vrot.slane %v11192_v27, %v16133_v52  ;;  %v3026_v35 = vsel %vm3015_vm12, %v3003_v63, %v3002_v10  ;;  %v3027_v56 = vsel %vm3015_vm12, %v3002_v10, %v3001_v24  ;;  %v16168_v53 = vld [vmem:[#allocation22_spill] sm:$0xff]  ;;  %v16170_v63 = vld [vmem:[#allocation24_spill] sm:$0xff]  ;;  %v11322_v10 = vpop.permute.xlu1 %2965  ;;  %v11398_v6 = vpop.permute.xlu0 %2967 }
 0x1d9   : > { %vm4224_vm4 = vcmp.lt.s32.totalorder %v16168_v53, %v11178_v39  ;;  %v4274_v20 = vrot.slane %v11192_v27, %v16158_v57  ;;  %v11312_v34 = vsel %vm3085_vm9, %v11227_v36, %v3059_v47  ;;  %v3061_v21 = vsel %vm3050_vm1, %v3024_v26, %v3026_v35 }
 0x1da   : > { %16169 = vst [vmem:[#allocation118_spill] sm:$0xff] %v11312_v34  ;;  %vm4223_vm6 = vcmp.lt.s32.totalorder %v16170_v63, %v11178_v39  ;;  %v2999_v0 = vsel %vm11113_vm11, %v11038_v18, %v11033_v25  ;;  %v11329_v11 = vsel %vm3085_vm9, %v11232_v62, %v3060_v60  ;;  %v3062_v26 = vsel %vm3050_vm1, %v3025_v32, %v3027_v56 }
 0x1db   : > { %16171 = vst [vmem:[#allocation98_spill] sm:$0xff] %v11329_v11  ;;  %v11336_v46 = vsel %vm3085_vm9, %v11271_v31, %v3061_v21  ;;  %v3000_v40 = vsel %vm11113_vm11, %v11016_v37, %v11038_v18  ;;  %vm3120_vm7 = vcmp.ne.s32.totalorder %v11220_v48, 0  ;;  %v4420_v23 = vsel %vm4224_vm4, %v4278_v12, 0.0  ;;  %v7109_v37 = vld [vmem:[%s7550_s14 + $0x45] ss:$8 sm:$0xf0] }
 0x1dc   : > { %16172 = vst [vmem:[#allocation99_spill] sm:$0xff] %v11336_v46  ;;  %4457 = vrot.lane.b32.xlu1 %v4418_v2, %s11261_s19  ;;  %4455 = vrot.lane.b32.xlu0 %v4417_v7, %s11261_s19  ;;  %v3028_v32 = vsel %vm3015_vm12, %v3001_v24, %v3000_v40  ;;  %v3029_v58 = vsel %vm3015_vm12, %v3000_v40, %v2999_v0  ;;  %v4419_v18 = vsel %vm4223_vm6, %v4274_v20, 0.0  ;;  %v16174_v24 = vld [vmem:[#allocation28_spill] sm:$0xff] }
 0x1dd   : > { %vm4226_vm8 = vcmp.lt.s32.totalorder %v16173_v22, %v11178_v39  ;;  %v3063_v7 = vsel %vm3050_vm1, %v3026_v35, %v3028_v32  ;;  %v4286_v2 = vrot.slane %v11192_v27, %v16117_v30  ;;  %vm4225_vm5 = vcmp.lt.s32.totalorder %v16174_v24, %v11178_v39 }
 0x1de   : > { %v11368_v40 = vsel %vm3085_vm9, %v11275_v5, %v3062_v26  ;;  %v3064_v12 = vsel %vm3050_vm1, %v3027_v56, %v3029_v58  ;;  %v4282_v20 = vrot.slane %v11192_v27, %v16161_v61  ;;  %v2997_v35 = vsel %vm11113_vm11, %v11056_v44, %v11049_v8 }
 0x1df   : > { %16175 = vst [vmem:[#allocation100_spill] sm:$0xff] %v11368_v40  ;;  %v11380_v22 = vsel %vm3085_vm9, %v3059_v47, %v3063_v7  ;;  %v4422_v24 = vsel %vm4226_vm8, %v4286_v2, 0.0  ;;  %v2998_v63 = vsel %vm11113_vm11, %v11033_v25, %v11056_v44  ;;  %v11386_v53 = vor.u32 %v7109_v37, %v7108_v17  ;;  %v16177_v47 = vld [vmem:[#allocation30_spill] sm:$0xff]  ;;  %v11396_v2 = vpop.permute.xlu1 %2969 }
 0x1e0   : > { %16176 = vst [vmem:[#allocation67_spill] sm:$0xff] %v11380_v22  ;;  %4461 = vrot.lane.b32.xlu1 %v4420_v23, %s11261_s19  ;;  %4459 = vrot.lane.b32.xlu0 %v4419_v18, %s11261_s19  ;;  %v4421_v27 = vsel %vm4225_vm5, %v4282_v20, 0.0  ;;  %v3030_v56 = vsel %vm3015_vm12, %v2999_v0, %v2998_v63  ;;  %v3031_v13 = vsel %vm3015_vm12, %v2998_v63, %v2997_v35  ;;  %v16178_v23 = vld [vmem:[#allocation31_spill] sm:$0xff] }
 0x1e1   : > { %vm4228_vm15 = vcmp.lt.s32.totalorder %v16177_v47, %v11178_v39  ;;  %v3065_v25 = vsel %vm3050_vm1, %v3028_v32, %v3030_v56  ;;  %v4294_v44 = vrot.slane %v11386_v53, %v16147_v50  ;;  %vm4227_vm10 = vcmp.lt.s32.totalorder %v16178_v23, %v11178_v39 }
 0x1e2   : > { %v4290_v17 = vrot.slane %v11386_v53, %v16148_v19  ;;  %v11410_v63 = vsel %vm3085_vm9, %v3060_v60, %v3064_v12  ;;  %v3066_v0 = vsel %vm3050_vm1, %v3029_v58, %v3031_v13  ;;  %v2995_v32 = vsel %vm11113_vm11, %v11078_v51, %v11068_v45 }
 0x1e3   : > { %16179 = vst [vmem:[#allocation60_spill] sm:$0xff] %v11410_v63  ;;  %v2996_v37 = vsel %vm11113_vm11, %v11049_v8, %v11078_v51  ;;  %v11424_v18 = vsel %vm3085_vm9, %v3061_v21, %v3065_v25  ;;  %v4424_v20 = vsel %vm4228_vm15, %v4294_v44, 0.0  ;;  %v16180_v51 = vld [vmem:[#allocation32_spill] sm:$0xff]  ;;  %v11466_v44 = vpop.permute.xlu1 %2973 }
 0x1e4   : > { %v3032_v60 = vsel %vm3015_vm12, %v2997_v35, %v2996_v37  ;;  %v3033_v58 = vsel %vm3015_vm12, %v2996_v37, %v2995_v32  ;;  %4465 = vrot.lane.b32.xlu1 %v4422_v24, %s11261_s19  ;;  %4463 = vrot.lane.b32.xlu0 %v4421_v27, %s11261_s19  ;;  %v4423_v23 = vsel %vm4227_vm10, %v4290_v17, 0.0  ;;  %vm4230_vm13 = vcmp.lt.s32.totalorder %v16180_v51, %v11178_v39  ;;  %v16181_v27 = vld [vmem:[#allocation33_spill] sm:$0xff]  ;;  %v11468_v17 = vpop.permute.xlu0 %2971 }
 0x1e5   : > { %v3067_v47 = vsel %vm3050_vm1, %v3030_v56, %v3032_v60  ;;  %v3068_v8 = vsel %vm3050_vm1, %v3031_v13, %v3033_v58  ;;  %v4302_v35 = vrot.slane %v11386_v53, %v16150_v9  ;;  %vm4229_vm14 = vcmp.lt.s32.totalorder %v16181_v27, %v11178_v39 }
 0x1e6   : > { %v11440_v21 = vsel %vm3085_vm9, %v3063_v7, %v3067_v47  ;;  %v11444_v24 = vsel %vm3085_vm9, %v3064_v12, %v3068_v8  ;;  %v11452_v13 = vsel %vm3085_vm9, %v3062_v26, %v3066_v0  ;;  %v4298_v12 = vrot.slane %v11386_v53, %v16152_v14 }
 0x1e7   : > { %v11458_v7 = vsel %vm3120_vm7, %v11312_v34, %v11440_v21  ;;  %v2993_v56 = vsel %vm11113_vm11, %v11108_v59, %v11106_v43  ;;  %v11474_v26 = vsel %vm3120_vm7, %v11329_v11, %v11444_v24  ;;  %v4426_v37 = vsel %vm4230_vm13, %v4302_v35, 0.0  ;;  %v16184_v35 = vld [vmem:[#allocation34_spill] sm:$0xff] }
 0x1e8   : > { %16182 = vst [vmem:[#allocation68_spill] sm:$0xff] %v11458_v7  ;;  %16183 = vst [vmem:[#allocation69_spill] sm:$0xff] %v11474_v26  ;;  %v2994_v27 = vsel %vm11113_vm11, %v11068_v45, %v11108_v59  ;;  %v4310_v51 = vrot.slane %v11386_v53, %v16133_v52  ;;  %4469 = vrot.lane.b32.xlu1 %v4424_v20, %s11261_s19  ;;  %4467 = vrot.lane.b32.xlu0 %v4423_v23, %s11261_s19  ;;  %v4425_v7 = vsel %vm4229_vm14, %v4298_v12, 0.0  ;;  %v16185_v23 = vld [vmem:[#allocation35_spill] sm:$0xff] }
 0x1e9   : > { %v3034_v34 = vsel %vm3015_vm12, %v2995_v32, %v2994_v27  ;;  %v3035_v26 = vsel %vm3015_vm12, %v2994_v27, %v2993_v56  ;;  %vm4232_vm0 = vcmp.lt.s32.totalorder %v16184_v35, %v11178_v39  ;;  %vm4231_vm2 = vcmp.lt.s32.totalorder %v16185_v23, %v11178_v39  ;;  %v7110_v35 = vld [vmem:[%s7550_s14 + $0x85] ss:$8 sm:$0xf] }
 0x1ea   : > { %v3069_v45 = vsel %vm3050_vm1, %v3032_v60, %v3034_v34  ;;  %v3070_v59 = vsel %vm3050_vm1, %v3033_v58, %v3035_v26  ;;  %v4306_v32 = vrot.slane %v11386_v53, %v16158_v57  ;;  %v2991_v60 = vsel %vm11113_vm11, %v11182_v42, %v11180_v1 }
 0x1eb   : > { %v11500_v20 = vsel %vm3085_vm9, %v3065_v25, %v3069_v45  ;;  %v11504_v27 = vsel %vm3085_vm9, %v3066_v0, %v3070_v59  ;;  %v2992_v58 = vsel %vm11113_vm11, %v11106_v43, %v11182_v42  ;;  %v4428_v12 = vsel %vm4232_vm0, %v4310_v51, 0.0  ;;  %v11538_v51 = vpop.permute.xlu1 %2977 }
 0x1ec   : > { %v11518_v25 = vsel %vm3120_vm7, %v11336_v46, %v11500_v20  ;;  %v11524_v0 = vsel %vm3120_vm7, %v11368_v40, %v11504_v27  ;;  %v3036_v23 = vsel %vm3015_vm12, %v2993_v56, %v2992_v58  ;;  %4473 = vrot.lane.b32.xlu1 %v4426_v37, %s11261_s19  ;;  %4471 = vrot.lane.b32.xlu0 %v4425_v7, %s11261_s19  ;;  %v4427_v43 = vsel %vm4231_vm2, %v4306_v32, 0.0  ;;  %v16188_v46 = vld [vmem:[#allocation36_spill] sm:$0xff]  ;;  %v16189_v37 = vld [vmem:[#allocation37_spill] sm:$0xff] }
 0x1ed   : > { %16186 = vst [vmem:[#allocation61_spill] sm:$0xff] %v11518_v25  ;;  %16187 = vst [vmem:[#allocation70_spill] sm:$0xff] %v11524_v0  ;;  %v3037_v42 = vsel %vm3015_vm12, %v2992_v58, %v2991_v60  ;;  %v3071_v25 = vsel %vm3050_vm1, %v3034_v34, %v3036_v23  ;;  %vm4234_vm3 = vcmp.lt.s32.totalorder %v16188_v46, %v11178_v39  ;;  %v7111_v40 = vld [vmem:[%s7550_s14 + $0x85] ss:$8 sm:$0xf0]  ;;  %v11540_v0 = vpop.permute.xlu0 %2975 }
 0x1ee   : > { %v3072_v7 = vsel %vm3050_vm1, %v3035_v26, %v3037_v42  ;;  %v11546_v56 = vsel %vm3085_vm9, %v3067_v47, %v3071_v25  ;;  %v4318_v34 = vrot.slane %v11386_v53, %v16117_v30  ;;  %vm4233_vm4 = vcmp.lt.s32.totalorder %v16189_v37, %v11178_v39 }
 0x1ef   : > { %v11554_v32 = vsel %vm3085_vm9, %v3068_v8, %v3072_v7  ;;  %v11560_v58 = vsel %vm3120_vm7, %v11380_v22, %v11546_v56  ;;  %v4314_v47 = vrot.slane %v11386_v53, %v16161_v61  ;;  %v2989_v26 = vsel %vm11113_vm11, %v11257_v41, %v11255_v55 }
 0x1f0   : > { %16190 = vst [vmem:[#allocation104_spill] sm:$0xff] %v11560_v58  ;;  %v11572_v8 = vsel %vm3120_vm7, %v11410_v63, %v11554_v32  ;;  %v4430_v37 = vsel %vm4234_vm3, %v4318_v34, 0.0  ;;  %v2990_v46 = vsel %vm11113_vm11, %v11180_v1, %v11257_v41  ;;  %v11578_v58 = vor.u32 %v7111_v40, %v7110_v35  ;;  %4477 = vrot.lane.b32.xlu1 %v4428_v12, %s11261_s19  ;;  %v16191_v63 = vld [vmem:[#allocation38_spill] sm:$0xff]  ;;  %v16192_v40 = vld [vmem:[#allocation39_spill] sm:$0xff]  ;;  %v11610_v12 = vpop.permute.xlu1 %3685 }
 0x1f1   : > { %4475 = vrot.lane.b32.xlu0 %v4427_v43, %s11261_s19  ;;  %v4429_v53 = vsel %vm4233_vm4, %v4314_v47, 0.0  ;;  %v3038_v22 = vsel %vm3015_vm12, %v2991_v60, %v2990_v46  ;;  %v3039_v11 = vsel %vm3015_vm12, %v2990_v46, %v2989_v26  ;;  %vm4236_vm6 = vcmp.lt.s32.totalorder %v16191_v63, %v11178_v39  ;;  %16193 = vst [vmem:[#allocation62_spill] sm:$0xff] %v11610_v12  ;;  %v11612_v43 = vpop.permute.xlu0 %3683  ;;  %v16195_v12 = vld [vmem:[#allocation40_spill] sm:$0xff] }
 0x1f2   : > { %v3073_v34 = vsel %vm3050_vm1, %v3036_v23, %v3038_v22  ;;  %v3074_v1 = vsel %vm3050_vm1, %v3037_v42, %v3039_v11  ;;  %v4326_v41 = vrot.slane %v11578_v58, %v16147_v50  ;;  %vm4235_vm8 = vcmp.lt.s32.totalorder %v16192_v40, %v11178_v39  ;;  %16194 = vst [vmem:[#allocation105_spill] sm:$0xff] %v11612_v43 }
 0x1f3   : > { %v11598_v46 = vsel %vm3085_vm9, %v3069_v45, %v3073_v34  ;;  %v11602_v35 = vsel %vm3085_vm9, %v3070_v59, %v3074_v1  ;;  %v4322_v23 = vrot.slane %v11578_v58, %v16148_v19  ;;  %v2987_v60 = vsel %vm11113_vm11, %v11324_v33, %v11322_v10 }
 0x1f4   : > { %v11618_v45 = vsel %vm3120_vm7, %v11424_v18, %v11598_v46  ;;  %v11624_v59 = vsel %vm3120_vm7, %v11452_v13, %v11602_v35  ;;  %v4432_v42 = vsel %vm4236_vm6, %v4326_v41, 0.0  ;;  %v2988_v47 = vsel %vm11113_vm11, %v11255_v55, %v11324_v33  ;;  %4481 = vrot.lane.b32.xlu1 %v4430_v37, %s11261_s19  ;;  %v16196_v37 = vld [vmem:[#allocation41_spill] sm:$0xff] }
 0x1f5   : > { %4479 = vrot.lane.b32.xlu0 %v4429_v53, %s11261_s19  ;;  %v4431_v40 = vsel %vm4235_vm8, %v4322_v23, 0.0  ;;  %v3040_v63 = vsel %vm3015_vm12, %v2989_v26, %v2988_v47  ;;  %v3041_v43 = vsel %vm3015_vm12, %v2988_v47, %v2987_v60  ;;  %vm4238_vm5 = vcmp.lt.s32.totalorder %v16195_v12, %v11178_v39 }
 0x1f6   : > { %v3075_v41 = vsel %vm3050_vm1, %v3038_v22, %v3040_v63  ;;  %v3076_v33 = vsel %vm3050_vm1, %v3039_v11, %v3041_v43  ;;  %v4334_v55 = vrot.slane %v11578_v58, %v16150_v9  ;;  %vm4237_vm15 = vcmp.lt.s32.totalorder %v16196_v37, %v11178_v39 }
 0x1f7   : > { %v11648_v26 = vsel %vm3085_vm9, %v3071_v25, %v3075_v41  ;;  %v11652_v53 = vsel %vm3085_vm9, %v3072_v7, %v3076_v33  ;;  %v4330_v22 = vrot.slane %v11578_v58, %v16152_v14  ;;  %v2985_v11 = vsel %vm11113_vm11, %v11398_v6, %v11396_v2  ;;  %v16197_v14 = vld [vmem:[#allocation42_spill] sm:$0xff] }
 0x1f8   : > { %v11664_v23 = vsel %vm3120_vm7, %v11440_v21, %v11648_v26  ;;  %v11670_v25 = vsel %vm3120_vm7, %v11444_v24, %v11652_v53  ;;  %v4434_v7 = vsel %vm4238_vm5, %v4334_v55, 0.0  ;;  %v2986_v47 = vsel %vm11113_vm11, %v11322_v10, %v11398_v6  ;;  %4485 = vrot.lane.b32.xlu1 %v4432_v42, %s11261_s19  ;;  %v11684_v24 = vpop.permute.xlu1 %3689  ;;  %v11686_v55 = vpop.permute.xlu0 %3687 }
 0x1f9   : > { %4483 = vrot.lane.b32.xlu0 %v4431_v40, %s11261_s19  ;;  %v4433_v37 = vsel %vm4237_vm15, %v4330_v22, 0.0  ;;  %v3042_v12 = vsel %vm3015_vm12, %v2987_v60, %v2986_v47  ;;  %v3043_v21 = vsel %vm3015_vm12, %v2986_v47, %v2985_v11  ;;  %vm4240_vm10 = vcmp.lt.s32.totalorder %v16197_v14, %v11178_v39  ;;  %16198 = vst [vmem:[#allocation106_spill] sm:$0xff] %v11684_v24  ;;  %v16200_v60 = vld [vmem:[#allocation43_spill] sm:$0xff]  ;;  %v16201_v24 = vld [vmem:[#allocation44_spill] sm:$0xff] }
 0x1fa   : > { %16199 = vst [vmem:[#allocation107_spill] sm:$0xff] %v11686_v55  ;;  %v3077_v6 = vsel %vm3050_vm1, %v3040_v63, %v3042_v12  ;;  %v3078_v10 = vsel %vm3050_vm1, %v3041_v43, %v3043_v21  ;;  %v4342_v40 = vrot.slane %v11578_v58, %v16133_v52  ;;  %vm4239_vm13 = vcmp.lt.s32.totalorder %v16200_v60, %v11178_v39 }
 0x1fb   : > { %v3112_v42 = vsel %vm3085_vm9, %v3073_v34, %v3077_v6  ;;  %v3113_v22 = vsel %vm3085_vm9, %v3074_v1, %v3078_v10  ;;  %v4338_v47 = vrot.slane %v11578_v58, %v16158_v57  ;;  %v2983_v63 = vsel %vm11113_vm11, %v11468_v17, %v11466_v44 }
 0x1fc   : > { %v11709_v43 = vsel %vm3120_vm7, %v11500_v20, %v3112_v42  ;;  %v11714_v34 = vsel %vm3120_vm7, %v11504_v27, %v3113_v22  ;;  %v4436_v60 = vsel %vm4240_vm10, %v4342_v40, 0.0  ;;  %v2984_v1 = vsel %vm11113_vm11, %v11396_v2, %v11468_v17  ;;  %4489 = vrot.lane.b32.xlu1 %v4434_v7, %s11261_s19 }
 0x1fd   : > { %4487 = vrot.lane.b32.xlu0 %v4433_v37, %s11261_s19  ;;  %v4435_v14 = vsel %vm4239_vm13, %v4338_v47, 0.0  ;;  %v3044_v55 = vsel %vm3015_vm12, %v2985_v11, %v2984_v1  ;;  %v3045_v20 = vsel %vm3015_vm12, %v2984_v1, %v2983_v63  ;;  %vm4242_vm14 = vcmp.lt.s32.totalorder %v16201_v24, %v11178_v39  ;;  %v16202_v37 = vld [vmem:[#allocation45_spill] sm:$0xff]  ;;  %v11748_v47 = vpop.permute.xlu0 %3691 }
 0x1fe   : > { %v3079_v27 = vsel %vm3050_vm1, %v3042_v12, %v3044_v55  ;;  %v3080_v2 = vsel %vm3050_vm1, %v3043_v21, %v3045_v20  ;;  %v4350_v17 = vrot.slane %v11578_v58, %v16117_v30  ;;  %vm4241_vm0 = vcmp.lt.s32.totalorder %v16202_v37, %v11178_v39  ;;  %v11746_v21 = vpop.permute.xlu1 %3693 }
 0x1ff   : > { %v3114_v11 = vsel %vm3085_vm9, %v3075_v41, %v3079_v27  ;;  %v3115_v7 = vsel %vm3085_vm9, %v3076_v33, %v3080_v2  ;;  %v4346_v40 = vrot.slane %v11578_v58, %v16161_v61  ;;  %v3012_v12 = vsel %vm11113_vm11, %v11538_v51, %v10791_v4 }
 0x200   : > { %v11753_v1 = vsel %vm3120_vm7, %v11546_v56, %v3114_v11  ;;  %v11758_v41 = vsel %vm3120_vm7, %v11554_v32, %v3115_v7  ;;  %v4438_v58 = vsel %vm4242_vm14, %v4350_v17, 0.0  ;;  %v3017_v33 = vsel %vm3015_vm12, %v3012_v12, %v11144_v54  ;;  %4493 = vrot.lane.b32.xlu1 %v4436_v60, %s11261_s19 }
 0x201   : > { %4491 = vrot.lane.b32.xlu0 %v4435_v14, %s11261_s19  ;;  %v4437_v4 = vsel %vm4241_vm0, %v4346_v40, 0.0  ;;  %v3054_v37 = vsel %vm3050_vm1, %v3017_v33, %v11198_v15  ;;  %v2981_v56 = vsel %vm11113_vm11, %v11540_v0, %v11538_v51  ;;  %v2982_v32 = vsel %vm11113_vm11, %v11466_v44, %v11540_v0 }
 0x202   : > { %v3093_v14 = vsel %vm3085_vm9, %v3054_v37, %v11275_v5  ;;  %v3016_v54 = vsel %vm3015_vm12, %v2981_v56, %v3012_v12  ;;  %v3046_v15 = vsel %vm3015_vm12, %v2983_v63, %v2982_v32  ;;  %v3047_v60 = vsel %vm3015_vm12, %v2982_v32, %v2981_v56  ;;  %v16209_v56 = vld [vmem:[#allocation67_spill] sm:$0xff] }
 0x203   : > { %v11788_v51 = vsel %vm3120_vm7, %v3093_v14, %v11452_v13  ;;  %v3051_v29 = vsel %vm3050_vm1, %v3046_v15, %v3016_v54  ;;  %v3052_v5 = vsel %vm3050_vm1, %v3047_v60, %v3017_v33  ;;  %v3053_v44 = vsel %vm3050_vm1, %v3016_v54, %v11171_v49  ;;  %v16207_v33 = vld [vmem:[#allocation99_spill] sm:$0xff] }
 0x204   : > { %v3081_v0 = vsel %vm3050_vm1, %v3044_v55, %v3046_v15  ;;  %v3082_v38 = vsel %vm3050_vm1, %v3045_v20, %v3047_v60  ;;  %v3086_v13 = vsel %vm3085_vm9, %v3079_v27, %v3051_v29  ;;  %v3087_v63 = vsel %vm3085_vm9, %v3080_v2, %v3052_v5  ;;  %4497 = vrot.lane.b32.xlu1 %v4438_v58, %s11261_s19  ;;  %v11815_v55 = vpop.permute.xlu1 %3697  ;;  %v11817_v20 = vpop.permute.xlu0 %3695  ;;  %v16205_v58 = vld [vmem:[#allocation118_spill] sm:$0xff] }
 0x205   : > { %4495 = vrot.lane.b32.xlu0 %v4437_v4, %s11261_s19  ;;  %vm3155_vm11 = vcmp.ne.s32.totalorder %v11222_v3, 0  ;;  %v3088_v17 = vsel %vm3085_vm9, %v3081_v0, %v3053_v44  ;;  %v3089_v49 = vsel %vm3085_vm9, %v3082_v38, %v3054_v37  ;;  %v3090_v16 = vsel %vm3085_vm9, %v3051_v29, %v11227_v36  ;;  %16203 = vst [vmem:[#allocation56_spill] sm:$0xff] %v11815_v55  ;;  %v16208_v4 = vld [vmem:[#allocation100_spill] sm:$0xff] }
 0x206   : > { %16204 = vst [vmem:[#allocation63_spill] sm:$0xff] %v11817_v20  ;;  %v3091_v27 = vsel %vm3085_vm9, %v3052_v5, %v11232_v62  ;;  %v3092_v2 = vsel %vm3085_vm9, %v3053_v44, %v11271_v31  ;;  %v3116_v40 = vsel %vm3085_vm9, %v3077_v6, %v3081_v0  ;;  %v3117_v37 = vsel %vm3085_vm9, %v3078_v10, %v3082_v38  ;;  %v16211_v5 = vld [vmem:[#allocation68_spill] sm:$0xff]  ;;  %v16212_v0 = vld [vmem:[#allocation69_spill] sm:$0xff] }
 0x207   : > { %v3121_v36 = vsel %vm3120_vm7, %v11648_v26, %v3086_v13  ;;  %v3122_v12 = vsel %vm3120_vm7, %v11652_v53, %v3087_v63  ;;  %v3123_v62 = vsel %vm3120_vm7, %v3112_v42, %v3088_v17  ;;  %v3124_v31 = vsel %vm3120_vm7, %v3113_v22, %v3089_v49  ;;  %v16206_v42 = vld [vmem:[#allocation98_spill] sm:$0xff] }
 0x208   : > { %v3125_v6 = vsel %vm3120_vm7, %v3114_v11, %v3090_v16  ;;  %v3126_v28 = vsel %vm3120_vm7, %v3115_v7, %v3091_v27  ;;  %v3127_v10 = vsel %vm3120_vm7, %v3116_v40, %v3092_v2  ;;  %v3128_v26 = vsel %vm3120_vm7, %v3117_v37, %v3093_v14  ;;  %v16210_v14 = vld [vmem:[#allocation60_spill] sm:$0xff] }
 0x209   : > { %v3129_v53 = vsel %vm3120_vm7, %v3086_v13, %v16205_v58  ;;  %v3130_v22 = vsel %vm3120_vm7, %v3087_v63, %v16206_v42  ;;  %v3131_v11 = vsel %vm3120_vm7, %v3088_v17, %v16207_v33  ;;  %v3132_v7 = vsel %vm3120_vm7, %v3089_v49, %v16208_v4  ;;  %v16213_v13 = vld [vmem:[#allocation61_spill] sm:$0xff]  ;;  %v11883_v63 = vpop.permute.xlu1 %3701  ;;  %v11885_v17 = vpop.permute.xlu0 %3699 }
 0x20a   : > { %v3133_v32 = vsel %vm3120_vm7, %v3090_v16, %v16209_v56  ;;  %v3134_v54 = vsel %vm3120_vm7, %v3091_v27, %v16210_v14  ;;  %v3135_v15 = vsel %vm3120_vm7, %v3092_v2, %v11424_v18  ;;  %v3151_v60 = vsel %vm3120_vm7, %v11598_v46, %v3116_v40  ;;  %16214 = vst [vmem:[#allocation71_spill] sm:$0xff] %v11883_v63  ;;  %v16216_v46 = vld [vmem:[#allocation70_spill] sm:$0xff] }
 0x20b   : > { %v3152_v29 = vsel %vm3120_vm7, %v11602_v35, %v3117_v37  ;;  %v3156_v44 = vsel %vm3155_vm11, %v16211_v5, %v3121_v36  ;;  %v3157_v38 = vsel %vm3155_vm11, %v16212_v0, %v3122_v12  ;;  %v3158_v18 = vsel %vm3155_vm11, %v16213_v13, %v3123_v62  ;;  %16215 = vst [vmem:[#allocation108_spill] sm:$0xff] %v11885_v17  ;;  %v16217_v35 = vld [vmem:[#allocation104_spill] sm:$0xff] }
 0x20c   : > { %v3159_v48 = vsel %vm3155_vm11, %v16216_v46, %v3124_v31  ;;  %v3160_v49 = vsel %vm3155_vm11, %v16217_v35, %v3125_v6  ;;  %v3161_v16 = vsel %vm3155_vm11, %v11572_v8, %v3126_v28  ;;  %v3162_v27 = vsel %vm3155_vm11, %v11618_v45, %v3127_v10 }
 0x20d   : > { %v3163_v2 = vsel %vm3155_vm11, %v11624_v59, %v3128_v26  ;;  %v3164_v40 = vsel %vm3155_vm11, %v11664_v23, %v3129_v53  ;;  %v3165_v37 = vsel %vm3155_vm11, %v11670_v25, %v3130_v22  ;;  %v3166_v58 = vsel %vm3155_vm11, %v11709_v43, %v3131_v11 }
 0x20e   : > { %v3167_v42 = vsel %vm3155_vm11, %v11714_v34, %v3132_v7  ;;  %v3168_v33 = vsel %vm3155_vm11, %v11753_v1, %v3133_v32  ;;  %v3169_v4 = vsel %vm3155_vm11, %v11758_v41, %v3134_v54  ;;  %v3170_v56 = vsel %vm3155_vm11, %v3151_v60, %v3135_v15 }
 0x20f   : > { %v3171_v14 = vsel %vm3155_vm11, %v3152_v29, %v11788_v51  ;;  %v3172_v24 = vsel %vm3155_vm11, %v3121_v36, %v16211_v5  ;;  %v3173_v17 = vsel %vm3155_vm11, %v3122_v12, %v16212_v0  ;;  %v3174_v63 = vsel %vm3155_vm11, %v3123_v62, %v16213_v13  ;;  %v11960_v5 = vpop.permute.xlu0 %3703  ;;  %v16218_v0 = vld [vmem:[#allocation57_spill] sm:$0xff] }
 0x210   : > { %v3175_v20 = vsel %vm3155_vm11, %v3124_v31, %v16216_v46  ;;  %v3176_v55 = vsel %vm3155_vm11, %v3125_v6, %v16217_v35  ;;  %v3177_v36 = vsel %vm3155_vm11, %v3126_v28, %v11572_v8  ;;  %v3178_v12 = vsel %vm3155_vm11, %v3127_v10, %v11618_v45  ;;  %v11958_v28 = vpop.permute.xlu1 %3705 }
 0x211   : > { %v3179_v62 = vsel %vm3155_vm11, %v3128_v26, %v11624_v59  ;;  %v3180_v31 = vsel %vm3155_vm11, %v3129_v53, %v11664_v23  ;;  %v3181_v6 = vsel %vm3155_vm11, %v3130_v22, %v11670_v25  ;;  %v3182_v8 = vsel %vm3155_vm11, %v3131_v11, %v11709_v43 }
 0x212   : > { %v3183_v45 = vsel %vm3155_vm11, %v3132_v7, %v11714_v34  ;;  %v3184_v59 = vsel %vm3155_vm11, %v3133_v32, %v11753_v1  ;;  %v3185_v23 = vsel %vm3155_vm11, %v3134_v54, %v11758_v41  ;;  %v3186_v25 = vsel %vm3155_vm11, %v3135_v15, %v3151_v60 }
 0x213   : > { %v3187_v43 = vsel %vm3155_vm11, %v11788_v51, %v3152_v29  ;;  %v3220_v10 = vcombine.low %v3156_v44, %v3157_v38  ;;  %v3221_v26 = vcombine.low %v3158_v18, %v3159_v48  ;;  %v3222_v53 = vcombine.low %v3160_v49, %v3161_v16  ;;  %v11986_v46 = vpop.permute.xlu0 %3707 }
 0x214   : > { %v3223_v22 = vcombine.low %v3162_v27, %v3163_v2  ;;  %v3269_v34 = vcombine.low %v3164_v40, %v3165_v37  ;;  %v3270_v11 = vcombine.low %v3166_v58, %v3167_v42  ;;  %v3271_v7 = vcombine.low %v3168_v33, %v3169_v4  ;;  %v11984_v18 = vpop.permute.xlu1 %3709  ;;  %v7112_v4 = vld [vmem:[%s7550_s14 + $0xc5] ss:$8 sm:$0xf] }
 0x215   : > { %v3230_v1 = vrot.slane %v3220_v10, %v16218_v0  ;;  %v3237_v32 = vrot.slane %v3221_v26, %v16218_v0  ;;  %v3244_v41 = vrot.slane %v3222_v53, %v16218_v0  ;;  %v3272_v54 = vcombine.low %v3170_v56, %v3171_v14  ;;  %v7113_v56 = vld [vmem:[%s7550_s14 + $0xc5] ss:$8 sm:$0xf0] }
 0x216   : > { %v3251_v15 = vrot.slane %v3223_v22, %v16218_v0  ;;  %v3279_v60 = vrot.slane %v3269_v34, %v16218_v0  ;;  %v3286_v3 = vrot.slane %v3270_v11, %v16218_v0  ;;  %v3293_v51 = vrot.slane %v3271_v7, %v16218_v0  ;;  %v16219_v22 = vld [vmem:[#allocation46_spill] sm:$0xff]  ;;  %v16220_v34 = vld [vmem:[#allocation47_spill] sm:$0xff] }
 0x217   : > { %v3252_v29 = vcombine.low %v3230_v1, %v3237_v32  ;;  %v3300_v44 = vrot.slane %v3272_v54, %v16218_v0  ;;  %v3318_v38 = vcombine.low %v3172_v24, %v3173_v17  ;;  %v3319_v13 = vcombine.low %v3174_v63, %v3175_v20 }
 0x218   : > { %v3253_v48 = vcombine.low %v3244_v41, %v3251_v15  ;;  %v3301_v35 = vcombine.low %v3279_v60, %v3286_v3  ;;  %v3320_v49 = vcombine.low %v3176_v55, %v3177_v36  ;;  %v3321_v16 = vcombine.low %v3178_v12, %v3179_v62  ;;  %v16221_v15 = vld [vmem:[#allocation48_spill] sm:$0xff] }
 0x219   : > { %v3260_v27 = vrot.slane %v3252_v29, %v16218_v0  ;;  %v3302_v2 = vcombine.low %v3293_v51, %v3300_v44  ;;  %v3328_v40 = vrot.slane %v3318_v38, %v16218_v0  ;;  %v3335_v37 = vrot.slane %v3319_v13, %v16218_v0  ;;  %v16222_v44 = vld [vmem:[#allocation49_spill] sm:$0xff]  ;;  %v16223_v13 = vld [vmem:[#allocation14_spill] sm:$0xff] }
 0x21a   : > { %v3267_v24 = vrot.slane %v3253_v48, %v16218_v0  ;;  %v3309_v20 = vrot.slane %v3301_v35, %v16218_v0  ;;  %v3342_v63 = vrot.slane %v3320_v49, %v16218_v0  ;;  %v3349_v17 = vrot.slane %v3321_v16, %v16218_v0  ;;  %v16226_v35 = vld [vmem:[#allocation17_spill] sm:$0xff] }
 0x21b   : > { %v3316_v58 = vrot.slane %v3302_v2, %v16218_v0  ;;  %v3350_v55 = vcombine.low %v3328_v40, %v3335_v37  ;;  %v3367_v42 = vcombine.low %v3180_v31, %v3181_v6  ;;  %v3368_v33 = vcombine.low %v3182_v8, %v3183_v45  ;;  %v12005_v8 = vpop.permute.xlu1 %3713  ;;  %v12007_v45 = vpop.permute.xlu0 %3711 }
 0x21c   : > { %v3268_v14 = vcombine.low %v3260_v27, %v3267_v24  ;;  %v3351_v36 = vcombine.low %v3342_v63, %v3349_v17  ;;  %v3369_v12 = vcombine.low %v3184_v59, %v3185_v23  ;;  %v3370_v62 = vcombine.low %v3186_v25, %v3187_v43  ;;  %v16227_v24 = vld [vmem:[#allocation50_spill] sm:$0xff]  ;;  %v16228_v17 = vld [vmem:[#allocation51_spill] sm:$0xff] }
 0x21d   : > { %v3317_v10 = vcombine.low %v3309_v20, %v3316_v58  ;;  %v3358_v26 = vrot.slane %v3350_v55, %v16218_v0  ;;  %v3377_v31 = vrot.slane %v3367_v42, %v16218_v0  ;;  %v3384_v6 = vrot.slane %v3368_v33, %v16218_v0  ;;  %v7122_v55 = vld [vmem:[%s7550_s14 + $0x6] ss:$8 sm:$0xf] }
 0x21e   : > { %v3365_v59 = vrot.slane %v3351_v36, %v16218_v0  ;;  %v3391_v23 = vrot.slane %v3369_v12, %v16218_v0  ;;  %v3398_v25 = vrot.slane %v3370_v62, %v16218_v0  ;;  %7082 = vst [vmem:[%s9550_s11 + $0x3] ss:$8 sm:$0xf] %v3268_v14  ;;  %7083 = vst [vmem:[%s9550_s11 + $0x3] ss:$8 sm:$0xf0] %v3268_v14  ;;  %v3747_v11 = vstv %s10200_s18 }
 0x21f   : > { %v12014_v43 = vor.u32 %v7113_v56, %v7112_v4  ;;  %v3399_v53 = vcombine.low %v3377_v31, %v3384_v6  ;;  %7084 = vst [vmem:[%s9550_s11 + $0x43] ss:$8 sm:$0xf] %v3317_v10  ;;  %7085 = vst [vmem:[%s9550_s11 + $0x43] ss:$8 sm:$0xf0] %v3317_v10  ;;  %vm4244_vm12 = vcmp.lt.s32.totalorder %v16219_v22, %v11178_v39  ;;  %v12050_v38 = vstv %s3781_s12  ;;  %v12061_v16 = vpop.permute.xlu1 %3717  ;;  %v12063_v27 = vpop.permute.xlu0 %3715 }
 0x220   : > { %vm4243_vm1 = vcmp.lt.s32.totalorder %v16220_v34, %v11178_v39  ;;  %v3366_v7 = vcombine.low %v3358_v26, %v3365_v59  ;;  %v3400_v1 = vcombine.low %v3391_v23, %v3398_v25  ;;  %vm4246_vm9 = vcmp.lt.s32.totalorder %v16221_v15, %v11178_v39  ;;  %s12048_s18 = sld [smem:[#allocation6 + %s4968_s8]]  ;;  %v16229_v42 = vld [vmem:[#allocation62_spill] sm:$0xff]  ;;  %v16230_v33 = vld [vmem:[#allocation105_spill] sm:$0xff]  ;;  %v16232_v12 = vld [vmem:[#allocation107_spill] sm:$0xff]  ;;  %s3921_s8 = sand.u32 16, %s12000_s7 }
 0x221   : > { %v4358_v32 = vrot.slane %v12014_v43, %v16147_v50  ;;  %v4354_v41 = vrot.slane %v12014_v43, %v16148_v19  ;;  %v3407_v54 = vrot.slane %v3399_v53, %v16218_v0  ;;  %v4366_v60 = vrot.slane %v12014_v43, %v16150_v9  ;;  %v16231_v56 = vld [vmem:[#allocation106_spill] sm:$0xff]  ;;  %v16233_v59 = vld [vmem:[#allocation52_spill] sm:$0xff]  ;;  %v16234_v25 = vld [vmem:[#allocation53_spill] sm:$0xff]  ;;  %s5216_s7 = sand.u32 4095, %s12081_s17  }
 0x222   : > { %v3414_v3 = vrot.slane %v3400_v1, %v16218_v0  ;;  %7086 = vst [vmem:[%s9550_s11 + $0x83] ss:$8 sm:$0xf] %v3366_v7  ;;  %7087 = vst [vmem:[%s9550_s11 + $0x83] ss:$8 sm:$0xf0] %v3366_v7  ;;  %vm4245_vm7 = vcmp.lt.s32.totalorder %v16222_v44, %v11178_v39  ;;  %vm12055_vm2 = vcmp.lt.s32.totalorder %v16223_v13, %v3747_v11  ;;  %v12065_v2 = vstv %s3816_s29 }
 0x223   : > { %v4440_v51 = vsel %vm4244_vm12, %v4358_v32, 0.0  ;;  %v4439_v29 = vsel %vm4243_vm1, %v4354_v41, 0.0  ;;  %v4362_v49 = vrot.slane %v12014_v43, %v16226_v35  ;;  %v4442_v37 = vsel %vm4246_vm9, %v4366_v60, 0.0  ;;  %v7123_v36 = vld [vmem:[%s7550_s14 + $0x6] ss:$8 sm:$0xf0]  ;;  %v12132_v7 = vpop.permute.xlu1 %3721  ;;  %v12134_v1 = vpop.permute.xlu0 %3719 }
 0x224   : > { %4501 = vrot.lane.b32.xlu1 %v4440_v51, %s11261_s19  ;;  %4499 = vrot.lane.b32.xlu0 %v4439_v29, %s11261_s19  ;;  %v3415_v40 = vcombine.low %v3407_v54, %v3414_v3  ;;  %vm4248_vm3 = vcmp.lt.s32.totalorder %v16227_v24, %v11178_v39  ;;  %v4374_v63 = vrot.slane %v12014_v43, %v16133_v52  ;;  %vm3783_vm6 = vcmp.ne.s32.totalorder %v12050_v38, 0  ;;  %v16235_v51 = vld [vmem:[#allocation56_spill] sm:$0xff]  ;;  %v16236_v29 = vld [vmem:[#allocation63_spill] sm:$0xff]  ;;  %s12221_s12 = sand.u32 127, %s5216_s7   ;;  %s5736_s29 = sadd.s32 7, %s7557_s16 }
 0x225   : > { %v4441_v20 = vsel %vm4245_vm7, %v4362_v49, 0.0  ;;  %vm4247_vm4 = vcmp.lt.s32.totalorder %v16228_v17, %v11178_v39  ;;  %v4370_v58 = vrot.slane %v12014_v43, %v16158_v57  ;;  %v12089_v4 = vsel %vm12055_vm2, %v16230_v33, %v16229_v42  ;;  %v7124_v24 = vld [vmem:[%s7550_s14 + $0x46] ss:$8 sm:$0xf]  ;;  %s13000_s10 = sld [smem:[#allocation6 + %s5736_s29]] }
 0x226   : > { %7088 = vst [vmem:[%s9550_s11 + $0xc3] ss:$8 sm:$0xf] %v3415_v40  ;;  %7089 = vst [vmem:[%s9550_s11 + $0xc3] ss:$8 sm:$0xf0] %v3415_v40  ;;  %v3776_v14 = vsel %vm12055_vm2, %v16231_v56, %v11748_v47  ;;  %v3777_v62 = vsel %vm12055_vm2, %v16232_v12, %v16231_v56  ;;  %v3778_v10 = vsel %vm12055_vm2, %v16229_v42, %v16232_v12  ;;  %v12136_v32 = vstv %s3851_s27 }
 0x227   : > { %vm3818_vm8 = vcmp.ne.s32.totalorder %v12065_v2, 0  ;;  %v3775_v26 = vsel %vm12055_vm2, %v11748_v47, %v11746_v21  ;;  %v4444_v31 = vsel %vm4248_vm3, %v4374_v63, 0.0  ;;  %v4443_v6 = vsel %vm4247_vm4, %v4370_v58, 0.0 }
 0x228   : > { %4505 = vrot.lane.b32.xlu1 %v4442_v37, %s11261_s19  ;;  %4503 = vrot.lane.b32.xlu0 %v4441_v20, %s11261_s19  ;;  %vm4250_vm5 = vcmp.lt.s32.totalorder %v16233_v59, %v11178_v39  ;;  %v4382_v23 = vrot.slane %v12014_v43, %v16117_v30  ;;  %v3788_v47 = vsel %vm3783_vm6, %v3777_v62, %v3776_v14  ;;  %v12146_v60 = vstv %s12048_s18  ;;  %s12976_s18 = sshrl.u32 %s4448_s9, 7 }
 0x229   : > { %vm4249_vm15 = vcmp.lt.s32.totalorder %v16234_v25, %v11178_v39  ;;  %v4378_v53 = vrot.slane %v12014_v43, %v16161_v61  ;;  %v12130_v11 = vor.u32 %v7123_v36, %v7122_v55  ;;  %v12141_v41 = vsel %vm3783_vm6, %v12089_v4, %v3778_v10  ;;  %v16237_v55 = vld [vmem:[#allocation20_spill] sm:$0xff]  ;;  %s4549_s9 = sand.u32 1, %s12976_s18  ;;  %s4584_s27 = sand.u32 2, %s12976_s18 }
 0x22a   : > { %v3789_v54 = vsel %vm3783_vm6, %v3776_v14, %v3775_v26  ;;  %v12148_v43 = vstv %s3886_s30  ;;  %v12152_v3 = vsel %vm3783_vm6, %v3778_v10, %v3777_v62  ;;  %v3773_v49 = vsel %vm12055_vm2, %v16236_v29, %v16235_v51  ;;  %v16238_v14 = vld [vmem:[#allocation71_spill] sm:$0xff]  ;;  %v16239_v36 = vld [vmem:[#allocation108_spill] sm:$0xff]  ;;  %s4654_s30 = sand.u32 8, %s12976_s18 }
 0x22b   : > { %v3774_v40 = vsel %vm12055_vm2, %v11746_v21, %v16236_v29  ;;  %v12168_v37 = vsel %vm3818_vm8, %v12141_v41, %v3788_v47  ;;  %v4446_v20 = vsel %vm4250_vm5, %v4382_v23, 0.0  ;;  %v4445_v63 = vsel %vm4249_vm15, %v4378_v53, 0.0  ;;  %v12212_v23 = vpop.permute.xlu1 %3725  ;;  %v12214_v53 = vpop.permute.xlu0 %3723 }
 0x22c   : > { %4509 = vrot.lane.b32.xlu1 %v4444_v31, %s11261_s19  ;;  %4507 = vrot.lane.b32.xlu0 %v4443_v6, %s11261_s19  ;;  %v5030_v58 = vrot.slane %v12130_v11, %v16147_v50  ;;  %v12181_v21 = vsel %vm3818_vm8, %v12152_v3, %v3789_v54  ;;  %vm4988_vm10 = vcmp.lt.s32.totalorder %v16237_v55, %v12146_v60  ;;  %v12202_v10 = vstv %s3921_s8  ;;  %s13058_s8 = sld [smem:[#allocation2 + %s5736_s29]]  ;;  %s4689_s29 = sand.u32 16, %s12976_s18 }
 0x22d   : > { %vm4987_vm13 = vcmp.lt.s32.totalorder %v16223_v13, %v12146_v60  ;;  %v5026_v39 = vrot.slane %v12130_v11, %v16148_v19  ;;  %v3790_v42 = vsel %vm3783_vm6, %v3775_v26, %v3774_v40  ;;  %v3791_v56 = vsel %vm3783_vm6, %v3774_v40, %v3773_v49  ;;  %v16247_v13 = vld [vmem:[#allocation26_spill] sm:$0xff] }
 0x22e   : > { %v3771_v12 = vsel %vm12055_vm2, %v16239_v36, %v16238_v14  ;;  %v3772_v62 = vsel %vm12055_vm2, %v16235_v51, %v16239_v36  ;;  %v5038_v6 = vrot.slane %v12130_v11, %v16150_v9  ;;  %v5184_v51 = vsel %vm4988_vm10, %v5030_v58, 0.0  ;;  %v16242_v58 = vld [vmem:[#allocation16_spill] sm:$0xff] }
 0x22f   : > { %v3792_v26 = vsel %vm3783_vm6, %v3773_v49, %v3772_v62  ;;  %v3793_v31 = vsel %vm3783_vm6, %v3772_v62, %v3771_v12  ;;  %v5183_v29 = vsel %vm4987_vm13, %v5026_v39, 0.0  ;;  %v16240_v49 = vld [vmem:[#allocation18_spill] sm:$0xff]  ;;  %v5034_v40 = vrot.slane %v12130_v11, %v16226_v35 }
 0x230   : > { %4513 = vrot.lane.b32.xlu1 %v4446_v20, %s11261_s19  ;;  %4511 = vrot.lane.b32.xlu0 %v4445_v63, %s11261_s19  ;;  %vm4990_vm14 = vcmp.lt.s32.totalorder %v16240_v49, %v12146_v60  ;;  %v12232_v20 = vsel %vm3818_vm8, %v3788_v47, %v3790_v42  ;;  %v12236_v63 = vsel %vm3818_vm8, %v3789_v54, %v3791_v56  ;;  %vm3853_vm11 = vcmp.ne.s32.totalorder %v12136_v32, 0 }
 0x231   : > { %16241 = vst [vmem:[#allocation109_spill] sm:$0xff] %v12232_v20  ;;  %vm4989_vm0 = vcmp.lt.s32.totalorder %v16242_v58, %v12146_v60  ;;  %v3769_v39 = vsel %vm12055_vm2, %v11960_v5, %v11958_v28  ;;  %v3827_v36 = vsel %vm3818_vm8, %v3790_v42, %v3792_v26  ;;  %v3828_v47 = vsel %vm3818_vm8, %v3791_v56, %v3793_v31 }
 0x232   : > { %v3770_v54 = vsel %vm12055_vm2, %v16238_v14, %v11960_v5  ;;  %v5186_v62 = vsel %vm4990_vm14, %v5038_v6, 0.0  ;;  %v5046_v42 = vrot.slane %v12130_v11, %v16133_v52  ;;  %v5185_v56 = vsel %vm4989_vm0, %v5034_v40, 0.0  ;;  %v16243_v5 = vld [vmem:[#allocation22_spill] sm:$0xff]  ;;  %v16244_v6 = vld [vmem:[#allocation24_spill] sm:$0xff]  ;;  %v12284_v40 = vpop.permute.xlu0 %3727  ;;  %s5984_s16 = sand.u32 4095, %s13058_s8  }
 0x233   : > { %v3794_v58 = vsel %vm3783_vm6, %v3771_v12, %v3770_v54  ;;  %v3795_v49 = vsel %vm3783_vm6, %v3770_v54, %v3769_v39  ;;  %vm4992_vm12 = vcmp.lt.s32.totalorder %v16243_v5, %v12146_v60  ;;  %v5042_v14 = vrot.slane %v12130_v11, %v16158_v57  ;;  %v16248_v5 = vld [vmem:[#allocation28_spill] sm:$0xff]  ;;  %s322_s8 = scalar_select %p321_p6, %s7432_s25, 1 }
 0x234   : > { %5221 = vrot.lane.b32.xlu1 %v5184_v51, %s12221_s12  ;;  %5219 = vrot.lane.b32.xlu0 %v5183_v29, %s12221_s12  ;;  %v3829_v55 = vsel %vm3818_vm8, %v3792_v26, %v3794_v58  ;;  %v12270_v12 = vsel %vm3853_vm11, %v12168_v37, %v3827_v36  ;;  %vm4991_vm1 = vcmp.lt.s32.totalorder %v16244_v6, %v12146_v60  ;;  %v12282_v29 = vpop.permute.xlu1 %3729  ;;  %vm3888_vm5 = vcmp.ne.s32.totalorder %v12148_v43, 0 }
 0x235   : > { %v3767_v26 = vsel %vm12055_vm2, %v11986_v46, %v11984_v18  ;;  %v3768_v51 = vsel %vm12055_vm2, %v11958_v28, %v11986_v46  ;;  %v12289_v54 = vsel %vm3853_vm11, %v12181_v21, %v3828_v47  ;;  %v3830_v25 = vsel %vm3818_vm8, %v3793_v31, %v3795_v49  ;;  %v7125_v28 = vld [vmem:[%s7550_s14 + $0x46] ss:$8 sm:$0xf0] }
 0x236   : > { %16245 = vst [vmem:[#allocation110_spill] sm:$0xff] %v12289_v54  ;;  %v3796_v59 = vsel %vm3783_vm6, %v3769_v39, %v3768_v51  ;;  %v3797_v17 = vsel %vm3783_vm6, %v3768_v51, %v3767_v26  ;;  %v12304_v46 = vsel %vm3853_vm11, %v12232_v20, %v3829_v55  ;;  %v5188_v31 = vsel %vm4992_vm12, %v5046_v42, 0.0 }
 0x237   : > { %16246 = vst [vmem:[#allocation111_spill] sm:$0xff] %v12304_v46  ;;  %v3831_v39 = vsel %vm3818_vm8, %v3794_v58, %v3796_v59  ;;  %v5054_v51 = vrot.slane %v12130_v11, %v16117_v30  ;;  %vm4994_vm9 = vcmp.lt.s32.totalorder %v16247_v13, %v12146_v60  ;;  %v5050_v42 = vrot.slane %v12130_v11, %v16161_v61 }
 0x238   : > { %5225 = vrot.lane.b32.xlu1 %v5186_v62, %s12221_s12  ;;  %5223 = vrot.lane.b32.xlu0 %v5185_v56, %s12221_s12  ;;  %v5187_v62 = vsel %vm4991_vm1, %v5042_v14, 0.0  ;;  %v3832_v56 = vsel %vm3818_vm8, %v3795_v49, %v3797_v17  ;;  %vm4993_vm7 = vcmp.lt.s32.totalorder %v16248_v5, %v12146_v60  ;;  %v3765_v58 = vsel %vm12055_vm2, %v12007_v45, %v12005_v8 }
 0x239   : > { %v3766_v14 = vsel %vm12055_vm2, %v11984_v18, %v12007_v45  ;;  %v12332_v49 = vor.u32 %v7125_v28, %v7124_v24  ;;  %v12337_v13 = vsel %vm3853_vm11, %v12236_v63, %v3830_v25  ;;  %v12341_v11 = vsel %vm3853_vm11, %v3827_v36, %v3831_v39 }
 0x23a   : > { %16249 = vst [vmem:[#allocation112_spill] sm:$0xff] %v12337_v13  ;;  %v3798_v6 = vsel %vm3783_vm6, %v3767_v26, %v3766_v14  ;;  %v3799_v44 = vsel %vm3783_vm6, %v3766_v14, %v3765_v58  ;;  %v12351_v18 = vsel %vm3853_vm11, %v3828_v47, %v3832_v56  ;;  %v5190_v45 = vsel %vm4994_vm9, %v5054_v51, 0.0  ;;  %v12357_v28 = vpop.permute.xlu1 %3733  ;;  %v12359_v26 = vpop.permute.xlu0 %3731  ;;  %v16250_v47 = vld [vmem:[#allocation30_spill] sm:$0xff] }
 0x23b   : > { %v3833_v24 = vsel %vm3818_vm8, %v3796_v59, %v3798_v6  ;;  %v3834_v36 = vsel %vm3818_vm8, %v3797_v17, %v3799_v44  ;;  %vm4996_vm3 = vcmp.lt.s32.totalorder %v16250_v47, %v12146_v60  ;;  %v5062_v51 = vrot.slane %v12332_v49, %v16147_v50 }
 0x23c   : > { %5229 = vrot.lane.b32.xlu1 %v5188_v31, %s12221_s12  ;;  %5227 = vrot.lane.b32.xlu0 %v5187_v62, %s12221_s12  ;;  %v5189_v31 = vsel %vm4993_vm7, %v5050_v42, 0.0  ;;  %v5058_v59 = vrot.slane %v12332_v49, %v16148_v19  ;;  %v12372_v17 = vsel %vm3853_vm11, %v3829_v55, %v3833_v24  ;;  %v16251_v62 = vld [vmem:[#allocation31_spill] sm:$0xff]  ;;  %v3763_v42 = vsel %vm12055_vm2, %v12063_v27, %v12061_v16 }
 0x23d   : > { %vm4995_vm4 = vcmp.lt.s32.totalorder %v16251_v62, %v12146_v60  ;;  %v3764_v14 = vsel %vm12055_vm2, %v12005_v8, %v12063_v27  ;;  %v12386_v5 = vsel %vm3853_vm11, %v3830_v25, %v3834_v36  ;;  %v5070_v34 = vrot.slane %v12332_v49, %v16150_v9  ;;  %v16252_v25 = vld [vmem:[#allocation32_spill] sm:$0xff] }
 0x23e   : > { %v3800_v55 = vsel %vm3783_vm6, %v3765_v58, %v3764_v14  ;;  %v3801_v15 = vsel %vm3783_vm6, %v3764_v14, %v3763_v42  ;;  %vm4998_vm15 = vcmp.lt.s32.totalorder %v16252_v25, %v12146_v60  ;;  %v12403_v58 = vpop.permute.xlu1 %3737  ;;  %v12405_v14 = vpop.permute.xlu0 %3735 }
 0x23f   : > { %v3835_v8 = vsel %vm3818_vm8, %v3798_v6, %v3800_v55  ;;  %v3836_v27 = vsel %vm3818_vm8, %v3799_v44, %v3801_v15  ;;  %v5191_v6 = vsel %vm4995_vm4, %v5058_v59, 0.0  ;;  %v5066_v44 = vrot.slane %v12332_v49, %v16226_v35 }
 0x240   : > { %5233 = vrot.lane.b32.xlu1 %v5190_v45, %s12221_s12  ;;  %5231 = vrot.lane.b32.xlu0 %v5189_v31, %s12221_s12  ;;  %v5192_v45 = vsel %vm4996_vm3, %v5062_v51, 0.0  ;;  %v16253_v31 = vld [vmem:[#allocation33_spill] sm:$0xff]  ;;  %v12419_v25 = vsel %vm3853_vm11, %v3831_v39, %v3835_v8  ;;  %v12423_v22 = vsel %vm3853_vm11, %v3832_v56, %v3836_v27  ;;  %v3761_v51 = vsel %vm12055_vm2, %v12134_v1, %v12132_v7  ;;  %v16254_v56 = vld [vmem:[#allocation34_spill] sm:$0xff] }
 0x241   : > { %vm4997_vm10 = vcmp.lt.s32.totalorder %v16253_v31, %v12146_v60  ;;  %v3762_v59 = vsel %vm12055_vm2, %v12061_v16, %v12134_v1  ;;  %v5194_v31 = vsel %vm4998_vm15, %v5070_v34, 0.0  ;;  %vm5000_vm13 = vcmp.lt.s32.totalorder %v16254_v56, %v12146_v60 }
 0x242   : > { %v3802_v62 = vsel %vm3783_vm6, %v3763_v42, %v3762_v59  ;;  %v3803_v39 = vsel %vm3783_vm6, %v3762_v59, %v3761_v51  ;;  %v5193_v47 = vsel %vm4997_vm10, %v5066_v44, 0.0  ;;  %v5078_v34 = vrot.slane %v12332_v49, %v16133_v52  ;;  %v12447_v16 = vpop.permute.xlu1 %3741  ;;  %v12449_v1 = vpop.permute.xlu0 %3739 }
 0x243   : > { %v3837_v0 = vsel %vm3818_vm8, %v3800_v55, %v3802_v62  ;;  %v3838_v20 = vsel %vm3818_vm8, %v3801_v15, %v3803_v39  ;;  %v16255_v55 = vld [vmem:[#allocation35_spill] sm:$0xff]  ;;  %v5074_v15 = vrot.slane %v12332_v49, %v16158_v57  ;;  %v3759_v44 = vsel %vm12055_vm2, %v12214_v53, %v12212_v23 }
 0x244   : > { %5237 = vrot.lane.b32.xlu1 %v5192_v45, %s12221_s12  ;;  %5235 = vrot.lane.b32.xlu0 %v5191_v6, %s12221_s12  ;;  %v12453_v42 = vsel %vm3853_vm11, %v3833_v24, %v3837_v0  ;;  %v12457_v45 = vsel %vm3853_vm11, %v3834_v36, %v3838_v20  ;;  %vm4999_vm14 = vcmp.lt.s32.totalorder %v16255_v55, %v12146_v60  ;;  %v5196_v55 = vsel %vm5000_vm13, %v5078_v34, 0.0  ;;  %v16260_v34 = vld [vmem:[#allocation36_spill] sm:$0xff] }
 0x245   : > { %v12467_v6 = vsel %vm3888_vm5, %v12270_v12, %v12419_v25  ;;  %v12473_v24 = vsel %vm3888_vm5, %v12289_v54, %v12423_v22  ;;  %v12479_v36 = vsel %vm3888_vm5, %v12304_v46, %v12453_v42  ;;  %v12489_v59 = vsel %vm3888_vm5, %v12337_v13, %v12457_v45 }
 0x246   : > { %16256 = vst [vmem:[#allocation113_spill] sm:$0xff] %v12467_v6  ;;  %16257 = vst [vmem:[#allocation114_spill] sm:$0xff] %v12473_v24  ;;  %v5086_v24 = vrot.slane %v12332_v49, %v16117_v30  ;;  %v5195_v6 = vsel %vm4999_vm14, %v5074_v15, 0.0  ;;  %vm5002_vm0 = vcmp.lt.s32.totalorder %v16260_v34, %v12146_v60  ;;  %v12508_v13 = vpop.permute.xlu1 %3745  ;;  %v12510_v46 = vpop.permute.xlu0 %3743  ;;  %v7127_v15 = vld [vmem:[%s7550_s14 + $0x86] ss:$8 sm:$0xf0] }
 0x247   : > { %16258 = vst [vmem:[#allocation76_spill] sm:$0xff] %v12479_v36  ;;  %16259 = vst [vmem:[#allocation77_spill] sm:$0xff] %v12489_v59  ;;  %v3760_v36 = vsel %vm12055_vm2, %v12132_v7, %v12214_v53 }
 0x248   : > { %5241 = vrot.lane.b32.xlu1 %v5194_v31, %s12221_s12  ;;  %5239 = vrot.lane.b32.xlu0 %v5193_v47, %s12221_s12  ;;  %v3804_v59 = vsel %vm3783_vm6, %v3761_v51, %v3760_v36  ;;  %v3805_v56 = vsel %vm3783_vm6, %v3760_v36, %v3759_v44  ;;  %v16261_v47 = vld [vmem:[#allocation37_spill] sm:$0xff]  ;;  %v5082_v31 = vrot.slane %v12332_v49, %v16161_v61 }
 0x249   : > { %v3839_v7 = vsel %vm3818_vm8, %v3802_v62, %v3804_v59  ;;  %v3840_v53 = vsel %vm3818_vm8, %v3803_v39, %v3805_v56  ;;  %vm5001_vm12 = vcmp.lt.s32.totalorder %v16261_v47, %v12146_v60  ;;  %v7126_v51 = vld [vmem:[%s7550_s14 + $0x86] ss:$8 sm:$0xf]  ;;  %v3757_v62 = vsel %vm12055_vm2, %v12284_v40, %v12282_v29 }
 0x24a   : > { %v12524_v36 = vsel %vm3853_vm11, %v3835_v8, %v3839_v7  ;;  %v12528_v34 = vsel %vm3853_vm11, %v3836_v27, %v3840_v53  ;;  %v3758_v49 = vsel %vm12055_vm2, %v12212_v23, %v12284_v40  ;;  %v5198_v39 = vsel %vm5002_vm0, %v5086_v24, 0.0 }
 0x24b   : > { %v12542_v8 = vsel %vm3888_vm5, %v12341_v11, %v12524_v36  ;;  %v12548_v27 = vsel %vm3888_vm5, %v12351_v18, %v12528_v34  ;;  %v3806_v47 = vsel %vm3783_vm6, %v3759_v44, %v3758_v49  ;;  %v5197_v54 = vsel %vm5001_vm12, %v5082_v31, 0.0  ;;  %v12584_v31 = vpop.permute.xlu1 %4453 }
 0x24c   : > { %16262 = vst [vmem:[#allocation115_spill] sm:$0xff] %v12542_v8  ;;  %16263 = vst [vmem:[#allocation78_spill] sm:$0xff] %v12548_v27  ;;  %5245 = vrot.lane.b32.xlu1 %v5196_v55, %s12221_s12  ;;  %5243 = vrot.lane.b32.xlu0 %v5195_v6, %s12221_s12  ;;  %v3807_v23 = vsel %vm3783_vm6, %v3758_v49, %v3757_v62  ;;  %v3841_v40 = vsel %vm3818_vm8, %v3804_v59, %v3806_v47  ;;  %v16264_v55 = vld [vmem:[#allocation38_spill] sm:$0xff]  ;;  %v16265_v6 = vld [vmem:[#allocation39_spill] sm:$0xff] }
 0x24d   : > { %v12558_v8 = vor.u32 %v7127_v15, %v7126_v51  ;;  %v3842_v27 = vsel %vm3818_vm8, %v3805_v56, %v3807_v23  ;;  %v12564_v24 = vsel %vm3853_vm11, %v3837_v0, %v3841_v40  ;;  %vm5004_vm1 = vcmp.lt.s32.totalorder %v16264_v55, %v12146_v60  ;;  %16266 = vst [vmem:[#allocation58_spill] sm:$0xff] %v12584_v31  ;;  %v12586_v51 = vpop.permute.xlu0 %4451 }
 0x24e   : > { %vm5003_vm9 = vcmp.lt.s32.totalorder %v16265_v6, %v12146_v60  ;;  %v12572_v44 = vsel %vm3853_vm11, %v3838_v20, %v3842_v27  ;;  %v12578_v59 = vsel %vm3888_vm5, %v12372_v17, %v12564_v24  ;;  %16267 = vst [vmem:[#allocation79_spill] sm:$0xff] %v12586_v51  ;;  %v3755_v15 = vsel %vm12055_vm2, %v12359_v26, %v12357_v28  ;;  %v16268_v6 = vld [vmem:[#allocation40_spill] sm:$0xff] }
 0x24f   : > { %v5094_v0 = vrot.slane %v12558_v8, %v16147_v50  ;;  %v5090_v56 = vrot.slane %v12558_v8, %v16148_v19  ;;  %v12592_v20 = vsel %vm3888_vm5, %v12386_v5, %v12572_v44  ;;  %v3756_v49 = vsel %vm12055_vm2, %v12282_v29, %v12359_v26 }
 0x250   : > { %vm5006_vm7 = vcmp.lt.s32.totalorder %v16268_v6, %v12146_v60  ;;  %5249 = vrot.lane.b32.xlu1 %v5198_v39, %s12221_s12  ;;  %5247 = vrot.lane.b32.xlu0 %v5197_v54, %s12221_s12  ;;  %v3808_v31 = vsel %vm3783_vm6, %v3757_v62, %v3756_v49  ;;  %v3809_v19 = vsel %vm3783_vm6, %v3756_v49, %v3755_v15  ;;  %v16269_v54 = vld [vmem:[#allocation41_spill] sm:$0xff] }
 0x251   : > { %v5200_v55 = vsel %vm5004_vm1, %v5094_v0, 0.0  ;;  %v5199_v51 = vsel %vm5003_vm9, %v5090_v56, 0.0  ;;  %v3843_v50 = vsel %vm3818_vm8, %v3806_v47, %v3808_v31  ;;  %v3844_v29 = vsel %vm3818_vm8, %v3807_v23, %v3809_v19  ;;  %v12661_v6 = vpop.permute.xlu0 %4455 }
 0x252   : > { %v5102_v26 = vrot.slane %v12558_v8, %v16150_v9  ;;  %vm5005_vm3 = vcmp.lt.s32.totalorder %v16269_v54, %v12146_v60  ;;  %v12620_v39 = vsel %vm3853_vm11, %v3839_v7, %v3843_v50  ;;  %v12624_v62 = vsel %vm3853_vm11, %v3840_v53, %v3844_v29  ;;  %16272 = vst [vmem:[#allocation80_spill] sm:$0xff] %v12661_v6 }
 0x253   : > { %v5098_v47 = vrot.slane %v12558_v8, %v16226_v35  ;;  %v3753_v23 = vsel %vm12055_vm2, %v12405_v14, %v12403_v58  ;;  %v12636_v0 = vsel %vm3888_vm5, %v12419_v25, %v12620_v39  ;;  %v12642_v7 = vsel %vm3888_vm5, %v12423_v22, %v12624_v62  ;;  %v16270_v22 = vld [vmem:[#allocation42_spill] sm:$0xff] }
 0x254   : > { %v5202_v53 = vsel %vm5006_vm7, %v5102_v26, 0.0  ;;  %v3754_v56 = vsel %vm12055_vm2, %v12357_v28, %v12405_v14  ;;  %5253 = vrot.lane.b32.xlu1 %v5200_v55, %s12221_s12  ;;  %5251 = vrot.lane.b32.xlu0 %v5199_v51, %s12221_s12  ;;  %vm5008_vm4 = vcmp.lt.s32.totalorder %v16270_v22, %v12146_v60  ;;  %v12659_v26 = vpop.permute.xlu1 %4457  ;;  %v5110_v55 = vrot.slane %v12558_v8, %v16133_v52  ;;  %v16273_v51 = vld [vmem:[#allocation43_spill] sm:$0xff] }
 0x255   : > { %v5201_v49 = vsel %vm5005_vm3, %v5098_v47, 0.0  ;;  %v3810_v25 = vsel %vm3783_vm6, %v3755_v15, %v3754_v56  ;;  %v3811_v54 = vsel %vm3783_vm6, %v3754_v56, %v3753_v23  ;;  %16271 = vst [vmem:[#allocation64_spill] sm:$0xff] %v12659_v26  ;;  %vm5007_vm15 = vcmp.lt.s32.totalorder %v16273_v51, %v12146_v60  ;;  %v16274_v26 = vld [vmem:[#allocation44_spill] sm:$0xff] }
 0x256   : > { %v3845_v28 = vsel %vm3818_vm8, %v3808_v31, %v3810_v25  ;;  %v3846_v14 = vsel %vm3818_vm8, %v3809_v19, %v3811_v54  ;;  %v5106_v56 = vrot.slane %v12558_v8, %v16158_v57  ;;  %v3751_v19 = vsel %vm12055_vm2, %v12449_v1, %v12447_v16 }
 0x257   : > { %v3880_v15 = vsel %vm3853_vm11, %v3841_v40, %v3845_v28  ;;  %v3881_v47 = vsel %vm3853_vm11, %v3842_v27, %v3846_v14  ;;  %v5204_v51 = vsel %vm5008_vm4, %v5110_v55, 0.0  ;;  %v3752_v27 = vsel %vm12055_vm2, %v12403_v58, %v12449_v1 }
 0x258   : > { %v12684_v31 = vsel %vm3888_vm5, %v12453_v42, %v3880_v15  ;;  %v12689_v40 = vsel %vm3888_vm5, %v12457_v45, %v3881_v47  ;;  %5257 = vrot.lane.b32.xlu1 %v5202_v53, %s12221_s12  ;;  %5255 = vrot.lane.b32.xlu0 %v5201_v49, %s12221_s12  ;;  %v5203_v22 = vsel %vm5007_vm15, %v5106_v56, 0.0  ;;  %v3812_v6 = vsel %vm3783_vm6, %v3753_v23, %v3752_v27  ;;  %v16275_v53 = vld [vmem:[#allocation45_spill] sm:$0xff]  ;;  %v12723_v56 = vpop.permute.xlu0 %4459 }
 0x259   : > { %v3813_v42 = vsel %vm3783_vm6, %v3752_v27, %v3751_v19  ;;  %vm5010_vm10 = vcmp.lt.s32.totalorder %v16274_v26, %v12146_v60  ;;  %v3847_v45 = vsel %vm3818_vm8, %v3810_v25, %v3812_v6  ;;  %v5118_v1 = vrot.slane %v12558_v8, %v16117_v30  ;;  %v12721_v25 = vpop.permute.xlu1 %4461 }
 0x25a   : > { %v3848_v58 = vsel %vm3818_vm8, %v3811_v54, %v3813_v42  ;;  %vm5009_vm13 = vcmp.lt.s32.totalorder %v16275_v53, %v12146_v60  ;;  %v3882_v23 = vsel %vm3853_vm11, %v3843_v50, %v3847_v45  ;;  %v5114_v55 = vrot.slane %v12558_v8, %v16161_v61 }
 0x25b   : > { %v3883_v49 = vsel %vm3853_vm11, %v3844_v29, %v3848_v58  ;;  %v3780_v54 = vsel %vm12055_vm2, %v12508_v13, %v16230_v33  ;;  %v12728_v27 = vsel %vm3888_vm5, %v12524_v36, %v3882_v23  ;;  %v5206_v8 = vsel %vm5010_vm10, %v5118_v1, 0.0 }
 0x25c   : > { %v12733_v50 = vsel %vm3888_vm5, %v12528_v34, %v3883_v49  ;;  %v3785_v29 = vsel %vm3783_vm6, %v3780_v54, %v12089_v4  ;;  %5261 = vrot.lane.b32.xlu1 %v5204_v51, %s12221_s12  ;;  %5259 = vrot.lane.b32.xlu0 %v5203_v22, %s12221_s12  ;;  %v5205_v33 = vsel %vm5009_vm13, %v5114_v55, 0.0  ;;  %v3749_v34 = vsel %vm12055_vm2, %v12510_v46, %v12508_v13 }
 0x25d   : > { %v3822_v53 = vsel %vm3818_vm8, %v3785_v29, %v12152_v3  ;;  %v3750_v36 = vsel %vm12055_vm2, %v12447_v16, %v12510_v46  ;;  %v3784_v22 = vsel %vm3783_vm6, %v3749_v34, %v3780_v54  ;;  %vm3923_vm2 = vcmp.ne.s32.totalorder %v12202_v10, 0 }
 0x25e   : > { %v3861_v4 = vsel %vm3853_vm11, %v3822_v53, %v12236_v63  ;;  %v3814_v3 = vsel %vm3783_vm6, %v3751_v19, %v3750_v36  ;;  %v3815_v51 = vsel %vm3783_vm6, %v3750_v36, %v3749_v34  ;;  %v3821_v46 = vsel %vm3818_vm8, %v3784_v22, %v12141_v41  ;;  %v16280_v34 = vld [vmem:[#allocation112_spill] sm:$0xff] }
 0x25f   : > { %v12763_v13 = vsel %vm3888_vm5, %v3861_v4, %v12386_v5  ;;  %v3819_v48 = vsel %vm3818_vm8, %v3814_v3, %v3784_v22  ;;  %v3820_v63 = vsel %vm3818_vm8, %v3815_v51, %v3785_v29  ;;  %v3849_v16 = vsel %vm3818_vm8, %v3812_v6, %v3814_v3  ;;  %v12790_v6 = vpop.permute.xlu1 %4465 }
 0x260   : > { %v3850_v38 = vsel %vm3818_vm8, %v3813_v42, %v3815_v51  ;;  %v3854_v5 = vsel %vm3853_vm11, %v3847_v45, %v3819_v48  ;;  %v3855_v19 = vsel %vm3853_vm11, %v3848_v58, %v3820_v63  ;;  %5265 = vrot.lane.b32.xlu1 %v5206_v8, %s12221_s12  ;;  %5263 = vrot.lane.b32.xlu0 %v5205_v33, %s12221_s12  ;;  %v12792_v42 = vpop.permute.xlu0 %4463  ;;  %v16277_v58 = vld [vmem:[#allocation109_spill] sm:$0xff]  ;;  %v16279_v33 = vld [vmem:[#allocation111_spill] sm:$0xff] }
 0x261   : > { %v3856_v1 = vsel %vm3853_vm11, %v3849_v16, %v3821_v46  ;;  %v3857_v41 = vsel %vm3853_vm11, %v3850_v38, %v3822_v53  ;;  %v3858_v2 = vsel %vm3853_vm11, %v3819_v48, %v12168_v37  ;;  %16276 = vst [vmem:[#allocation116_spill] sm:$0xff] %v12790_v6  ;;  %v3859_v45 = vsel %vm3853_vm11, %v3820_v63, %v12181_v21  ;;  %v16281_v51 = vld [vmem:[#allocation113_spill] sm:$0xff]  ;;  %v16282_v48 = vld [vmem:[#allocation114_spill] sm:$0xff]  ;;  %v16283_v63 = vld [vmem:[#allocation76_spill] sm:$0xff] }
 0x262   : > { %v3860_v55 = vsel %vm3853_vm11, %v3821_v46, %v16277_v58  ;;  %v3884_v54 = vsel %vm3853_vm11, %v3845_v28, %v3849_v16  ;;  %v3885_v53 = vsel %vm3853_vm11, %v3846_v14, %v3850_v38  ;;  %v3889_v37 = vsel %vm3888_vm5, %v12620_v39, %v3854_v5 }
 0x263   : > { %v3890_v8 = vsel %vm3888_vm5, %v12624_v62, %v3855_v19  ;;  %v3891_v21 = vsel %vm3888_vm5, %v3880_v15, %v3856_v1  ;;  %v3892_v29 = vsel %vm3888_vm5, %v3881_v47, %v3857_v41  ;;  %v3893_v28 = vsel %vm3888_vm5, %v3882_v23, %v3858_v2  ;;  %v16278_v15 = vld [vmem:[#allocation110_spill] sm:$0xff]  ;;  %v12858_v46 = vpop.permute.xlu1 %4469 }
 0x264   : > { %v3894_v32 = vsel %vm3888_vm5, %v3883_v49, %v3859_v45  ;;  %v3895_v14 = vsel %vm3888_vm5, %v3884_v54, %v3860_v55  ;;  %v3896_v39 = vsel %vm3888_vm5, %v3885_v53, %v3861_v4  ;;  %v3897_v62 = vsel %vm3888_vm5, %v3854_v5, %v12270_v12  ;;  %16284 = vst [vmem:[#allocation81_spill] sm:$0xff] %v12858_v46  ;;  %v12860_v16 = vpop.permute.xlu0 %4467  ;;  %v16288_v5 = vld [vmem:[#allocation78_spill] sm:$0xff] }
 0x265   : > { %v3898_v47 = vsel %vm3888_vm5, %v3855_v19, %v16278_v15  ;;  %v3899_v23 = vsel %vm3888_vm5, %v3856_v1, %v16279_v33  ;;  %v3900_v49 = vsel %vm3888_vm5, %v3857_v41, %v16280_v34  ;;  %v3901_v36 = vsel %vm3888_vm5, %v3858_v2, %v12341_v11  ;;  %16285 = vst [vmem:[#allocation82_spill] sm:$0xff] %v12860_v16 }
 0x266   : > { %v3902_v12 = vsel %vm3888_vm5, %v3859_v45, %v12351_v18  ;;  %v3903_v4 = vsel %vm3888_vm5, %v3860_v55, %v12372_v17  ;;  %v3919_v22 = vsel %vm3888_vm5, %v12564_v24, %v3884_v54  ;;  %v3920_v3 = vsel %vm3888_vm5, %v12572_v44, %v3885_v53  ;;  %v16286_v24 = vld [vmem:[#allocation77_spill] sm:$0xff]  ;;  %v16287_v44 = vld [vmem:[#allocation115_spill] sm:$0xff] }
 0x267   : > { %v3924_v11 = vsel %vm3923_vm2, %v16281_v51, %v3889_v37  ;;  %v3925_v18 = vsel %vm3923_vm2, %v16282_v48, %v3890_v8  ;;  %v3926_v17 = vsel %vm3923_vm2, %v16283_v63, %v3891_v21  ;;  %v3927_v43 = vsel %vm3923_vm2, %v16286_v24, %v3892_v29 }
 0x268   : > { %v3928_v38 = vsel %vm3923_vm2, %v16287_v44, %v3893_v28  ;;  %v3929_v19 = vsel %vm3923_vm2, %v16288_v5, %v3894_v32  ;;  %v3930_v1 = vsel %vm3923_vm2, %v12578_v59, %v3895_v14  ;;  %v3931_v41 = vsel %vm3923_vm2, %v12592_v20, %v3896_v39 }
 0x269   : > { %v3932_v2 = vsel %vm3923_vm2, %v12636_v0, %v3897_v62  ;;  %v3933_v45 = vsel %vm3923_vm2, %v12642_v7, %v3898_v47  ;;  %v3934_v58 = vsel %vm3923_vm2, %v12684_v31, %v3899_v23  ;;  %v3935_v55 = vsel %vm3923_vm2, %v12689_v40, %v3900_v49 }
 0x26a   : > { %v3936_v54 = vsel %vm3923_vm2, %v12728_v27, %v3901_v36  ;;  %v3937_v53 = vsel %vm3923_vm2, %v12733_v50, %v3902_v12  ;;  %v3938_v15 = vsel %vm3923_vm2, %v3919_v22, %v3903_v4  ;;  %v3939_v33 = vsel %vm3923_vm2, %v3920_v3, %v12763_v13 }
 0x26b   : > { %v3940_v34 = vsel %vm3923_vm2, %v3889_v37, %v16281_v51  ;;  %v3941_v26 = vsel %vm3923_vm2, %v3890_v8, %v16282_v48  ;;  %v3942_v16 = vsel %vm3923_vm2, %v3891_v21, %v16283_v63  ;;  %v3943_v46 = vsel %vm3923_vm2, %v3892_v29, %v16286_v24  ;;  %v12933_v51 = vpop.permute.xlu1 %4473  ;;  %v12935_v48 = vpop.permute.xlu0 %4471  ;;  %v16289_v63 = vld [vmem:[#allocation57_spill] sm:$0xff] }
 0x26c   : > { %v3944_v6 = vsel %vm3923_vm2, %v3893_v28, %v16287_v44  ;;  %v3945_v37 = vsel %vm3923_vm2, %v3894_v32, %v16288_v5  ;;  %v3946_v8 = vsel %vm3923_vm2, %v3895_v14, %v12578_v59  ;;  %v3947_v21 = vsel %vm3923_vm2, %v3896_v39, %v12592_v20 }
 0x26d   : > { %v3948_v29 = vsel %vm3923_vm2, %v3897_v62, %v12636_v0  ;;  %v3949_v28 = vsel %vm3923_vm2, %v3898_v47, %v12642_v7  ;;  %v3950_v32 = vsel %vm3923_vm2, %v3899_v23, %v12684_v31  ;;  %v3951_v59 = vsel %vm3923_vm2, %v3900_v49, %v12689_v40 }
 0x26e   : > { %v3952_v20 = vsel %vm3923_vm2, %v3901_v36, %v12728_v27  ;;  %v3953_v0 = vsel %vm3923_vm2, %v3902_v12, %v12733_v50  ;;  %v3954_v7 = vsel %vm3923_vm2, %v3903_v4, %v3919_v22  ;;  %v3955_v31 = vsel %vm3923_vm2, %v12763_v13, %v3920_v3 }
 0x26f   : > { %v3988_v14 = vcombine.low %v3924_v11, %v3925_v18  ;;  %v3989_v39 = vcombine.low %v3926_v17, %v3927_v43  ;;  %v3990_v62 = vcombine.low %v3928_v38, %v3929_v19  ;;  %v3991_v47 = vcombine.low %v3930_v1, %v3931_v41  ;;  %v12959_v24 = vpop.permute.xlu1 %4477  ;;  %v12961_v43 = vpop.permute.xlu0 %4475 }
 0x270   : > { %v4037_v40 = vcombine.low %v3932_v2, %v3933_v45  ;;  %v4038_v23 = vcombine.low %v3934_v58, %v3935_v55  ;;  %v4039_v49 = vcombine.low %v3936_v54, %v3937_v53  ;;  %v4040_v12 = vcombine.low %v3938_v15, %v3939_v33  ;;  %v7128_v15 = vld [vmem:[%s7550_s14 + $0xc6] ss:$8 sm:$0xf] }
 0x271   : > { %v3998_v27 = vrot.slane %v3988_v14, %v16289_v63  ;;  %v4005_v36 = vrot.slane %v3989_v39, %v16289_v63  ;;  %v4012_v50 = vrot.slane %v3990_v62, %v16289_v63  ;;  %v4019_v4 = vrot.slane %v3991_v47, %v16289_v63  ;;  %v7129_v33 = vld [vmem:[%s7550_s14 + $0xc6] ss:$8 sm:$0xf0] }
 0x272   : > { %v4047_v22 = vrot.slane %v4037_v40, %v16289_v63  ;;  %v4054_v10 = vrot.slane %v4038_v23, %v16289_v63  ;;  %v4061_v13 = vrot.slane %v4039_v49, %v16289_v63  ;;  %v4068_v11 = vrot.slane %v4040_v12, %v16289_v63  ;;  %v16290_v47 = vld [vmem:[#allocation46_spill] sm:$0xff]  ;;  %v16291_v40 = vld [vmem:[#allocation47_spill] sm:$0xff] }
 0x273   : > { %v4020_v3 = vcombine.low %v3998_v27, %v4005_v36  ;;  %v4086_v18 = vcombine.low %v3940_v34, %v3941_v26  ;;  %v4087_v17 = vcombine.low %v3942_v16, %v3943_v46  ;;  %v4021_v44 = vcombine.low %v4012_v50, %v4019_v4  ;;  %v16292_v27 = vld [vmem:[#allocation21_spill] sm:$0xff]  ;;  %v16293_v50 = vld [vmem:[#allocation15_spill] sm:$0xff] }
 0x274   : > { %v4069_v38 = vcombine.low %v4047_v22, %v4054_v10  ;;  %v4088_v5 = vcombine.low %v3944_v6, %v3945_v37  ;;  %v4089_v19 = vcombine.low %v3946_v8, %v3947_v21  ;;  %v4070_v41 = vcombine.low %v4061_v13, %v4068_v11  ;;  %v16294_v10 = vld [vmem:[#allocation48_spill] sm:$0xff] }
 0x275   : > { %v4028_v1 = vrot.slane %v4020_v3, %v16289_v63  ;;  %v4096_v2 = vrot.slane %v4086_v18, %v16289_v63  ;;  %v4103_v45 = vrot.slane %v4087_v17, %v16289_v63  ;;  %v4035_v26 = vrot.slane %v4021_v44, %v16289_v63  ;;  %v16295_v17 = vld [vmem:[#allocation49_spill] sm:$0xff] }
 0x276   : > { %v4077_v46 = vrot.slane %v4069_v38, %v16289_v63  ;;  %v4110_v16 = vrot.slane %v4088_v5, %v16289_v63  ;;  %v4117_v58 = vrot.slane %v4089_v19, %v16289_v63  ;;  %v4084_v6 = vrot.slane %v4070_v41, %v16289_v63 }
 0x277   : > { %v4118_v55 = vcombine.low %v4096_v2, %v4103_v45  ;;  %v4135_v54 = vcombine.low %v3948_v29, %v3949_v28  ;;  %v4136_v53 = vcombine.low %v3950_v32, %v3951_v59  ;;  %v4036_v34 = vcombine.low %v4028_v1, %v4035_v26  ;;  %v12981_v32 = vpop.permute.xlu1 %4481  ;;  %v12983_v59 = vpop.permute.xlu0 %4479  ;;  %v16296_v2 = vld [vmem:[#allocation14_spill] sm:$0xff] }
 0x278   : > { %v4119_v37 = vcombine.low %v4110_v16, %v4117_v58  ;;  %v4137_v8 = vcombine.low %v3952_v20, %v3953_v0  ;;  %v4138_v21 = vcombine.low %v3954_v7, %v3955_v31  ;;  %v4085_v14 = vcombine.low %v4077_v46, %v4084_v6  ;;  %v16299_v46 = vld [vmem:[#allocation50_spill] sm:$0xff]  ;;  %v16300_v6 = vld [vmem:[#allocation51_spill] sm:$0xff] }
 0x279   : > { %v4126_v39 = vrot.slane %v4118_v55, %v16289_v63  ;;  %v4145_v29 = vrot.slane %v4135_v54, %v16289_v63  ;;  %v4152_v28 = vrot.slane %v4136_v53, %v16289_v63  ;;  %7098 = vst [vmem:[%s9550_s11 + $0x4] ss:$8 sm:$0xf] %v4036_v34  ;;  %7099 = vst [vmem:[%s9550_s11 + $0x4] ss:$8 sm:$0xf0] %v4036_v34  ;;  %v4515_v22 = vstv %s11261_s19 }
 0x27a   : > { %v4133_v20 = vrot.slane %v4119_v37, %v16289_v63  ;;  %v4159_v0 = vrot.slane %v4137_v8, %v16289_v63  ;;  %v4166_v7 = vrot.slane %v4138_v21, %v16289_v63  ;;  %v12990_v31 = vor.u32 %v7129_v33, %v7128_v15  ;;  %7100 = vst [vmem:[%s9550_s11 + $0x44] ss:$8 sm:$0xf] %v4085_v14  ;;  %s4619_s19 = sand.u32 4, %s12976_s18  ;;  %v16301_v33 = vld [vmem:[#allocation64_spill] sm:$0xff]  ;;  %v16303_v21 = vld [vmem:[#allocation58_spill] sm:$0xff] }
 0x27b   : > { %v4167_v62 = vcombine.low %v4145_v29, %v4152_v28  ;;  %7101 = vst [vmem:[%s9550_s11 + $0x44] ss:$8 sm:$0xf0] %v4085_v14  ;;  %vm5012_vm6 = vcmp.lt.s32.totalorder %v16290_v47, %v12146_v60  ;;  %vm5011_vm8 = vcmp.lt.s32.totalorder %v16291_v40, %v12146_v60  ;;  %vm5014_vm11 = vcmp.lt.s32.totalorder %v16294_v10, %v12146_v60  ;;  %v13035_v19 = vpop.permute.xlu1 %4485  ;;  %v13037_v1 = vpop.permute.xlu0 %4483  ;;  %v7138_v54 = vld [vmem:[%s7550_s14 + $0x7] ss:$8 sm:$0xf] }
 0x27c   : > { %v4134_v23 = vcombine.low %v4126_v39, %v4133_v20  ;;  %v4168_v49 = vcombine.low %v4159_v0, %v4166_v7  ;;  %v5126_v36 = vrot.slane %v12990_v31, %v16292_v27  ;;  %v5122_v12 = vrot.slane %v12990_v31, %v16293_v50  ;;  %v16302_v34 = vld [vmem:[#allocation80_spill] sm:$0xff] }
 0x27d   : > { %v4175_v4 = vrot.slane %v4167_v62, %v16289_v63  ;;  %v5134_v13 = vrot.slane %v12990_v31, %v16150_v9  ;;  %vm5013_vm5 = vcmp.lt.s32.totalorder %v16295_v17, %v12146_v60  ;;  %v13025_v44 = vstv %s4549_s9  ;;  %v7139_v8 = vld [vmem:[%s7550_s14 + $0x7] ss:$8 sm:$0xf0] }
 0x27e   : > { %v4182_v3 = vrot.slane %v4168_v49, %v16289_v63  ;;  %7102 = vst [vmem:[%s9550_s11 + $0x84] ss:$8 sm:$0xf] %v4134_v23  ;;  %7103 = vst [vmem:[%s9550_s11 + $0x84] ss:$8 sm:$0xf0] %v4134_v23  ;;  %v13027_v38 = vstv %s4584_s27  ;;  %v5130_v5 = vrot.slane %v12990_v31, %v16226_v35  ;;  %vm13040_vm14 = vcmp.lt.s32.totalorder %v16296_v2, %v4515_v22 }
 0x27f   : > { %v5208_v11 = vsel %vm5012_vm6, %v5126_v36, 0.0  ;;  %v5207_v18 = vsel %vm5011_vm8, %v5122_v12, 0.0  ;;  %v5210_v26 = vsel %vm5014_vm11, %v5134_v13, 0.0  ;;  %vm5016_vm0 = vcmp.lt.s32.totalorder %v16299_v46, %v12146_v60  ;;  %v16304_v62 = vld [vmem:[#allocation52_spill] sm:$0xff]  ;;  %v16305_v23 = vld [vmem:[#allocation79_spill] sm:$0xff]  ;;  %v16306_v36 = vld [vmem:[#allocation53_spill] sm:$0xff]  ;;  %v13111_v22 = vpop.permute.xlu1 %4489 }
 0x280   : > { %5269 = vrot.lane.b32.xlu1 %v5208_v11, %s12221_s12  ;;  %5267 = vrot.lane.b32.xlu0 %v5207_v18, %s12221_s12  ;;  %v4183_v41 = vcombine.low %v4175_v4, %v4182_v3  ;;  %v5209_v16 = vsel %vm5013_vm5, %v5130_v5, 0.0  ;;  %v5142_v58 = vrot.slane %v12990_v31, %v16133_v52  ;;  %vm5015_vm12 = vcmp.lt.s32.totalorder %v16300_v6, %v12146_v60  ;;  %v7140_v46 = vld [vmem:[%s7550_s14 + $0x47] ss:$8 sm:$0xf] }
 0x281   : > { %v5138_v55 = vrot.slane %v12990_v31, %v16158_v57  ;;  %v13060_v53 = vstv %s4619_s19  ;;  %v13062_v15 = vstv %s4654_s30  ;;  %vm4551_vm1 = vcmp.ne.s32.totalorder %v13025_v44, 0  ;;  %v7141_v17 = vld [vmem:[%s7550_s14 + $0x47] ss:$8 sm:$0xf0] }
 0x282   : > { %7104 = vst [vmem:[%s9550_s11 + $0xc4] ss:$8 sm:$0xf] %v4183_v41  ;;  %7105 = vst [vmem:[%s9550_s11 + $0xc4] ss:$8 sm:$0xf0] %v4183_v41  ;;  %v4545_v37 = vsel %vm13040_vm14, %v16302_v34, %v16301_v33  ;;  %v4546_v14 = vsel %vm13040_vm14, %v16303_v21, %v16302_v34  ;;  %v4544_v39 = vsel %vm13040_vm14, %v16301_v33, %v12723_v56  ;;  %v13085_v28 = vstv %s13000_s10 }
 0x283   : > { %v5150_v29 = vrot.slane %v12990_v31, %v16117_v30  ;;  %v5212_v20 = vsel %vm5016_vm0, %v5142_v58, 0.0  ;;  %v5211_v0 = vsel %vm5015_vm12, %v5138_v55, 0.0  ;;  %v4543_v7 = vsel %vm13040_vm14, %v12723_v56, %v12721_v25  ;;  %v13113_v56 = vpop.permute.xlu0 %4487  ;;  %v16308_v58 = vld [vmem:[#allocation20_spill] sm:$0xff]  ;;  %v16310_v33 = vld [vmem:[#allocation82_spill] sm:$0xff]  ;;  %s13186_s10 = sand.u32 127, %s5984_s16  }
 0x284   : > { %5273 = vrot.lane.b32.xlu1 %v5210_v26, %s12221_s12  ;;  %5271 = vrot.lane.b32.xlu0 %v5209_v16, %s12221_s12  ;;  %vm5018_vm9 = vcmp.lt.s32.totalorder %v16304_v62, %v12146_v60  ;;  %v13103_v49 = vsel %vm13040_vm14, %v16305_v23, %v16303_v21  ;;  %vm5017_vm7 = vcmp.lt.s32.totalorder %v16306_v36, %v12146_v60  ;;  %vm4586_vm3 = vcmp.ne.s32.totalorder %v13027_v38, 0  ;;  %v16307_v26 = vld [vmem:[#allocation116_spill] sm:$0xff]  ;;  %v16319_v62 = vld [vmem:[#allocation26_spill] sm:$0xff] }
 0x285   : > { %v5146_v12 = vrot.slane %v12990_v31, %v16161_v61  ;;  %v13109_v4 = vor.u32 %v7139_v8, %v7138_v54  ;;  %v13118_v13 = vsel %vm4551_vm1, %v13103_v49, %v4546_v14  ;;  %v13122_v3 = vsel %vm4551_vm1, %v4546_v14, %v4545_v37  ;;  %v16309_v54 = vld [vmem:[#allocation81_spill] sm:$0xff] }
 0x286   : > { %v4556_v60 = vsel %vm4551_vm1, %v4545_v37, %v4544_v39  ;;  %v4557_v31 = vsel %vm4551_vm1, %v4544_v39, %v4543_v7  ;;  %v5214_v11 = vsel %vm5018_vm9, %v5150_v29, 0.0  ;;  %v4542_v18 = vsel %vm13040_vm14, %v12721_v25, %v12792_v42 }
 0x287   : > { %v5798_v5 = vrot.slane %v13109_v4, %v16292_v27  ;;  %v5213_v41 = vsel %vm5017_vm7, %v5146_v12, 0.0  ;;  %v4541_v16 = vsel %vm13040_vm14, %v12792_v42, %v16307_v26  ;;  %vm5756_vm4 = vcmp.lt.s32.totalorder %v16308_v58, %v13085_v28 }
 0x288   : > { %5277 = vrot.lane.b32.xlu1 %v5212_v20, %s12221_s12  ;;  %5275 = vrot.lane.b32.xlu0 %v5211_v0, %s12221_s12  ;;  %v5794_v55 = vrot.slane %v13109_v4, %v16293_v50  ;;  %v13148_v25 = vsel %vm4586_vm3, %v13118_v13, %v4556_v60  ;;  %vm5755_vm15 = vcmp.lt.s32.totalorder %v16296_v2, %v13085_v28  ;;  %vm4621_vm10 = vcmp.ne.s32.totalorder %v13060_v53, 0  ;;  %v13179_v0 = vpop.permute.xlu1 %4493 }
 0x289   : > { %v4539_v42 = vsel %vm13040_vm14, %v16310_v33, %v16309_v54  ;;  %v4540_v34 = vsel %vm13040_vm14, %v16307_v26, %v16310_v33  ;;  %v13164_v37 = vsel %vm4586_vm3, %v13122_v3, %v4557_v31  ;;  %v4558_v8 = vsel %vm4551_vm1, %v4543_v7, %v4542_v18  ;;  %v13181_v7 = vpop.permute.xlu0 %4491  ;;  %v16313_v26 = vld [vmem:[#allocation16_spill] sm:$0xff] }
 0x28a   : > { %16311 = vst [vmem:[#allocation83_spill] sm:$0xff] %v13164_v37  ;;  %v4560_v21 = vsel %vm4551_vm1, %v4541_v16, %v4540_v34  ;;  %v4561_v14 = vsel %vm4551_vm1, %v4540_v34, %v4539_v42  ;;  %v4559_v39 = vsel %vm4551_vm1, %v4542_v18, %v4541_v16  ;;  %v5952_v29 = vsel %vm5756_vm4, %v5798_v5, 0.0 }
 0x28b   : > { %v4595_v20 = vsel %vm4586_vm3, %v4558_v8, %v4560_v21  ;;  %v5951_v12 = vsel %vm5755_vm15, %v5794_v55, 0.0  ;;  %v5806_v18 = vrot.slane %v13109_v4, %v16150_v9  ;;  %v5802_v5 = vrot.slane %v13109_v4, %v16226_v35 }
 0x28c   : > { %5281 = vrot.lane.b32.xlu1 %v5214_v11, %s12221_s12  ;;  %5279 = vrot.lane.b32.xlu0 %v5213_v41, %s12221_s12  ;;  %v13193_v11 = vsel %vm4586_vm3, %v4559_v39, %v4561_v14  ;;  %v16312_v41 = vld [vmem:[#allocation18_spill] sm:$0xff]  ;;  %vm5757_vm2 = vcmp.lt.s32.totalorder %v16313_v26, %v13085_v28  ;;  %v4537_v16 = vsel %vm13040_vm14, %v12935_v48, %v12933_v51  ;;  %v13226_v26 = vstv %s4689_s29 }
 0x28d   : > { %vm5758_vm13 = vcmp.lt.s32.totalorder %v16312_v41, %v13085_v28  ;;  %v4538_v58 = vsel %vm13040_vm14, %v16309_v54, %v12935_v48  ;;  %v13213_v55 = vsel %vm4586_vm3, %v4556_v60, %v4558_v8  ;;  %v13217_v33 = vsel %vm4586_vm3, %v4557_v31, %v4559_v39  ;;  %v16317_v8 = vld [vmem:[#allocation22_spill] sm:$0xff]  ;;  %v13258_v2 = vpop.permute.xlu0 %4495 }
 0x28e   : > { %16314 = vst [vmem:[#allocation85_spill] sm:$0xff] %v13213_v55  ;;  %v13222_v34 = vsel %vm4621_vm10, %v13148_v25, %v4595_v20  ;;  %v4562_v41 = vsel %vm4551_vm1, %v4539_v42, %v4538_v58  ;;  %v13234_v48 = vsel %vm4621_vm10, %v13164_v37, %v13193_v11  ;;  %v4563_v60 = vsel %vm4551_vm1, %v4538_v58, %v4537_v16  ;;  %v13256_v58 = vpop.permute.xlu1 %4497 }
 0x28f   : > { %16315 = vst [vmem:[#allocation54_spill] sm:$0xff] %v13222_v34  ;;  %16316 = vst [vmem:[#allocation93_spill] sm:$0xff] %v13234_v48  ;;  %v5814_v31 = vrot.slane %v13109_v4, %v16133_v52  ;;  %v5954_v54 = vsel %vm5758_vm13, %v5806_v18, 0.0  ;;  %v5953_v42 = vsel %vm5757_vm2, %v5802_v5, 0.0  ;;  %vm5760_vm6 = vcmp.lt.s32.totalorder %v16317_v8, %v13085_v28 }
 0x290   : > { %5989 = vrot.lane.b32.xlu1 %v5952_v29, %s13186_s10  ;;  %5987 = vrot.lane.b32.xlu0 %v5951_v12, %s13186_s10  ;;  %v5810_v39 = vrot.slane %v13109_v4, %v16158_v57  ;;  %v4597_v29 = vsel %vm4586_vm3, %v4560_v21, %v4562_v41  ;;  %v16318_v12 = vld [vmem:[#allocation24_spill] sm:$0xff]  ;;  %v4535_v18 = vsel %vm13040_vm14, %v12961_v43, %v12959_v24  ;;  %vm4656_vm0 = vcmp.ne.s32.totalorder %v13062_v15, 0 }
 0x291   : > { %vm5759_vm8 = vcmp.lt.s32.totalorder %v16318_v12, %v13085_v28  ;;  %v4536_v5 = vsel %vm13040_vm14, %v12933_v51, %v12961_v43  ;;  %v4598_v21 = vsel %vm4586_vm3, %v4561_v14, %v4563_v60  ;;  %vm5762_vm11 = vcmp.lt.s32.totalorder %v16319_v62, %v13085_v28  ;;  %v16323_v62 = vld [vmem:[#allocation31_spill] sm:$0xff] }
 0x292   : > { %v4564_v36 = vsel %vm4551_vm1, %v4537_v16, %v4536_v5  ;;  %v5822_v6 = vrot.slane %v13109_v4, %v16117_v30  ;;  %v5956_v51 = vsel %vm5760_vm6, %v5814_v31, 0.0  ;;  %v4565_v43 = vsel %vm4551_vm1, %v4536_v5, %v4535_v18 }
 0x293   : > { %v4599_v14 = vsel %vm4586_vm3, %v4562_v41, %v4564_v36  ;;  %v5818_v16 = vrot.slane %v13109_v4, %v16161_v61  ;;  %v4533_v31 = vsel %vm13040_vm14, %v12983_v59, %v12981_v32  ;;  %v4534_v41 = vsel %vm13040_vm14, %v12959_v24, %v12983_v59 }
 0x294   : > { %5993 = vrot.lane.b32.xlu1 %v5954_v54, %s13186_s10  ;;  %5991 = vrot.lane.b32.xlu0 %v5953_v42, %s13186_s10  ;;  %v5955_v54 = vsel %vm5759_vm8, %v5810_v39, 0.0  ;;  %v16320_v42 = vld [vmem:[#allocation28_spill] sm:$0xff]  ;;  %v13298_v4 = vsel %vm4621_vm10, %v13213_v55, %v4597_v29  ;;  %v13303_v8 = vsel %vm4621_vm10, %v13217_v33, %v4598_v21  ;;  %v4566_v39 = vsel %vm4551_vm1, %v4535_v18, %v4534_v41 }
 0x295   : > { %vm5761_vm5 = vcmp.lt.s32.totalorder %v16320_v42, %v13085_v28  ;;  %16321 = vst [vmem:[#allocation86_spill] sm:$0xff] %v13298_v4  ;;  %v13307_v12 = vor.u32 %v7141_v17, %v7140_v46  ;;  %v4600_v24 = vsel %vm4586_vm3, %v4563_v60, %v4565_v43  ;;  %v13313_v59 = vsel %vm4621_vm10, %v4595_v20, %v4599_v14  ;;  %v16322_v46 = vld [vmem:[#allocation30_spill] sm:$0xff] }
 0x296   : > { %v5958_v5 = vsel %vm5762_vm11, %v5822_v6, 0.0  ;;  %v4567_v42 = vsel %vm4551_vm1, %v4534_v41, %v4533_v31  ;;  %v5957_v10 = vsel %vm5761_vm5, %v5818_v16, 0.0  ;;  %v4601_v17 = vsel %vm4586_vm3, %v4564_v36, %v4566_v39  ;;  %v13328_v60 = vpop.permute.xlu1 %4501  ;;  %v13330_v6 = vpop.permute.xlu0 %4499 }
 0x297   : > { %vm5764_vm12 = vcmp.lt.s32.totalorder %v16322_v46, %v13085_v28  ;;  %v5830_v20 = vrot.slane %v13307_v12, %v16292_v27  ;;  %vm5763_vm9 = vcmp.lt.s32.totalorder %v16323_v62, %v13085_v28  ;;  %v5826_v18 = vrot.slane %v13307_v12, %v16293_v50 }
 0x298   : > { %5997 = vrot.lane.b32.xlu1 %v5956_v51, %s13186_s10  ;;  %5995 = vrot.lane.b32.xlu0 %v5955_v54, %s13186_s10  ;;  %v4531_v36 = vsel %vm13040_vm14, %v13037_v1, %v13035_v19  ;;  %v4532_v51 = vsel %vm13040_vm14, %v12981_v32, %v13037_v1  ;;  %v13347_v16 = vsel %vm4621_vm10, %v13193_v11, %v4600_v24  ;;  %v16324_v11 = vld [vmem:[#allocation32_spill] sm:$0xff] }
 0x299   : > { %v4602_v54 = vsel %vm4586_vm3, %v4565_v43, %v4567_v42  ;;  %v4568_v41 = vsel %vm4551_vm1, %v4533_v31, %v4532_v51  ;;  %v4569_v62 = vsel %vm4551_vm1, %v4532_v51, %v4531_v36  ;;  %v13357_v40 = vsel %vm4621_vm10, %v4597_v29, %v4601_v17 }
 0x29a   : > { %v4603_v32 = vsel %vm4586_vm3, %v4566_v39, %v4568_v41  ;;  %v4604_v1 = vsel %vm4586_vm3, %v4567_v42, %v4569_v62  ;;  %vm5766_vm7 = vcmp.lt.s32.totalorder %v16324_v11, %v13085_v28  ;;  %v5960_v43 = vsel %vm5764_vm12, %v5830_v20, 0.0  ;;  %v13376_v42 = vpop.permute.xlu1 %4505  ;;  %v13378_v51 = vpop.permute.xlu0 %4503 }
 0x29b   : > { %v5959_v31 = vsel %vm5763_vm9, %v5826_v18, 0.0  ;;  %v13372_v29 = vsel %vm4621_vm10, %v4599_v14, %v4603_v32  ;;  %v5838_v39 = vrot.slane %v13307_v12, %v16150_v9  ;;  %v4529_v14 = vsel %vm13040_vm14, %v13113_v56, %v13111_v22 }
 0x29c   : > { %6001 = vrot.lane.b32.xlu1 %v5958_v5, %s13186_s10  ;;  %5999 = vrot.lane.b32.xlu0 %v5957_v10, %s13186_s10  ;;  %v13382_v10 = vsel %vm4621_vm10, %v4600_v24, %v4604_v1  ;;  %v5834_v5 = vrot.slane %v13307_v12, %v16226_v35  ;;  %v4530_v46 = vsel %vm13040_vm14, %v13035_v19, %v13113_v56  ;;  %v16325_v24 = vld [vmem:[#allocation33_spill] sm:$0xff]  ;;  %v16326_v19 = vld [vmem:[#allocation34_spill] sm:$0xff] }
 0x29d   : > { %v13396_v20 = vsel %vm4621_vm10, %v4598_v21, %v4602_v54  ;;  %vm5765_vm4 = vcmp.lt.s32.totalorder %v16325_v24, %v13085_v28  ;;  %v4570_v18 = vsel %vm4551_vm1, %v4531_v36, %v4530_v46  ;;  %v4571_v47 = vsel %vm4551_vm1, %v4530_v46, %v4529_v14 }
 0x29e   : > { %v4605_v63 = vsel %vm4586_vm3, %v4568_v41, %v4570_v18  ;;  %v4606_v55 = vsel %vm4586_vm3, %v4569_v62, %v4571_v47  ;;  %vm5768_vm15 = vcmp.lt.s32.totalorder %v16326_v19, %v13085_v28  ;;  %v5846_v56 = vrot.slane %v13307_v12, %v16133_v52  ;;  %v16329_v19 = vld [vmem:[#allocation35_spill] sm:$0xff] }
 0x29f   : > { %v13418_v21 = vsel %vm4656_vm0, %v13222_v34, %v13372_v29  ;;  %v13424_v36 = vsel %vm4656_vm0, %v13234_v48, %v13382_v10  ;;  %v5962_v41 = vsel %vm5766_vm7, %v5838_v39, 0.0  ;;  %v5842_v62 = vrot.slane %v13307_v12, %v16158_v57 }
 0x2a0   : > { %6005 = vrot.lane.b32.xlu1 %v5960_v43, %s13186_s10  ;;  %6003 = vrot.lane.b32.xlu0 %v5959_v31, %s13186_s10  ;;  %16327 = vst [vmem:[#allocation65_spill] sm:$0xff] %v13418_v21  ;;  %16328 = vst [vmem:[#allocation66_spill] sm:$0xff] %v13424_v36  ;;  %v13431_v43 = vpop.permute.xlu1 %4509  ;;  %v13433_v31 = vpop.permute.xlu0 %4507  ;;  %v5961_v46 = vsel %vm5765_vm4, %v5834_v5, 0.0  ;;  %v13437_v24 = vsel %vm4621_vm10, %v4601_v17, %v4605_v63  ;;  %vm5767_vm13 = vcmp.lt.s32.totalorder %v16329_v19, %v13085_v28  ;;  %v16330_v5 = vld [vmem:[#allocation36_spill] sm:$0xff] }
 0x2a1   : > { %v4527_v11 = vsel %vm13040_vm14, %v13181_v7, %v13179_v0  ;;  %v13447_v39 = vsel %vm4621_vm10, %v4602_v54, %v4606_v55  ;;  %v5964_v36 = vsel %vm5768_vm15, %v5846_v56, 0.0  ;;  %v4528_v17 = vsel %vm13040_vm14, %v13111_v22, %v13181_v7  ;;  %v7142_v56 = vld [vmem:[%s7550_s14 + $0x87] ss:$8 sm:$0xf] }
 0x2a2   : > { %vm5770_vm2 = vcmp.lt.s32.totalorder %v16330_v5, %v13085_v28  ;;  %v4572_v19 = vsel %vm4551_vm1, %v4529_v14, %v4528_v17  ;;  %v4573_v21 = vsel %vm4551_vm1, %v4528_v17, %v4527_v11  ;;  %v5854_v48 = vrot.slane %v13307_v12, %v16117_v30  ;;  %v7143_v17 = vld [vmem:[%s7550_s14 + $0x87] ss:$8 sm:$0xf0] }
 0x2a3   : > { %v5850_v54 = vrot.slane %v13307_v12, %v16161_v61  ;;  %v5963_v34 = vsel %vm5767_vm13, %v5842_v62, 0.0  ;;  %v4607_v22 = vsel %vm4586_vm3, %v4570_v18, %v4572_v19  ;;  %v4608_v7 = vsel %vm4586_vm3, %v4571_v47, %v4573_v21  ;;  %v16331_v47 = vld [vmem:[#allocation37_spill] sm:$0xff] }
 0x2a4   : > { %6009 = vrot.lane.b32.xlu1 %v5962_v41, %s13186_s10  ;;  %6007 = vrot.lane.b32.xlu0 %v5961_v46, %s13186_s10  ;;  %v4525_v14 = vsel %vm13040_vm14, %v13258_v2, %v13256_v58  ;;  %v13475_v37 = vpop.permute.xlu1 %4513  ;;  %v13477_v12 = vpop.permute.xlu0 %4511  ;;  %v13481_v41 = vsel %vm4621_vm10, %v4603_v32, %v4607_v22  ;;  %v13485_v18 = vsel %vm4621_vm10, %v4604_v1, %v4608_v7 }
 0x2a5   : > { %vm5769_vm6 = vcmp.lt.s32.totalorder %v16331_v47, %v13085_v28  ;;  %v4526_v62 = vsel %vm13040_vm14, %v13179_v0, %v13258_v2  ;;  %v13497_v46 = vsel %vm4656_vm0, %v13298_v4, %v13437_v24  ;;  %v13503_v32 = vsel %vm4656_vm0, %v13303_v8, %v13447_v39 }
 0x2a6   : > { %16332 = vst [vmem:[#allocation87_spill] sm:$0xff] %v13497_v46  ;;  %v4574_v1 = vsel %vm4551_vm1, %v4527_v11, %v4526_v62  ;;  %v4575_v47 = vsel %vm4551_vm1, %v4526_v62, %v4525_v14  ;;  %v5966_v2 = vsel %vm5770_vm2, %v5854_v48, 0.0  ;;  %v13516_v4 = vor.u32 %v7143_v17, %v7142_v56 }
 0x2a7   : > { %v4609_v0 = vsel %vm4586_vm3, %v4572_v19, %v4574_v1  ;;  %v4610_v46 = vsel %vm4586_vm3, %v4573_v21, %v4575_v47  ;;  %v13524_v11 = vsel %vm4656_vm0, %v13313_v59, %v13481_v41  ;;  %v13530_v48 = vsel %vm4656_vm0, %v13347_v16, %v13485_v18  ;;  %v16335_v19 = vld [vmem:[#allocation39_spill] sm:$0xff] }
 0x2a8   : > { %6013 = vrot.lane.b32.xlu1 %v5964_v36, %s13186_s10  ;;  %6011 = vrot.lane.b32.xlu0 %v5963_v34, %s13186_s10  ;;  %16333 = vst [vmem:[#allocation72_spill] sm:$0xff] %v13530_v48  ;;  %v5965_v5 = vsel %vm5769_vm6, %v5850_v54, 0.0  ;;  %v13534_v21 = vsel %vm4621_vm10, %v4605_v63, %v4609_v0  ;;  %v16334_v34 = vld [vmem:[#allocation38_spill] sm:$0xff]  ;;  %v5862_v36 = vrot.slane %v13516_v4, %v16292_v27 }
 0x2a9   : > { %vm5772_vm8 = vcmp.lt.s32.totalorder %v16334_v34, %v13085_v28  ;;  %vm5771_vm11 = vcmp.lt.s32.totalorder %v16335_v19, %v13085_v28  ;;  %v5858_v56 = vrot.slane %v13516_v4, %v16293_v50  ;;  %v13546_v54 = vsel %vm4621_vm10, %v4606_v55, %v4610_v46  ;;  %v13562_v19 = vpop.permute.xlu1 %5221  ;;  %v13564_v55 = vpop.permute.xlu0 %5219 }
 0x2aa   : > { %v13552_v63 = vsel %vm4656_vm0, %v13357_v40, %v13534_v21  ;;  %v4523_v17 = vsel %vm13040_vm14, %v13330_v6, %v13328_v60  ;;  %v4524_v62 = vsel %vm13040_vm14, %v13256_v58, %v13330_v6  ;;  %16337 = vst [vmem:[#allocation89_spill] sm:$0xff] %v13562_v19  ;;  %16338 = vst [vmem:[#allocation73_spill] sm:$0xff] %v13564_v55  ;;  %v5968_v58 = vsel %vm5772_vm8, %v5862_v36, 0.0  ;;  %v16341_v19 = vld [vmem:[#allocation42_spill] sm:$0xff] }
 0x2ab   : > { %16336 = vst [vmem:[#allocation88_spill] sm:$0xff] %v13552_v63  ;;  %v4576_v50 = vsel %vm4551_vm1, %v4525_v14, %v4524_v62  ;;  %v4577_v27 = vsel %vm4551_vm1, %v4524_v62, %v4523_v17  ;;  %v16339_v63 = vld [vmem:[#allocation40_spill] sm:$0xff]  ;;  %v5870_v48 = vrot.slane %v13516_v4, %v16150_v9  ;;  %v5967_v6 = vsel %vm5771_vm11, %v5858_v56, 0.0 }
 0x2ac   : > { %vm5774_vm5 = vcmp.lt.s32.totalorder %v16339_v63, %v13085_v28  ;;  %6017 = vrot.lane.b32.xlu1 %v5966_v2, %s13186_s10  ;;  %6015 = vrot.lane.b32.xlu0 %v5965_v5, %s13186_s10  ;;  %v4611_v14 = vsel %vm4586_vm3, %v4574_v1, %v4576_v50  ;;  %v4612_v62 = vsel %vm4586_vm3, %v4575_v47, %v4577_v27 }
 0x2ad   : > { %v13585_v55 = vsel %vm4621_vm10, %v4607_v22, %v4611_v14  ;;  %v13589_v2 = vsel %vm4621_vm10, %v4608_v7, %v4612_v62  ;;  %v5866_v5 = vrot.slane %v13516_v4, %v16226_v35  ;;  %v4521_v34 = vsel %vm13040_vm14, %v13378_v51, %v13376_v42  ;;  %v16340_v7 = vld [vmem:[#allocation41_spill] sm:$0xff] }
 0x2ae   : > { %v13601_v1 = vsel %vm4656_vm0, %v13396_v20, %v13546_v54  ;;  %v13607_v22 = vsel %vm4656_vm0, %v13372_v29, %v13585_v55  ;;  %vm5773_vm12 = vcmp.lt.s32.totalorder %v16340_v7, %v13085_v28  ;;  %v4522_v47 = vsel %vm13040_vm14, %v13328_v60, %v13378_v51 }
 0x2af   : > { %v4578_v36 = vsel %vm4551_vm1, %v4523_v17, %v4522_v47  ;;  %v4579_v56 = vsel %vm4551_vm1, %v4522_v47, %v4521_v34  ;;  %vm5776_vm9 = vcmp.lt.s32.totalorder %v16341_v19, %v13085_v28  ;;  %v5878_v29 = vrot.slane %v13516_v4, %v16133_v52  ;;  %v13642_v19 = vpop.permute.xlu1 %5225 }
 0x2b0   : > { %6021 = vrot.lane.b32.xlu1 %v5968_v58, %s13186_s10  ;;  %6019 = vrot.lane.b32.xlu0 %v5967_v6, %s13186_s10  ;;  %v13629_v7 = vsel %vm4656_vm0, %v13382_v10, %v13589_v2  ;;  %v5970_v60 = vsel %vm5774_vm5, %v5870_v48, 0.0  ;;  %v13636_v51 = vsel %vm4586_vm3, %v4576_v50, %v4578_v36  ;;  %v13640_v17 = vsel %vm4586_vm3, %v4577_v27, %v4579_v56  ;;  %v13644_v58 = vpop.permute.xlu0 %5223  ;;  %v16343_v48 = vld [vmem:[#allocation43_spill] sm:$0xff] }
 0x2b1   : > { %16342 = vst [vmem:[#allocation90_spill] sm:$0xff] %v13644_v58  ;;  %v5969_v10 = vsel %vm5773_vm12, %v5866_v5, 0.0  ;;  %v4648_v63 = vsel %vm4621_vm10, %v4609_v0, %v13636_v51  ;;  %vm5775_vm7 = vcmp.lt.s32.totalorder %v16343_v48, %v13085_v28  ;;  %v5874_v50 = vrot.slane %v13516_v4, %v16158_v57 }
 0x2b2   : > { %v4649_v27 = vsel %vm4621_vm10, %v4610_v46, %v13640_v17  ;;  %v5972_v6 = vsel %vm5776_vm9, %v5878_v29, 0.0  ;;  %v4519_v5 = vsel %vm13040_vm14, %v13433_v31, %v13431_v43  ;;  %v4520_v0 = vsel %vm13040_vm14, %v13376_v42, %v13433_v31  ;;  %v16344_v29 = vld [vmem:[#allocation44_spill] sm:$0xff] }
 0x2b3   : > { %v13667_v47 = vsel %vm4656_vm0, %v13437_v24, %v4648_v63  ;;  %v4580_v48 = vsel %vm4551_vm1, %v4521_v34, %v4520_v0  ;;  %v4581_v46 = vsel %vm4551_vm1, %v4520_v0, %v4519_v5  ;;  %vm5778_vm4 = vcmp.lt.s32.totalorder %v16344_v29, %v13085_v28 }
 0x2b4   : > { %6025 = vrot.lane.b32.xlu1 %v5970_v60, %s13186_s10  ;;  %6023 = vrot.lane.b32.xlu0 %v5969_v10, %s13186_s10  ;;  %v5971_v58 = vsel %vm5775_vm7, %v5874_v50, 0.0  ;;  %v4615_v42 = vsel %vm4586_vm3, %v4578_v36, %v4580_v48  ;;  %v4616_v31 = vsel %vm4586_vm3, %v4579_v56, %v4581_v46  ;;  %v5886_v24 = vrot.slane %v13516_v4, %v16117_v30  ;;  %v16345_v60 = vld [vmem:[#allocation45_spill] sm:$0xff]  ;;  %v13712_v50 = vpop.permute.xlu0 %5227 }
 0x2b5   : > { %v4650_v34 = vsel %vm4621_vm10, %v4611_v14, %v4615_v42  ;;  %v4651_v0 = vsel %vm4621_vm10, %v4612_v62, %v4616_v31  ;;  %vm5777_vm15 = vcmp.lt.s32.totalorder %v16345_v60, %v13085_v28  ;;  %v5882_v36 = vrot.slane %v13516_v4, %v16161_v61  ;;  %v13710_v62 = vpop.permute.xlu1 %5229 }
 0x2b6   : > { %v13694_v56 = vsel %vm4656_vm0, %v13447_v39, %v4649_v27  ;;  %v13699_v10 = vsel %vm4656_vm0, %v13481_v41, %v4650_v34  ;;  %v13704_v14 = vsel %vm4656_vm0, %v13485_v18, %v4651_v0  ;;  %v4548_v4 = vsel %vm13040_vm14, %v13475_v37, %v16305_v23 }
 0x2b7   : > { %v5974_v39 = vsel %vm5778_vm4, %v5886_v24, 0.0  ;;  %v4553_v41 = vsel %vm4551_vm1, %v4548_v4, %v13103_v49  ;;  %v4517_v18 = vsel %vm13040_vm14, %v13477_v12, %v13475_v37  ;;  %v4518_v23 = vsel %vm13040_vm14, %v13431_v43, %v13477_v12 }
 0x2b8   : > { %6029 = vrot.lane.b32.xlu1 %v5972_v6, %s13186_s10  ;;  %6027 = vrot.lane.b32.xlu0 %v5971_v58, %s13186_s10  ;;  %v5973_v60 = vsel %vm5777_vm15, %v5882_v36, 0.0  ;;  %v4590_v29 = vsel %vm4586_vm3, %v4553_v41, %v13122_v3  ;;  %v4552_v49 = vsel %vm4551_vm1, %v4517_v18, %v4548_v4  ;;  %v4582_v37 = vsel %vm4551_vm1, %v4519_v5, %v4518_v23  ;;  %v13780_v4 = vpop.permute.xlu0 %5231 }
 0x2b9   : > { %v4629_v45 = vsel %vm4621_vm10, %v4590_v29, %v13217_v33  ;;  %v4583_v43 = vsel %vm4551_vm1, %v4518_v23, %v4517_v18  ;;  %v4587_v12 = vsel %vm4586_vm3, %v4582_v37, %v4552_v49  ;;  %v4589_v3 = vsel %vm4586_vm3, %v4552_v49, %v13118_v13  ;;  %v13778_v36 = vpop.permute.xlu1 %5233  ;;  %16349 = vst [vmem:[#allocation74_spill] sm:$0xff] %v13780_v4  ;;  %v16352_v49 = vld [vmem:[#allocation86_spill] sm:$0xff] }
 0x2ba   : > { %v13750_v58 = vsel %vm4656_vm0, %v4629_v45, %v13396_v20  ;;  %v4588_v6 = vsel %vm4586_vm3, %v4583_v43, %v4553_v41  ;;  %v4617_v33 = vsel %vm4586_vm3, %v4580_v48, %v4582_v37  ;;  %v4618_v44 = vsel %vm4586_vm3, %v4581_v46, %v4583_v43  ;;  %v16346_v48 = vld [vmem:[#allocation83_spill] sm:$0xff]  ;;  %16348 = vst [vmem:[#allocation91_spill] sm:$0xff] %v13778_v36 }
 0x2bb   : > { %v4622_v5 = vsel %vm4621_vm10, %v4615_v42, %v4587_v12  ;;  %v4623_v13 = vsel %vm4621_vm10, %v4616_v31, %v4588_v6  ;;  %v4624_v24 = vsel %vm4621_vm10, %v4617_v33, %v4589_v3  ;;  %v4625_v20 = vsel %vm4621_vm10, %v4618_v44, %v4590_v29  ;;  %v16347_v42 = vld [vmem:[#allocation85_spill] sm:$0xff]  ;;  %v16350_v29 = vld [vmem:[#allocation54_spill] sm:$0xff] }
 0x2bc   : > { %6033 = vrot.lane.b32.xlu1 %v5974_v39, %s13186_s10  ;;  %6031 = vrot.lane.b32.xlu0 %v5973_v60, %s13186_s10  ;;  %vm4691_vm14 = vcmp.ne.s32.totalorder %v13226_v26, 0  ;;  %v4626_v38 = vsel %vm4621_vm10, %v4587_v12, %v13148_v25  ;;  %v4627_v46 = vsel %vm4621_vm10, %v4588_v6, %v16346_v48  ;;  %v4628_v31 = vsel %vm4621_vm10, %v4589_v3, %v16347_v42  ;;  %v16353_v3 = vld [vmem:[#allocation65_spill] sm:$0xff]  ;;  %v16354_v6 = vld [vmem:[#allocation66_spill] sm:$0xff] }
 0x2bd   : > { %v4652_v39 = vsel %vm4621_vm10, %v13636_v51, %v4617_v33  ;;  %v4653_v25 = vsel %vm4621_vm10, %v13640_v17, %v4618_v44  ;;  %v4657_v41 = vsel %vm4656_vm0, %v13585_v55, %v4622_v5  ;;  %v4658_v18 = vsel %vm4656_vm0, %v13589_v2, %v4623_v13  ;;  %v16355_v33 = vld [vmem:[#allocation87_spill] sm:$0xff]  ;;  %v13850_v44 = vpop.permute.xlu0 %5235 }
 0x2be   : > { %v4659_v23 = vsel %vm4656_vm0, %v4648_v63, %v4624_v24  ;;  %v4660_v60 = vsel %vm4656_vm0, %v4649_v27, %v4625_v20  ;;  %v4661_v51 = vsel %vm4656_vm0, %v4650_v34, %v4626_v38  ;;  %v4662_v53 = vsel %vm4656_vm0, %v4651_v0, %v4627_v46  ;;  %v16351_v63 = vld [vmem:[#allocation93_spill] sm:$0xff]  ;;  %16357 = vst [vmem:[#allocation95_spill] sm:$0xff] %v13850_v44 }
 0x2bf   : > { %v4663_v17 = vsel %vm4656_vm0, %v4652_v39, %v4628_v31  ;;  %v4664_v55 = vsel %vm4656_vm0, %v4653_v25, %v4629_v45  ;;  %v4665_v2 = vsel %vm4656_vm0, %v4622_v5, %v16350_v29  ;;  %v4666_v27 = vsel %vm4656_vm0, %v4623_v13, %v16351_v63  ;;  %v16358_v5 = vld [vmem:[#allocation72_spill] sm:$0xff] }
 0x2c0   : > { %v4667_v34 = vsel %vm4656_vm0, %v4624_v24, %v16352_v49  ;;  %v4668_v0 = vsel %vm4656_vm0, %v4625_v20, %v13303_v8  ;;  %v4669_v37 = vsel %vm4656_vm0, %v4626_v38, %v13313_v59  ;;  %v4670_v45 = vsel %vm4656_vm0, %v4627_v46, %v13347_v16  ;;  %v16359_v24 = vld [vmem:[#allocation88_spill] sm:$0xff] }
 0x2c1   : > { %v4671_v43 = vsel %vm4656_vm0, %v4628_v31, %v13357_v40  ;;  %v4687_v12 = vsel %vm4656_vm0, %v13534_v21, %v4652_v39  ;;  %v4688_v8 = vsel %vm4656_vm0, %v13546_v54, %v4653_v25  ;;  %v4692_v59 = vsel %vm4691_vm14, %v16353_v3, %v4657_v41  ;;  %v13848_v54 = vpop.permute.xlu1 %5237 }
 0x2c2   : > { %v4693_v16 = vsel %vm4691_vm14, %v16354_v6, %v4658_v18  ;;  %v4694_v40 = vsel %vm4691_vm14, %v16355_v33, %v4659_v23  ;;  %v4695_v21 = vsel %vm4691_vm14, %v13503_v32, %v4660_v60  ;;  %v4696_v15 = vsel %vm4691_vm14, %v13524_v11, %v4661_v51  ;;  %16356 = vst [vmem:[#allocation92_spill] sm:$0xff] %v13848_v54 }
 0x2c3   : > { %v4697_v13 = vsel %vm4691_vm14, %v16358_v5, %v4662_v53  ;;  %v4698_v20 = vsel %vm4691_vm14, %v16359_v24, %v4663_v17  ;;  %v4699_v38 = vsel %vm4691_vm14, %v13601_v1, %v4664_v55  ;;  %v4700_v48 = vsel %vm4691_vm14, %v13607_v22, %v4665_v2 }
 0x2c4   : > { %v4701_v46 = vsel %vm4691_vm14, %v13629_v7, %v4666_v27  ;;  %v4702_v42 = vsel %vm4691_vm14, %v13667_v47, %v4667_v34  ;;  %v4703_v31 = vsel %vm4691_vm14, %v13694_v56, %v4668_v0  ;;  %v4704_v39 = vsel %vm4691_vm14, %v13699_v10, %v4669_v37 }
 0x2c5   : > { %v4705_v25 = vsel %vm4691_vm14, %v13704_v14, %v4670_v45  ;;  %v4706_v29 = vsel %vm4691_vm14, %v4687_v12, %v4671_v43  ;;  %v4707_v63 = vsel %vm4691_vm14, %v4688_v8, %v13750_v58  ;;  %v4708_v49 = vsel %vm4691_vm14, %v4657_v41, %v16353_v3 }
 0x2c6   : > { %v4709_v44 = vsel %vm4691_vm14, %v4658_v18, %v16354_v6  ;;  %v4710_v54 = vsel %vm4691_vm14, %v4659_v23, %v16355_v33  ;;  %v4711_v36 = vsel %vm4691_vm14, %v4660_v60, %v13503_v32  ;;  %v4712_v4 = vsel %vm4691_vm14, %v4661_v51, %v13524_v11 }
 0x2c7   : > { %v4713_v41 = vsel %vm4691_vm14, %v4662_v53, %v16358_v5  ;;  %v4714_v18 = vsel %vm4691_vm14, %v4663_v17, %v16359_v24  ;;  %v4715_v23 = vsel %vm4691_vm14, %v4664_v55, %v13601_v1  ;;  %v4716_v32 = vsel %vm4691_vm14, %v4665_v2, %v13607_v22  ;;  %v13923_v53 = vpop.permute.xlu1 %5241  ;;  %v13925_v17 = vpop.permute.xlu0 %5239 }
 0x2c8   : > { %v4717_v11 = vsel %vm4691_vm14, %v4666_v27, %v13629_v7  ;;  %v4718_v60 = vsel %vm4691_vm14, %v4667_v34, %v13667_v47  ;;  %v4719_v51 = vsel %vm4691_vm14, %v4668_v0, %v13694_v56  ;;  %v4720_v1 = vsel %vm4691_vm14, %v4669_v37, %v13699_v10  ;;  %v16360_v34 = vld [vmem:[#allocation57_spill] sm:$0xff] }
 0x2c9   : > { %v4721_v22 = vsel %vm4691_vm14, %v4670_v45, %v13704_v14  ;;  %v4722_v7 = vsel %vm4691_vm14, %v4671_v43, %v4687_v12  ;;  %v4723_v47 = vsel %vm4691_vm14, %v13750_v58, %v4688_v8  ;;  %v4756_v56 = vcombine.low %v4692_v59, %v4693_v16 }
 0x2ca   : > { %v4757_v55 = vcombine.low %v4694_v40, %v4695_v21  ;;  %v4758_v2 = vcombine.low %v4696_v15, %v4697_v13  ;;  %v4759_v27 = vcombine.low %v4698_v20, %v4699_v38  ;;  %v4805_v10 = vcombine.low %v4700_v48, %v4701_v46 }
 0x2cb   : > { %v4766_v0 = vrot.slane %v4756_v56, %v16360_v34  ;;  %v4806_v37 = vcombine.low %v4702_v42, %v4703_v31  ;;  %v4807_v3 = vcombine.low %v4704_v39, %v4705_v25  ;;  %v4808_v6 = vcombine.low %v4706_v29, %v4707_v63  ;;  %v13943_v15 = vpop.permute.xlu1 %5245  ;;  %v13945_v5 = vpop.permute.xlu0 %5243  ;;  %v7144_v39 = vld [vmem:[%s7550_s14 + $0xc7] ss:$8 sm:$0xf] }
 0x2cc   : > { %v4773_v33 = vrot.slane %v4757_v55, %v16360_v34  ;;  %v4780_v14 = vrot.slane %v4758_v2, %v16360_v34  ;;  %v4787_v45 = vrot.slane %v4759_v27, %v16360_v34  ;;  %v4815_v43 = vrot.slane %v4805_v10, %v16360_v34  ;;  %v7145_v25 = vld [vmem:[%s7550_s14 + $0xc7] ss:$8 sm:$0xf0]  ;;  %s13983_s14 = sshrl.u32 %s5216_s7, 7 }
 0x2cd   : > { %v4822_v26 = vrot.slane %v4806_v37, %v16360_v34  ;;  %v4829_v58 = vrot.slane %v4807_v3, %v16360_v34  ;;  %v4836_v12 = vrot.slane %v4808_v6, %v16360_v34  ;;  %v4854_v8 = vcombine.low %v4708_v49, %v4709_v44  ;;  %v16364_v3 = vld [vmem:[#allocation15_spill] sm:$0xff]  ;;  %s5317_s17 = sand.u32 1, %s13983_s14  ;;  %s5352_s7 = sand.u32 2, %s13983_s14 }
 0x2ce   : > { %v4788_v59 = vcombine.low %v4766_v0, %v4773_v33  ;;  %v4789_v16 = vcombine.low %v4780_v14, %v4787_v45  ;;  %v4855_v40 = vcombine.low %v4710_v54, %v4711_v36  ;;  %v4856_v21 = vcombine.low %v4712_v4, %v4713_v41  ;;  %v16363_v0 = vld [vmem:[#allocation21_spill] sm:$0xff]  ;;  %v16365_v45 = vld [vmem:[#allocation48_spill] sm:$0xff]  ;;  %s5387_s18 = sand.u32 4, %s13983_s14  ;;  %s5422_s9 = sand.u32 8, %s13983_s14 }
 0x2cf   : > { %v4837_v13 = vcombine.low %v4815_v43, %v4822_v26  ;;  %v4838_v24 = vcombine.low %v4829_v58, %v4836_v12  ;;  %v4857_v20 = vcombine.low %v4714_v18, %v4715_v23  ;;  %v4864_v38 = vrot.slane %v4854_v8, %v16360_v34  ;;  %s5457_s27 = sand.u32 16, %s13983_s14 }
 0x2d0   : > { %v4796_v48 = vrot.slane %v4788_v59, %v16360_v34  ;;  %v4803_v46 = vrot.slane %v4789_v16, %v16360_v34  ;;  %v4871_v44 = vrot.slane %v4855_v40, %v16360_v34  ;;  %v4878_v36 = vrot.slane %v4856_v21, %v16360_v34  ;;  %v16366_v59 = vld [vmem:[#allocation49_spill] sm:$0xff] }
 0x2d1   : > { %v4845_v4 = vrot.slane %v4837_v13, %v16360_v34  ;;  %v4852_v54 = vrot.slane %v4838_v24, %v16360_v34  ;;  %v4885_v42 = vrot.slane %v4857_v20, %v16360_v34  ;;  %v4903_v31 = vcombine.low %v4716_v32, %v4717_v11 }
 0x2d2   : > { %v4804_v29 = vcombine.low %v4796_v48, %v4803_v46  ;;  %v4886_v63 = vcombine.low %v4864_v38, %v4871_v44  ;;  %v4904_v49 = vcombine.low %v4718_v60, %v4719_v51  ;;  %v4905_v41 = vcombine.low %v4720_v1, %v4721_v22  ;;  %v13965_v60 = vpop.permute.xlu1 %5249  ;;  %v13967_v51 = vpop.permute.xlu0 %5247  ;;  %v16367_v38 = vld [vmem:[#allocation50_spill] sm:$0xff]  ;;  %v16368_v46 = vld [vmem:[#allocation51_spill] sm:$0xff] }
 0x2d3   : > { %v4853_v18 = vcombine.low %v4845_v4, %v4852_v54  ;;  %v4887_v23 = vcombine.low %v4878_v36, %v4885_v42  ;;  %v4906_v56 = vcombine.low %v4722_v7, %v4723_v47  ;;  %v4913_v55 = vrot.slane %v4903_v31, %v16360_v34  ;;  %v16361_v7 = vld [vmem:[#allocation46_spill] sm:$0xff]  ;;  %v16362_v47 = vld [vmem:[#allocation47_spill] sm:$0xff] }
 0x2d4   : > { %v4894_v2 = vrot.slane %v4886_v63, %v16360_v34  ;;  %v4920_v27 = vrot.slane %v4904_v49, %v16360_v34  ;;  %v4927_v32 = vrot.slane %v4905_v41, %v16360_v34  ;;  %7114 = vst [vmem:[%s9550_s11 + $0x5] ss:$8 sm:$0xf] %v4804_v29  ;;  %7115 = vst [vmem:[%s9550_s11 + $0x5] ss:$8 sm:$0xf0] %v4804_v29  ;;  %v14015_v36 = vstv %s5317_s17 }
 0x2d5   : > { %v13963_v11 = vor.u32 %v7145_v25, %v7144_v39  ;;  %v4901_v1 = vrot.slane %v4887_v23, %v16360_v34  ;;  %v4934_v22 = vrot.slane %v4906_v56, %v16360_v34  ;;  %7116 = vst [vmem:[%s9550_s11 + $0x45] ss:$8 sm:$0xf] %v4853_v18  ;;  %7117 = vst [vmem:[%s9550_s11 + $0x45] ss:$8 sm:$0xf0] %v4853_v18  ;;  %v5283_v4 = vstv %s12221_s12 }
 0x2d6   : > { %vm5780_vm1 = vcmp.lt.s32.totalorder %v16361_v7, %v13085_v28  ;;  %vm5779_vm3 = vcmp.lt.s32.totalorder %v16362_v47, %v13085_v28  ;;  %v4935_v10 = vcombine.low %v4913_v55, %v4920_v27  ;;  %vm5782_vm10 = vcmp.lt.s32.totalorder %v16365_v45, %v13085_v28  ;;  %v14000_v21 = vpop.permute.xlu1 %5253  ;;  %v14002_v13 = vpop.permute.xlu0 %5251  ;;  %v16369_v63 = vld [vmem:[#allocation52_spill] sm:$0xff]  ;;  %v16370_v49 = vld [vmem:[#allocation53_spill] sm:$0xff]  ;;  %v16371_v18 = vld [vmem:[#allocation14_spill] sm:$0xff]  ;;  %s5986_s12 = sshrl.u32 %s5984_s16, 7  ;;  %s7027_s16 = sshll.u32 %s322_s8, 3 }
 0x2d7   : > { %v5894_v37 = vrot.slane %v13963_v11, %v16363_v0  ;;  %v5890_v6 = vrot.slane %v13963_v11, %v16364_v3  ;;  %v4902_v33 = vcombine.low %v4894_v2, %v4901_v1  ;;  %v4936_v14 = vcombine.low %v4927_v32, %v4934_v22  ;;  %v16374_v27 = vld [vmem:[#allocation90_spill] sm:$0xff]  ;;  %v16375_v1 = vld [vmem:[#allocation89_spill] sm:$0xff]  ;;  %s6085_s19 = sand.u32 1, %s5986_s12  ;;  %s6120_s30 = sand.u32 2, %s5986_s12 }
 0x2d8   : > { %v4943_v43 = vrot.slane %v4935_v10, %v16360_v34  ;;  %v5902_v12 = vrot.slane %v13963_v11, %v16150_v9  ;;  %vm5781_vm0 = vcmp.lt.s32.totalorder %v16366_v59, %v13085_v28  ;;  %v5898_v16 = vrot.slane %v13963_v11, %v16226_v35  ;;  %v16376_v10 = vld [vmem:[#allocation74_spill] sm:$0xff]  ;;  %s6155_s29 = sand.u32 4, %s5986_s12  ;;  %s6190_s14 = sand.u32 8, %s5986_s12 }
 0x2d9   : > { %v5976_v26 = vsel %vm5780_vm1, %v5894_v37, 0.0  ;;  %v5975_v58 = vsel %vm5779_vm3, %v5890_v6, 0.0  ;;  %v4950_v8 = vrot.slane %v4936_v14, %v16360_v34  ;;  %7118 = vst [vmem:[%s9550_s11 + $0x85] ss:$8 sm:$0xf] %v4902_v33  ;;  %vm5784_vm13 = vcmp.lt.s32.totalorder %v16367_v38, %v13085_v28  ;;  %v16377_v6 = vld [vmem:[#allocation91_spill] sm:$0xff] }
 0x2da   : > { %7119 = vst [vmem:[%s9550_s11 + $0x85] ss:$8 sm:$0xf0] %v4902_v33  ;;  %6037 = vrot.lane.b32.xlu1 %v5976_v26, %s13186_s10  ;;  %6035 = vrot.lane.b32.xlu0 %v5975_v58, %s13186_s10  ;;  %v5978_v40 = vsel %vm5782_vm10, %v5902_v12, 0.0  ;;  %v5977_v20 = vsel %vm5781_vm0, %v5898_v16, 0.0  ;;  %v5910_v48 = vrot.slane %v13963_v11, %v16133_v52  ;;  %vm5783_vm2 = vcmp.lt.s32.totalorder %v16368_v46, %v13085_v28  ;;  %v14045_v55 = vpop.permute.xlu1 %5257  ;;  %v5256_v2 = vpop.permute.xlu0 %5255  ;;  %v16378_v14 = vld [vmem:[#allocation92_spill] sm:$0xff] }
 0x2db   : > { %v4951_v24 = vcombine.low %v4943_v43, %v4950_v8  ;;  %v5906_v44 = vrot.slane %v13963_v11, %v16158_v57  ;;  %v14023_v54 = vstv %s5352_s7  ;;  %v5918_v39 = vrot.slane %v13963_v11, %v16117_v30  ;;  %v16380_v43 = vld [vmem:[#allocation73_spill] sm:$0xff]  ;;  %s6225_s17 = sand.u32 16, %s5986_s12  ;;  %s328_s12 = scalar_lea.vmem %s15568_s3, %s7027_s16 }
 0x2dc   : > { %v5980_v42 = vsel %vm5784_vm13, %v5910_v48, 0.0  ;;  %v14027_v25 = vstv %s5387_s18  ;;  %v14029_v29 = vstv %s5422_s9  ;;  %vm5786_vm6 = vcmp.lt.s32.totalorder %v16369_v63, %v13085_v28  ;;  %s324_s18 = scalar_lea.vmem %s15567_s2, %s7027_s16  ;;  %s7160_s7 = sshll.u32 %s7432_s25, 12 }
 0x2dd   : > { %7120 = vst [vmem:[%s9550_s11 + $0xc5] ss:$8 sm:$0xf] %v4951_v24  ;;  %7121 = vst [vmem:[%s9550_s11 + $0xc5] ss:$8 sm:$0xf0] %v4951_v24  ;;  %vm5785_vm8 = vcmp.lt.s32.totalorder %v16370_v49, %v13085_v28  ;;  %v14035_v41 = vstv %s5457_s27  ;;  %vm14038_vm11 = vcmp.lt.s32.totalorder %v16371_v18, %v5283_v4  ;;  %v5914_v56 = vrot.slane %v13963_v11, %v16161_v61  ;;  %s15513_s27 = scalar_lea.hbm %s15571_s6, %s7160_s7 }
 0x2de   : > { %6041 = vrot.lane.b32.xlu1 %v5978_v40, %s13186_s10  ;;  %6039 = vrot.lane.b32.xlu0 %v5977_v20, %s13186_s10  ;;  %v5979_v31 = vsel %vm5783_vm2, %v5906_v44, 0.0  ;;  %vm5319_vm5 = vcmp.ne.s32.totalorder %v14015_v36, 0  ;;  %v5313_v28 = vsel %vm14038_vm11, %v16374_v27, %v13642_v19  ;;  %vm5354_vm12 = vcmp.ne.s32.totalorder %v14023_v54, 0  ;;  %v5262_v48 = vpop.permute.xlu1 %5261  ;;  %v5260_v46 = vpop.permute.xlu0 %5259 }
 0x2df   : > { %v5311_v32 = vsel %vm14038_vm11, %v13712_v50, %v13710_v62  ;;  %v5312_v11 = vsel %vm14038_vm11, %v13642_v19, %v13712_v50  ;;  %v5314_v22 = vsel %vm14038_vm11, %v16375_v1, %v16374_v27  ;;  %v5982_v7 = vsel %vm5786_vm6, %v5918_v39, 0.0  ;;  %v16379_v19 = vld [vmem:[#allocation95_spill] sm:$0xff] }
 0x2e0   : > { %v5981_v47 = vsel %vm5785_vm8, %v5914_v56, 0.0  ;;  %v5310_v37 = vsel %vm14038_vm11, %v13710_v62, %v16376_v10  ;;  %v5309_v33 = vsel %vm14038_vm11, %v16376_v10, %v16377_v6  ;;  %v5307_v50 = vsel %vm14038_vm11, %v16379_v19, %v16378_v14 }
 0x2e1   : > { %v5308_v45 = vsel %vm14038_vm11, %v16377_v6, %v16379_v19  ;;  %v5306_v62 = vsel %vm14038_vm11, %v16378_v14, %v13925_v17  ;;  %v14090_v26 = vsel %vm14038_vm11, %v16380_v43, %v16375_v1  ;;  %v5324_v58 = vsel %vm5319_vm5, %v5313_v28, %v5312_v11 }
 0x2e2   : > { %6045 = vrot.lane.b32.xlu1 %v5980_v42, %s13186_s10  ;;  %6043 = vrot.lane.b32.xlu0 %v5979_v31, %s13186_s10  ;;  %v5325_v12 = vsel %vm5319_vm5, %v5312_v11, %v5311_v32  ;;  %v5305_v8 = vsel %vm14038_vm11, %v13925_v17, %v13923_v53  ;;  %v14103_v59 = vsel %vm5319_vm5, %v14090_v26, %v5314_v22  ;;  %vm5389_vm9 = vcmp.ne.s32.totalorder %v14027_v25, 0  ;;  %v5266_v6 = vpop.permute.xlu1 %5265 }
 0x2e3   : > { %v14107_v16 = vsel %vm5319_vm5, %v5314_v22, %v5313_v28  ;;  %v5326_v40 = vsel %vm5319_vm5, %v5311_v32, %v5310_v37  ;;  %v5327_v24 = vsel %vm5319_vm5, %v5310_v37, %v5309_v33  ;;  %v5328_v17 = vsel %vm5319_vm5, %v5309_v33, %v5308_v45  ;;  %v5264_v33 = vpop.permute.xlu0 %5263 }
 0x2e4   : > { %v5329_v20 = vsel %vm5319_vm5, %v5308_v45, %v5307_v50  ;;  %v5330_v38 = vsel %vm5319_vm5, %v5307_v50, %v5306_v62  ;;  %v14125_v44 = vsel %vm5354_vm12, %v14103_v59, %v5324_v58  ;;  %v14130_v4 = vsel %vm5354_vm12, %v14107_v16, %v5325_v12 }
 0x2e5   : > { %v5331_v42 = vsel %vm5319_vm5, %v5306_v62, %v5305_v8  ;;  %v5304_v31 = vsel %vm14038_vm11, %v13923_v53, %v13945_v5  ;;  %v14140_v39 = vsel %vm5354_vm12, %v5324_v58, %v5326_v40  ;;  %v5303_v63 = vsel %vm14038_vm11, %v13945_v5, %v13943_v15 }
 0x2e6   : > { %6049 = vrot.lane.b32.xlu1 %v5982_v7, %s13186_s10  ;;  %6047 = vrot.lane.b32.xlu0 %v5981_v47, %s13186_s10  ;;  %v5301_v49 = vsel %vm14038_vm11, %v13967_v51, %v13965_v60  ;;  %v5302_v56 = vsel %vm14038_vm11, %v13943_v15, %v13967_v51  ;;  %v14156_v53 = vsel %vm5354_vm12, %v5325_v12, %v5327_v24  ;;  %vm5424_vm7 = vcmp.ne.s32.totalorder %v14029_v29, 0 }
 0x2e7   : > { %v5363_v27 = vsel %vm5354_vm12, %v5326_v40, %v5328_v17  ;;  %v5364_v5 = vsel %vm5354_vm12, %v5327_v24, %v5329_v20  ;;  %v5365_v28 = vsel %vm5354_vm12, %v5328_v17, %v5330_v38  ;;  %v5366_v32 = vsel %vm5354_vm12, %v5329_v20, %v5331_v42 }
 0x2e8   : > { %v5332_v15 = vsel %vm5319_vm5, %v5305_v8, %v5304_v31  ;;  %v5299_v51 = vsel %vm14038_vm11, %v14002_v13, %v14000_v21  ;;  %v5300_v11 = vsel %vm14038_vm11, %v13965_v60, %v14002_v13  ;;  %v5333_v1 = vsel %vm5319_vm5, %v5304_v31, %v5303_v63 }
 0x2e9   : > { %v5334_v22 = vsel %vm5319_vm5, %v5303_v63, %v5302_v56  ;;  %v5335_v7 = vsel %vm5319_vm5, %v5302_v56, %v5301_v49  ;;  %v5336_v47 = vsel %vm5319_vm5, %v5301_v49, %v5300_v11  ;;  %v14188_v10 = vsel %vm5389_vm9, %v14125_v44, %v5363_v27 }
 0x2ea   : > { %v14193_v60 = vsel %vm5389_vm9, %v14130_v4, %v5364_v5  ;;  %v5337_v13 = vsel %vm5319_vm5, %v5300_v11, %v5299_v51  ;;  %v5298_v37 = vsel %vm14038_vm11, %v14000_v21, %v5256_v2  ;;  %v14203_v14 = vsel %vm5389_vm9, %v14140_v39, %v5365_v28 }
 0x2eb   : > { %v14208_v19 = vsel %vm5389_vm9, %v14156_v53, %v5366_v32  ;;  %v5367_v50 = vsel %vm5354_vm12, %v5330_v38, %v5332_v15  ;;  %v5297_v45 = vsel %vm14038_vm11, %v5256_v2, %v14045_v55  ;;  %v5368_v21 = vsel %vm5354_vm12, %v5331_v42, %v5333_v1 }
 0x2ec   : > { %v5369_v62 = vsel %vm5354_vm12, %v5332_v15, %v5334_v22  ;;  %v5370_v58 = vsel %vm5354_vm12, %v5333_v1, %v5335_v7  ;;  %v5371_v12 = vsel %vm5354_vm12, %v5334_v22, %v5336_v47  ;;  %v5372_v8 = vsel %vm5354_vm12, %v5335_v7, %v5337_v13 }
 0x2ed   : > { %v5338_v40 = vsel %vm5319_vm5, %v5299_v51, %v5298_v37  ;;  %v5295_v2 = vsel %vm14038_vm11, %v5260_v46, %v5262_v48  ;;  %v5296_v24 = vsel %vm14038_vm11, %v14045_v55, %v5260_v46  ;;  %v5339_v17 = vsel %vm5319_vm5, %v5298_v37, %v5297_v45 }
 0x2ee   : > { %v5340_v20 = vsel %vm5319_vm5, %v5297_v45, %v5296_v24  ;;  %v5341_v38 = vsel %vm5319_vm5, %v5296_v24, %v5295_v2  ;;  %v5294_v42 = vsel %vm14038_vm11, %v5262_v48, %v5264_v33  ;;  %v14242_v31 = vsel %vm5389_vm9, %v5363_v27, %v5367_v50 }
 0x2ef   : > { %v14246_v63 = vsel %vm5389_vm9, %v5364_v5, %v5368_v21  ;;  %v5406_v55 = vsel %vm5389_vm9, %v5367_v50, %v5371_v12  ;;  %v5293_v46 = vsel %vm14038_vm11, %v5264_v33, %v5266_v6  ;;  %v14254_v49 = vsel %vm5389_vm9, %v5365_v28, %v5369_v62 }
 0x2f0   : > { %v14258_v48 = vsel %vm5389_vm9, %v5366_v32, %v5370_v58  ;;  %v5407_v56 = vsel %vm5389_vm9, %v5368_v21, %v5372_v8  ;;  %v5373_v27 = vsel %vm5354_vm12, %v5336_v47, %v5338_v40  ;;  %v5374_v51 = vsel %vm5354_vm12, %v5337_v13, %v5339_v17 }
 0x2f1   : > { %v5375_v11 = vsel %vm5354_vm12, %v5338_v40, %v5340_v20  ;;  %v5376_v28 = vsel %vm5354_vm12, %v5339_v17, %v5341_v38  ;;  %v5342_v32 = vsel %vm5319_vm5, %v5295_v2, %v5294_v42  ;;  %v14275_v1 = vsel %vm5424_vm7, %v14188_v10, %v5406_v55 }
 0x2f2   : > { %v5270_v5 = vpop.permute.xlu1 %5269  ;;  %v5268_v15 = vpop.permute.xlu0 %5267  ;;  %v5343_v22 = vsel %vm5319_vm5, %v5294_v42, %v5293_v46  ;;  %v14286_v13 = vsel %vm5424_vm7, %v14193_v60, %v5407_v56  ;;  %v5408_v37 = vsel %vm5389_vm9, %v5369_v62, %v5373_v27  ;;  %v5409_v45 = vsel %vm5389_vm9, %v5370_v58, %v5374_v51 }
 0x2f3   : > { %v5291_v7 = vsel %vm14038_vm11, %v5268_v15, %v5270_v5  ;;  %v5292_v47 = vsel %vm14038_vm11, %v5266_v6, %v5268_v15  ;;  %v5410_v6 = vsel %vm5389_vm9, %v5371_v12, %v5375_v11  ;;  %v5411_v21 = vsel %vm5389_vm9, %v5372_v8, %v5376_v28 }
 0x2f4   : > { %v5344_v33 = vsel %vm5319_vm5, %v5293_v46, %v5292_v47  ;;  %v5345_v50 = vsel %vm5319_vm5, %v5292_v47, %v5291_v7  ;;  %v5377_v40 = vsel %vm5354_vm12, %v5340_v20, %v5342_v32  ;;  %v5378_v24 = vsel %vm5354_vm12, %v5341_v38, %v5343_v22 }
 0x2f5   : > { %v5379_v17 = vsel %vm5354_vm12, %v5342_v32, %v5344_v33  ;;  %v14313_v8 = vsel %vm5424_vm7, %v14203_v14, %v5408_v37  ;;  %v5380_v20 = vsel %vm5354_vm12, %v5343_v22, %v5345_v50  ;;  %v14324_v46 = vsel %vm5424_vm7, %v14208_v19, %v5409_v45 }
 0x2f6   : > { %v5274_v2 = vpop.permute.xlu1 %5273  ;;  %v5272_v62 = vpop.permute.xlu0 %5271  ;;  %v14337_v22 = vsel %vm5424_vm7, %v14242_v31, %v5410_v6  ;;  %v5414_v47 = vsel %vm5389_vm9, %v5375_v11, %v5379_v17  ;;  %vm5459_vm4 = vcmp.ne.s32.totalorder %v14035_v41, 0 }
 0x2f7   : > { %v5289_v58 = vsel %vm14038_vm11, %v5272_v62, %v5274_v2  ;;  %v5290_v12 = vsel %vm14038_vm11, %v5270_v5, %v5272_v62  ;;  %v14328_v5 = vsel %vm5389_vm9, %v5373_v27, %v5377_v40  ;;  %v14346_v27 = vsel %vm5389_vm9, %v5374_v51, %v5378_v24 }
 0x2f8   : > { %v5346_v38 = vsel %vm5319_vm5, %v5291_v7, %v5290_v12  ;;  %v5347_v42 = vsel %vm5319_vm5, %v5290_v12, %v5289_v58  ;;  %v14342_v7 = vsel %vm5424_vm7, %v14246_v63, %v5411_v21  ;;  %v14362_v51 = vsel %vm5424_vm7, %v14254_v49, %v14328_v5 }
 0x2f9   : > { %v5381_v15 = vsel %vm5354_vm12, %v5344_v33, %v5346_v38  ;;  %v5382_v32 = vsel %vm5354_vm12, %v5345_v50, %v5347_v42  ;;  %v5415_v50 = vsel %vm5389_vm9, %v5376_v28, %v5380_v20 }
 0x2fa   : > { %v5278_v33 = vpop.permute.xlu1 %5277  ;;  %v5276_v62 = vpop.permute.xlu0 %5275  ;;  %v5416_v12 = vsel %vm5389_vm9, %v5377_v40, %v5381_v15  ;;  %v5417_v11 = vsel %vm5389_vm9, %v5378_v24, %v5382_v32 }
 0x2fb   : > { %v5287_v30 = vsel %vm14038_vm11, %v5276_v62, %v5278_v33  ;;  %v5288_v61 = vsel %vm14038_vm11, %v5274_v2, %v5276_v62  ;;  %v14374_v2 = vsel %vm5424_vm7, %v14258_v48, %v14346_v27  ;;  %v14378_v62 = vsel %vm5424_vm7, %v5406_v55, %v5414_v47 }
 0x2fc   : > { %v5348_v28 = vsel %vm5319_vm5, %v5289_v58, %v5288_v61  ;;  %v5349_v40 = vsel %vm5319_vm5, %v5288_v61, %v5287_v30  ;;  %v14386_v58 = vsel %vm5424_vm7, %v5407_v56, %v5415_v50  ;;  %v14390_v61 = vsel %vm5424_vm7, %v5408_v37, %v5416_v12 }
 0x2fd   : > { %v5383_v52 = vsel %vm5354_vm12, %v5346_v38, %v5348_v28  ;;  %v5384_v24 = vsel %vm5354_vm12, %v5347_v42, %v5349_v40  ;;  %v14398_v38 = vsel %vm5424_vm7, %v5409_v45, %v5417_v11 }
 0x2fe   : > { %v5418_v57 = vsel %vm5389_vm9, %v5379_v17, %v5383_v52  ;;  %v5419_v55 = vsel %vm5389_vm9, %v5380_v20, %v5384_v24  ;;  %v5282_v9 = vpop.permute.xlu1 %5281  ;;  %v5280_v35 = vpop.permute.xlu0 %5279 }
 0x2ff   : > { %v14402_v56 = vsel %vm5424_vm7, %v5410_v6, %v5418_v57  ;;  %v5316_v37 = vsel %vm14038_vm11, %v5282_v9, %v16380_v43  ;;  %v5285_v17 = vsel %vm14038_vm11, %v5280_v35, %v5282_v9  ;;  %v14412_v20 = vsel %vm5424_vm7, %v5411_v21, %v5419_v55 }
 0x300   : > { %v5321_v45 = vsel %vm5319_vm5, %v5316_v37, %v14090_v26  ;;  %v5286_v6 = vsel %vm14038_vm11, %v5278_v33, %v5280_v35  ;;  %v5320_v42 = vsel %vm5319_vm5, %v5285_v17, %v5316_v37 }
 0x301   : > { %v5358_v43 = vsel %vm5354_vm12, %v5321_v45, %v14107_v16  ;;  %v5350_v9 = vsel %vm5319_vm5, %v5287_v30, %v5286_v6  ;;  %v5351_v21 = vsel %vm5319_vm5, %v5286_v6, %v5285_v17  ;;  %v5357_v26 = vsel %vm5354_vm12, %v5320_v42, %v14103_v59 }
 0x302   : > { %v5397_v35 = vsel %vm5389_vm9, %v5358_v43, %v14156_v53  ;;  %v5355_v23 = vsel %vm5354_vm12, %v5350_v9, %v5320_v42  ;;  %v5356_v16 = vsel %vm5354_vm12, %v5351_v21, %v5321_v45  ;;  %v5385_v30 = vsel %vm5354_vm12, %v5348_v28, %v5350_v9  ;;  %v14451_v37 = vpop.permute.xlu1 %5989  ;;  %v14453_v17 = vpop.permute.xlu0 %5987 }
 0x303   : > { %v14443_v36 = vsel %vm5424_vm7, %v5397_v35, %v14258_v48  ;;  %v5386_v59 = vsel %vm5354_vm12, %v5349_v40, %v5351_v21  ;;  %v5390_v53 = vsel %vm5389_vm9, %v5383_v52, %v5355_v23  ;;  %v5391_v33 = vsel %vm5389_vm9, %v5384_v24, %v5356_v16 }
 0x304   : > { %v5392_v28 = vsel %vm5389_vm9, %v5385_v30, %v5357_v26  ;;  %v5393_v48 = vsel %vm5389_vm9, %v5386_v59, %v5358_v43  ;;  %v5394_v54 = vsel %vm5389_vm9, %v5355_v23, %v14125_v44  ;;  %v5395_v52 = vsel %vm5389_vm9, %v5356_v16, %v14130_v4 }
 0x305   : > { %v5396_v40 = vsel %vm5389_vm9, %v5357_v26, %v14140_v39  ;;  %v5420_v24 = vsel %vm5389_vm9, %v5381_v15, %v5385_v30  ;;  %v5421_v45 = vsel %vm5389_vm9, %v5382_v32, %v5386_v59  ;;  %v5425_v6 = vsel %vm5424_vm7, %v5414_v47, %v5390_v53 }
 0x306   : > { %v5426_v44 = vsel %vm5424_vm7, %v5415_v50, %v5391_v33  ;;  %v5427_v42 = vsel %vm5424_vm7, %v5416_v12, %v5392_v28  ;;  %v5428_v4 = vsel %vm5424_vm7, %v5417_v11, %v5393_v48  ;;  %v5429_v39 = vsel %vm5424_vm7, %v5418_v57, %v5394_v54  ;;  %v14517_v43 = vpop.permute.xlu0 %5991 }
 0x307   : > { %v5430_v15 = vsel %vm5424_vm7, %v5419_v55, %v5395_v52  ;;  %v5431_v25 = vsel %vm5424_vm7, %v5420_v24, %v5396_v40  ;;  %v5432_v32 = vsel %vm5424_vm7, %v5421_v45, %v5397_v35  ;;  %v5433_v47 = vsel %vm5424_vm7, %v5390_v53, %v14188_v10  ;;  %v14515_v55 = vpop.permute.xlu1 %5993 }
 0x308   : > { %v5434_v50 = vsel %vm5424_vm7, %v5391_v33, %v14193_v60  ;;  %v5435_v57 = vsel %vm5424_vm7, %v5392_v28, %v14203_v14  ;;  %v5436_v12 = vsel %vm5424_vm7, %v5393_v48, %v14208_v19  ;;  %v5437_v11 = vsel %vm5424_vm7, %v5394_v54, %v14242_v31 }
 0x309   : > { %v5438_v10 = vsel %vm5424_vm7, %v5395_v52, %v14246_v63  ;;  %v5439_v60 = vsel %vm5424_vm7, %v5396_v40, %v14254_v49  ;;  %v5455_v14 = vsel %vm5424_vm7, %v14328_v5, %v5420_v24  ;;  %v5456_v19 = vsel %vm5424_vm7, %v14346_v27, %v5421_v45 }
 0x30a   : > { %v5460_v31 = vsel %vm5459_vm4, %v14275_v1, %v5425_v6  ;;  %v5461_v63 = vsel %vm5459_vm4, %v14286_v13, %v5426_v44  ;;  %v5462_v49 = vsel %vm5459_vm4, %v14313_v8, %v5427_v42  ;;  %v5463_v29 = vsel %vm5459_vm4, %v14324_v46, %v5428_v4  ;;  %v14592_v45 = vpop.permute.xlu0 %5995 }
 0x30b   : > { %v5464_v5 = vsel %vm5459_vm4, %v14337_v22, %v5429_v39  ;;  %v5465_v27 = vsel %vm5459_vm4, %v14342_v7, %v5430_v15  ;;  %v5466_v9 = vsel %vm5459_vm4, %v14362_v51, %v5431_v25  ;;  %v5467_v21 = vsel %vm5459_vm4, %v14374_v2, %v5432_v32  ;;  %v14590_v24 = vpop.permute.xlu1 %5997 }
 0x30c   : > { %v5468_v26 = vsel %vm5459_vm4, %v14378_v62, %v5433_v47  ;;  %v5469_v35 = vsel %vm5459_vm4, %v14386_v58, %v5434_v50  ;;  %v5470_v23 = vsel %vm5459_vm4, %v14390_v61, %v5435_v57  ;;  %v5471_v16 = vsel %vm5459_vm4, %v14398_v38, %v5436_v12 }
 0x30d   : > { %v5472_v30 = vsel %vm5459_vm4, %v14402_v56, %v5437_v11  ;;  %v5473_v59 = vsel %vm5459_vm4, %v14412_v20, %v5438_v10  ;;  %v5474_v53 = vsel %vm5459_vm4, %v5455_v14, %v5439_v60  ;;  %v5475_v33 = vsel %vm5459_vm4, %v5456_v19, %v14443_v36 }
 0x30e   : > { %v5476_v28 = vsel %vm5459_vm4, %v5425_v6, %v14275_v1  ;;  %v5477_v48 = vsel %vm5459_vm4, %v5426_v44, %v14286_v13  ;;  %v5478_v54 = vsel %vm5459_vm4, %v5427_v42, %v14313_v8  ;;  %v5479_v52 = vsel %vm5459_vm4, %v5428_v4, %v14324_v46 }
 0x30f   : > { %v5480_v40 = vsel %vm5459_vm4, %v5429_v39, %v14337_v22  ;;  %v5481_v1 = vsel %vm5459_vm4, %v5430_v15, %v14342_v7  ;;  %v5482_v13 = vsel %vm5459_vm4, %v5431_v25, %v14362_v51  ;;  %v5483_v8 = vsel %vm5459_vm4, %v5432_v32, %v14374_v2 }
 0x310   : > { %v5484_v46 = vsel %vm5459_vm4, %v5433_v47, %v14378_v62  ;;  %v5485_v22 = vsel %vm5459_vm4, %v5434_v50, %v14386_v58  ;;  %v5486_v7 = vsel %vm5459_vm4, %v5435_v57, %v14390_v61  ;;  %v5487_v51 = vsel %vm5459_vm4, %v5436_v12, %v14398_v38  ;;  %v14625_v12 = vpop.permute.xlu1 %6001 }
 0x311   : > { %v5488_v2 = vsel %vm5459_vm4, %v5437_v11, %v14402_v56  ;;  %v5489_v62 = vsel %vm5459_vm4, %v5438_v10, %v14412_v20  ;;  %v5490_v6 = vsel %vm5459_vm4, %v5439_v60, %v5455_v14  ;;  %v5491_v58 = vsel %vm5459_vm4, %v14443_v36, %v5456_v19  ;;  %v14627_v11 = vpop.permute.xlu0 %5999 }
 0x312   : > { %v5524_v61 = vcombine.low %v5460_v31, %v5461_v63  ;;  %v5525_v44 = vcombine.low %v5462_v49, %v5463_v29  ;;  %v5526_v42 = vcombine.low %v5464_v5, %v5465_v27  ;;  %v5527_v4 = vcombine.low %v5466_v9, %v5467_v21 }
 0x313   : > { %v5573_v38 = vcombine.low %v5468_v26, %v5469_v35  ;;  %v5574_v39 = vcombine.low %v5470_v23, %v5471_v16  ;;  %v5575_v15 = vcombine.low %v5472_v30, %v5473_v59  ;;  %v5576_v25 = vcombine.low %v5474_v53, %v5475_v33 }
 0x314   : > { %v5534_v56 = vrot.slane %v5524_v61, %v16360_v34  ;;  %v5541_v32 = vrot.slane %v5525_v44, %v16360_v34  ;;  %v5548_v20 = vrot.slane %v5526_v42, %v16360_v34  ;;  %v5555_v47 = vrot.slane %v5527_v4, %v16360_v34 }
 0x315   : > { %v5583_v50 = vrot.slane %v5573_v38, %v16360_v34  ;;  %v5590_v41 = vrot.slane %v5574_v39, %v16360_v34  ;;  %v5597_v36 = vrot.slane %v5575_v15, %v16360_v34  ;;  %v5604_v57 = vrot.slane %v5576_v25, %v16360_v34 }
 0x316   : > { %v5556_v10 = vcombine.low %v5534_v56, %v5541_v32  ;;  %v5557_v60 = vcombine.low %v5548_v20, %v5555_v47  ;;  %v5622_v14 = vcombine.low %v5476_v28, %v5477_v48  ;;  %v5623_v19 = vcombine.low %v5478_v54, %v5479_v52 }
 0x317   : > { %v5605_v31 = vcombine.low %v5583_v50, %v5590_v41  ;;  %v5606_v63 = vcombine.low %v5597_v36, %v5604_v57  ;;  %v5624_v49 = vcombine.low %v5480_v40, %v5481_v1  ;;  %v5625_v29 = vcombine.low %v5482_v13, %v5483_v8  ;;  %v14637_v40 = vpop.permute.xlu1 %6005  ;;  %v6004_v1 = vpop.permute.xlu0 %6003 }
 0x318   : > { %v5564_v5 = vrot.slane %v5556_v10, %v16360_v34  ;;  %v5571_v27 = vrot.slane %v5557_v60, %v16360_v34  ;;  %v5632_v9 = vrot.slane %v5622_v14, %v16360_v34  ;;  %v5639_v21 = vrot.slane %v5623_v19, %v16360_v34 }
 0x319   : > { %v5613_v26 = vrot.slane %v5605_v31, %v16360_v34  ;;  %v5620_v35 = vrot.slane %v5606_v63, %v16360_v34  ;;  %v5646_v23 = vrot.slane %v5624_v49, %v16360_v34  ;;  %v5653_v16 = vrot.slane %v5625_v29, %v16360_v34 }
 0x31a   : > { %v5572_v30 = vcombine.low %v5564_v5, %v5571_v27  ;;  %v5654_v59 = vcombine.low %v5632_v9, %v5639_v21  ;;  %v5671_v53 = vcombine.low %v5484_v46, %v5485_v22  ;;  %v5672_v33 = vcombine.low %v5486_v7, %v5487_v51 }
 0x31b   : > { %v5621_v28 = vcombine.low %v5613_v26, %v5620_v35  ;;  %v5655_v48 = vcombine.low %v5646_v23, %v5653_v16  ;;  %v5673_v54 = vcombine.low %v5488_v2, %v5489_v62  ;;  %v5674_v52 = vcombine.low %v5490_v6, %v5491_v58  ;;  %v6010_v44 = vpop.permute.xlu1 %6009  ;;  %v6008_v42 = vpop.permute.xlu0 %6007 }
 0x31c   : > { %v5662_v13 = vrot.slane %v5654_v59, %v16360_v34  ;;  %v5681_v8 = vrot.slane %v5671_v53, %v16360_v34  ;;  %v5688_v61 = vrot.slane %v5672_v33, %v16360_v34  ;;  %7130 = vst [vmem:[%s9550_s11 + $0x6] ss:$8 sm:$0xf] %v5572_v30  ;;  %7131 = vst [vmem:[%s9550_s11 + $0x6] ss:$8 sm:$0xf0] %v5572_v30  ;;  %v6051_v20 = vstv %s13186_s10 }
 0x31d   : > { %v5669_v46 = vrot.slane %v5655_v48, %v16360_v34  ;;  %v5695_v22 = vrot.slane %v5673_v54, %v16360_v34  ;;  %v5702_v7 = vrot.slane %v5674_v52, %v16360_v34  ;;  %7132 = vst [vmem:[%s9550_s11 + $0x46] ss:$8 sm:$0xf] %v5621_v28  ;;  %7133 = vst [vmem:[%s9550_s11 + $0x46] ss:$8 sm:$0xf0] %v5621_v28  ;;  %v14660_v47 = vstv %s6085_s19 }
 0x31e   : > { %v5703_v51 = vcombine.low %v5681_v8, %v5688_v61  ;;  %vm14663_vm15 = vcmp.lt.s32.totalorder %v16371_v18, %v6051_v20  ;;  %v14667_v41 = vstv %s6120_s30  ;;  %v14669_v36 = vstv %s6155_s29  ;;  %s7375_s30 = smov [#allocation9]  }
 0x31f   : > { %v5670_v2 = vcombine.low %v5662_v13, %v5669_v46  ;;  %v5704_v62 = vcombine.low %v5695_v22, %v5702_v7  ;;  %v6014_v38 = vpop.permute.xlu1 %6013  ;;  %v6012_v39 = vpop.permute.xlu0 %6011  ;;  %v6076_v57 = vsel %vm14663_vm15, %v14625_v12, %v6004_v1  ;;  %v14674_v14 = vstv %s6190_s14  ;;  %s7298_s29 = sshll.u32 %s7375_s30, 4  ;;  %s7299_s29 = int_to_ptr.vmem [resolvable:$false] %s7298_s29 }
 0x320   : > { %v5711_v6 = vrot.slane %v5703_v51, %v16360_v34  ;;  %v14676_v19 = vstv %s6225_s17  ;;  %v6079_v18 = vsel %vm14663_vm15, %v14592_v45, %v14590_v24  ;;  %v6080_v31 = vsel %vm14663_vm15, %v14515_v55, %v14592_v45  ;;  %s7300_s14 = scalar_lea.vmem %s7299_s29, 8192 }
 0x321   : > { %v5718_v58 = vrot.slane %v5704_v62, %v16360_v34  ;;  %7134 = vst [vmem:[%s9550_s11 + $0x86] ss:$8 sm:$0xf] %v5670_v2  ;;  %7135 = vst [vmem:[%s9550_s11 + $0x86] ss:$8 sm:$0xf0] %v5670_v2  ;;  %v6077_v63 = vsel %vm14663_vm15, %v14627_v11, %v14625_v12  ;;  %v6078_v49 = vsel %vm14663_vm15, %v14590_v24, %v14627_v11 }
 0x322   : > { %vm6087_vm14 = vcmp.ne.s32.totalorder %v14660_v47, 0  ;;  %v6075_v29 = vsel %vm14663_vm15, %v6004_v1, %v14637_v40  ;;  %v6081_v45 = vsel %vm14663_vm15, %v14517_v43, %v14515_v55  ;;  %v6082_v5 = vsel %vm14663_vm15, %v14451_v37, %v14517_v43 }
 0x323   : > { %v5719_v4 = vcombine.low %v5711_v6, %v5718_v58  ;;  %v6018_v15 = vpop.permute.xlu1 %6017  ;;  %v6016_v25 = vpop.permute.xlu0 %6015  ;;  %vm6122_vm1 = vcmp.ne.s32.totalorder %v14667_v41, 0  ;;  %v6096_v12 = vsel %vm6087_vm14, %v6077_v63, %v6076_v57  ;;  %v14713_v24 = vsel %vm14663_vm15, %v14453_v17, %v14451_v37 }
 0x324   : > { %v6092_v11 = vsel %vm6087_vm14, %v6081_v45, %v6080_v31  ;;  %v6093_v55 = vsel %vm6087_vm14, %v6080_v31, %v6079_v18  ;;  %vm6157_vm3 = vcmp.ne.s32.totalorder %v14669_v36, 0  ;;  %v6094_v43 = vsel %vm6087_vm14, %v6079_v18, %v6078_v49 }
 0x325   : > { %7136 = vst [vmem:[%s9550_s11 + $0xc6] ss:$8 sm:$0xf] %v5719_v4  ;;  %7137 = vst [vmem:[%s9550_s11 + $0xc6] ss:$8 sm:$0xf0] %v5719_v4  ;;  %v6097_v27 = vsel %vm6087_vm14, %v6076_v57, %v6075_v29  ;;  %v6073_v9 = vsel %vm14663_vm15, %v6008_v42, %v6010_v44  ;;  %v6074_v37 = vsel %vm14663_vm15, %v14637_v40, %v6008_v42 }
 0x326   : > { %v14732_v21 = vsel %vm6087_vm14, %v14713_v24, %v6082_v5  ;;  %v14736_v26 = vsel %vm6087_vm14, %v6082_v5, %v6081_v45  ;;  %v6095_v35 = vsel %vm6087_vm14, %v6078_v49, %v6077_v63  ;;  %v6131_v23 = vsel %vm6122_vm1, %v6094_v43, %v6096_v12 }
 0x327   : > { %v14657_v56 = vpop.permute.xlu1 %6021  ;;  %v6020_v32 = vpop.permute.xlu0 %6019  ;;  %v14745_v59 = vsel %vm6122_vm1, %v14732_v21, %v6092_v11  ;;  %v14750_v53 = vsel %vm6122_vm1, %v14736_v26, %v6093_v55  ;;  %v6071_v33 = vsel %vm14663_vm15, %v6012_v39, %v6014_v38  ;;  %v6072_v28 = vsel %vm14663_vm15, %v6010_v44, %v6012_v39 }
 0x328   : > { %v6132_v48 = vsel %vm6122_vm1, %v6095_v35, %v6097_v27  ;;  %v6098_v54 = vsel %vm6087_vm14, %v6075_v29, %v6074_v37  ;;  %v6099_v52 = vsel %vm6087_vm14, %v6074_v37, %v6073_v9  ;;  %v6068_v40 = vsel %vm14663_vm15, %v6018_v15, %v6020_v32 }
 0x329   : > { %v14766_v1 = vsel %vm6122_vm1, %v6092_v11, %v6094_v43  ;;  %v14770_v13 = vsel %vm6122_vm1, %v6093_v55, %v6095_v35  ;;  %v14775_v8 = vsel %vm6157_vm3, %v14745_v59, %v6131_v23  ;;  %v6067_v61 = vsel %vm14663_vm15, %v6020_v32, %v14657_v56 }
 0x32a   : > { %v6100_v46 = vsel %vm6087_vm14, %v6073_v9, %v6072_v28  ;;  %v6101_v22 = vsel %vm6087_vm14, %v6072_v28, %v6071_v33  ;;  %v6069_v7 = vsel %vm14663_vm15, %v6016_v25, %v6018_v15  ;;  %v6070_v51 = vsel %vm14663_vm15, %v6014_v38, %v6016_v25 }
 0x32b   : > { %v6026_v10 = vpop.permute.xlu1 %6025  ;;  %v6024_v60 = vpop.permute.xlu0 %6023  ;;  %vm6192_vm10 = vcmp.ne.s32.totalorder %v14674_v14, 0  ;;  %v14792_v2 = vsel %vm6157_vm3, %v14750_v53, %v6132_v48  ;;  %v6133_v62 = vsel %vm6122_vm1, %v6096_v12, %v6098_v54  ;;  %v6134_v6 = vsel %vm6122_vm1, %v6097_v27, %v6099_v52 }
 0x32c   : > { %v6104_v58 = vsel %vm6087_vm14, %v6069_v7, %v6068_v40  ;;  %v6105_v44 = vsel %vm6087_vm14, %v6068_v40, %v6067_v61  ;;  %v6065_v42 = vsel %vm14663_vm15, %v6024_v60, %v6026_v10  ;;  %v6066_v4 = vsel %vm14663_vm15, %v14657_v56, %v6024_v60 }
 0x32d   : > { %v6135_v25 = vsel %vm6122_vm1, %v6098_v54, %v6100_v46  ;;  %v6136_v32 = vsel %vm6122_vm1, %v6099_v52, %v6101_v22  ;;  %v6102_v20 = vsel %vm6087_vm14, %v6071_v33, %v6070_v51  ;;  %v14820_v56 = vsel %vm6157_vm3, %v14766_v1, %v6133_v62 }
 0x32e   : > { %v6103_v60 = vsel %vm6087_vm14, %v6070_v51, %v6069_v7  ;;  %v6139_v18 = vsel %vm6122_vm1, %v6102_v20, %v6104_v58  ;;  %v6106_v63 = vsel %vm6087_vm14, %v6067_v61, %v6066_v4  ;;  %v6107_v49 = vsel %vm6087_vm14, %v6066_v4, %v6065_v42 }
 0x32f   : > { %v6030_v16 = vpop.permute.xlu1 %6029  ;;  %v6028_v30 = vpop.permute.xlu0 %6027  ;;  %v6140_v31 = vsel %vm6122_vm1, %v6103_v60, %v6105_v44  ;;  %v14841_v45 = vsel %vm6157_vm3, %v6131_v23, %v6135_v25  ;;  %v14845_v5 = vsel %vm6157_vm3, %v6132_v48, %v6136_v32  ;;  %v6137_v55 = vsel %vm6122_vm1, %v6100_v46, %v6102_v20 }
 0x330   : > { %v6064_v38 = vsel %vm14663_vm15, %v6026_v10, %v6028_v30  ;;  %v6063_v57 = vsel %vm14663_vm15, %v6028_v30, %v6030_v16  ;;  %v14825_v10 = vsel %vm6157_vm3, %v14770_v13, %v6134_v6  ;;  %v6138_v43 = vsel %vm6122_vm1, %v6101_v22, %v6103_v60 }
 0x331   : > { %v6108_v29 = vsel %vm6087_vm14, %v6065_v42, %v6064_v38  ;;  %v6109_v12 = vsel %vm6087_vm14, %v6064_v38, %v6063_v57  ;;  %v6174_v27 = vsel %vm6157_vm3, %v6135_v25, %v6139_v18  ;;  %v6175_v37 = vsel %vm6157_vm3, %v6136_v32, %v6140_v31 }
 0x332   : > { %v6141_v35 = vsel %vm6122_vm1, %v6104_v58, %v6106_v63  ;;  %v6142_v23 = vsel %vm6122_vm1, %v6105_v44, %v6107_v49  ;;  %v6144_v28 = vsel %vm6122_vm1, %v6107_v49, %v6109_v12  ;;  %v14877_v40 = vsel %vm6157_vm3, %v6133_v62, %v6137_v55 }
 0x333   : > { %v6034_v39 = vpop.permute.xlu1 %6033  ;;  %v6032_v15 = vpop.permute.xlu0 %6031  ;;  %v14881_v61 = vsel %vm6157_vm3, %v6134_v6, %v6138_v43  ;;  %v14890_v7 = vsel %vm6192_vm10, %v14775_v8, %v6174_v27  ;;  %v14895_v51 = vsel %vm6192_vm10, %v14792_v2, %v6175_v37  ;;  %v6176_v62 = vsel %vm6157_vm3, %v6137_v55, %v6141_v35 }
 0x334   : > { %v6062_v11 = vsel %vm14663_vm15, %v6030_v16, %v6032_v15  ;;  %v6061_v9 = vsel %vm14663_vm15, %v6032_v15, %v6034_v39  ;;  %v6143_v16 = vsel %vm6122_vm1, %v6106_v63, %v6108_v29  ;;  %v6177_v58 = vsel %vm6157_vm3, %v6138_v43, %v6142_v23 }
 0x335   : > { %v6110_v48 = vsel %vm6087_vm14, %v6063_v57, %v6062_v11  ;;  %v6111_v46 = vsel %vm6087_vm14, %v6062_v11, %v6061_v9  ;;  %v6178_v44 = vsel %vm6157_vm3, %v6139_v18, %v6143_v16  ;;  %v6179_v42 = vsel %vm6157_vm3, %v6140_v31, %v6144_v28 }
 0x336   : > { %v6145_v4 = vsel %vm6122_vm1, %v6108_v29, %v6110_v48  ;;  %v6146_v15 = vsel %vm6122_vm1, %v6109_v12, %v6111_v46  ;;  %v14920_v57 = vsel %vm6192_vm10, %v14820_v56, %v6176_v62  ;;  %v14931_v63 = vsel %vm6192_vm10, %v14825_v10, %v6177_v58 }
 0x337   : > { %v14935_v49 = vsel %vm6157_vm3, %v6141_v35, %v6145_v4  ;;  %v14944_v11 = vsel %vm6192_vm10, %v14841_v45, %v6178_v44  ;;  %v14949_v55 = vsel %vm6192_vm10, %v14845_v5, %v6179_v42  ;;  %v14953_v43 = vsel %vm6157_vm3, %v6142_v23, %v6146_v15 }
 0x338   : > { %v14969_v23 = vsel %vm6192_vm10, %v14877_v40, %v14935_v49  ;;  %vm6227_vm0 = vcmp.ne.s32.totalorder %v14676_v19, 0 }
 0x34c   : > { %v6038_v30 = vpop.permute.xlu1 %6037  ;;  %v6036_v33 = vpop.permute.xlu0 %6035 }
 0x34d   : > { %v6059_v54 = vsel %vm14663_vm15, %v6036_v33, %v6038_v30  ;;  %v6060_v52 = vsel %vm14663_vm15, %v6034_v39, %v6036_v33 }
 0x34e   : > { %v6112_v22 = vsel %vm6087_vm14, %v6061_v9, %v6060_v52  ;;  %v6113_v6 = vsel %vm6087_vm14, %v6060_v52, %v6059_v54 }
 0x34f   : > { %v6147_v25 = vsel %vm6122_vm1, %v6110_v48, %v6112_v22  ;;  %v6148_v60 = vsel %vm6122_vm1, %v6111_v46, %v6113_v6 }
 0x350   : > { %v6042_v38 = vpop.permute.xlu1 %6041  ;;  %v6040_v39 = vpop.permute.xlu0 %6039  ;;  %v6182_v9 = vsel %vm6157_vm3, %v6143_v16, %v6147_v25  ;;  %v6183_v33 = vsel %vm6157_vm3, %v6144_v28, %v6148_v60 }
 0x351   : > { %v6057_v32 = vsel %vm14663_vm15, %v6040_v39, %v6042_v38  ;;  %v6058_v20 = vsel %vm14663_vm15, %v6038_v30, %v6040_v39  ;;  %v14993_v39 = vsel %vm6192_vm10, %v6175_v37, %v6183_v33 }
 0x352   : > { %v6114_v18 = vsel %vm6087_vm14, %v6059_v54, %v6058_v20  ;;  %v6115_v31 = vsel %vm6087_vm14, %v6058_v20, %v6057_v32 }
 0x353   : > { %v6149_v29 = vsel %vm6122_vm1, %v6112_v22, %v6114_v18  ;;  %v6150_v12 = vsel %vm6122_vm1, %v6113_v6, %v6115_v31  ;;  %v14981_v22 = vsel %vm6192_vm10, %v14881_v61, %v14953_v43  ;;  %v14985_v6 = vsel %vm6192_vm10, %v6174_v27, %v6182_v9 }
 0x354   : > { %v6046_v35 = vpop.permute.xlu1 %6045  ;;  %v6044_v30 = vpop.permute.xlu0 %6043  ;;  %v6184_v48 = vsel %vm6157_vm3, %v6145_v4, %v6149_v29  ;;  %v6185_v16 = vsel %vm6157_vm3, %v6146_v15, %v6150_v12 }
 0x355   : > { %v6055_v54 = vsel %vm14663_vm15, %v6044_v30, %v6046_v35  ;;  %v6056_v52 = vsel %vm14663_vm15, %v6042_v38, %v6044_v30  ;;  %v14997_v15 = vsel %vm6192_vm10, %v6176_v62, %v6184_v48 }
 0x356   : > { %v6116_v28 = vsel %vm6087_vm14, %v6057_v32, %v6056_v52  ;;  %v6117_v46 = vsel %vm6087_vm14, %v6056_v52, %v6055_v54 }
 0x357   : > { %v6151_v4 = vsel %vm6122_vm1, %v6114_v18, %v6116_v28  ;;  %v6152_v38 = vsel %vm6122_vm1, %v6115_v31, %v6117_v46  ;;  %v15005_v18 = vsel %vm6192_vm10, %v6177_v58, %v6185_v16 }
 0x358   : > { %v6186_v32 = vsel %vm6157_vm3, %v6147_v25, %v6151_v4  ;;  %v6187_v27 = vsel %vm6157_vm3, %v6148_v60, %v6152_v38  ;;  %v6050_v20 = vpop.permute.xlu1 %6049  ;;  %v6048_v30 = vpop.permute.xlu0 %6047 }
 0x359   : > { %v15009_v37 = vsel %vm6192_vm10, %v6178_v44, %v6186_v32  ;;  %v6084_v62 = vsel %vm14663_vm15, %v6050_v20, %v14453_v17  ;;  %v6053_v25 = vsel %vm14663_vm15, %v6048_v30, %v6050_v20  ;;  %v15019_v60 = vsel %vm6192_vm10, %v6179_v42, %v6187_v27 }
 0x35a   : > { %v6089_v58 = vsel %vm6087_vm14, %v6084_v62, %v14713_v24  ;;  %v6054_v44 = vsel %vm14663_vm15, %v6046_v35, %v6048_v30  ;;  %v6088_v31 = vsel %vm6087_vm14, %v6053_v25, %v6084_v62 }
 0x35b   : > { %v6126_v17 = vsel %vm6122_vm1, %v6089_v58, %v14736_v26  ;;  %v6118_v52 = vsel %vm6087_vm14, %v6055_v54, %v6054_v44  ;;  %v6119_v42 = vsel %vm6087_vm14, %v6054_v44, %v6053_v25  ;;  %v6125_v24 = vsel %vm6122_vm1, %v6088_v31, %v14732_v21 }
 0x35c   : > { %v6165_v50 = vsel %vm6157_vm3, %v6126_v17, %v14770_v13  ;;  %v6123_v35 = vsel %vm6122_vm1, %v6118_v52, %v6088_v31  ;;  %v6124_v26 = vsel %vm6122_vm1, %v6119_v42, %v6089_v58  ;;  %v6153_v54 = vsel %vm6122_vm1, %v6116_v28, %v6118_v52 }
 0x35d   : > { %v6208_v47 = vsel %vm6192_vm10, %v6165_v50, %v14881_v61  ;;  %v6154_v21 = vsel %vm6122_vm1, %v6117_v46, %v6119_v42  ;;  %v6158_v20 = vsel %vm6157_vm3, %v6151_v4, %v6123_v35  ;;  %v6159_v13 = vsel %vm6157_vm3, %v6152_v38, %v6124_v26 }
 0x35e   : > { %v6160_v30 = vsel %vm6157_vm3, %v6153_v54, %v6125_v24  ;;  %v6161_v62 = vsel %vm6157_vm3, %v6154_v21, %v6126_v17  ;;  %v6162_v28 = vsel %vm6157_vm3, %v6123_v35, %v14745_v59  ;;  %v6163_v41 = vsel %vm6157_vm3, %v6124_v26, %v14750_v53 }
 0x35f   : > { %v6164_v61 = vsel %vm6157_vm3, %v6125_v24, %v14766_v1  ;;  %v6188_v46 = vsel %vm6157_vm3, %v6149_v29, %v6153_v54  ;;  %v6189_v4 = vsel %vm6157_vm3, %v6150_v12, %v6154_v21  ;;  %v6193_v38 = vsel %vm6192_vm10, %v6182_v9, %v6158_v20 }
 0x360   : > { %v6194_v59 = vsel %vm6192_vm10, %v6183_v33, %v6159_v13  ;;  %v6195_v25 = vsel %vm6192_vm10, %v6184_v48, %v6160_v30  ;;  %v6196_v53 = vsel %vm6192_vm10, %v6185_v16, %v6161_v62  ;;  %v6197_v1 = vsel %vm6192_vm10, %v6186_v32, %v6162_v28 }
 0x361   : > { %v6198_v29 = vsel %vm6192_vm10, %v6187_v27, %v6163_v41  ;;  %v6199_v36 = vsel %vm6192_vm10, %v6188_v46, %v6164_v61  ;;  %v6200_v12 = vsel %vm6192_vm10, %v6189_v4, %v6165_v50  ;;  %v6201_v9 = vsel %vm6192_vm10, %v6158_v20, %v14775_v8 }
 0x362   : > { %v6202_v33 = vsel %vm6192_vm10, %v6159_v13, %v14792_v2  ;;  %v6203_v48 = vsel %vm6192_vm10, %v6160_v30, %v14820_v56  ;;  %v6204_v16 = vsel %vm6192_vm10, %v6161_v62, %v14825_v10  ;;  %v6205_v32 = vsel %vm6192_vm10, %v6162_v28, %v14841_v45 }
 0x363   : > { %v6206_v8 = vsel %vm6192_vm10, %v6163_v41, %v14845_v5  ;;  %v6207_v2 = vsel %vm6192_vm10, %v6164_v61, %v14877_v40  ;;  %v6223_v56 = vsel %vm6192_vm10, %v14935_v49, %v6188_v46  ;;  %v6224_v10 = vsel %vm6192_vm10, %v14953_v43, %v6189_v4 }
 0x364   : > { %v6228_v45 = vsel %vm6227_vm0, %v14890_v7, %v6193_v38  ;;  %v6229_v5 = vsel %vm6227_vm0, %v14895_v51, %v6194_v59  ;;  %v6230_v40 = vsel %vm6227_vm0, %v14920_v57, %v6195_v25  ;;  %v6231_v49 = vsel %vm6227_vm0, %v14931_v63, %v6196_v53 }
 0x365   : > { %v6232_v14 = vsel %vm6227_vm0, %v14944_v11, %v6197_v1  ;;  %v6233_v43 = vsel %vm6227_vm0, %v14949_v55, %v6198_v29  ;;  %v6234_v27 = vsel %vm6227_vm0, %v14969_v23, %v6199_v36  ;;  %v6235_v58 = vsel %vm6227_vm0, %v14981_v22, %v6200_v12 }
 0x366   : > { %v6236_v44 = vsel %vm6227_vm0, %v14985_v6, %v6201_v9  ;;  %v6237_v31 = vsel %vm6227_vm0, %v14993_v39, %v6202_v33  ;;  %v6238_v17 = vsel %vm6227_vm0, %v14997_v15, %v6203_v48  ;;  %v6239_v52 = vsel %vm6227_vm0, %v15005_v18, %v6204_v16 }
 0x367   : > { %v6240_v42 = vsel %vm6227_vm0, %v15009_v37, %v6205_v32  ;;  %v6241_v24 = vsel %vm6227_vm0, %v15019_v60, %v6206_v8  ;;  %v6242_v50 = vsel %vm6227_vm0, %v6223_v56, %v6207_v2  ;;  %v6243_v35 = vsel %vm6227_vm0, %v6224_v10, %v6208_v47 }
 0x368   : > { %v6244_v26 = vsel %vm6227_vm0, %v6193_v38, %v14890_v7  ;;  %v6245_v54 = vsel %vm6227_vm0, %v6194_v59, %v14895_v51  ;;  %v6246_v21 = vsel %vm6227_vm0, %v6195_v25, %v14920_v57  ;;  %v6247_v20 = vsel %vm6227_vm0, %v6196_v53, %v14931_v63 }
 0x369   : > { %v6248_v13 = vsel %vm6227_vm0, %v6197_v1, %v14944_v11  ;;  %v6249_v7 = vsel %vm6227_vm0, %v6198_v29, %v14949_v55  ;;  %v6250_v51 = vsel %vm6227_vm0, %v6199_v36, %v14969_v23  ;;  %v6251_v57 = vsel %vm6227_vm0, %v6200_v12, %v14981_v22 }
 0x36a   : > { %v6252_v63 = vsel %vm6227_vm0, %v6201_v9, %v14985_v6  ;;  %v6253_v11 = vsel %vm6227_vm0, %v6202_v33, %v14993_v39  ;;  %v6254_v55 = vsel %vm6227_vm0, %v6203_v48, %v14997_v15  ;;  %v6255_v23 = vsel %vm6227_vm0, %v6204_v16, %v15005_v18 }
 0x36b   : > { %v6256_v22 = vsel %vm6227_vm0, %v6205_v32, %v15009_v37  ;;  %v6257_v6 = vsel %vm6227_vm0, %v6206_v8, %v15019_v60  ;;  %v6258_v30 = vsel %vm6227_vm0, %v6207_v2, %v6223_v56  ;;  %v6259_v39 = vsel %vm6227_vm0, %v6208_v47, %v6224_v10 }
 0x36c   : > { %v6292_v62 = vcombine.low %v6228_v45, %v6229_v5  ;;  %v6293_v15 = vcombine.low %v6230_v40, %v6231_v49  ;;  %v6294_v28 = vcombine.low %v6232_v14, %v6233_v43  ;;  %v6295_v41 = vcombine.low %v6234_v27, %v6235_v58 }
 0x36d   : > { %v6341_v61 = vcombine.low %v6236_v44, %v6237_v31  ;;  %v6342_v18 = vcombine.low %v6238_v17, %v6239_v52  ;;  %v6343_v46 = vcombine.low %v6240_v42, %v6241_v24  ;;  %v6344_v4 = vcombine.low %v6242_v50, %v6243_v35 }
 0x36e   : > { %v6302_v37 = vrot.slane %v6292_v62, %v16360_v34  ;;  %v6309_v38 = vrot.slane %v6293_v15, %v16360_v34  ;;  %v6316_v60 = vrot.slane %v6294_v28, %v16360_v34  ;;  %v6323_v59 = vrot.slane %v6295_v41, %v16360_v34 }
 0x36f   : > { %v6351_v25 = vrot.slane %v6341_v61, %v16360_v34  ;;  %v6358_v19 = vrot.slane %v6342_v18, %v16360_v34  ;;  %v6365_v47 = vrot.slane %v6343_v46, %v16360_v34  ;;  %v6372_v53 = vrot.slane %v6344_v4, %v16360_v34 }
 0x370   : > { %v6324_v1 = vcombine.low %v6302_v37, %v6309_v38  ;;  %v6325_v29 = vcombine.low %v6316_v60, %v6323_v59  ;;  %v6390_v36 = vcombine.low %v6244_v26, %v6245_v54  ;;  %v6391_v12 = vcombine.low %v6246_v21, %v6247_v20 }
 0x371   : > { %v6373_v9 = vcombine.low %v6351_v25, %v6358_v19  ;;  %v6374_v33 = vcombine.low %v6365_v47, %v6372_v53  ;;  %v6392_v48 = vcombine.low %v6248_v13, %v6249_v7  ;;  %v6393_v16 = vcombine.low %v6250_v51, %v6251_v57 }
 0x372   : > { %v6332_v32 = vrot.slane %v6324_v1, %v16360_v34  ;;  %v6339_v8 = vrot.slane %v6325_v29, %v16360_v34  ;;  %v6400_v2 = vrot.slane %v6390_v36, %v16360_v34  ;;  %v6407_v56 = vrot.slane %v6391_v12, %v16360_v34 }
 0x373   : > { %v6381_v10 = vrot.slane %v6373_v9, %v16360_v34  ;;  %v6388_v45 = vrot.slane %v6374_v33, %v16360_v34  ;;  %v6414_v5 = vrot.slane %v6392_v48, %v16360_v34  ;;  %v6421_v40 = vrot.slane %v6393_v16, %v16360_v34 }
 0x374   : > { %v6340_v49 = vcombine.low %v6332_v32, %v6339_v8  ;;  %v6422_v14 = vcombine.low %v6400_v2, %v6407_v56  ;;  %v6439_v43 = vcombine.low %v6252_v63, %v6253_v11  ;;  %v6440_v27 = vcombine.low %v6254_v55, %v6255_v23 }
 0x375   : > { %v6389_v58 = vcombine.low %v6381_v10, %v6388_v45  ;;  %v6423_v44 = vcombine.low %v6414_v5, %v6421_v40  ;;  %v6441_v31 = vcombine.low %v6256_v22, %v6257_v6  ;;  %v6442_v17 = vcombine.low %v6258_v30, %v6259_v39 }
 0x376   : > { %v6430_v52 = vrot.slane %v6422_v14, %v16360_v34  ;;  %v6449_v42 = vrot.slane %v6439_v43, %v16360_v34  ;;  %v6456_v24 = vrot.slane %v6440_v27, %v16360_v34  ;;  %7146 = vst [vmem:[%s9550_s11 + $0x7] ss:$8 sm:$0xf] %v6340_v49  ;;  %7147 = vst [vmem:[%s9550_s11 + $0x7] ss:$8 sm:$0xf0] %v6340_v49 }
 0x377   : > { %v6437_v50 = vrot.slane %v6423_v44, %v16360_v34  ;;  %v6463_v35 = vrot.slane %v6441_v31, %v16360_v34  ;;  %v6470_v26 = vrot.slane %v6442_v17, %v16360_v34  ;;  %7148 = vst [vmem:[%s9550_s11 + $0x47] ss:$8 sm:$0xf] %v6389_v58  ;;  %7149 = vst [vmem:[%s9550_s11 + $0x47] ss:$8 sm:$0xf0] %v6389_v58 }
 0x378   : > { %v6471_v54 = vcombine.low %v6449_v42, %v6456_v24 }
 0x379   : > { %v6438_v21 = vcombine.low %v6430_v52, %v6437_v50  ;;  %v6472_v20 = vcombine.low %v6463_v35, %v6470_v26 }
 0x37a   : > { %v6479_v13 = vrot.slane %v6471_v54, %v16360_v34 }
 0x37b   : > { %v6486_v7 = vrot.slane %v6472_v20, %v16360_v34  ;;  %7150 = vst [vmem:[%s9550_s11 + $0x87] ss:$8 sm:$0xf] %v6438_v21  ;;  %7151 = vst [vmem:[%s9550_s11 + $0x87] ss:$8 sm:$0xf0] %v6438_v21 }
 0x37d   : > { %v6487_v51 = vcombine.low %v6479_v13, %v6486_v7  ;;  %v15239_v57 = vld [vmem:[%s9550_s11] sm:$0xff]  ;;  %v15242_v63 = vld [vmem:[%s9550_s11 + $0x8] sm:$0xff]  ;;  %v15245_v11 = vld [vmem:[%s9550_s11 + $0x10] sm:$0xff] }
 0x37e   : > { %v6536_v55 = vmul.f32 %v15239_v57, %v15239_v57  ;;  %v6537_v23 = vmul.f32 %v15242_v63, %v15242_v63  ;;  %v15254_v34 = vld [vmem:[%s9550_s11 + $0x18] sm:$0xff]  ;;  %v6538_v22 = vmul.f32 %v15245_v11, %v15245_v11  ;;  %v15259_v30 = vld [vmem:[%s9550_s11 + $0x20] sm:$0xff]  ;;  %v15264_v15 = vld [vmem:[%s9550_s11 + $0x28] sm:$0xff] }
 0x37f   : > { %7152 = vst [vmem:[%s9550_s11 + $0xc7] ss:$8 sm:$0xf] %v6487_v51  ;;  %7153 = vst [vmem:[%s9550_s11 + $0xc7] ss:$8 sm:$0xf0] %v6487_v51  ;;  %v6539_v39 = vmul.f32 %v15254_v34, %v15254_v34  ;;  %v6540_v28 = vmul.f32 %v15259_v30, %v15259_v30  ;;  %v6541_v18 = vmul.f32 %v15264_v15, %v15264_v15 }
 0x380   : > { %v6568_v6 = vadd.f32 %v6537_v23, %v6536_v55  ;;  %v15269_v61 = vld [vmem:[%s9550_s11 + $0x30] sm:$0xff]  ;;  %v15274_v4 = vld [vmem:[%s9550_s11 + $0x38] sm:$0xff]  ;;  %v15279_v60 = vld [vmem:[%s9550_s11 + $0x40] sm:$0xff] }
 0x381   : > { %v6542_v37 = vmul.f32 %v15269_v61, %v15269_v61  ;;  %v6543_v59 = vmul.f32 %v15274_v4, %v15274_v4  ;;  %v15284_v19 = vld [vmem:[%s9550_s11 + $0x48] sm:$0xff]  ;;  %v6544_v47 = vmul.f32 %v15279_v60, %v15279_v60  ;;  %v15289_v1 = vld [vmem:[%s9550_s11 + $0x50] sm:$0xff]  ;;  %v15294_v12 = vld [vmem:[%s9550_s11 + $0x58] sm:$0xff] }
 0x382   : > { %v6569_v62 = vadd.f32 %v6568_v6, %v6538_v22  ;;  %v6545_v29 = vmul.f32 %v15284_v19, %v15284_v19  ;;  %16383 = vst [vmem:[#allocation59_spill] sm:$0xff] %v15294_v12  ;;  %v6546_v9 = vmul.f32 %v15289_v1, %v15289_v1  ;;  %v15299_v48 = vld [vmem:[%s9550_s11 + $0x60] sm:$0xff]  ;;  %v6547_v16 = vmul.f32 %v15294_v12, %v15294_v12  ;;  %v15304_v8 = vld [vmem:[%s9550_s11 + $0x68] sm:$0xff]  ;;  %v15309_v10 = vld [vmem:[%s9550_s11 + $0x70] sm:$0xff] }
 0x383   : > { %16384 = vst [vmem:[#allocation101_spill] sm:$0xff] %v15299_v48  ;;  %16385 = vst [vmem:[#allocation75_spill] sm:$0xff] %v15304_v8  ;;  %v6548_v2 = vmul.f32 %v15299_v48, %v15299_v48  ;;  %v6549_v45 = vmul.f32 %v15304_v8, %v15304_v8  ;;  %v15314_v40 = vld [vmem:[%s9550_s11 + $0x78] sm:$0xff]  ;;  %v6550_v49 = vmul.f32 %v15309_v10, %v15309_v10  ;;  %v15319_v43 = vld [vmem:[%s9550_s11 + $0x80] sm:$0xff] }
 0x384   : > { %v6570_v41 = vadd.f32 %v6569_v62, %v6539_v39  ;;  %16386 = vst [vmem:[#allocation103_spill] sm:$0xff] %v15309_v10  ;;  %16387 = vst [vmem:[#allocation119_spill] sm:$0xff] %v15314_v40  ;;  %v6551_v27 = vmul.f32 %v15314_v40, %v15314_v40  ;;  %v15324_v44 = vld [vmem:[%s9550_s11 + $0x88] sm:$0xff]  ;;  %v6552_v31 = vmul.f32 %v15319_v43, %v15319_v43  ;;  %v15329_v52 = vld [vmem:[%s9550_s11 + $0x90] sm:$0xff] }
 0x385   : > { %16388 = vst [vmem:[#allocation102_spill] sm:$0xff] %v15319_v43  ;;  %16389 = vst [vmem:[#allocation94_spill] sm:$0xff] %v15324_v44  ;;  %v6553_v42 = vmul.f32 %v15324_v44, %v15324_v44  ;;  %v15334_v50 = vld [vmem:[%s9550_s11 + $0x98] sm:$0xff]  ;;  %v6554_v35 = vmul.f32 %v15329_v52, %v15329_v52  ;;  %v15339_v54 = vld [vmem:[%s9550_s11 + $0xa0] sm:$0xff] }
 0x386   : > { %v6571_v46 = vadd.f32 %v6570_v41, %v6540_v28  ;;  %16390 = vst [vmem:[#allocation55_spill] sm:$0xff] %v15329_v52  ;;  %16391 = vst [vmem:[#allocation96_spill] sm:$0xff] %v15334_v50  ;;  %v6555_v21 = vmul.f32 %v15334_v50, %v15334_v50  ;;  %v15344_v13 = vld [vmem:[%s9550_s11 + $0xa8] sm:$0xff]  ;;  %v6556_v7 = vmul.f32 %v15339_v54, %v15339_v54  ;;  %v15349_v55 = vld [vmem:[%s9550_s11 + $0xb0] sm:$0xff] }
 0x387   : > { %16392 = vst [vmem:[#allocation97_spill] sm:$0xff] %v15339_v54  ;;  %16393 = vst [vmem:[#allocation84_spill] sm:$0xff] %v15344_v13  ;;  %v6557_v23 = vmul.f32 %v15344_v13, %v15344_v13  ;;  %v15354_v6 = vld [vmem:[%s9550_s11 + $0xb8] sm:$0xff]  ;;  %v6558_v39 = vmul.f32 %v15349_v55, %v15349_v55  ;;  %v15359_v28 = vld [vmem:[%s9550_s11 + $0xc0] sm:$0xff] }
 0x388   : > { %v6572_v38 = vadd.f32 %v6571_v46, %v6541_v18  ;;  %16394 = vst [vmem:[#allocation117_spill] sm:$0xff] %v15349_v55  ;;  %16395 = vst [vmem:[#allocation118_spill] sm:$0xff] %v15354_v6  ;;  %v6559_v41 = vmul.f32 %v15354_v6, %v15354_v6  ;;  %v15364_v46 = vld [vmem:[%s9550_s11 + $0xc8] sm:$0xff] }
 0x389   : > { %16396 = vst [vmem:[#allocation98_spill] sm:$0xff] %v15359_v28  ;;  %16397 = vst [vmem:[#allocation99_spill] sm:$0xff] %v15364_v46 }
 0x38a   : > { %v6573_v25 = vadd.f32 %v6572_v38, %v6542_v37  ;;  %v6560_v37 = vmul.f32 %v15359_v28, %v15359_v28 }
 0x38c   : > { %v6574_v53 = vadd.f32 %v6573_v25, %v6543_v59  ;;  %v15369_v59 = vld [vmem:[%s9550_s11 + $0xd0] sm:$0xff]  ;;  %v6561_v25 = vmul.f32 %v15364_v46, %v15364_v46 }
 0x38d   : > { %16398 = vst [vmem:[#allocation100_spill] sm:$0xff] %v15369_v59 }
 0x38e   : > { %v6575_v36 = vadd.f32 %v6574_v53, %v6544_v47  ;;  %v15374_v53 = vld [vmem:[%s9550_s11 + $0xd8] sm:$0xff] }
 0x38f   : > { %16399 = vst [vmem:[#allocation67_spill] sm:$0xff] %v15374_v53 }
 0x390   : > { %v6576_v33 = vadd.f32 %v6575_v36, %v6545_v29  ;;  %v6562_v29 = vmul.f32 %v15369_v59, %v15369_v59 }
 0x392   : > { %v6577_v32 = vadd.f32 %v6576_v33, %v6546_v9  ;;  %v15379_v9 = vld [vmem:[%s9550_s11 + $0xe0] sm:$0xff]  ;;  %v6563_v33 = vmul.f32 %v15374_v53, %v15374_v53 }
 0x393   : > { %16400 = vst [vmem:[#allocation60_spill] sm:$0xff] %v15379_v9 }
 0x394   : > { %v6578_v56 = vadd.f32 %v6577_v32, %v6547_v16  ;;  %v15384_v32 = vld [vmem:[%s9550_s11 + $0xe8] sm:$0xff] }
 0x395   : > { %16401 = vst [vmem:[#allocation68_spill] sm:$0xff] %v15384_v32 }
 0x396   : > { %v6579_v5 = vadd.f32 %v6578_v56, %v6548_v2  ;;  %v6564_v2 = vmul.f32 %v15379_v9, %v15379_v9 }
 0x398   : > { %v6580_v14 = vadd.f32 %v6579_v5, %v6549_v45  ;;  %v15389_v45 = vld [vmem:[%s9550_s11 + $0xf0] sm:$0xff]  ;;  %v6565_v5 = vmul.f32 %v15384_v32, %v15384_v32 }
 0x399   : > { %16402 = vst [vmem:[#allocation69_spill] sm:$0xff] %v15389_v45 }
 0x39a   : > { %v6581_v58 = vadd.f32 %v6580_v14, %v6550_v49  ;;  %v15394_v14 = vld [vmem:[%s9550_s11 + $0xf8] sm:$0xff] }
 0x39b   : > { %16403 = vst [vmem:[#allocation61_spill] sm:$0xff] %v15394_v14 }
 0x39c   : > { %v6582_v17 = vadd.f32 %v6581_v58, %v6551_v27  ;;  %v6566_v27 = vmul.f32 %v15389_v45, %v15389_v45 }
 0x39e   : > { %v6583_v24 = vadd.f32 %v6582_v17, %v6552_v31  ;;  %v6567_v31 = vmul.f32 %v15394_v14, %v15394_v14 }
 0x3a0   : > { %v6584_v26 = vadd.f32 %v6583_v24, %v6553_v42  ;;  %v7374_v24 = vmov 0  }
 0x3a1   : > { %7230 = vset.pattern.permute.xlu1 %v7374_v24  ;;  %7231 = vset.pattern.permute.xlu0 %v7374_v24 }
 0x3a2   : > { %v6585_v20 = vadd.f32 %v6584_v26, %v6554_v35 }
 0x3a4   : > { %v6586_v51 = vadd.f32 %v6585_v20, %v6555_v21 }
 0x3a6   : > { %v6587_v22 = vadd.f32 %v6586_v51, %v6556_v7  ;;  %v6610_v51 = vld [vmem:[%s324_s18] sm:$0xff]  ;;  %s6898_s18 = sshll.u32 %s9550_s11, 4  ;;  %s15515_s18 = int_to_ptr.vmem [resolvable:$true] %s6898_s18 }
 0x3a7   : > { %s7294_s19 = scalar_lea.vmem %s15515_s18, 4096  ;;  %p7301_p12 = scmp.lt.s32.totalorder %s15515_s18, %s7299_s29 }
 0x3a8   : > { %v6588_v62 = vadd.f32 %v6587_v22, %v6557_v23  ;;  %p7295_p13 = scmp.ne.s32.totalorder %s15515_s18, %s7294_s19  ;;  %p7302_p0 = scmp.lt.s32.totalorder %s7300_s14, %s7294_s19 }
 0x3aa   : > { %v6589_v18 = vadd.f32 %v6588_v62, %v6558_v39  ;;  %v6612_v39 = vld [vmem:[%s328_s12] sm:$0xff]  ;;  %s6884_s12 = scalar_lea.sflag [#allocation4], %s7544_s15  ;;  %p7296_p3 = pnand %p7295_p13, %p7490_p8 }
 0x3ab   : > { %p7303_p2 = por %p7302_p0, %p7301_p12 }
 0x3ac   : > { %v6590_v38 = vadd.f32 %v6589_v18, %v6559_v41  ;;  %v6614_v18 = vld [vmem:[%s15570_s5] sm:$0xff]  ;;  %p7297_p7 = pneg %p7296_p3 }
 0x3ae   : > { %v6591_v47 = vadd.f32 %v6590_v38, %v6560_v37  ;;  %v6615_v37 = vld [vmem:[%s15570_s5 + $0x8] sm:$0xff]  ;;  %v6630_v38 = vrot.slane %v6614_v18, %v16364_v3  ;;  %p7304_p10 = pnand %p7303_p2, %p7297_p7 }
 0x3af   : > { %v6666_v24 = vrot.slane %v6615_v37, %v16363_v0 }
 0x3b0   : > { %v6592_v36 = vadd.f32 %v6591_v47, %v6561_v25  ;;  %v6634_v25 = vrot.slane %v6614_v18, %v16363_v0  ;;  %v16404_v47 = vld [vmem:[#allocation17_spill] sm:$0xff] }
 0x3b2   : > { %v6593_v16 = vadd.f32 %v6592_v36, %v6562_v29  ;;  %v6638_v29 = vrot.slane %v6614_v18, %v16404_v47  ;;  %v16405_v36 = vld [vmem:[#allocation19_spill] sm:$0xff] }
 0x3b4   : > { %v6594_v56 = vadd.f32 %v6593_v16, %v6563_v33  ;;  %v6642_v33 = vrot.slane %v6614_v18, %v16405_v36  ;;  %v6616_v16 = vld [vmem:[%s15570_s5 + $0x10] sm:$0xff] }
 0x3b6   : > { %v6595_v49 = vadd.f32 %v6594_v56, %v6564_v2  ;;  %v16406_v2 = vld [vmem:[#allocation25_spill] sm:$0xff] }
 0x3b7   : > { %v6646_v56 = vrot.slane %v6614_v18, %v16406_v2 }
 0x3b8   : > { %v6596_v58 = vadd.f32 %v6595_v49, %v6565_v5  ;;  %v16407_v5 = vld [vmem:[#allocation23_spill] sm:$0xff] }
 0x3b9   : > { %v6650_v49 = vrot.slane %v6614_v18, %v16407_v5  ;;  %v6714_v14 = vrot.slane %v6616_v16, %v16407_v5 }
 0x3ba   : > { %v6597_v17 = vadd.f32 %v6596_v58, %v6566_v27  ;;  %v16408_v27 = vld [vmem:[#allocation29_spill] sm:$0xff] }
 0x3bb   : > { %v6654_v58 = vrot.slane %v6614_v18, %v16408_v27  ;;  %v6718_v45 = vrot.slane %v6616_v16, %v16408_v27 }
 0x3bc   : > { %v6598_v42 = vadd.f32 %v6597_v17, %v6567_v31  ;;  %v16409_v31 = vld [vmem:[#allocation27_spill] sm:$0xff] }
 0x3bd   : > { %v6658_v17 = vrot.slane %v6614_v18, %v16409_v31  ;;  %v6710_v18 = vrot.slane %v6616_v16, %v16406_v2  ;;  %v6722_v32 = vrot.slane %v6616_v16, %v16409_v31 }
 0x3be   : > { %6599 = vadd.xlane.f32.xlu0 %v6598_v42  ;;  %v6662_v42 = vrot.slane %v6615_v37, %v16364_v3 }
 0x44b   : > { %v6600_v35 = vpop.xlane.xlu0 %6599 }
 0x44c   : > { %v6602_v26 = vmul.f32 0.00024414063, %v6600_v35  ;;  %v6670_v35 = vrot.slane %v6615_v37, %v16404_v47 }
 0x44e   : > { %7232 = vrsqrt.f32 %v6602_v26  ;;  %vm6605_vm13 = vcmp.eq.f32.partialorder %v6602_v26, inf  ;;  %v6608_v7 = vand.u32 2147483648, %v6602_v26  ;;  %vm6607_vm2 = vcmp.eq.f32.partialorder %v6602_v26, 0.0 }
 0x458   : > { %v7233_v21 = vpop.eup %7232 }
 0x459   : > { %v6604_v20 = vmul.f32 %v7233_v21, %v6602_v26  ;;  %v6617_v21 = vld [vmem:[%s15570_s5 + $0x18] sm:$0xff] }
 0x45a   : > { %v6726_v9 = vrot.slane %v6617_v21, %v16364_v3  ;;  %v6734_v53 = vrot.slane %v6617_v21, %v16404_v47  ;;  %v6738_v59 = vrot.slane %v6617_v21, %v16405_v36  ;;  %v6742_v46 = vrot.slane %v6617_v21, %v16406_v2 }
 0x45b   : > { %v6606_v23 = vsel %vm6605_vm13, %v6602_v26, %v6604_v20  ;;  %v6674_v26 = vrot.slane %v6615_v37, %v16405_v36  ;;  %v6678_v20 = vrot.slane %v6615_v37, %v16406_v2  ;;  %v6746_v28 = vrot.slane %v6617_v21, %v16407_v5 }
 0x45c   : > { %v6609_v22 = vsel %vm6607_vm2, %v6608_v7, %v6606_v23  ;;  %v6682_v7 = vrot.slane %v6615_v37, %v16407_v5  ;;  %v6690_v23 = vrot.slane %v6615_v37, %v16409_v31  ;;  %v6750_v6 = vrot.slane %v6617_v21, %v16408_v27 }
 0x45d   : > { %v6611_v62 = vmul.f32 %v6610_v51, %v6609_v22  ;;  %v6686_v51 = vrot.slane %v6615_v37, %v16408_v27  ;;  %v6694_v22 = vrot.slane %v6616_v16, %v16364_v3  ;;  %v6730_v37 = vrot.slane %v6617_v21, %v16363_v0 }
 0x45e   : > { %v6754_v55 = vrot.slane %v6617_v21, %v16409_v31 }
 0x45f   : > { %v6613_v41 = vadd.f32 %v6612_v39, %v6611_v62  ;;  %v6698_v39 = vrot.slane %v6616_v16, %v16363_v0  ;;  %v6702_v62 = vrot.slane %v6616_v16, %v16404_v47 }
 0x461   : > { %6620 = vperm.xlu1 %7230, %v6613_v41   ;;  %v6706_v41 = vrot.slane %v6616_v16, %v16405_v36 }
 0x4e0   : > { %v6621_v13 = vpop.permute.xlu1 %6620 }
 0x4e1   : > { %v6787_v54 = vmul.f32 %v6630_v38, %v6621_v13  ;;  %v6788_v50 = vmul.f32 %v6634_v25, %v6621_v13  ;;  %v6789_v16 = vmul.f32 %v6638_v29, %v6621_v13  ;;  %v6790_v52 = vmul.f32 %v6642_v33, %v6621_v13 }
 0x4e2   : > { %v6791_v3 = vmul.f32 %v6646_v56, %v6621_v13  ;;  %v6792_v44 = vmul.f32 %v6650_v49, %v6621_v13  ;;  %v6793_v0 = vmul.f32 %v6654_v58, %v6621_v13  ;;  %v6794_v43 = vmul.f32 %v6658_v17, %v6621_v13 }
 0x4e3   : > { %v6795_v47 = vmul.f32 %v6662_v42, %v6621_v13  ;;  %v6796_v40 = vmul.f32 %v6666_v24, %v6621_v13  ;;  %v6797_v36 = vmul.f32 %v6670_v35, %v6621_v13  ;;  %v6798_v10 = vmul.f32 %v6674_v26, %v6621_v13 }
 0x4e4   : > { %v6799_v2 = vmul.f32 %v6678_v20, %v6621_v13  ;;  %v6800_v8 = vmul.f32 %v6682_v7, %v6621_v13  ;;  %v6801_v5 = vmul.f32 %v6686_v51, %v6621_v13  ;;  %v6802_v48 = vmul.f32 %v6690_v23, %v6621_v13  ;;  %v16422_v23 = vld [vmem:[#allocation118_spill] sm:$0xff] }
 0x4e5   : > { %v6803_v27 = vmul.f32 %v6694_v22, %v6621_v13  ;;  %v6804_v12 = vmul.f32 %v6698_v39, %v6621_v13  ;;  %v6805_v31 = vmul.f32 %v6702_v62, %v6621_v13  ;;  %v6806_v21 = vmul.f32 %v6706_v41, %v6621_v13  ;;  %v16423_v39 = vld [vmem:[#allocation98_spill] sm:$0xff]  ;;  %v16424_v41 = vld [vmem:[#allocation99_spill] sm:$0xff] }
 0x4e6   : > { %v6807_v38 = vmul.f32 %v6710_v18, %v6621_v13  ;;  %v6808_v25 = vmul.f32 %v6714_v14, %v6621_v13  ;;  %v6809_v29 = vmul.f32 %v6718_v45, %v6621_v13  ;;  %v6810_v33 = vmul.f32 %v6722_v32, %v6621_v13 }
 0x4e7   : > { %v6811_v56 = vmul.f32 %v6726_v9, %v6621_v13  ;;  %v6812_v49 = vmul.f32 %v6730_v37, %v6621_v13  ;;  %v6813_v58 = vmul.f32 %v6734_v53, %v6621_v13  ;;  %v6814_v17 = vmul.f32 %v6738_v59, %v6621_v13  ;;  %v16420_v53 = vld [vmem:[#allocation84_spill] sm:$0xff] }
 0x4e8   : > { %v6815_v42 = vmul.f32 %v6742_v46, %v6621_v13  ;;  %v6816_v24 = vmul.f32 %v6746_v28, %v6621_v13  ;;  %v6817_v35 = vmul.f32 %v6750_v6, %v6621_v13  ;;  %v6818_v26 = vmul.f32 %v6754_v55, %v6621_v13  ;;  %v16425_v37 = vld [vmem:[#allocation100_spill] sm:$0xff] }
 0x4e9   : > { %v6819_v20 = vadd.f32 %v6787_v54, %v15239_v57  ;;  %v6820_v7 = vadd.f32 %v6788_v50, %v15242_v63  ;;  %v6821_v14 = vadd.f32 %v6789_v16, %v15245_v11  ;;  %v6822_v32 = vadd.f32 %v6790_v52, %v15254_v34  ;;  %v16410_v50 = vld [vmem:[#allocation59_spill] sm:$0xff] }
 0x4ea   : > { %v6823_v9 = vadd.f32 %v6791_v3, %v15259_v30  ;;  %v6824_v46 = vadd.f32 %v6792_v44, %v15264_v15  ;;  %v6825_v28 = vadd.f32 %v6793_v0, %v15269_v61  ;;  %v6826_v13 = vadd.f32 %v6794_v43, %v15274_v4  ;;  %v16411_v30 = vld [vmem:[#allocation101_spill] sm:$0xff]  ;;  %v16412_v61 = vld [vmem:[#allocation75_spill] sm:$0xff]  ;;  %v16416_v44 = vld [vmem:[#allocation94_spill] sm:$0xff] }
 0x4eb   : > { %v6827_v57 = vadd.f32 %v6795_v47, %v15279_v60  ;;  %v6828_v63 = vadd.f32 %v6796_v40, %v15284_v19  ;;  %v6829_v11 = vadd.f32 %v6797_v36, %v15289_v1  ;;  %v6830_v34 = vadd.f32 %v6798_v10, %v16410_v50  ;;  %6851 = vst [vmem:[%s9550_s11] sm:$0xff] %v6819_v20  ;;  %v16413_v60 = vld [vmem:[#allocation103_spill] sm:$0xff]  ;;  %v16415_v10 = vld [vmem:[#allocation102_spill] sm:$0xff]  ;;  %v16427_v47 = vld [vmem:[#allocation60_spill] sm:$0xff] }
 0x4ec   : > { %6852 = vst [vmem:[%s9550_s11 + $0x8] sm:$0xff] %v6820_v7  ;;  %6853 = vst [vmem:[%s9550_s11 + $0x10] sm:$0xff] %v6821_v14  ;;  %v6831_v15 = vadd.f32 %v6799_v2, %v16411_v30  ;;  %v6832_v4 = vadd.f32 %v6800_v8, %v16412_v61  ;;  %v6833_v19 = vadd.f32 %v6801_v5, %v16413_v60  ;;  %v16414_v40 = vld [vmem:[#allocation119_spill] sm:$0xff]  ;;  %v16418_v8 = vld [vmem:[#allocation96_spill] sm:$0xff] }
 0x4ed   : > { %6854 = vst [vmem:[%s9550_s11 + $0x18] sm:$0xff] %v6822_v32  ;;  %v6834_v1 = vadd.f32 %v6802_v48, %v16414_v40  ;;  %6855 = vst [vmem:[%s9550_s11 + $0x20] sm:$0xff] %v6823_v9  ;;  %v6835_v43 = vadd.f32 %v6803_v27, %v16415_v10  ;;  %v6836_v52 = vadd.f32 %v6804_v12, %v16416_v44  ;;  %v16417_v54 = vld [vmem:[#allocation55_spill] sm:$0xff]  ;;  %v16419_v48 = vld [vmem:[#allocation97_spill] sm:$0xff] }
 0x4ee   : > { %6856 = vst [vmem:[%s9550_s11 + $0x28] sm:$0xff] %v6824_v46  ;;  %6857 = vst [vmem:[%s9550_s11 + $0x30] sm:$0xff] %v6825_v28  ;;  %v6837_v55 = vadd.f32 %v6805_v31, %v16417_v54  ;;  %v6838_v6 = vadd.f32 %v6806_v21, %v16418_v8  ;;  %v6839_v59 = vadd.f32 %v6807_v38, %v16419_v48  ;;  %v16421_v12 = vld [vmem:[#allocation117_spill] sm:$0xff]  ;;  %v16426_v3 = vld [vmem:[#allocation67_spill] sm:$0xff] }
 0x4ef   : > { %6858 = vst [vmem:[%s9550_s11 + $0x38] sm:$0xff] %v6826_v13  ;;  %6859 = vst [vmem:[%s9550_s11 + $0x40] sm:$0xff] %v6827_v57  ;;  %v6840_v45 = vadd.f32 %v6808_v25, %v16420_v53  ;;  %v6841_v51 = vadd.f32 %v6809_v29, %v16421_v12  ;;  %v6842_v22 = vadd.f32 %v6810_v33, %v16422_v23  ;;  %v16428_v2 = vld [vmem:[#allocation68_spill] sm:$0xff]  ;;  %v16429_v27 = vld [vmem:[#allocation69_spill] sm:$0xff] }
 0x4f0   : > { %6860 = vst [vmem:[%s9550_s11 + $0x48] sm:$0xff] %v6828_v63  ;;  %6861 = vst [vmem:[%s9550_s11 + $0x50] sm:$0xff] %v6829_v11  ;;  %v6843_v62 = vadd.f32 %v6811_v56, %v16423_v39  ;;  %v6844_v18 = vadd.f32 %v6812_v49, %v16424_v41  ;;  %v6845_v16 = vadd.f32 %v6813_v58, %v16425_v37  ;;  %v16430_v21 = vld [vmem:[#allocation61_spill] sm:$0xff] }
 0x4f1   : > { %6862 = vst [vmem:[%s9550_s11 + $0x58] sm:$0xff] %v6830_v34  ;;  %6863 = vst [vmem:[%s9550_s11 + $0x60] sm:$0xff] %v6831_v15  ;;  %v6846_v0 = vadd.f32 %v6814_v17, %v16426_v3  ;;  %v6847_v36 = vadd.f32 %v6815_v42, %v16427_v47  ;;  %v6848_v5 = vadd.f32 %v6816_v24, %v16428_v2 }
 0x4f2   : > { %6864 = vst [vmem:[%s9550_s11 + $0x68] sm:$0xff] %v6832_v4  ;;  %6865 = vst [vmem:[%s9550_s11 + $0x70] sm:$0xff] %v6833_v19  ;;  %v6849_v31 = vadd.f32 %v6817_v35, %v16429_v27  ;;  %v6850_v38 = vadd.f32 %v6818_v26, %v16430_v21 }
 0x4f3   : > { %6866 = vst [vmem:[%s9550_s11 + $0x78] sm:$0xff] %v6834_v1  ;;  %6867 = vst [vmem:[%s9550_s11 + $0x80] sm:$0xff] %v6835_v43 }
 0x4f4   : > { %6868 = vst [vmem:[%s9550_s11 + $0x88] sm:$0xff] %v6836_v52  ;;  %6869 = vst [vmem:[%s9550_s11 + $0x90] sm:$0xff] %v6837_v55 }
 0x4f5   : > { %6870 = vst [vmem:[%s9550_s11 + $0x98] sm:$0xff] %v6838_v6  ;;  %6871 = vst [vmem:[%s9550_s11 + $0xa0] sm:$0xff] %v6839_v59 }
 0x4f6   : > { %6872 = vst [vmem:[%s9550_s11 + $0xa8] sm:$0xff] %v6840_v45  ;;  %6873 = vst [vmem:[%s9550_s11 + $0xb0] sm:$0xff] %v6841_v51 }
 0x4f7   : > { %6874 = vst [vmem:[%s9550_s11 + $0xb8] sm:$0xff] %v6842_v22  ;;  %6875 = vst [vmem:[%s9550_s11 + $0xc0] sm:$0xff] %v6843_v62 }
 0x4f8   : > { %6876 = vst [vmem:[%s9550_s11 + $0xc8] sm:$0xff] %v6844_v18  ;;  %6877 = vst [vmem:[%s9550_s11 + $0xd0] sm:$0xff] %v6845_v16 }
 0x4f9   : > { %6878 = vst [vmem:[%s9550_s11 + $0xd8] sm:$0xff] %v6846_v0  ;;  %6879 = vst [vmem:[%s9550_s11 + $0xe0] sm:$0xff] %v6847_v36 }
 0x4fa   : > { %6880 = vst [vmem:[%s9550_s11 + $0xe8] sm:$0xff] %v6848_v5  ;;  %6881 = vst [vmem:[%s9550_s11 + $0xf0] sm:$0xff] %v6849_v31 }
 0x4fb   : > { %6882 = vst [vmem:[%s9550_s11 + $0xf8] sm:$0xff] %v6850_v38 }
 0x4fc   : > { %7307 = shalt.err (!%p7304_p10)
}
 0x4fd   : > { %s7308_s15 = scalar_lea.hbm %s15513_s27, 4096  ;;  %s7312_s8 = scalar_lea.hbm %s15571_s6, 8192 }
 0x4fe   : > { %p7309_p5 = scmp.ne.s32.totalorder %s15513_s27, %s7308_s15  ;;  %p7313_p4 = scmp.lt.u32.totalorder %s15513_s27, %s15571_s6 }
 0x4ff   : > { %p7314_p11 = scmp.lt.u32.totalorder %s7312_s8, %s7308_s15  ;;  %p7316_p13 = scmp.lt.u32.totalorder %s7308_s15, %s15513_s27 }
 0x500   : > { %p7310_p1 = pnand %p7309_p5, %p7490_p8 }
 0x501   : > { %p7315_p6 = por %p7314_p11, %p7313_p4 }
 0x502   : > { %p7311_p9 = pneg %p7310_p1 }
 0x503   : > { %p7317_p3 = por %p7316_p13, %p7315_p6 }
 0x505   : > { %p7318_p7 = pnand %p7317_p3, %p7311_p9 }
 0x507   : > { %7321 = shalt.err (!%p7318_p7)
}
 0x508   : > { %7171 = dma.vmem_to_hbm [thread:$0]  (%p7490_p8), %s15515_s18, 4096, %s15513_s27, %s6884_s12  }
 0x509 PF: > { %s6910_s7 = sand.u32 1, %s7356_s21   ;;  %p16431_p12 = scmp.ne.s32.totalorder %s15825_s28, 0 }
 0x50a   : > { %p16432_p0 = scmp.ge.s32.totalorder %s7368_s24, 2  ;;  %s6911_s25 = scalar_lea.sflag [#allocation4], %s6910_s7 }
 0x50c   : > { %p7185_p2 = pnand %p16432_p0, %p16431_p12 }
 0x50e   : > { %7351 = dma.done.wait (!%p7185_p2), %s6911_s25, 4096  }
 0x50f   : > { %7353 = vsyncadd (!%p7185_p2), %s6911_s25, 4294963200  ;;  %p21_p10 = scmp.ge.s32.totalorder %s7471_s13, 4   ;;  %s16433_s21 = smov %s7360_s22 }
 0x510   : > { %s16434_s22 = smov %s7364_s23  ;;  %s16435_s23 = smov %s7486_s20 }
 0x511   : > { %s16436_s24 = smov %s7471_s13  ;;  %23 = sbr.rel (!%p21_p10) target bundleno = 7 (0x7), region = 166 }
 0x518   :  { %6916 = vsyncpa [#allocation3], 1 }
 0x519   :  { %6918 = vsyncpa [#allocation3 + $0x1], 1 }
 0x51a   :  { %6919 = vsyncpa [#allocation4], 1 }
 0x51b   :  { %6921 = vsyncpa [#allocation4 + $0x1], 1 }
 0x51c   :  { %6922 = vsyncpa [#allocation5], 1 }
 0x51d   :  { %6924 = vsyncpa [#allocation5 + $0x1], 1 }
 0x51e   :  { %6925 = vsyncpa [#allocation7], 1 }

</bundles_post_ra>
